<compile_context>
chip_gen: v7x
topology: tpu7x:2x2x1
jax: 0.10.0
libtpu: 0.0.40
codegen_flags: <defaults>
</compile_context>

<pallas_src>
import jax
import jax.numpy as jnp
from jax.experimental import pallas as pl
from jax.experimental.pallas import tpu as pltpu


def mil_dann_kernel(
    x_ref,                         # (Bblk*N, Din)  f32
    w1_ref, b1_ref,                # (Din, H) bf16, (1, H) f32
    wvu_ref, bvu_ref,              # (H, 2A) bf16, (1, 2A) f32  (attention V|U fused)
    ww_ref,                        # (1, A)  f32   (attention_weights row; bias dropped)
    whead1_ref, bhead1_ref,        # (H, 3C) bf16, (1, 3C) f32  (classifier|dom_bag|dom_tile layer 1)
    wc2_ref,                       # (1, C)  f32   (classifier layer-2 row)
    whead2_ref,                    # (C, 2*ND) bf16             (dom_bag|dom_tile layer 2)
    btail_ref,                     # (1, 1+2*ND) f32            [bc2 | bdb2 | bdt2]
    out_ref,                       # (Bblk, 1+2*ND) f32         [logits | dom_bag | dom_tile]
):
    rows, _ = x_ref.shape
    Bblk, _ = out_ref.shape
    N = rows // Bblk
    H = w1_ref.shape[1]
    A = ww_ref.shape[1]
    C = wc2_ref.shape[1]
    ND = whead2_ref.shape[1] // 2
    bf16, f32 = jnp.bfloat16, jnp.float32

    # fc1 + ReLU (Dropout is identity in the forward/eval pass).
    # bf16 MXU operands, f32 accumulation; elementwise math stays f32.
    h = jnp.dot(x_ref[...].astype(bf16), w1_ref[...],
                preferred_element_type=f32) + b1_ref[...]
    h = jnp.maximum(h, 0.0)                                        # (rows, H) f32

    # Gated attention: one fused (H, 2A) matmul for V|U, then tanh * sigmoid.
    vu = jnp.dot(h.astype(bf16), wvu_ref[...],
                 preferred_element_type=f32) + bvu_ref[...]        # (rows, 2A)
    gated = jnp.tanh(vu[:, :A]) * jax.nn.sigmoid(vu[:, A:])        # (rows, A) f32

    # (A -> 1) scores as VPU multiply + lane reduction (no 1-column MXU matmul).
    # attention_weights bias omitted: a uniform shift cancels in the softmax.
    gated3 = gated.reshape(Bblk, N, A)
    scores = jnp.sum(gated3 * ww_ref[...], axis=-1)                # (Bblk, N)

    # Per-bag softmax over the tile dimension (torch dim=1), exact divide.
    m = jnp.max(scores, axis=-1, keepdims=True)
    e = jnp.exp(scores - m)
    att = e / jnp.sum(e, axis=-1, keepdims=True)                   # (Bblk, N)

    h3 = h.reshape(Bblk, N, H)
    bag_rep = jnp.sum(att[:, :, None] * h3, axis=1)                # (Bblk, H)
    tile_avg = jnp.mean(h3, axis=1)                                # (Bblk, H)

    # Fused head layer 1: [bag_rep; tile_avg] @ [wc1 | wdb1 | wdt1].
    # The off-block products ride free through the under-filled MXU.
    reps = jnp.concatenate([bag_rep, tile_avg], axis=0)            # (2*Bblk, H)
    z1 = jnp.dot(reps.astype(bf16), whead1_ref[...],
                 preferred_element_type=f32) + bhead1_ref[...]
    z1 = jnp.maximum(z1, 0.0)                                      # (2*Bblk, 3C)
    zc = z1[:Bblk, :C]                                             # classifier hidden
    zdb = z1[:Bblk, C:2 * C]                                       # domain-bag hidden
    zdt = z1[Bblk:, 2 * C:]                                        # domain-tile hidden

    btail = btail_ref[...]                                         # (1, 1+2*ND)

    # Classifier layer 2 (C -> 1): VPU reduction (kept f32), + bc2.
    logits = jnp.sum(zc * wc2_ref[...], axis=-1, keepdims=True) + btail[:, :1]

    # Fused head layer 2: [zdb; zdt] @ [wdb2 | wdt2].  grad_reverse is
    # identity in the forward pass.
    z2 = jnp.dot(jnp.concatenate([zdb, zdt], axis=0).astype(bf16),
                 whead2_ref[...], preferred_element_type=f32)      # (2*Bblk, 2*ND)
    dom_bag = z2[:Bblk, :ND] + btail[:, 1:1 + ND]
    dom_tile = z2[Bblk:, ND:] + btail[:, 1 + ND:]

    # Static-sliced stores (no in-vreg lane concatenation).
    out_ref[:, :1] = logits
    out_ref[:, 1:1 + ND] = dom_bag
    out_ref[:, 1 + ND:] = dom_tile


def _auto_bags_per_step(B, N, Din, H, A, *, vmem_act_budget_bytes=40 << 20):
    """Pick bags/step: >=512 MXU rows per step when possible, capped by a
    conservative per-step activation budget (safe on v7x's 64 MiB/TC; raise
    the budget on v5e/v6e's 128 MiB VMEM for even larger tiles)."""
    # Rough bytes per flattened row: f32 x (double-buffered) + f32 h + f32 V|U
    # output + transient bf16 casts of x and h.
    bytes_per_row = 4 * (2 * Din + H + 2 * A) + 2 * (Din + H)
    max_rows = max(N, vmem_act_budget_bytes // bytes_per_row)
    target_rows = min(max_rows, max(512, N))
    bblk = max(1, target_rows // N)
    if bblk >= B:
        return B                       # whole batch in one step (full-dim block)
    return max(8, (bblk // 8) * 8)     # keep blocks (8,128)-tile aligned


def _weight_spec(arr, single_buffer):
    nd = arr.ndim
    idx = lambda b, _nd=nd: (0,) * _nd
    if single_buffer:
        # Grid-invariant weights: a single VMEM buffer instead of the default
        # double buffer (they never change across grid steps).
        return pl.BlockSpec(arr.shape, idx, pipeline_mode=pl.Buffered(buffer_count=1))
    return pl.BlockSpec(arr.shape, idx)


def mil_dann_multi_forward(x, params, *, bags_per_step=None, single_buffer_weights=True):
    """Runs the MIL-DANN forward. Returns (logits, domain_logits_bag, domain_logits_tile)."""
    B, N, Din = x.shape
    H = params["w1"].shape[1]
    A = params["wv"].shape[1]
    C = params["wc1"].shape[1]
    ND = params["wdb2"].shape[1]
    OUT = 1 + 2 * ND
    bf16 = jnp.bfloat16

    # ---- one-time weight plumbing (wrapper-side; hoist out of any hot loop) ----
    w1 = params["w1"].astype(bf16)                                                   # (Din, H)
    wvu = jnp.concatenate([params["wv"], params["wu"]], axis=1).astype(bf16)         # (H, 2A)
    bvu = jnp.concatenate([params["bv"], params["bu"]], axis=1)                      # (1, 2A)
    ww_row = params["ww"].T                                                          # (1, A); bw dropped (cancels in softmax)
    whead1 = jnp.concatenate(
        [params["wc1"], params["wdb1"], params["wdt1"]], axis=1).astype(bf16)        # (H, 3C)
    bhead1 = jnp.concatenate([params["bc1"], params["bdb1"], params["bdt1"]], axis=1)  # (1, 3C)
    wc2_row = params["wc2"].T                                                        # (1, C)
    whead2 = jnp.concatenate([params["wdb2"], params["wdt2"]], axis=1).astype(bf16)  # (C, 2*ND)
    btail = jnp.concatenate([params["bc2"], params["bdb2"], params["bdt2"]], axis=1)  # (1, 1+2*ND)

    weights = [w1, params["b1"], wvu, bvu, ww_row,
               whead1, bhead1, wc2_row, whead2, btail]

    # ---- tiling: batch Bblk bags per grid step, pad B so the grid divides ----
    Bblk = bags_per_step if bags_per_step is not None else _auto_bags_per_step(B, N, Din, H, A)
    Bblk = max(1, min(Bblk, B))
    if Bblk < B and Bblk % 8:
        Bblk = min(B, ((Bblk + 7) // 8) * 8)
    pad = (-B) % Bblk
    xp = jnp.pad(x, ((0, pad), (0, 0), (0, 0))) if pad else x
    Bp = B + pad
    # Flatten bags in the wrapper: the kernel's input block is a clean 2-D MXU tile.
    xp2d = xp.reshape(Bp * N, Din)

    x_spec = pl.BlockSpec((Bblk * N, Din), lambda b: (b, 0))
    out_spec = pl.BlockSpec((Bblk, OUT), lambda b: (b, 0))

    def _run(single_buffer):
        in_specs = [x_spec] + [_weight_spec(w, single_buffer) for w in weights]
        return pl.pallas_call(
            mil_dann_kernel,
            grid=(Bp // Bblk,),
            in_specs=in_specs,
            out_specs=out_spec,
            out_shape=jax.ShapeDtypeStruct((Bp, OUT), jnp.float32),
            compiler_params=pltpu.CompilerParams(
                dimension_semantics=("parallel",),   # no cross-step state -> megacore-shardable
                vmem_limit_bytes=64 * 1024 * 1024,
            ),
        )(xp2d, *weights)

    if single_buffer_weights:
        try:
            out = _run(True)
        except Exception:
            # pipeline_mode=pl.Buffered(1) not supported on this JAX/Mosaic
            # version -> fall back to default double-buffered weight specs.
            out = _run(False)
    else:
        out = _run(False)

    out = out[:B]
    return out[:, :1], out[:, 1:1 + ND], out[:, 1 + ND:]


_PARAM_KEYS = [
    ("w1", "b1"), ("wv", "bv"), ("wu", "bu"), ("ww", "bw"),
    ("wc1", "bc1"), ("wc2", "bc2"),
    ("wdb1", "bdb1"), ("wdb2", "bdb2"),
    ("wdt1", "bdt1"), ("wdt2", "bdt2"),
]


def init_params(key, input_dim, hidden_dim, attn_dim, cls_dim, num_domains):
    """Deterministic PyTorch-style (uniform +-1/sqrt(fan_in)) init, weights stored as (in, out)."""
    dims = [
        (input_dim, hidden_dim),
        (hidden_dim, attn_dim),
        (hidden_dim, attn_dim),
        (attn_dim, 1),
        (hidden_dim, cls_dim),
        (cls_dim, 1),
        (hidden_dim, cls_dim),
        (cls_dim, num_domains),
        (hidden_dim, cls_dim),
        (cls_dim, num_domains),
    ]
    ks = jax.random.split(key, len(dims))
    p = {}
    for (wk, bk), k, (fi, fo) in zip(_PARAM_KEYS, ks, dims):
        kw, kb = jax.random.split(k)
        s = 1.0 / float(fi) ** 0.5
        p[wk] = jax.random.uniform(kw, (fi, fo), jnp.float32, -s, s)
        p[bk] = jax.random.uniform(kb, (1, fo), jnp.float32, -s, s)
    return p


def reference_forward(x, p, *, mxu_dtype=None):
    """Pure-JAX reference reproducing the PyTorch forward (eval mode).

    With mxu_dtype=jnp.bfloat16 it mirrors the kernel's MXU configuration
    (bf16 operands, f32 accumulation) for a tight numerical comparison; with
    mxu_dtype=None it is the exact f32 PyTorch-equivalent forward.
    """
    def mm(a, w):
        if mxu_dtype is None:
            return jnp.dot(a, w, preferred_element_type=jnp.float32)
        return jnp.dot(a.astype(mxu_dtype), w.astype(mxu_dtype),
                       preferred_element_type=jnp.float32)

    h = jax.nn.relu(mm(x, p["w1"]) + p["b1"])
    a = jnp.tanh(mm(h, p["wv"]) + p["bv"])
    g = jax.nn.sigmoid(mm(h, p["wu"]) + p["bu"])
    scores = (a * g) @ p["ww"] + p["bw"]            # (B, N, 1); f32 like the kernel
    att = jax.nn.softmax(scores, axis=1)
    bag = jnp.sum(att * h, axis=1)                  # (B, H)
    tile_avg = jnp.mean(h, axis=1)                  # (B, H)

    # Classifier layer 2 stays f32 in both modes (the kernel keeps it on the VPU).
    logits = jax.nn.relu(mm(bag, p["wc1"]) + p["bc1"]) @ p["wc2"] + p["bc2"]
    dom_bag = mm(jax.nn.relu(mm(bag, p["wdb1"]) + p["bdb1"]), p["wdb2"]) + p["bdb2"]
    dom_tile = mm(jax.nn.relu(mm(tile_avg, p["wdt1"]) + p["bdt1"]), p["wdt2"]) + p["bdt2"]
    return logits, dom_bag, dom_tile


if __name__ == "__main__":
    # Small shapes consistent with the module (scaled-down input/hidden dims;
    # attention dim 256 and classifier hidden 512 kept as in __init__).
    B, N = 16, 16
    INPUT_DIM, HIDDEN_DIM = 256, 128
    ATTN_DIM, CLS_DIM, NUM_DOMAINS = 256, 512, 3

    key = jax.random.PRNGKey(0)
    kx, kp = jax.random.split(key)
    x = jax.random.normal(kx, (B, N, INPUT_DIM), jnp.float32)
    params = init_params(kp, INPUT_DIM, HIDDEN_DIM, ATTN_DIM, CLS_DIM, NUM_DOMAINS)

    logits, dom_bag, dom_tile = mil_dann_multi_forward(x, params)
    jax.block_until_ready((logits, dom_bag, dom_tile))

    assert logits.shape == (B, 1)
    assert dom_bag.shape == (B, NUM_DOMAINS)
    assert dom_tile.shape == (B, NUM_DOMAINS)

    # Tight check vs. a reference using the same bf16-operand / f32-accumulate
    # MXU configuration as the kernel (structural correctness).
    r_l, r_db, r_dt = reference_forward(x, params, mxu_dtype=jnp.bfloat16)
    assert jnp.allclose(logits, r_l, atol=2e-3, rtol=2e-3)
    assert jnp.allclose(dom_bag, r_db, atol=2e-3, rtol=2e-3)
    assert jnp.allclose(dom_tile, r_dt, atol=2e-3, rtol=2e-3)

    # Fidelity check vs. the exact f32 PyTorch-equivalent forward (bf16 MXU
    # operands introduce ~1% relative error at these fan-ins).
    f_l, f_db, f_dt = reference_forward(x, params)
    assert jnp.allclose(logits, f_l, atol=5e-2, rtol=5e-2)
    assert jnp.allclose(dom_bag, f_db, atol=5e-2, rtol=5e-2)
    assert jnp.allclose(dom_tile, f_dt, atol=5e-2, rtol=5e-2)

    print("KERNEL_OK")
</pallas_src>

<mosaic_0001>
module attributes {stable_mosaic.version = 11 : i64} {
  func.func @mil_dann_kernel(%arg0: i32, %arg1: memref<256x256xf32, #tpu.memory_space<vmem>>, %arg2: memref<256x128xbf16, #tpu.memory_space<vmem>>, %arg3: memref<1x128xf32, #tpu.memory_space<vmem>>, %arg4: memref<128x512xbf16, #tpu.memory_space<vmem>>, %arg5: memref<1x512xf32, #tpu.memory_space<vmem>>, %arg6: memref<1x256xf32, #tpu.memory_space<vmem>>, %arg7: memref<128x1536xbf16, #tpu.memory_space<vmem>>, %arg8: memref<1x1536xf32, #tpu.memory_space<vmem>>, %arg9: memref<1x512xf32, #tpu.memory_space<vmem>>, %arg10: memref<512x6xbf16, #tpu.memory_space<vmem>>, %arg11: memref<1x7xf32, #tpu.memory_space<vmem>>, %arg12: memref<16x7xf32, #tpu.memory_space<vmem>>) attributes {dimension_semantics = [#tpu.dimension_semantics<parallel>], iteration_bounds = array<i64: 1>, scalar_prefetch = 0 : i64, scratch_operands = 0 : i64, tpu.core_type = #tpu.core_type<tc>, window_params = [{transform_indices = @transform_0, window_bounds = array<i64: 256, 256>}, {pipeline_mode = #tpu.pipeline_mode<synchronous>, transform_indices = @transform_1, window_bounds = array<i64: 256, 128>}, {pipeline_mode = #tpu.pipeline_mode<synchronous>, transform_indices = @transform_2, window_bounds = array<i64: 1, 128>}, {pipeline_mode = #tpu.pipeline_mode<synchronous>, transform_indices = @transform_3, window_bounds = array<i64: 128, 512>}, {pipeline_mode = #tpu.pipeline_mode<synchronous>, transform_indices = @transform_4, window_bounds = array<i64: 1, 512>}, {pipeline_mode = #tpu.pipeline_mode<synchronous>, transform_indices = @transform_5, window_bounds = array<i64: 1, 256>}, {pipeline_mode = #tpu.pipeline_mode<synchronous>, transform_indices = @transform_6, window_bounds = array<i64: 128, 1536>}, {pipeline_mode = #tpu.pipeline_mode<synchronous>, transform_indices = @transform_7, window_bounds = array<i64: 1, 1536>}, {pipeline_mode = #tpu.pipeline_mode<synchronous>, transform_indices = @transform_8, window_bounds = array<i64: 1, 512>}, {pipeline_mode = #tpu.pipeline_mode<synchronous>, transform_indices = @transform_9, window_bounds = array<i64: 512, 6>}, {pipeline_mode = #tpu.pipeline_mode<synchronous>, transform_indices = @transform_10, window_bounds = array<i64: 1, 7>}, {transform_indices = @transform_11, window_bounds = array<i64: 16, 7>}]} {
    %c0 = arith.constant 0 : index
    %c0_0 = arith.constant 0 : index
    %0 = vector.load %arg1[%c0, %c0_0] : memref<256x256xf32, #tpu.memory_space<vmem>>, vector<256x256xf32>
    %1 = arith.truncf %0 : vector<256x256xf32> to vector<256x256xbf16>
    %c0_1 = arith.constant 0 : index
    %c0_2 = arith.constant 0 : index
    %2 = vector.load %arg2[%c0_1, %c0_2] : memref<256x128xbf16, #tpu.memory_space<vmem>>, vector<256x128xbf16>
    %cst = arith.constant dense<0.000000e+00> : vector<256x128xf32>
    %3 = tpu.matmul %1, %2, %cst {dimension_numbers = #tpu.dot_dimension_numbers<[1], [0], [0], [1], [0, 0, 1, 1], [], []>} : vector<256x256xbf16>, vector<256x128xbf16>, vector<256x128xf32> -> vector<256x128xf32>
    %c0_3 = arith.constant 0 : index
    %c0_4 = arith.constant 0 : index
    %4 = vector.load %arg3[%c0_3, %c0_4] : memref<1x128xf32, #tpu.memory_space<vmem>>, vector<1x128xf32>
    %5 = vector.broadcast %4 : vector<1x128xf32> to vector<256x128xf32>
    %6 = arith.addf %3, %5 : vector<256x128xf32>
    %cst_5 = arith.constant 0.000000e+00 : f32
    %7 = vector.broadcast %cst_5 : f32 to vector<256x128xf32>
    %8 = arith.maximumf %6, %7 : vector<256x128xf32>
    %9 = arith.truncf %8 : vector<256x128xf32> to vector<256x128xbf16>
    %c0_6 = arith.constant 0 : index
    %c0_7 = arith.constant 0 : index
    %10 = vector.load %arg4[%c0_6, %c0_7] : memref<128x512xbf16, #tpu.memory_space<vmem>>, vector<128x512xbf16>
    %cst_8 = arith.constant dense<0.000000e+00> : vector<256x512xf32>
    %11 = tpu.matmul %9, %10, %cst_8 {dimension_numbers = #tpu.dot_dimension_numbers<[1], [0], [0], [1], [0, 0, 1, 1], [], []>} : vector<256x128xbf16>, vector<128x512xbf16>, vector<256x512xf32> -> vector<256x512xf32>
    %c0_9 = arith.constant 0 : index
    %c0_10 = arith.constant 0 : index
    %12 = vector.load %arg5[%c0_9, %c0_10] : memref<1x512xf32, #tpu.memory_space<vmem>>, vector<1x512xf32>
    %13 = vector.broadcast %12 : vector<1x512xf32> to vector<256x512xf32>
    %14 = arith.addf %11, %13 : vector<256x512xf32>
    %15 = vector.extract_strided_slice %14 {offsets = [0, 0], sizes = [256, 256], strides = [1, 1]} : vector<256x512xf32> to vector<256x256xf32>
    %16 = math.tanh %15 : vector<256x256xf32>
    %17 = vector.extract_strided_slice %14 {offsets = [0, 256], sizes = [256, 256], strides = [1, 1]} : vector<256x512xf32> to vector<256x256xf32>
    %18 = arith.negf %17 : vector<256x256xf32>
    %19 = math.exp %18 : vector<256x256xf32>
    %cst_11 = arith.constant 1.000000e+00 : f32
    %20 = vector.broadcast %cst_11 : f32 to vector<256x256xf32>
    %21 = arith.addf %20, %19 : vector<256x256xf32>
    %22 = arith.divf %20, %21 : vector<256x256xf32>
    %23 = arith.mulf %16, %22 : vector<256x256xf32>
    %24 = vector.shape_cast %23 : vector<256x256xf32> to vector<16x16x256xf32>
    %c0_12 = arith.constant 0 : index
    %c0_13 = arith.constant 0 : index
    %25 = vector.load %arg6[%c0_12, %c0_13] : memref<1x256xf32, #tpu.memory_space<vmem>>, vector<1x256xf32>
    %26 = vector.shape_cast %25 : vector<1x256xf32> to vector<1x1x256xf32>
    %27 = vector.broadcast %26 : vector<1x1x256xf32> to vector<16x16x256xf32>
    %28 = arith.mulf %24, %27 : vector<16x16x256xf32>
    %cst_14 = arith.constant dense<0.000000e+00> : vector<16x16xf32>
    %29 = vector.multi_reduction <add>, %28, %cst_14 [2] : vector<16x16x256xf32> to vector<16x16xf32>
    %cst_15 = arith.constant dense<0xFF800000> : vector<16xf32>
    %30 = vector.multi_reduction <maximumf>, %29, %cst_15 [1] : vector<16x16xf32> to vector<16xf32>
    %31 = vector.shape_cast %30 : vector<16xf32> to vector<16x1xf32>
    %32 = vector.broadcast %31 : vector<16x1xf32> to vector<16x16xf32>
    %33 = arith.subf %29, %32 : vector<16x16xf32>
    %34 = math.exp %33 : vector<16x16xf32>
    %cst_16 = arith.constant dense<0.000000e+00> : vector<16xf32>
    %35 = vector.multi_reduction <add>, %34, %cst_16 [1] : vector<16x16xf32> to vector<16xf32>
    %36 = vector.shape_cast %35 : vector<16xf32> to vector<16x1xf32>
    %37 = vector.broadcast %36 : vector<16x1xf32> to vector<16x16xf32>
    %38 = arith.divf %34, %37 : vector<16x16xf32>
    %39 = vector.shape_cast %8 : vector<256x128xf32> to vector<16x16x128xf32>
    %40 = vector.shape_cast %38 : vector<16x16xf32> to vector<16x16x1xf32>
    %41 = vector.broadcast %40 : vector<16x16x1xf32> to vector<16x16x128xf32>
    %42 = arith.mulf %41, %39 : vector<16x16x128xf32>
    %cst_17 = arith.constant dense<0.000000e+00> : vector<16x128xf32>
    %43 = vector.multi_reduction <add>, %42, %cst_17 [1] : vector<16x16x128xf32> to vector<16x128xf32>
    %cst_18 = arith.constant dense<0.000000e+00> : vector<16x128xf32>
    %44 = vector.multi_reduction <add>, %39, %cst_18 [1] : vector<16x16x128xf32> to vector<16x128xf32>
    %cst_19 = arith.constant 1.600000e+01 : f32
    %45 = vector.broadcast %cst_19 : f32 to vector<16x128xf32>
    %46 = arith.divf %44, %45 : vector<16x128xf32>
    %47 = tpu.concatenate %43, %46 in 0 : vector<16x128xf32>, vector<16x128xf32> -> vector<32x128xf32>
    %48 = arith.truncf %47 : vector<32x128xf32> to vector<32x128xbf16>
    %c0_20 = arith.constant 0 : index
    %c0_21 = arith.constant 0 : index
    %49 = vector.load %arg7[%c0_20, %c0_21] : memref<128x1536xbf16, #tpu.memory_space<vmem>>, vector<128x1536xbf16>
    %cst_22 = arith.constant dense<0.000000e+00> : vector<32x1536xf32>
    %50 = tpu.matmul %48, %49, %cst_22 {dimension_numbers = #tpu.dot_dimension_numbers<[1], [0], [0], [1], [0, 0, 1, 1], [], []>} : vector<32x128xbf16>, vector<128x1536xbf16>, vector<32x1536xf32> -> vector<32x1536xf32>
    %c0_23 = arith.constant 0 : index
    %c0_24 = arith.constant 0 : index
    %51 = vector.load %arg8[%c0_23, %c0_24] : memref<1x1536xf32, #tpu.memory_space<vmem>>, vector<1x1536xf32>
    %52 = vector.broadcast %51 : vector<1x1536xf32> to vector<32x1536xf32>
    %53 = arith.addf %50, %52 : vector<32x1536xf32>
    %cst_25 = arith.constant 0.000000e+00 : f32
    %54 = vector.broadcast %cst_25 : f32 to vector<32x1536xf32>
    %55 = arith.maximumf %53, %54 : vector<32x1536xf32>
    %56 = vector.extract_strided_slice %55 {offsets = [0, 0], sizes = [16, 512], strides = [1, 1]} : vector<32x1536xf32> to vector<16x512xf32>
    %57 = vector.extract_strided_slice %55 {offsets = [0, 512], sizes = [16, 512], strides = [1, 1]} : vector<32x1536xf32> to vector<16x512xf32>
    %58 = vector.extract_strided_slice %55 {offsets = [16, 1024], sizes = [16, 512], strides = [1, 1]} : vector<32x1536xf32> to vector<16x512xf32>
    %c0_26 = arith.constant 0 : index
    %c0_27 = arith.constant 0 : index
    %59 = vector.load %arg11[%c0_26, %c0_27] : memref<1x7xf32, #tpu.memory_space<vmem>>, vector<1x7xf32>
    %c0_28 = arith.constant 0 : index
    %c0_29 = arith.constant 0 : index
    %60 = vector.load %arg9[%c0_28, %c0_29] : memref<1x512xf32, #tpu.memory_space<vmem>>, vector<1x512xf32>
    %61 = vector.broadcast %60 : vector<1x512xf32> to vector<16x512xf32>
    %62 = arith.mulf %56, %61 : vector<16x512xf32>
    %cst_30 = arith.constant dense<0.000000e+00> : vector<16xf32>
    %63 = vector.multi_reduction <add>, %62, %cst_30 [1] : vector<16x512xf32> to vector<16xf32>
    %64 = vector.shape_cast %63 : vector<16xf32> to vector<16x1xf32>
    %65 = vector.extract_strided_slice %59 {offsets = [0, 0], sizes = [1, 1], strides = [1, 1]} : vector<1x7xf32> to vector<1x1xf32>
    %66 = vector.broadcast %65 : vector<1x1xf32> to vector<16x1xf32>
    %67 = arith.addf %64, %66 : vector<16x1xf32>
    %68 = tpu.concatenate %57, %58 in 0 : vector<16x512xf32>, vector<16x512xf32> -> vector<32x512xf32>
    %69 = arith.truncf %68 : vector<32x512xf32> to vector<32x512xbf16>
    %c0_31 = arith.constant 0 : index
    %c0_32 = arith.constant 0 : index
    %70 = vector.load %arg10[%c0_31, %c0_32] : memref<512x6xbf16, #tpu.memory_space<vmem>>, vector<512x6xbf16>
    %cst_33 = arith.constant dense<0.000000e+00> : vector<32x6xf32>
    %71 = tpu.matmul %69, %70, %cst_33 {dimension_numbers = #tpu.dot_dimension_numbers<[1], [0], [0], [1], [0, 0, 1, 1], [], []>} : vector<32x512xbf16>, vector<512x6xbf16>, vector<32x6xf32> -> vector<32x6xf32>
    %72 = vector.extract_strided_slice %71 {offsets = [0, 0], sizes = [16, 3], strides = [1, 1]} : vector<32x6xf32> to vector<16x3xf32>
    %73 = vector.extract_strided_slice %59 {offsets = [0, 1], sizes = [1, 3], strides = [1, 1]} : vector<1x7xf32> to vector<1x3xf32>
    %74 = vector.broadcast %73 : vector<1x3xf32> to vector<16x3xf32>
    %75 = arith.addf %72, %74 : vector<16x3xf32>
    %76 = vector.extract_strided_slice %71 {offsets = [16, 3], sizes = [16, 3], strides = [1, 1]} : vector<32x6xf32> to vector<16x3xf32>
    %77 = vector.extract_strided_slice %59 {offsets = [0, 4], sizes = [1, 3], strides = [1, 1]} : vector<1x7xf32> to vector<1x3xf32>
    %78 = vector.broadcast %77 : vector<1x3xf32> to vector<16x3xf32>
    %79 = arith.addf %76, %78 : vector<16x3xf32>
    %c0_34 = arith.constant 0 : index
    %c0_35 = arith.constant 0 : index
    %80 = vector.load %arg12[%c0_34, %c0_35] : memref<16x7xf32, #tpu.memory_space<vmem>>, vector<16x1xf32>
    tpu.vector_store %arg12[%c0_34, %c0_35], %67 {strides = array<i32>} : memref<16x7xf32, #tpu.memory_space<vmem>>, vector<16x1xf32>,
    %c0_36 = arith.constant 0 : index
    %c1 = arith.constant 1 : index
    %81 = vector.load %arg12[%c0_36, %c1] : memref<16x7xf32, #tpu.memory_space<vmem>>, vector<16x3xf32>
    tpu.vector_store %arg12[%c0_36, %c1], %75 {strides = array<i32>} : memref<16x7xf32, #tpu.memory_space<vmem>>, vector<16x3xf32>,
    %c0_37 = arith.constant 0 : index
    %c4 = arith.constant 4 : index
    %82 = vector.load %arg12[%c0_37, %c4] : memref<16x7xf32, #tpu.memory_space<vmem>>, vector<16x3xf32>
    tpu.vector_store %arg12[%c0_37, %c4], %79 {strides = array<i32>} : memref<16x7xf32, #tpu.memory_space<vmem>>, vector<16x3xf32>,
    return
  }
  func.func @transform_0(%arg0: i32) -> (i32, i32) {
    %c0_i32 = arith.constant 0 : i32
    %c0_i32_0 = arith.constant 0 : i32
    return %arg0, %c0_i32 : i32, i32
  }
  func.func @transform_1(%arg0: i32) -> (i32, i32) {
    %c0_i32 = arith.constant 0 : i32
    %c0_i32_0 = arith.constant 0 : i32
    %c0_i32_1 = arith.constant 0 : i32
    return %c0_i32, %c0_i32_0 : i32, i32
  }
  func.func @transform_2(%arg0: i32) -> (i32, i32) {
    %c0_i32 = arith.constant 0 : i32
    %c0_i32_0 = arith.constant 0 : i32
    %c0_i32_1 = arith.constant 0 : i32
    return %c0_i32, %c0_i32_0 : i32, i32
  }
  func.func @transform_3(%arg0: i32) -> (i32, i32) {
    %c0_i32 = arith.constant 0 : i32
    %c0_i32_0 = arith.constant 0 : i32
    %c0_i32_1 = arith.constant 0 : i32
    return %c0_i32, %c0_i32_0 : i32, i32
  }
  func.func @transform_4(%arg0: i32) -> (i32, i32) {
    %c0_i32 = arith.constant 0 : i32
    %c0_i32_0 = arith.constant 0 : i32
    %c0_i32_1 = arith.constant 0 : i32
    return %c0_i32, %c0_i32_0 : i32, i32
  }
  func.func @transform_5(%arg0: i32) -> (i32, i32) {
    %c0_i32 = arith.constant 0 : i32
    %c0_i32_0 = arith.constant 0 : i32
    %c0_i32_1 = arith.constant 0 : i32
    return %c0_i32, %c0_i32_0 : i32, i32
  }
  func.func @transform_6(%arg0: i32) -> (i32, i32) {
    %c0_i32 = arith.constant 0 : i32
    %c0_i32_0 = arith.constant 0 : i32
    %c0_i32_1 = arith.constant 0 : i32
    return %c0_i32, %c0_i32_0 : i32, i32
  }
  func.func @transform_7(%arg0: i32) -> (i32, i32) {
    %c0_i32 = arith.constant 0 : i32
    %c0_i32_0 = arith.constant 0 : i32
    %c0_i32_1 = arith.constant 0 : i32
    return %c0_i32, %c0_i32_0 : i32, i32
  }
  func.func @transform_8(%arg0: i32) -> (i32, i32) {
    %c0_i32 = arith.constant 0 : i32
    %c0_i32_0 = arith.constant 0 : i32
    %c0_i32_1 = arith.constant 0 : i32
    return %c0_i32, %c0_i32_0 : i32, i32
  }
  func.func @transform_9(%arg0: i32) -> (i32, i32) {
    %c0_i32 = arith.constant 0 : i32
    %c0_i32_0 = arith.constant 0 : i32
    %c0_i32_1 = arith.constant 0 : i32
    return %c0_i32, %c0_i32_0 : i32, i32
  }
  func.func @transform_10(%arg0: i32) -> (i32, i32) {
    %c0_i32 = arith.constant 0 : i32
    %c0_i32_0 = arith.constant 0 : i32
    %c0_i32_1 = arith.constant 0 : i32
    return %c0_i32, %c0_i32_0 : i32, i32
  }
  func.func @transform_11(%arg0: i32) -> (i32, i32) {
    %c0_i32 = arith.constant 0 : i32
    %c0_i32_0 = arith.constant 0 : i32
    return %arg0, %c0_i32 : i32, i32
  }
}

module attributes {stable_mosaic.version = 11 : i64} {
  func.func @mil_dann_kernel(%arg0: i32, %arg1: memref<256x256xf32, #tpu.memory_space<vmem>>, %arg2: memref<256x128xbf16, #tpu.memory_space<vmem>>, %arg3: memref<1x128xf32, #tpu.memory_space<vmem>>, %arg4: memref<128x512xbf16, #tpu.memory_space<vmem>>, %arg5: memref<1x512xf32, #tpu.memory_space<vmem>>, %arg6: memref<1x256xf32, #tpu.memory_space<vmem>>, %arg7: memref<128x1536xbf16, #tpu.memory_space<vmem>>, %arg8: memref<1x1536xf32, #tpu.memory_space<vmem>>, %arg9: memref<1x512xf32, #tpu.memory_space<vmem>>, %arg10: memref<512x6xbf16, #tpu.memory_space<vmem>>, %arg11: memref<1x7xf32, #tpu.memory_space<vmem>>, %arg12: memref<16x7xf32, #tpu.memory_space<vmem>>) attributes {dimension_semantics = [#tpu.dimension_semantics<parallel>], iteration_bounds = array<i64: 1>, scalar_prefetch = 0 : i64, scratch_operands = 0 : i64, tpu.core_type = #tpu.core_type<tc>, window_params = [{transform_indices = @transform_0, window_bounds = array<i64: 256, 256>}, {pipeline_mode = #tpu.pipeline_mode<synchronous>, transform_indices = @transform_1, window_bounds = array<i64: 256, 128>}, {pipeline_mode = #tpu.pipeline_mode<synchronous>, transform_indices = @transform_2, window_bounds = array<i64: 1, 128>}, {pipeline_mode = #tpu.pipeline_mode<synchronous>, transform_indices = @transform_3, window_bounds = array<i64: 128, 512>}, {pipeline_mode = #tpu.pipeline_mode<synchronous>, transform_indices = @transform_4, window_bounds = array<i64: 1, 512>}, {pipeline_mode = #tpu.pipeline_mode<synchronous>, transform_indices = @transform_5, window_bounds = array<i64: 1, 256>}, {pipeline_mode = #tpu.pipeline_mode<synchronous>, transform_indices = @transform_6, window_bounds = array<i64: 128, 1536>}, {pipeline_mode = #tpu.pipeline_mode<synchronous>, transform_indices = @transform_7, window_bounds = array<i64: 1, 1536>}, {pipeline_mode = #tpu.pipeline_mode<synchronous>, transform_indices = @transform_8, window_bounds = array<i64: 1, 512>}, {pipeline_mode = #tpu.pipeline_mode<synchronous>, transform_indices = @transform_9, window_bounds = array<i64: 512, 6>}, {pipeline_mode = #tpu.pipeline_mode<synchronous>, transform_indices = @transform_10, window_bounds = array<i64: 1, 7>}, {transform_indices = @transform_11, window_bounds = array<i64: 16, 7>}]} {
    %c0 = arith.constant 0 : index
    %c0_0 = arith.constant 0 : index
    %0 = vector.load %arg1[%c0, %c0_0] : memref<256x256xf32, #tpu.memory_space<vmem>>, vector<256x256xf32>
    %1 = arith.truncf %0 : vector<256x256xf32> to vector<256x256xbf16>
    %c0_1 = arith.constant 0 : index
    %c0_2 = arith.constant 0 : index
    %2 = vector.load %arg2[%c0_1, %c0_2] : memref<256x128xbf16, #tpu.memory_space<vmem>>, vector<256x128xbf16>
    %cst = arith.constant dense<0.000000e+00> : vector<256x128xf32>
    %3 = tpu.matmul %1, %2, %cst {dimension_numbers = #tpu.dot_dimension_numbers<[1], [0], [0], [1], [0, 0, 1, 1], [], []>} : vector<256x256xbf16>, vector<256x128xbf16>, vector<256x128xf32> -> vector<256x128xf32>
    %c0_3 = arith.constant 0 : index
    %c0_4 = arith.constant 0 : index
    %4 = vector.load %arg3[%c0_3, %c0_4] : memref<1x128xf32, #tpu.memory_space<vmem>>, vector<1x128xf32>
    %5 = vector.broadcast %4 : vector<1x128xf32> to vector<256x128xf32>
    %6 = arith.addf %3, %5 : vector<256x128xf32>
    %cst_5 = arith.constant 0.000000e+00 : f32
    %7 = vector.broadcast %cst_5 : f32 to vector<256x128xf32>
    %8 = arith.maximumf %6, %7 : vector<256x128xf32>
    %9 = arith.truncf %8 : vector<256x128xf32> to vector<256x128xbf16>
    %c0_6 = arith.constant 0 : index
    %c0_7 = arith.constant 0 : index
    %10 = vector.load %arg4[%c0_6, %c0_7] : memref<128x512xbf16, #tpu.memory_space<vmem>>, vector<128x512xbf16>
    %cst_8 = arith.constant dense<0.000000e+00> : vector<256x512xf32>
    %11 = tpu.matmul %9, %10, %cst_8 {dimension_numbers = #tpu.dot_dimension_numbers<[1], [0], [0], [1], [0, 0, 1, 1], [], []>} : vector<256x128xbf16>, vector<128x512xbf16>, vector<256x512xf32> -> vector<256x512xf32>
    %c0_9 = arith.constant 0 : index
    %c0_10 = arith.constant 0 : index
    %12 = vector.load %arg5[%c0_9, %c0_10] : memref<1x512xf32, #tpu.memory_space<vmem>>, vector<1x512xf32>
    %13 = vector.broadcast %12 : vector<1x512xf32> to vector<256x512xf32>
    %14 = arith.addf %11, %13 : vector<256x512xf32>
    %15 = vector.extract_strided_slice %14 {offsets = [0, 0], sizes = [256, 256], strides = [1, 1]} : vector<256x512xf32> to vector<256x256xf32>
    %16 = math.tanh %15 : vector<256x256xf32>
    %17 = vector.extract_strided_slice %14 {offsets = [0, 256], sizes = [256, 256], strides = [1, 1]} : vector<256x512xf32> to vector<256x256xf32>
    %18 = arith.negf %17 : vector<256x256xf32>
    %19 = math.exp %18 : vector<256x256xf32>
    %cst_11 = arith.constant 1.000000e+00 : f32
    %20 = vector.broadcast %cst_11 : f32 to vector<256x256xf32>
    %21 = arith.addf %20, %19 : vector<256x256xf32>
    %22 = arith.divf %20, %21 : vector<256x256xf32>
    %23 = arith.mulf %16, %22 : vector<256x256xf32>
    %24 = vector.shape_cast %23 : vector<256x256xf32> to vector<16x16x256xf32>
    %c0_12 = arith.constant 0 : index
    %c0_13 = arith.constant 0 : index
    %25 = vector.load %arg6[%c0_12, %c0_13] : memref<1x256xf32, #tpu.memory_space<vmem>>, vector<1x256xf32>
    %26 = vector.shape_cast %25 : vector<1x256xf32> to vector<1x1x256xf32>
    %27 = vector.broadcast %26 : vector<1x1x256xf32> to vector<16x16x256xf32>
    %28 = arith.mulf %24, %27 : vector<16x16x256xf32>
    %cst_14 = arith.constant dense<0.000000e+00> : vector<16x16xf32>
    %29 = vector.multi_reduction <add>, %28, %cst_14 [2] : vector<16x16x256xf32> to vector<16x16xf32>
    %cst_15 = arith.constant dense<0xFF800000> : vector<16xf32>
    %30 = vector.multi_reduction <maximumf>, %29, %cst_15 [1] : vector<16x16xf32> to vector<16xf32>
    %31 = vector.shape_cast %30 : vector<16xf32> to vector<16x1xf32>
    %32 = vector.broadcast %31 : vector<16x1xf32> to vector<16x16xf32>
    %33 = arith.subf %29, %32 : vector<16x16xf32>
    %34 = math.exp %33 : vector<16x16xf32>
    %cst_16 = arith.constant dense<0.000000e+00> : vector<16xf32>
    %35 = vector.multi_reduction <add>, %34, %cst_16 [1] : vector<16x16xf32> to vector<16xf32>
    %36 = vector.shape_cast %35 : vector<16xf32> to vector<16x1xf32>
    %37 = vector.broadcast %36 : vector<16x1xf32> to vector<16x16xf32>
    %38 = arith.divf %34, %37 : vector<16x16xf32>
    %39 = vector.shape_cast %8 : vector<256x128xf32> to vector<16x16x128xf32>
    %40 = vector.shape_cast %38 : vector<16x16xf32> to vector<16x16x1xf32>
    %41 = vector.broadcast %40 : vector<16x16x1xf32> to vector<16x16x128xf32>
    %42 = arith.mulf %41, %39 : vector<16x16x128xf32>
    %cst_17 = arith.constant dense<0.000000e+00> : vector<16x128xf32>
    %43 = vector.multi_reduction <add>, %42, %cst_17 [1] : vector<16x16x128xf32> to vector<16x128xf32>
    %cst_18 = arith.constant dense<0.000000e+00> : vector<16x128xf32>
    %44 = vector.multi_reduction <add>, %39, %cst_18 [1] : vector<16x16x128xf32> to vector<16x128xf32>
    %cst_19 = arith.constant 1.600000e+01 : f32
    %45 = vector.broadcast %cst_19 : f32 to vector<16x128xf32>
    %46 = arith.divf %44, %45 : vector<16x128xf32>
    %47 = tpu.concatenate %43, %46 in 0 : vector<16x128xf32>, vector<16x128xf32> -> vector<32x128xf32>
    %48 = arith.truncf %47 : vector<32x128xf32> to vector<32x128xbf16>
    %c0_20 = arith.constant 0 : index
    %c0_21 = arith.constant 0 : index
    %49 = vector.load %arg7[%c0_20, %c0_21] : memref<128x1536xbf16, #tpu.memory_space<vmem>>, vector<128x1536xbf16>
    %cst_22 = arith.constant dense<0.000000e+00> : vector<32x1536xf32>
    %50 = tpu.matmul %48, %49, %cst_22 {dimension_numbers = #tpu.dot_dimension_numbers<[1], [0], [0], [1], [0, 0, 1, 1], [], []>} : vector<32x128xbf16>, vector<128x1536xbf16>, vector<32x1536xf32> -> vector<32x1536xf32>
    %c0_23 = arith.constant 0 : index
    %c0_24 = arith.constant 0 : index
    %51 = vector.load %arg8[%c0_23, %c0_24] : memref<1x1536xf32, #tpu.memory_space<vmem>>, vector<1x1536xf32>
    %52 = vector.broadcast %51 : vector<1x1536xf32> to vector<32x1536xf32>
    %53 = arith.addf %50, %52 : vector<32x1536xf32>
    %cst_25 = arith.constant 0.000000e+00 : f32
    %54 = vector.broadcast %cst_25 : f32 to vector<32x1536xf32>
    %55 = arith.maximumf %53, %54 : vector<32x1536xf32>
    %56 = vector.extract_strided_slice %55 {offsets = [0, 0], sizes = [16, 512], strides = [1, 1]} : vector<32x1536xf32> to vector<16x512xf32>
    %57 = vector.extract_strided_slice %55 {offsets = [0, 512], sizes = [16, 512], strides = [1, 1]} : vector<32x1536xf32> to vector<16x512xf32>
    %58 = vector.extract_strided_slice %55 {offsets = [16, 1024], sizes = [16, 512], strides = [1, 1]} : vector<32x1536xf32> to vector<16x512xf32>
    %c0_26 = arith.constant 0 : index
    %c0_27 = arith.constant 0 : index
    %59 = vector.load %arg11[%c0_26, %c0_27] : memref<1x7xf32, #tpu.memory_space<vmem>>, vector<1x7xf32>
    %c0_28 = arith.constant 0 : index
    %c0_29 = arith.constant 0 : index
    %60 = vector.load %arg9[%c0_28, %c0_29] : memref<1x512xf32, #tpu.memory_space<vmem>>, vector<1x512xf32>
    %61 = vector.broadcast %60 : vector<1x512xf32> to vector<16x512xf32>
    %62 = arith.mulf %56, %61 : vector<16x512xf32>
    %cst_30 = arith.constant dense<0.000000e+00> : vector<16xf32>
    %63 = vector.multi_reduction <add>, %62, %cst_30 [1] : vector<16x512xf32> to vector<16xf32>
    %64 = vector.shape_cast %63 : vector<16xf32> to vector<16x1xf32>
    %65 = vector.extract_strided_slice %59 {offsets = [0, 0], sizes = [1, 1], strides = [1, 1]} : vector<1x7xf32> to vector<1x1xf32>
    %66 = vector.broadcast %65 : vector<1x1xf32> to vector<16x1xf32>
    %67 = arith.addf %64, %66 : vector<16x1xf32>
    %68 = tpu.concatenate %57, %58 in 0 : vector<16x512xf32>, vector<16x512xf32> -> vector<32x512xf32>
    %69 = arith.truncf %68 : vector<32x512xf32> to vector<32x512xbf16>
    %c0_31 = arith.constant 0 : index
    %c0_32 = arith.constant 0 : index
    %70 = vector.load %arg10[%c0_31, %c0_32] : memref<512x6xbf16, #tpu.memory_space<vmem>>, vector<512x6xbf16>
    %cst_33 = arith.constant dense<0.000000e+00> : vector<32x6xf32>
    %71 = tpu.matmul %69, %70, %cst_33 {dimension_numbers = #tpu.dot_dimension_numbers<[1], [0], [0], [1], [0, 0, 1, 1], [], []>} : vector<32x512xbf16>, vector<512x6xbf16>, vector<32x6xf32> -> vector<32x6xf32>
    %72 = vector.extract_strided_slice %71 {offsets = [0, 0], sizes = [16, 3], strides = [1, 1]} : vector<32x6xf32> to vector<16x3xf32>
    %73 = vector.extract_strided_slice %59 {offsets = [0, 1], sizes = [1, 3], strides = [1, 1]} : vector<1x7xf32> to vector<1x3xf32>
    %74 = vector.broadcast %73 : vector<1x3xf32> to vector<16x3xf32>
    %75 = arith.addf %72, %74 : vector<16x3xf32>
    %76 = vector.extract_strided_slice %71 {offsets = [16, 3], sizes = [16, 3], strides = [1, 1]} : vector<32x6xf32> to vector<16x3xf32>
    %77 = vector.extract_strided_slice %59 {offsets = [0, 4], sizes = [1, 3], strides = [1, 1]} : vector<1x7xf32> to vector<1x3xf32>
    %78 = vector.broadcast %77 : vector<1x3xf32> to vector<16x3xf32>
    %79 = arith.addf %76, %78 : vector<16x3xf32>
    %c0_34 = arith.constant 0 : index
    %c0_35 = arith.constant 0 : index
    %80 = vector.load %arg12[%c0_34, %c0_35] : memref<16x7xf32, #tpu.memory_space<vmem>>, vector<16x1xf32>
    tpu.vector_store %arg12[%c0_34, %c0_35], %67 {strides = array<i32>} : memref<16x7xf32, #tpu.memory_space<vmem>>, vector<16x1xf32>,
    %c0_36 = arith.constant 0 : index
    %c1 = arith.constant 1 : index
    %81 = vector.load %arg12[%c0_36, %c1] : memref<16x7xf32, #tpu.memory_space<vmem>>, vector<16x3xf32>
    tpu.vector_store %arg12[%c0_36, %c1], %75 {strides = array<i32>} : memref<16x7xf32, #tpu.memory_space<vmem>>, vector<16x3xf32>,
    %c0_37 = arith.constant 0 : index
    %c4 = arith.constant 4 : index
    %82 = vector.load %arg12[%c0_37, %c4] : memref<16x7xf32, #tpu.memory_space<vmem>>, vector<16x3xf32>
    tpu.vector_store %arg12[%c0_37, %c4], %79 {strides = array<i32>} : memref<16x7xf32, #tpu.memory_space<vmem>>, vector<16x3xf32>,
    return
  }
  func.func @transform_0(%arg0: i32) -> (i32, i32) {
    %c0_i32 = arith.constant 0 : i32
    %c0_i32_0 = arith.constant 0 : i32
    return %arg0, %c0_i32 : i32, i32
  }
  func.func @transform_1(%arg0: i32) -> (i32, i32) {
    %c0_i32 = arith.constant 0 : i32
    %c0_i32_0 = arith.constant 0 : i32
    %c0_i32_1 = arith.constant 0 : i32
    return %c0_i32, %c0_i32_0 : i32, i32
  }
  func.func @transform_2(%arg0: i32) -> (i32, i32) {
    %c0_i32 = arith.constant 0 : i32
    %c0_i32_0 = arith.constant 0 : i32
    %c0_i32_1 = arith.constant 0 : i32
    return %c0_i32, %c0_i32_0 : i32, i32
  }
  func.func @transform_3(%arg0: i32) -> (i32, i32) {
    %c0_i32 = arith.constant 0 : i32
    %c0_i32_0 = arith.constant 0 : i32
    %c0_i32_1 = arith.constant 0 : i32
    return %c0_i32, %c0_i32_0 : i32, i32
  }
  func.func @transform_4(%arg0: i32) -> (i32, i32) {
    %c0_i32 = arith.constant 0 : i32
    %c0_i32_0 = arith.constant 0 : i32
    %c0_i32_1 = arith.constant 0 : i32
    return %c0_i32, %c0_i32_0 : i32, i32
  }
  func.func @transform_5(%arg0: i32) -> (i32, i32) {
    %c0_i32 = arith.constant 0 : i32
    %c0_i32_0 = arith.constant 0 : i32
    %c0_i32_1 = arith.constant 0 : i32
    return %c0_i32, %c0_i32_0 : i32, i32
  }
  func.func @transform_6(%arg0: i32) -> (i32, i32) {
    %c0_i32 = arith.constant 0 : i32
    %c0_i32_0 = arith.constant 0 : i32
    %c0_i32_1 = arith.constant 0 : i32
    return %c0_i32, %c0_i32_0 : i32, i32
  }
  func.func @transform_7(%arg0: i32) -> (i32, i32) {
    %c0_i32 = arith.constant 0 : i32
    %c0_i32_0 = arith.constant 0 : i32
    %c0_i32_1 = arith.constant 0 : i32
    return %c0_i32, %c0_i32_0 : i32, i32
  }
  func.func @transform_8(%arg0: i32) -> (i32, i32) {
    %c0_i32 = arith.constant 0 : i32
    %c0_i32_0 = arith.constant 0 : i32
    %c0_i32_1 = arith.constant 0 : i32
    return %c0_i32, %c0_i32_0 : i32, i32
  }
  func.func @transform_9(%arg0: i32) -> (i32, i32) {
    %c0_i32 = arith.constant 0 : i32
    %c0_i32_0 = arith.constant 0 : i32
    %c0_i32_1 = arith.constant 0 : i32
    return %c0_i32, %c0_i32_0 : i32, i32
  }
  func.func @transform_10(%arg0: i32) -> (i32, i32) {
    %c0_i32 = arith.constant 0 : i32
    %c0_i32_0 = arith.constant 0 : i32
    %c0_i32_1 = arith.constant 0 : i32
    return %c0_i32, %c0_i32_0 : i32, i32
  }
  func.func @transform_11(%arg0: i32) -> (i32, i32) {
    %c0_i32 = arith.constant 0 : i32
    %c0_i32_0 = arith.constant 0 : i32
    return %arg0, %c0_i32 : i32, i32
  }
}

</mosaic_0001>

<bundles_post_ra>
// kernel: tpu_custom_call.1
= control target key start
LH: loop header
LB: loop body
LE: loop exit
PB: predicated region body
PF: predicated region fallthrough
CT: control target
= control target key end

     0   :  { %16 = vsyncpa [#allocation3], 0  ;;  %s7709_s0 = inlined_call_operand.hbm [shape: f32[256,256], index: 0, kind: input, shape index: {}]   ;;  %s7710_s1 = inlined_call_operand.hbm [shape: bf16[256,128], index: 1, kind: input, shape index: {}]   ;;  %s7711_s2 = inlined_call_operand.hbm [shape: f32[1,128], index: 2, kind: input, shape index: {}]   ;;  %s7712_s3 = inlined_call_operand.hbm [shape: bf16[128,512], index: 3, kind: input, shape index: {}]   ;;  %s7713_s4 = inlined_call_operand.hbm [shape: f32[1,512], index: 4, kind: input, shape index: {}]   ;;  %s7714_s5 = inlined_call_operand.hbm [shape: f32[1,256], index: 5, kind: input, shape index: {}]   ;;  %s7715_s6 = inlined_call_operand.hbm [shape: bf16[128,1536], index: 6, kind: input, shape index: {}]   ;;  %s7716_s7 = inlined_call_operand.hbm [shape: f32[1,1536], index: 7, kind: input, shape index: {}]   ;;  %s7717_s8 = inlined_call_operand.hbm [shape: f32[1,512], index: 8, kind: input, shape index: {}]   ;;  %s7718_s9 = inlined_call_operand.hbm [shape: bf16[512,6], index: 9, kind: input, shape index: {}]   ;;  %s7719_s10 = inlined_call_operand.hbm [shape: f32[1,7], index: 10, kind: input, shape index: {}]   ;;  %s7720_s11 = inlined_call_operand.hbm [shape: f32[16,7], index: 11, kind: output, shape index: {}]  }
   0x1   :  { %17 = vsyncpa [#allocation6], 0 }
   0x2   :  { %18 = vsyncpa [#allocation9], 0 }
   0x3   :  { %19 = vsyncpa [#allocation12], 0 }
   0x4   :  { %20 = vsyncpa [#allocation15], 0 }
   0x5   :  { %21 = vsyncpa [#allocation18], 0 }
   0x6   :  { %22 = vsyncpa [#allocation4], 0  ;;  %s6068_s17 = smov [#allocation5]   ;;  %s5790_s21 = scalar_lea.hbm %s7710_s1, 2048 }
   0x7   :  { %s40_s18 = sshll.u32 %s6068_s17, 4  ;;  %p5791_p0 = scmp.ne.s32.totalorder %s7710_s1, %s5790_s21  ;;  %s41_s18 = int_to_ptr.vmem [resolvable:$true] %s40_s18 }
   0x8   :  { %p5794_p1 = scmp.lt.u32.totalorder %s5790_s21, %s7710_s1 }
   0xa   :  { %p5796_p2 = pnand %p5794_p1, %p5791_p0 }
   0xc   :  { %5799 = shalt.err (!%p5796_p2)
}
   0xd   :  { %s5800_s26 = scalar_lea.vmem %s41_s18, 2048  ;;  %p5805_p4 = scmp.lt.s32.totalorder %s41_s18, %s41_s18 }
   0xe   :  { %p5801_p3 = scmp.ne.s32.totalorder %s41_s18, %s5800_s26  ;;  %p5806_p5 = scmp.lt.s32.totalorder %s5800_s26, %s5800_s26 }
  0x10   :  { %p5807_p6 = por %p5806_p5, %p5805_p4 }
  0x12   :  { %p5808_p7 = pnand %p5807_p6, %p5801_p3 }
  0x14   :  { %5811 = shalt.err (!%p5808_p7)
}
  0x15   :  { %s6069_s27 = smov 64   ;;  %s6070_s28 = smov 4  }
  0x16   :  { %46 = dma.hbm_to_vmem [thread:$0]  %s7710_s1, 2048, %s41_s18, [#allocation6], %s6069_s27, %s6069_s27, %s6070_s28  }
  0x17   :  { %s6071_s12 = smov [#allocation8]   ;;  %s6072_s14 = smov [#allocation11]  }
  0x18   :  { %s62_s13 = sshll.u32 %s6071_s12, 4  ;;  %s85_s15 = sshll.u32 %s6072_s14, 4  ;;  %s63_s13 = int_to_ptr.vmem [resolvable:$true] %s62_s13  ;;  %s86_s15 = int_to_ptr.vmem [resolvable:$true] %s85_s15 }
  0x19   :  { %s5812_s19 = scalar_lea.hbm %s7712_s3, 4096 }
  0x1a   :  { %p5813_p8 = scmp.ne.s32.totalorder %s7712_s3, %s5812_s19  ;;  %p5816_p9 = scmp.lt.u32.totalorder %s5812_s19, %s7712_s3 }
  0x1c   :  { %p5818_p10 = pnand %p5816_p9, %p5813_p8 }
  0x1e   :  { %5821 = shalt.err (!%p5818_p10)
}
  0x1f   :  { %s5822_s1 = scalar_lea.vmem %s63_s13, 4096  ;;  %p5827_p12 = scmp.lt.s32.totalorder %s63_s13, %s63_s13 }
  0x20   :  { %p5823_p11 = scmp.ne.s32.totalorder %s63_s13, %s5822_s1  ;;  %p5828_p13 = scmp.lt.s32.totalorder %s5822_s1, %s5822_s1 }
  0x22   :  { %p5829_p0 = por %p5828_p13, %p5827_p12 }
  0x24   :  { %p5830_p1 = pnand %p5829_p0, %p5823_p11 }
  0x26   :  { %5833 = shalt.err (!%p5830_p1)
}
  0x27   :  { %s6073_s18 = smov 256   ;;  %s6074_s24 = smov 16  }
  0x28   :  { %68 = dma.hbm_to_vmem [thread:$0]  %s7712_s3, 4096, %s63_s13, [#allocation9], %s6073_s18, %s6073_s18, %s6074_s24  }
  0x29   :  { %s5834_s12 = scalar_lea.hbm %s7714_s5, 32 }
  0x2a   :  { %p5835_p2 = scmp.ne.s32.totalorder %s7714_s5, %s5834_s12  ;;  %p5838_p3 = scmp.lt.u32.totalorder %s5834_s12, %s7714_s5 }
  0x2c   :  { %p5840_p4 = pnand %p5838_p3, %p5835_p2 }
  0x2e   :  { %5843 = shalt.err (!%p5840_p4)
}
  0x2f   :  { %s5844_s20 = scalar_lea.vmem %s86_s15, 32  ;;  %p5849_p6 = scmp.lt.s32.totalorder %s86_s15, %s86_s15 }
  0x30   :  { %p5845_p5 = scmp.ne.s32.totalorder %s86_s15, %s5844_s20  ;;  %p5850_p7 = scmp.lt.s32.totalorder %s5844_s20, %s5844_s20 }
  0x32   :  { %p5851_p8 = por %p5850_p7, %p5849_p6 }
  0x34   :  { %p5852_p9 = pnand %p5851_p8, %p5845_p5 }
  0x36   :  { %5855 = shalt.err (!%p5852_p9)
}
  0x37   :  { %88 = dma.hbm_to_vmem [thread:$0]  %s7714_s5, 32, %s86_s15, [#allocation12]  }
  0x38   :  { %s6075_s21 = smov [#allocation14]   ;;  %s6076_s23 = smov [#allocation17]  }
  0x39   :  { %s107_s22 = sshll.u32 %s6075_s21, 4  ;;  %s126_s1 = sshll.u32 %s6076_s23, 4  ;;  %s108_s22 = int_to_ptr.vmem [resolvable:$true] %s107_s22  ;;  %s127_s1 = int_to_ptr.vmem [resolvable:$true] %s126_s1 }
  0x3a   :  { %s5856_s29 = scalar_lea.hbm %s7716_s7, 192 }
  0x3b   :  { %p5857_p10 = scmp.ne.s32.totalorder %s7716_s7, %s5856_s29  ;;  %p5860_p11 = scmp.lt.u32.totalorder %s5856_s29, %s7716_s7 }
  0x3d   :  { %p5862_p12 = pnand %p5860_p11, %p5857_p10 }
  0x3f   :  { %5865 = shalt.err (!%p5862_p12)
}
  0x40   :  { %s5866_s5 = scalar_lea.vmem %s108_s22, 192  ;;  %p5871_p0 = scmp.lt.s32.totalorder %s108_s22, %s108_s22 }
  0x41   :  { %p5867_p13 = scmp.ne.s32.totalorder %s108_s22, %s5866_s5  ;;  %p5872_p1 = scmp.lt.s32.totalorder %s5866_s5, %s5866_s5 }
  0x43   :  { %p5873_p2 = por %p5872_p1, %p5871_p0 }
  0x45   :  { %p5874_p3 = pnand %p5873_p2, %p5867_p13 }
  0x47   :  { %5877 = shalt.err (!%p5874_p3)
}
  0x48   :  { %110 = dma.hbm_to_vmem [thread:$0]  %s7716_s7, 192, %s108_s22, [#allocation15]  }
  0x49   :  { %s5878_s3 = scalar_lea.hbm %s7718_s9, 4096 }
  0x4a   :  { %p5879_p4 = scmp.ne.s32.totalorder %s7718_s9, %s5878_s3  ;;  %p5882_p5 = scmp.lt.u32.totalorder %s5878_s3, %s7718_s9 }
  0x4c   :  { %p5884_p6 = pnand %p5882_p5, %p5879_p4 }
  0x4e   :  { %5887 = shalt.err (!%p5884_p6)
}
  0x4f   :  { %s5888_s26 = scalar_lea.vmem %s127_s1, 4096  ;;  %p5893_p8 = scmp.lt.s32.totalorder %s127_s1, %s127_s1 }
  0x50   :  { %p5889_p7 = scmp.ne.s32.totalorder %s127_s1, %s5888_s26  ;;  %p5894_p9 = scmp.lt.s32.totalorder %s5888_s26, %s5888_s26 }
  0x52   :  { %p5895_p10 = por %p5894_p9, %p5893_p8 }
  0x54   :  { %p5896_p11 = pnand %p5895_p10, %p5889_p7 }
  0x56   :  { %5899 = shalt.err (!%p5896_p11)
}
  0x57   :  { %132 = dma.hbm_to_vmem [thread:$0]  %s7718_s9, 4096, %s127_s1, [#allocation18], %s6069_s27, %s6069_s27, %s6070_s28  }
  0x58   :  { %s6077_s29 = smov [#allocation2]   ;;  %s6078_s12 = smov [#allocation7]  }
  0x59   :  { %s28_s30 = sshll.u32 %s6077_s29, 4  ;;  %s53_s14 = sshll.u32 %s6078_s12, 4  ;;  %s29_s30 = int_to_ptr.vmem [resolvable:$true] %s28_s30  ;;  %s54_s14 = int_to_ptr.vmem [resolvable:$true] %s53_s14 }
  0x5a   :  { %s5900_s15 = scalar_lea.hbm %s7709_s0, 8192 }
  0x5b   :  { %p5901_p12 = scmp.ne.s32.totalorder %s7709_s0, %s5900_s15  ;;  %p5904_p13 = scmp.lt.u32.totalorder %s5900_s15, %s7709_s0 }
  0x5d   :  { %p5906_p0 = pnand %p5904_p13, %p5901_p12 }
  0x5f   :  { %5909 = shalt.err (!%p5906_p0)
}
  0x60   :  { %s5910_s9 = scalar_lea.vmem %s29_s30, 8192  ;;  %p5915_p2 = scmp.lt.s32.totalorder %s29_s30, %s29_s30 }
  0x61   :  { %p5911_p1 = scmp.ne.s32.totalorder %s29_s30, %s5910_s9  ;;  %p5916_p3 = scmp.lt.s32.totalorder %s5910_s9, %s5910_s9 }
  0x63   :  { %p5917_p4 = por %p5916_p3, %p5915_p2 }
  0x65   :  { %p5918_p5 = pnand %p5917_p4, %p5911_p1 }
  0x67   :  { %5921 = shalt.err (!%p5918_p5)
}
  0x68   :  { %34 = dma.hbm_to_vmem [thread:$0]  %s7709_s0, 8192, %s29_s30, [#allocation3], %s6073_s18, %s6073_s18, %s6074_s24  }
  0x69   :  { %s5922_s21 = scalar_lea.hbm %s7711_s2, 16 }
  0x6a   :  { %p5923_p6 = scmp.ne.s32.totalorder %s7711_s2, %s5922_s21  ;;  %p5926_p7 = scmp.lt.u32.totalorder %s5922_s21, %s7711_s2 }
  0x6c   :  { %p5928_p8 = pnand %p5926_p7, %p5923_p6 }
  0x6e   :  { %5931 = shalt.err (!%p5928_p8)
}
  0x6f   :  { %s5932_s22 = scalar_lea.vmem %s54_s14, 16  ;;  %s5936_s29 = scalar_lea.vmem %s54_s14, 32 }
  0x70   :  { %p5933_p9 = scmp.ne.s32.totalorder %s54_s14, %s5932_s22  ;;  %p5937_p10 = scmp.lt.s32.totalorder %s54_s14, %s54_s14 }
  0x71   :  { %p5938_p11 = scmp.lt.s32.totalorder %s5936_s29, %s5932_s22 }
  0x73   :  { %p5939_p12 = por %p5938_p11, %p5937_p10 }
  0x75   :  { %p5940_p13 = pnand %p5939_p12, %p5933_p9 }
  0x77   :  { %5943 = shalt.err (!%p5940_p13)
}
  0x78   :  { %56 = dma.hbm_to_vmem [thread:$0]  %s7711_s2, 16, %s54_s14, [#allocation6]  }
  0x79   :  { %s6079_s24 = smov [#allocation10]   ;;  %s6080_s12 = smov [#allocation13]  }
  0x7a   :  { %s75_s30 = sshll.u32 %s6079_s24, 4  ;;  %s94_s16 = sshll.u32 %s6080_s12, 4  ;;  %s76_s30 = int_to_ptr.vmem [resolvable:$true] %s75_s30  ;;  %s95_s16 = int_to_ptr.vmem [resolvable:$true] %s94_s16 }
  0x7b   :  { %s5944_s17 = scalar_lea.hbm %s7713_s4, 64 }
  0x7c   :  { %p5945_p0 = scmp.ne.s32.totalorder %s7713_s4, %s5944_s17  ;;  %p5948_p1 = scmp.lt.u32.totalorder %s5944_s17, %s7713_s4 }
  0x7e   :  { %p5950_p2 = pnand %p5948_p1, %p5945_p0 }
  0x80   :  { %5953 = shalt.err (!%p5950_p2)
}
  0x81   :  { %s5954_s2 = scalar_lea.vmem %s76_s30, 64  ;;  %p5959_p4 = scmp.lt.s32.totalorder %s76_s30, %s76_s30 }
  0x82   :  { %p5955_p3 = scmp.ne.s32.totalorder %s76_s30, %s5954_s2  ;;  %p5960_p5 = scmp.lt.s32.totalorder %s5954_s2, %s5954_s2 }
  0x84   :  { %p5961_p6 = por %p5960_p5, %p5959_p4 }
  0x86   :  { %p5962_p7 = pnand %p5961_p6, %p5955_p3 }
  0x88   :  { %5965 = shalt.err (!%p5962_p7)
}
  0x89   :  { %78 = dma.hbm_to_vmem [thread:$0]  %s7713_s4, 64, %s76_s30, [#allocation9]  }
  0x8a   :  { %s5966_s13 = scalar_lea.hbm %s7715_s6, 12288 }
  0x8b   :  { %p5967_p8 = scmp.ne.s32.totalorder %s7715_s6, %s5966_s13  ;;  %p5970_p9 = scmp.lt.u32.totalorder %s5966_s13, %s7715_s6 }
  0x8d   :  { %p5972_p10 = pnand %p5970_p9, %p5967_p8 }
  0x8f   :  { %5975 = shalt.err (!%p5972_p10)
}
  0x90   :  { %s5976_s7 = scalar_lea.vmem %s95_s16, 12288  ;;  %p5981_p12 = scmp.lt.s32.totalorder %s95_s16, %s95_s16 }
  0x91   :  { %p5977_p11 = scmp.ne.s32.totalorder %s95_s16, %s5976_s7  ;;  %p5982_p13 = scmp.lt.s32.totalorder %s5976_s7, %s5976_s7 }
  0x93   :  { %p5983_p0 = por %p5982_p13, %p5981_p12 }
  0x95   :  { %p5984_p1 = pnand %p5983_p0, %p5977_p11 }
  0x97   :  { %5987 = shalt.err (!%p5984_p1)
}
  0x98   :  { %s6081_s4 = smov 768   ;;  %s6082_s22 = smov 48  }
  0x99   :  { %100 = dma.hbm_to_vmem [thread:$0]  %s7715_s6, 12288, %s95_s16, [#allocation12], %s6081_s4, %s6081_s4, %s6082_s22  }
  0x9a   :  { %s6083_s18 = smov [#allocation16]   ;;  %s6084_s30 = smov [#allocation19]  }
  0x9b   :  { %s117_s24 = sshll.u32 %s6083_s18, 4  ;;  %s139_s12 = sshll.u32 %s6084_s30, 4  ;;  %s118_s24 = int_to_ptr.vmem [resolvable:$true] %s117_s24  ;;  %s140_s12 = int_to_ptr.vmem [resolvable:$true] %s139_s12 }
  0x9c   :  { %s5988_s17 = scalar_lea.hbm %s7717_s8, 64 }
  0x9d   :  { %p5989_p2 = scmp.ne.s32.totalorder %s7717_s8, %s5988_s17  ;;  %p5992_p3 = scmp.lt.u32.totalorder %s5988_s17, %s7717_s8 }
  0x9f   :  { %p5994_p4 = pnand %p5992_p3, %p5989_p2 }
  0xa1   :  { %5997 = shalt.err (!%p5994_p4)
}
  0xa2   :  { %s5998_s6 = scalar_lea.vmem %s118_s24, 64  ;;  %p6003_p6 = scmp.lt.s32.totalorder %s118_s24, %s118_s24 }
  0xa3   :  { %p5999_p5 = scmp.ne.s32.totalorder %s118_s24, %s5998_s6  ;;  %p6004_p7 = scmp.lt.s32.totalorder %s5998_s6, %s5998_s6 }
  0xa5   :  { %p6005_p8 = por %p6004_p7, %p6003_p6 }
  0xa7   :  { %p6006_p9 = pnand %p6005_p8, %p5999_p5 }
  0xa9   :  { %6009 = shalt.err (!%p6006_p9)
}
  0xaa   :  { %120 = dma.hbm_to_vmem [thread:$0]  %s7717_s8, 64, %s118_s24, [#allocation15]  }
  0xab   :  { %s6010_s28 = scalar_lea.hbm %s7719_s10, 16 }
  0xac   :  { %p6011_p10 = scmp.ne.s32.totalorder %s7719_s10, %s6010_s28  ;;  %p6014_p11 = scmp.lt.u32.totalorder %s6010_s28, %s7719_s10 }
  0xae   :  { %p6016_p12 = pnand %p6014_p11, %p6011_p10 }
  0xb0   :  { %6019 = shalt.err (!%p6016_p12)
}
  0xb1   :  { %s6020_s25 = scalar_lea.vmem %s140_s12, 16  ;;  %s6024_s26 = scalar_lea.vmem %s140_s12, 32 }
  0xb2   :  { %p6021_p13 = scmp.ne.s32.totalorder %s140_s12, %s6020_s25  ;;  %p6025_p0 = scmp.lt.s32.totalorder %s140_s12, %s140_s12 }
  0xb3   :  { %p6026_p1 = scmp.lt.s32.totalorder %s6024_s26, %s6020_s25 }
  0xb5   :  { %p6027_p2 = por %p6026_p1, %p6025_p0 }
  0xb7   :  { %p6028_p3 = pnand %p6027_p2, %p6021_p13 }
  0xb9   :  { %6031 = shalt.err (!%p6028_p3)
}
  0xba   :  { %142 = dma.hbm_to_vmem [thread:$0]  %s7719_s10, 16, %s140_s12, [#allocation18]  }
  0xbb   :  { %6054 = dma.done.wait [#allocation3], 8192  }
  0xbc   :  { %6055 = vsyncadd [#allocation3], 4294959104 }
  0xbd   :  { %6056 = dma.done.wait [#allocation6], 2064  }
  0xbe   :  { %6057 = vsyncadd [#allocation6], 4294965232 }
  0xbf   :  { %6058 = dma.done.wait [#allocation9], 4160  }
  0xc0   :  { %6059 = vsyncadd [#allocation9], 4294963136 }
  0xc1   :  { %6060 = dma.done.wait [#allocation12], 12320  }
  0xc2   :  { %6061 = vsyncadd [#allocation12], 4294954976 }
  0xc3   :  { %6062 = dma.done.wait [#allocation15], 256  }
  0xc4   :  { %6063 = vsyncadd [#allocation15], 4294967040 }
  0xc5   :  { %6064 = dma.done.wait [#allocation18], 4112  }
  0xc6   :  { %6065 = vsyncadd [#allocation18], 4294963184  ;;  %v5070_v0 = vld [vmem:[#allocation5 + $0x40] sm:$0xff]   ;;  %v5072_v2 = vld [vmem:[#allocation5 + $0x48] sm:$0xff]   ;;  %vm1944_vm0 = vcmask 130112   ;;  %vm2081_vm1 = vcmask 1041409  }
  0xc7   :  { %v5071_v1 = vld [vmem:[#allocation5] sm:$0xff]   ;;  %4877 = vmatprep.subr.bf16.mxu0 %v5070_v0  ;;  %v5073_v3 = vld [vmem:[#allocation5 + $0x8] sm:$0xff]   ;;  %v5074_v4 = vld [vmem:[#allocation5 + $0x50] sm:$0xff]   ;;  %vm2083_vm2 = vcmask 1042434   ;;  %vm2085_vm3 = vcmask 1043459   ;;  %vm2087_vm4 = vcmask 1044484  }
  0xc8   :  { %4878 = vmatpush3.bf16.msra.mxu0 %v5071_v1  ;;  %v5075_v5 = vld [vmem:[#allocation5 + $0x10] sm:$0xff]   ;;  %v5076_v6 = vld [vmem:[#allocation5 + $0x58] sm:$0xff]   ;;  %v5078_v8 = vld [vmem:[#allocation5 + $0x60] sm:$0xff]   ;;  %vm2089_vm5 = vcmask 1045509   ;;  %vm2091_vm6 = vcmask 1046534   ;;  %vm2104_vm7 = vcmask 130048  }
  0xc9   :  { %4879 = vmatprep.subr.bf16.mxu0 %v5072_v2  ;;  %v5077_v7 = vld [vmem:[#allocation5 + $0x18] sm:$0xff]   ;;  %v5079_v9 = vld [vmem:[#allocation5 + $0x20] sm:$0xff]   ;;  %v5080_v10 = vld [vmem:[#allocation5 + $0x68] sm:$0xff]   ;;  %vm2093_vm8 = vcmask 1047559   ;;  %s6086_s10 = smov 127   ;;  %vm4588_vm9 = vcmask 7168  }
  0xca   :  { %v178_v11 = vld [vmem:[#allocation2 + $0x8] sm:$0xff]  ;;  %v180_v12 = vld [vmem:[#allocation2 + $0x18] sm:$0xff]  ;;  %v5082_v15 = vld [vmem:[#allocation5 + $0x70] sm:$0xff]   ;;  %s6087_s4 = smov 1   ;;  %vm4599_vm10 = vcmask 31752   ;;  %vm4610_vm11 = vcmask 56352  }
  0xcb   :  { %v242_v13 = vpack.c.bf16 %v180_v12, %v178_v11  ;;  %v5081_v14 = vld [vmem:[#allocation5 + $0x28] sm:$0xff]   ;;  %v5083_v16 = vld [vmem:[#allocation5 + $0x30] sm:$0xff]   ;;  %v5084_v17 = vld [vmem:[#allocation5 + $0x78] sm:$0xff]   ;;  %s6088_s22 = smov [#allocation20]  }
  0xcc   :  { %4880 = vmatpush3.bf16.msra.mxu0 %v5073_v3  ;;  %v5085_v18 = vld [vmem:[#allocation5 + $0x38] sm:$0xff]   ;;  %v177_v19 = vld [vmem:[#allocation2] sm:$0xff]  ;;  %v179_v20 = vld [vmem:[#allocation2 + $0x10] sm:$0xff]  ;;  %s4618_s29 = sshll.u32 %s6088_s22, 4  ;;  %s4619_s29 = int_to_ptr.vmem [resolvable:$true] %s4618_s29 }
  0xcd   :  { %4881 = vmatprep.subr.bf16.mxu0 %v5074_v4  ;;  %440 = vmatprep.mubr.bf16.mxu0 %v242_v13  ;;  %v182_v21 = vld [vmem:[#allocation2 + $0x28] sm:$0xff]  ;;  %v184_v22 = vld [vmem:[#allocation2 + $0x38] sm:$0xff]  ;;  %v241_v23 = vpack.c.bf16 %v179_v20, %v177_v19  ;;  %v181_v27 = vld [vmem:[#allocation2 + $0x20] sm:$0xff]  ;;  %s6032_s0 = scalar_lea.vmem %s4619_s29, 256  ;;  %p6037_p5 = scmp.lt.s32.totalorder %s4619_s29, %s4619_s29 }
  0xce   :  { %v244_v24 = vpack.c.bf16 %v184_v22, %v182_v21  ;;  %v5086_v25 = vld [vmem:[#allocation8 + $0x8] ss:$16 sps:$4 sm:$0xff]   ;;  %v5088_v26 = vld [vmem:[#allocation8 + $0xc] ss:$16 sps:$4 sm:$0xff]   ;;  %v5107_v47 = vld [vmem:[#allocation8 + $0x4] ss:$16 sps:$4 sm:$0xff]   ;;  %p6033_p4 = scmp.ne.s32.totalorder %s4619_s29, %s6032_s0  ;;  %p6038_p6 = scmp.lt.s32.totalorder %s6032_s0, %s6032_s0 }
  0xcf   :  { %v183_v28 = vld [vmem:[#allocation2 + $0x30] sm:$0xff]  ;;  %v186_v29 = vld [vmem:[#allocation2 + $0x48] sm:$0xff]  ;;  %v188_v30 = vld [vmem:[#allocation2 + $0x58] sm:$0xff]  ;;  %831 = vmatprep.subr.bf16.mxu1 %v5107_v47 }
  0xd0   :  { %4882 = vmatpush3.bf16.msra.mxu0 %v5075_v5  ;;  %v5089_v31 = vld [vmem:[#allocation8 + $0x28] ss:$16 sps:$4 sm:$0xff]   ;;  %v5091_v32 = vld [vmem:[#allocation8 + $0x2c] ss:$16 sps:$4 sm:$0xff]   ;;  %v243_v33 = vpack.c.bf16 %v183_v28, %v181_v27  ;;  %v246_v34 = vpack.c.bf16 %v188_v30, %v186_v29  ;;  %v5109_v48 = vld [vmem:[#allocation8] ss:$16 sps:$4 sm:$0xff]   ;;  %p6039_p7 = por %p6038_p6, %p6037_p5 }
  0xd1   :  { %4883 = vmatprep.subr.bf16.mxu0 %v5076_v6  ;;  %v5092_v35 = vld [vmem:[#allocation8 + $0x48] ss:$16 sps:$4 sm:$0xff]   ;;  %v185_v36 = vld [vmem:[#allocation2 + $0x40] sm:$0xff]  ;;  %v187_v38 = vld [vmem:[#allocation2 + $0x50] sm:$0xff]  ;;  %832 = vmatpush1.bf16.msra.mxu1 %v5109_v48 }
  0xd2   :  { %v5094_v37 = vld [vmem:[#allocation8 + $0x4c] ss:$16 sps:$4 sm:$0xff]   ;;  %v5095_v42 = vld [vmem:[#allocation8 + $0x68] ss:$16 sps:$4 sm:$0xff]   ;;  %v245_v44 = vpack.c.bf16 %v187_v38, %v185_v36  ;;  %v5110_v49 = vld [vmem:[#allocation8 + $0x24] ss:$16 sps:$4 sm:$0xff]   ;;  %p6040_p8 = pnand %p6039_p7, %p6033_p4 }
  0xd3   :  { %v5097_v39 = vld [vmem:[#allocation8 + $0x6c] ss:$16 sps:$4 sm:$0xff]   ;;  %v5098_v45 = vld [vmem:[#allocation8 + $0x88] ss:$16 sps:$4 sm:$0xff]   ;;  %v5112_v54 = vld [vmem:[#allocation8 + $0x20] ss:$16 sps:$4 sm:$0xff]   ;;  %833 = vmatprep.subr.bf16.mxu1 %v5110_v49 }
  0xd4   :  { %4884 = vmatpush3.bf16.msra.mxu0 %v5077_v7  ;;  %v190_v40 = vld [vmem:[#allocation2 + $0x68] sm:$0xff]  ;;  %v192_v41 = vld [vmem:[#allocation2 + $0x78] sm:$0xff]  ;;  %v189_v50 = vld [vmem:[#allocation2 + $0x60] sm:$0xff] }
  0xd5   :  { %4885 = vmatprep.subr.bf16.mxu0 %v5078_v8  ;;  %v5100_v43 = vld [vmem:[#allocation8 + $0x8c] ss:$16 sps:$4 sm:$0xff]   ;;  %v248_v46 = vpack.c.bf16 %v192_v41, %v190_v40  ;;  %v5113_v56 = vld [vmem:[#allocation8 + $0x44] ss:$16 sps:$4 sm:$0xff]   ;;  %v5101_v57 = vld [vmem:[#allocation8 + $0xa8] ss:$16 sps:$4 sm:$0xff]   ;;  %834 = vmatpush1.bf16.msra.mxu1 %v5112_v54 }
  0xd6   :  { %v191_v51 = vld [vmem:[#allocation2 + $0x70] sm:$0xff]  ;;  %v194_v53 = vld [vmem:[#allocation2 + $0x88] sm:$0xff]  ;;  %v196_v55 = vld [vmem:[#allocation2 + $0x98] sm:$0xff]  ;;  %835 = vmatprep.subr.bf16.mxu1 %v5113_v56 }
  0xd7   :  { %v5103_v52 = vld [vmem:[#allocation8 + $0xac] ss:$16 sps:$4 sm:$0xff]   ;;  %v247_v59 = vpack.c.bf16 %v191_v51, %v189_v50  ;;  %v5104_v60 = vld [vmem:[#allocation8 + $0xc8] ss:$16 sps:$4 sm:$0xff]   ;;  %v5115_v61 = vld [vmem:[#allocation8 + $0x40] ss:$16 sps:$4 sm:$0xff]   ;;  %v250_v63 = vpack.c.bf16 %v196_v55, %v194_v53 }
  0xd8   :  { %4886 = vmatpush3.bf16.msra.mxu0 %v5079_v9  ;;  %v5106_v58 = vld [vmem:[#allocation8 + $0xcc] ss:$16 sps:$4 sm:$0xff]   ;;  %v5116_v62 = vld [vmem:[#allocation8 + $0x64] ss:$16 sps:$4 sm:$0xff]   ;;  %v5118_v1 = vld [vmem:[#allocation8 + $0x60] ss:$16 sps:$4 sm:$0xff]  }
  0xd9   :  { %4887 = vmatprep.subr.bf16.mxu0 %v5080_v10  ;;  %v5121_v0 = vld [vmem:[#allocation8 + $0xec] ss:$16 sps:$4 sm:$0xff]   ;;  %v5122_v4 = vld [vmem:[#allocation8 + $0x84] ss:$16 sps:$4 sm:$0xff]   ;;  %836 = vmatpush1.bf16.msra.mxu1 %v5115_v61  ;;  %v5119_v7 = vld [vmem:[#allocation8 + $0xe8] ss:$16 sps:$4 sm:$0xff]  }
  0xda   :  { %v193_v2 = vld [vmem:[#allocation2 + $0x80] sm:$0xff]  ;;  %v195_v3 = vld [vmem:[#allocation2 + $0x90] sm:$0xff]  ;;  %v198_v5 = vld [vmem:[#allocation2 + $0xa8] sm:$0xff]  ;;  %837 = vmatprep.subr.bf16.mxu1 %v5116_v62 }
  0xdb   :  { %v200_v6 = vld [vmem:[#allocation2 + $0xb8] sm:$0xff]  ;;  %v5124_v8 = vld [vmem:[#allocation8 + $0x80] ss:$16 sps:$4 sm:$0xff]   ;;  %v249_v9 = vpack.c.bf16 %v195_v3, %v193_v2  ;;  %v202_v13 = vld [vmem:[#allocation2 + $0xc8] sm:$0xff] }
  0xdc   :  { %4888 = vmatpush3.bf16.msra.mxu0 %v5081_v14  ;;  %v252_v10 = vpack.c.bf16 %v200_v6, %v198_v5  ;;  %v197_v11 = vld [vmem:[#allocation2 + $0xa0] sm:$0xff]  ;;  %v199_v12 = vld [vmem:[#allocation2 + $0xb0] sm:$0xff]  ;;  %v204_v14 = vld [vmem:[#allocation2 + $0xd8] sm:$0xff] }
  0xdd   :  { %4889 = vmatprep.subr.bf16.mxu0 %v5082_v15  ;;  %838 = vmatpush1.bf16.msra.mxu1 %v5118_v1  ;;  %v251_v15 = vpack.c.bf16 %v199_v12, %v197_v11  ;;  %v206_v19 = vld [vmem:[#allocation2 + $0xe8] sm:$0xff]  ;;  %v208_v20 = vld [vmem:[#allocation2 + $0xf8] sm:$0xff]  ;;  %v209_v29 = vld [vmem:[#allocation2 + $0x100] sm:$0xff]  ;;  %v7721_v1 = vmov 0  }
  0xde   :  { %839 = vmatprep.subr.bf16.mxu1 %v5122_v4  ;;  %v256_v22 = vpack.c.bf16 %v208_v20, %v206_v19  ;;  %v211_v30 = vld [vmem:[#allocation2 + $0x110] sm:$0xff]  ;;  %v220_v38 = vld [vmem:[#allocation2 + $0x158] sm:$0xff]  ;;  %v217_v41 = vld [vmem:[#allocation2 + $0x140] sm:$0xff]  ;;  %863 = vmatprep.mubr.bf16.mxu1 %v7721_v1 }
  0xdf   :  { %v215_v36 = vld [vmem:[#allocation2 + $0x130] sm:$0xff]  ;;  %v221_v47 = vld [vmem:[#allocation2 + $0x160] sm:$0xff]  ;;  %v226_v50 = vld [vmem:[#allocation2 + $0x188] sm:$0xff]  ;;  %5069 = vset.pattern.permute.xlu1 %v7721_v1  ;;  %5068 = vset.pattern.permute.xlu0 %v7721_v1 }
  0xe0   :  { %4890 = vmatpush3.bf16.msra.mxu0 %v5083_v16  ;;  %v254_v16 = vpack.c.bf16 %v204_v14, %v202_v13  ;;  %v223_v48 = vld [vmem:[#allocation2 + $0x170] sm:$0xff]  ;;  %v228_v51 = vld [vmem:[#allocation2 + $0x198] sm:$0xff]  ;;  %v229_v2 = vld [vmem:[#allocation2 + $0x1a0] sm:$0xff] }
  0xe1   :  { %4891 = vmatprep.subr.bf16.mxu0 %v5084_v17  ;;  %840 = vmatpush1.bf16.msra.mxu1 %v5124_v8  ;;  %v201_v17 = vld [vmem:[#allocation2 + $0xc0] sm:$0xff]  ;;  %v263_v53 = vpack.c.bf16 %v223_v48, %v221_v47  ;;  %v266_v54 = vpack.c.bf16 %v228_v51, %v226_v50  ;;  %v232_v61 = vld [vmem:[#allocation2 + $0x1b8] sm:$0xff]  ;;  %v231_v3 = vld [vmem:[#allocation2 + $0x1b0] sm:$0xff] }
  0xe2   :  { %v5125_v49 = vld [vmem:[#allocation8 + $0xa4] ss:$16 sps:$4 sm:$0xff]   ;;  %v5130_v56 = vld [vmem:[#allocation8 + $0xc0] ss:$16 sps:$4 sm:$0xff]   ;;  %v267_v6 = vpack.c.bf16 %v231_v3, %v229_v2 }
  0xe3   :  { %841 = vmatprep.subr.bf16.mxu1 %v5125_v49  ;;  %v5128_v55 = vld [vmem:[#allocation8 + $0xc4] ss:$16 sps:$4 sm:$0xff]   ;;  %v5133_v62 = vld [vmem:[#allocation8 + $0xe0] ss:$16 sps:$4 sm:$0xff]  }
  0xe4   :  { %4892 = vmatpush3.bf16.msra.mxu0 %v5085_v18  ;;  %v203_v18 = vld [vmem:[#allocation2 + $0xd0] sm:$0xff]  ;;  %v234_v4 = vld [vmem:[#allocation2 + $0x1c8] sm:$0xff]  ;;  %v236_v5 = vld [vmem:[#allocation2 + $0x1d8] sm:$0xff] }
  0xe5   :  { %1024 = vmatprep.subr.bf16.mxu0 %v5088_v26  ;;  %v253_v21 = vpack.c.bf16 %v203_v18, %v201_v17  ;;  %v212_v26 = vld [vmem:[#allocation2 + $0x118] sm:$0xff]  ;;  %v233_v8 = vld [vmem:[#allocation2 + $0x1c0] sm:$0xff] }
  0xe6   :  { %v240_v11 = vld [vmem:[#allocation2 + $0x1f8] sm:$0xff]  ;;  %v237_v14 = vld [vmem:[#allocation2 + $0x1e0] sm:$0xff] }
  0xe7   :  { %441 = vmatmul.mubr.bf16.vlgmr.msra.gmra.mrb[0].mxu0 %v241_v23  ;;  %v205_v23 = vld [vmem:[#allocation2 + $0xe0] sm:$0xff] }
  0xe8   :  { %448 = vmatprep.mubr.bf16.mxu0 %v244_v24  ;;  %1025 = vmatpush1.bf16.msra.mxu0 %v5086_v25  ;;  %v207_v24 = vld [vmem:[#allocation2 + $0xf0] sm:$0xff]  ;;  %v210_v25 = vld [vmem:[#allocation2 + $0x108] sm:$0xff]  ;;  %v6299_v18 = vld [vmem:[#allocation7] ss:$0 sm:$0xff] }
  0xe9   :  { %1026 = vmatprep.subr.bf16.mxu0 %v5091_v32  ;;  %v255_v27 = vpack.c.bf16 %v207_v24, %v205_v23  ;;  %v258_v28 = vpack.c.bf16 %v212_v26, %v210_v25  ;;  %v216_v32 = vld [vmem:[#allocation2 + $0x138] sm:$0xff] }
  0xec   :  { %1027 = vmatpush1.bf16.msra.mxu0 %v5089_v31  ;;  %v214_v31 = vld [vmem:[#allocation2 + $0x128] sm:$0xff] }
  0xed   :  { %1028 = vmatprep.subr.bf16.mxu0 %v5094_v37  ;;  %v218_v37 = vld [vmem:[#allocation2 + $0x148] sm:$0xff] }
  0xee   :  { %v262_v40 = vpack.c.bf16 %v220_v38, %v218_v37 }
  0xef   :  { %449 = vmatmul.mubr.bf16.gmra.mrb[4].mxu0 %v243_v33  ;;  %v257_v33 = vpack.c.bf16 %v211_v30, %v209_v29 }
  0xf0   :  { %456 = vmatprep.mubr.bf16.mxu0 %v246_v34  ;;  %1029 = vmatpush1.bf16.msra.mxu0 %v5092_v35  ;;  %v260_v34 = vpack.c.bf16 %v216_v32, %v214_v31  ;;  %v213_v35 = vld [vmem:[#allocation2 + $0x120] sm:$0xff] }
  0xf1   :  { %1030 = vmatprep.subr.bf16.mxu0 %v5097_v39  ;;  %v259_v39 = vpack.c.bf16 %v215_v36, %v213_v35 }
  0xf4   :  { %1031 = vmatpush1.bf16.msra.mxu0 %v5095_v42  ;;  %v219_v42 = vld [vmem:[#allocation2 + $0x150] sm:$0xff] }
  0xf5   :  { %1032 = vmatprep.subr.bf16.mxu0 %v5100_v43  ;;  %v222_v43 = vld [vmem:[#allocation2 + $0x168] sm:$0xff] }
  0xf7   :  { %457 = vmatmul.mubr.bf16.gmra.mrb[8].mxu0 %v245_v44  ;;  %v224_v44 = vld [vmem:[#allocation2 + $0x178] sm:$0xff] }
  0xf8   :  { %464 = vmatprep.mubr.bf16.mxu0 %v248_v46  ;;  %1033 = vmatpush1.bf16.msra.mxu0 %v5098_v45  ;;  %v261_v45 = vpack.c.bf16 %v219_v42, %v217_v41  ;;  %v264_v46 = vpack.c.bf16 %v224_v44, %v222_v43 }
  0xf9   :  { %1034 = vmatprep.subr.bf16.mxu0 %v5103_v52  ;;  %v5127_v52 = vld [vmem:[#allocation8 + $0xa0] ss:$16 sps:$4 sm:$0xff]  }
  0xfa   :  { %842 = vmatpush1.bf16.msra.mxu1 %v5127_v52 }
  0xfb   :  { %843 = vmatprep.subr.bf16.mxu1 %v5128_v55 }
  0xfc   :  { %1035 = vmatpush1.bf16.msra.mxu0 %v5101_v57  ;;  %v225_v57 = vld [vmem:[#allocation2 + $0x180] sm:$0xff] }
  0xfd   :  { %1036 = vmatprep.subr.bf16.mxu0 %v5106_v58  ;;  %v227_v58 = vld [vmem:[#allocation2 + $0x190] sm:$0xff] }
  0xfe   :  { %844 = vmatpush1.bf16.msra.mxu1 %v5130_v56 }
  0xff   :  { %465 = vmatmul.mubr.bf16.gmra.mrb[12].mxu0 %v247_v59  ;;  %v5131_v59 = vld [vmem:[#allocation8 + $0xe4] ss:$16 sps:$4 sm:$0xff]  }
 0x100   :  { %472 = vmatprep.mubr.bf16.mxu0 %v250_v63  ;;  %1037 = vmatpush1.bf16.msra.mxu0 %v5104_v60  ;;  %v230_v60 = vld [vmem:[#allocation2 + $0x1a8] sm:$0xff]  ;;  %v265_v63 = vpack.c.bf16 %v227_v58, %v225_v57 }
 0x101   :  { %1038 = vmatprep.subr.bf16.mxu0 %v5121_v0  ;;  %845 = vmatprep.subr.bf16.mxu1 %v5131_v59  ;;  %v268_v0 = vpack.c.bf16 %v232_v61, %v230_v60 }
 0x102   :  { %846 = vmatpush1.bf16.msra.mxu1 %v5133_v62 }
 0x104   :  { %1039 = vmatpush1.bf16.msra.mxu0 %v5119_v7  ;;  %v270_v7 = vpack.c.bf16 %v236_v5, %v234_v4 }
 0x107   :  { %473 = vmatmul.mubr.bf16.gmra.mrb[16].mxu0 %v249_v9  ;;  %v235_v9 = vld [vmem:[#allocation2 + $0x1d0] sm:$0xff] }
 0x108   :  { %480 = vmatprep.mubr.bf16.mxu0 %v252_v10  ;;  %v238_v10 = vld [vmem:[#allocation2 + $0x1e8] sm:$0xff]  ;;  %v269_v12 = vpack.c.bf16 %v235_v9, %v233_v8 }
 0x109   :  { %v272_v13 = vpack.c.bf16 %v240_v11, %v238_v10 }
 0x10f   :  { %481 = vmatmul.mubr.bf16.gmra.mrb[20].mxu0 %v251_v15  ;;  %v239_v15 = vld [vmem:[#allocation2 + $0x1f0] sm:$0xff] }
 0x110   :  { %488 = vmatprep.mubr.bf16.mxu0 %v254_v16  ;;  %v271_v16 = vpack.c.bf16 %v239_v15, %v237_v14 }
 0x117   :  { %489 = vmatmul.mubr.bf16.gmra.mrb[24].mxu0 %v253_v21 }
 0x118   :  { %496 = vmatprep.mubr.bf16.mxu0 %v256_v22 }
 0x11f   :  { %497 = vmatmul.mubr.bf16.gmra.mrb[28].mxu0 %v255_v27 }
 0x120   :  { %504 = vmatprep.mubr.bf16.mxu0 %v258_v28 }
 0x127   :  { %505 = vmatmul.mubr.bf16.gmra.mrb[32].mxu0 %v257_v33 }
 0x128   :  { %512 = vmatprep.mubr.bf16.mxu0 %v260_v34 }
 0x12f   :  { %513 = vmatmul.mubr.bf16.gmra.mrb[36].mxu0 %v259_v39 }
 0x130   :  { %520 = vmatprep.mubr.bf16.mxu0 %v262_v40 }
 0x137   :  { %521 = vmatmul.mubr.bf16.gmra.mrb[40].mxu0 %v261_v45 }
 0x138   :  { %528 = vmatprep.mubr.bf16.mxu0 %v264_v46 }
 0x13f   :  { %529 = vmatmul.mubr.bf16.gmra.mrb[44].mxu0 %v263_v53 }
 0x140   :  { %536 = vmatprep.mubr.bf16.mxu0 %v266_v54 }
 0x147   :  { %537 = vmatmul.mubr.bf16.gmra.mrb[48].mxu0 %v265_v63 }
 0x148   :  { %544 = vmatprep.mubr.bf16.mxu0 %v268_v0 }
 0x14f   :  { %545 = vmatmul.mubr.bf16.gmra.mrb[52].mxu0 %v267_v6 }
 0x150   :  { %552 = vmatprep.mubr.bf16.mxu0 %v270_v7 }
 0x157   :  { %553 = vmatmul.mubr.bf16.gmra.mrb[56].mxu0 %v269_v12 }
 0x158   :  { %560 = vmatprep.mubr.bf16.mxu0 %v272_v13 }
 0x15f   :  { %561 = vmatmul.mubr.bf16.gmra.mrb[60].mxu0 %v271_v16 }
 0x160   :  { %1056 = vmatprep.mubr.bf16.mxu0 %v7721_v1 }
 0x1ba   :  { %v4893_v17 = vpop.f32.mrb[0].mxu0 }
 0x1bb   :  { %v4894_v19 = vpop.f32.mrb[1].mxu0 }
 0x1bc   :  { %v4895_v20 = vadd.f32 %v4894_v19, %v4893_v17  ;;  %v4896_v21 = vpop.f32.mrb[2].mxu0 }
 0x1bd   :  { %v4897_v22 = vpop.f32.mrb[3].mxu0 }
 0x1be   :  { %v443_v23 = vadd.f32 %v4895_v20, %v6299_v18  ;;  %v4898_v24 = vadd.f32 %v4897_v22, %v4896_v21 }
 0x1c0   :  { %v446_v25 = vadd.f32 %v4898_v24, %v6299_v18  ;;  %v6303_v26 = vmax.f32 %v443_v23, 0.0 }
 0x1c2   :  { %7808 = vst [vmem:[#allocation28_spill] sm:$0xff] %v6303_v26  ;;  %v6305_v27 = vmax.f32 %v446_v25, 0.0  ;;  %v4899_v28 = vpop.f32.mrb[4].mxu0 }
 0x1c3   :  { %v4900_v29 = vpop.f32.mrb[5].mxu0 }
 0x1c4   :  { %7809 = vst [vmem:[#allocation29_spill] sm:$0xff] %v6305_v27  ;;  %v4901_v30 = vadd.f32 %v4900_v29, %v4899_v28  ;;  %v4902_v31 = vpop.f32.mrb[6].mxu0  ;;  %v601_v32 = vpack.c.bf16 %v6305_v27, %v6303_v26 }
 0x1c5   :  { %v4903_v33 = vpop.f32.mrb[7].mxu0 }
 0x1c6   :  { %v451_v34 = vadd.f32 %v4901_v30, %v6299_v18  ;;  %v4904_v35 = vadd.f32 %v4903_v33, %v4902_v31  ;;  %864 = vmatmul.mubr.bf16.vlgmr.msra.gmra.mrb[0].mxu1 %v601_v32  ;;  %1057 = vmatmul.mubr.bf16.vlgmr.msra.gmra.mrb[64].mxu0 %v601_v32 }
 0x1c7   :  { %873 = vmatprep.mubr.bf16.mxu1 %v7721_v1  ;;  %1066 = vmatprep.mubr.bf16.mxu0 %v7721_v1 }
 0x1c8   :  { %v454_v36 = vadd.f32 %v4904_v35, %v6299_v18  ;;  %v6313_v37 = vmax.f32 %v451_v34, 0.0 }
 0x1ca   :  { %7810 = vst [vmem:[#allocation30_spill] sm:$0xff] %v6313_v37  ;;  %v6315_v38 = vmax.f32 %v454_v36, 0.0  ;;  %v4905_v39 = vpop.f32.mrb[8].mxu0 }
 0x1cb   :  { %v4906_v40 = vpop.f32.mrb[9].mxu0 }
 0x1cc   :  { %7811 = vst [vmem:[#allocation31_spill] sm:$0xff] %v6315_v38  ;;  %v4907_v41 = vadd.f32 %v4906_v40, %v4905_v39  ;;  %v4908_v42 = vpop.f32.mrb[10].mxu0  ;;  %v602_v43 = vpack.c.bf16 %v6315_v38, %v6313_v37 }
 0x1cd   :  { %v4909_v44 = vpop.f32.mrb[11].mxu0 }
 0x1ce   :  { %v459_v45 = vadd.f32 %v4907_v41, %v6299_v18  ;;  %v4910_v46 = vadd.f32 %v4909_v44, %v4908_v42  ;;  %874 = vmatmul.mubr.bf16.gmra.mrb[4].mxu1 %v602_v43  ;;  %1067 = vmatmul.mubr.bf16.gmra.mrb[68].mxu0 %v602_v43 }
 0x1cf   :  { %883 = vmatprep.mubr.bf16.mxu1 %v7721_v1  ;;  %1076 = vmatprep.mubr.bf16.mxu0 %v7721_v1 }
 0x1d0   :  { %v462_v47 = vadd.f32 %v4910_v46, %v6299_v18  ;;  %v6323_v48 = vmax.f32 %v459_v45, 0.0 }
 0x1d2   :  { %7812 = vst [vmem:[#allocation32_spill] sm:$0xff] %v6323_v48  ;;  %v6325_v49 = vmax.f32 %v462_v47, 0.0  ;;  %v4911_v50 = vpop.f32.mrb[12].mxu0 }
 0x1d3   :  { %v4912_v51 = vpop.f32.mrb[13].mxu0 }
 0x1d4   :  { %7813 = vst [vmem:[#allocation33_spill] sm:$0xff] %v6325_v49  ;;  %v4913_v52 = vadd.f32 %v4912_v51, %v4911_v50  ;;  %v4914_v53 = vpop.f32.mrb[14].mxu0  ;;  %v603_v54 = vpack.c.bf16 %v6325_v49, %v6323_v48 }
 0x1d5   :  { %v4915_v55 = vpop.f32.mrb[15].mxu0 }
 0x1d6   :  { %v4916_v56 = vadd.f32 %v4915_v55, %v4914_v53  ;;  %884 = vmatmul.mubr.bf16.gmra.mrb[8].mxu1 %v603_v54  ;;  %1077 = vmatmul.mubr.bf16.gmra.mrb[72].mxu0 %v603_v54  ;;  %v467_v57 = vadd.f32 %v4913_v52, %v6299_v18 }
 0x1d7   :  { %893 = vmatprep.mubr.bf16.mxu1 %v7721_v1  ;;  %1086 = vmatprep.mubr.bf16.mxu0 %v7721_v1 }
 0x1d8   :  { %v470_v58 = vadd.f32 %v4916_v56, %v6299_v18  ;;  %v6335_v61 = vmax.f32 %v467_v57, 0.0 }
 0x1da   :  { %v6333_v59 = vmax.f32 %v470_v58, 0.0  ;;  %v4917_v60 = vpop.f32.mrb[16].mxu0  ;;  %7815 = vst [vmem:[#allocation35_spill] sm:$0xff] %v6335_v61 }
 0x1db   :  { %v4918_v62 = vpop.f32.mrb[17].mxu0 }
 0x1dc   :  { %7814 = vst [vmem:[#allocation34_spill] sm:$0xff] %v6333_v59  ;;  %v4919_v63 = vadd.f32 %v4918_v62, %v4917_v60  ;;  %v4920_v0 = vpop.f32.mrb[18].mxu0  ;;  %v604_v3 = vpack.c.bf16 %v6333_v59, %v6335_v61 }
 0x1dd   :  { %v4921_v2 = vpop.f32.mrb[19].mxu0 }
 0x1de   :  { %v4922_v4 = vadd.f32 %v4921_v2, %v4920_v0  ;;  %v475_v5 = vadd.f32 %v4919_v63, %v6299_v18  ;;  %894 = vmatmul.mubr.bf16.gmra.mrb[12].mxu1 %v604_v3  ;;  %1087 = vmatmul.mubr.bf16.gmra.mrb[76].mxu0 %v604_v3 }
 0x1df   :  { %903 = vmatprep.mubr.bf16.mxu1 %v7721_v1  ;;  %1096 = vmatprep.mubr.bf16.mxu0 %v7721_v1 }
 0x1e0   :  { %v478_v6 = vadd.f32 %v4922_v4, %v6299_v18  ;;  %v6345_v9 = vmax.f32 %v475_v5, 0.0 }
 0x1e2   :  { %v6343_v7 = vmax.f32 %v478_v6, 0.0  ;;  %v4923_v8 = vpop.f32.mrb[20].mxu0  ;;  %7817 = vst [vmem:[#allocation37_spill] sm:$0xff] %v6345_v9 }
 0x1e3   :  { %v4924_v10 = vpop.f32.mrb[21].mxu0 }
 0x1e4   :  { %7816 = vst [vmem:[#allocation36_spill] sm:$0xff] %v6343_v7  ;;  %v4925_v11 = vadd.f32 %v4924_v10, %v4923_v8  ;;  %v4926_v12 = vpop.f32.mrb[22].mxu0  ;;  %v605_v14 = vpack.c.bf16 %v6343_v7, %v6345_v9 }
 0x1e5   :  { %v4927_v13 = vpop.f32.mrb[23].mxu0 }
 0x1e6   :  { %v4928_v15 = vadd.f32 %v4927_v13, %v4926_v12  ;;  %v483_v16 = vadd.f32 %v4925_v11, %v6299_v18  ;;  %904 = vmatmul.mubr.bf16.gmra.mrb[16].mxu1 %v605_v14  ;;  %1097 = vmatmul.mubr.bf16.gmra.mrb[80].mxu0 %v605_v14 }
 0x1e7   :  { %913 = vmatprep.mubr.bf16.mxu1 %v7721_v1  ;;  %1106 = vmatprep.mubr.bf16.mxu0 %v7721_v1 }
 0x1e8   :  { %v486_v17 = vadd.f32 %v4928_v15, %v6299_v18  ;;  %v6355_v21 = vmax.f32 %v483_v16, 0.0 }
 0x1ea   :  { %v6353_v19 = vmax.f32 %v486_v17, 0.0  ;;  %v4929_v20 = vpop.f32.mrb[24].mxu0  ;;  %7819 = vst [vmem:[#allocation39_spill] sm:$0xff] %v6355_v21 }
 0x1eb   :  { %v4930_v22 = vpop.f32.mrb[25].mxu0 }
 0x1ec   :  { %7818 = vst [vmem:[#allocation38_spill] sm:$0xff] %v6353_v19  ;;  %v4931_v23 = vadd.f32 %v4930_v22, %v4929_v20  ;;  %v4932_v24 = vpop.f32.mrb[26].mxu0  ;;  %v606_v28 = vpack.c.bf16 %v6353_v19, %v6355_v21 }
 0x1ed   :  { %v4933_v25 = vpop.f32.mrb[27].mxu0 }
 0x1ee   :  { %v4934_v29 = vadd.f32 %v4933_v25, %v4932_v24  ;;  %v491_v30 = vadd.f32 %v4931_v23, %v6299_v18  ;;  %914 = vmatmul.mubr.bf16.gmra.mrb[20].mxu1 %v606_v28  ;;  %1107 = vmatmul.mubr.bf16.gmra.mrb[84].mxu0 %v606_v28 }
 0x1ef   :  { %923 = vmatprep.mubr.bf16.mxu1 %v7721_v1  ;;  %1116 = vmatprep.mubr.bf16.mxu0 %v7721_v1 }
 0x1f0   :  { %v494_v31 = vadd.f32 %v4934_v29, %v6299_v18  ;;  %v6365_v34 = vmax.f32 %v491_v30, 0.0 }
 0x1f2   :  { %v6363_v32 = vmax.f32 %v494_v31, 0.0  ;;  %v4935_v33 = vpop.f32.mrb[28].mxu0  ;;  %7821 = vst [vmem:[#allocation41_spill] sm:$0xff] %v6365_v34 }
 0x1f3   :  { %v4936_v35 = vpop.f32.mrb[29].mxu0 }
 0x1f4   :  { %7820 = vst [vmem:[#allocation40_spill] sm:$0xff] %v6363_v32  ;;  %v4937_v36 = vadd.f32 %v4936_v35, %v4935_v33  ;;  %v4938_v39 = vpop.f32.mrb[30].mxu0  ;;  %v607_v41 = vpack.c.bf16 %v6363_v32, %v6365_v34 }
 0x1f5   :  { %v4939_v40 = vpop.f32.mrb[31].mxu0 }
 0x1f6   :  { %v4940_v42 = vadd.f32 %v4939_v40, %v4938_v39  ;;  %v499_v43 = vadd.f32 %v4937_v36, %v6299_v18  ;;  %924 = vmatmul.mubr.bf16.gmra.mrb[24].mxu1 %v607_v41  ;;  %1117 = vmatmul.mubr.bf16.gmra.mrb[88].mxu0 %v607_v41 }
 0x1f7   :  { %933 = vmatprep.mubr.bf16.mxu1 %v7721_v1  ;;  %1126 = vmatprep.mubr.bf16.mxu0 %v7721_v1 }
 0x1f8   :  { %v502_v44 = vadd.f32 %v4940_v42, %v6299_v18  ;;  %v6375_v47 = vmax.f32 %v499_v43, 0.0 }
 0x1fa   :  { %v6373_v45 = vmax.f32 %v502_v44, 0.0  ;;  %v4941_v46 = vpop.f32.mrb[32].mxu0  ;;  %7823 = vst [vmem:[#allocation43_spill] sm:$0xff] %v6375_v47 }
 0x1fb   :  { %v4942_v50 = vpop.f32.mrb[33].mxu0 }
 0x1fc   :  { %7822 = vst [vmem:[#allocation42_spill] sm:$0xff] %v6373_v45  ;;  %v4943_v51 = vadd.f32 %v4942_v50, %v4941_v46  ;;  %v4944_v52 = vpop.f32.mrb[34].mxu0  ;;  %v608_v54 = vpack.c.bf16 %v6373_v45, %v6375_v47 }
 0x1fd   :  { %v4945_v53 = vpop.f32.mrb[35].mxu0 }
 0x1fe   :  { %v4946_v55 = vadd.f32 %v4945_v53, %v4944_v52  ;;  %v507_v56 = vadd.f32 %v4943_v51, %v6299_v18  ;;  %934 = vmatmul.mubr.bf16.gmra.mrb[28].mxu1 %v608_v54  ;;  %1127 = vmatmul.mubr.bf16.gmra.mrb[92].mxu0 %v608_v54 }
 0x1ff   :  { %943 = vmatprep.mubr.bf16.mxu1 %v7721_v1  ;;  %1136 = vmatprep.mubr.bf16.mxu0 %v7721_v1 }
 0x200   :  { %v510_v57 = vadd.f32 %v4946_v55, %v6299_v18  ;;  %v6385_v62 = vmax.f32 %v507_v56, 0.0 }
 0x202   :  { %v6383_v58 = vmax.f32 %v510_v57, 0.0  ;;  %v4947_v60 = vpop.f32.mrb[36].mxu0  ;;  %7825 = vst [vmem:[#allocation45_spill] sm:$0xff] %v6385_v62 }
 0x203   :  { %v4948_v63 = vpop.f32.mrb[37].mxu0 }
 0x204   :  { %7824 = vst [vmem:[#allocation44_spill] sm:$0xff] %v6383_v58  ;;  %v4949_v0 = vadd.f32 %v4948_v63, %v4947_v60  ;;  %v4950_v2 = vpop.f32.mrb[38].mxu0  ;;  %v609_v4 = vpack.c.bf16 %v6383_v58, %v6385_v62 }
 0x205   :  { %v4951_v3 = vpop.f32.mrb[39].mxu0 }
 0x206   :  { %v515_v5 = vadd.f32 %v4949_v0, %v6299_v18  ;;  %v4952_v6 = vadd.f32 %v4951_v3, %v4950_v2  ;;  %944 = vmatmul.mubr.bf16.gmra.mrb[32].mxu1 %v609_v4  ;;  %1137 = vmatmul.mubr.bf16.gmra.mrb[96].mxu0 %v609_v4 }
 0x207   :  { %953 = vmatprep.mubr.bf16.mxu1 %v7721_v1  ;;  %1146 = vmatprep.mubr.bf16.mxu0 %v7721_v1 }
 0x208   :  { %v518_v8 = vadd.f32 %v4952_v6, %v6299_v18  ;;  %v6393_v10 = vmax.f32 %v515_v5, 0.0 }
 0x20a   :  { %7826 = vst [vmem:[#allocation46_spill] sm:$0xff] %v6393_v10  ;;  %v6395_v11 = vmax.f32 %v518_v8, 0.0  ;;  %v4953_v12 = vpop.f32.mrb[40].mxu0 }
 0x20b   :  { %v4954_v13 = vpop.f32.mrb[41].mxu0 }
 0x20c   :  { %7827 = vst [vmem:[#allocation47_spill] sm:$0xff] %v6395_v11  ;;  %v4955_v14 = vadd.f32 %v4954_v13, %v4953_v12  ;;  %v4956_v15 = vpop.f32.mrb[42].mxu0  ;;  %v610_v16 = vpack.c.bf16 %v6395_v11, %v6393_v10 }
 0x20d   :  { %v4957_v17 = vpop.f32.mrb[43].mxu0 }
 0x20e   :  { %v523_v20 = vadd.f32 %v4955_v14, %v6299_v18  ;;  %v4958_v22 = vadd.f32 %v4957_v17, %v4956_v15  ;;  %954 = vmatmul.mubr.bf16.gmra.mrb[36].mxu1 %v610_v16  ;;  %1147 = vmatmul.mubr.bf16.gmra.mrb[100].mxu0 %v610_v16 }
 0x20f   :  { %963 = vmatprep.mubr.bf16.mxu1 %v7721_v1  ;;  %1156 = vmatprep.mubr.bf16.mxu0 %v7721_v1 }
 0x210   :  { %v526_v23 = vadd.f32 %v4958_v22, %v6299_v18  ;;  %v6403_v24 = vmax.f32 %v523_v20, 0.0 }
 0x212   :  { %7828 = vst [vmem:[#allocation48_spill] sm:$0xff] %v6403_v24  ;;  %v6405_v25 = vmax.f32 %v526_v23, 0.0  ;;  %v4959_v28 = vpop.f32.mrb[44].mxu0 }
 0x213   :  { %v4960_v29 = vpop.f32.mrb[45].mxu0 }
 0x214   :  { %7829 = vst [vmem:[#allocation49_spill] sm:$0xff] %v6405_v25  ;;  %v4961_v30 = vadd.f32 %v4960_v29, %v4959_v28  ;;  %v4962_v31 = vpop.f32.mrb[46].mxu0  ;;  %v611_v33 = vpack.c.bf16 %v6405_v25, %v6403_v24 }
 0x215   :  { %v4963_v35 = vpop.f32.mrb[47].mxu0 }
 0x216   :  { %v4964_v36 = vadd.f32 %v4963_v35, %v4962_v31  ;;  %v531_v39 = vadd.f32 %v4961_v30, %v6299_v18  ;;  %964 = vmatmul.mubr.bf16.gmra.mrb[40].mxu1 %v611_v33  ;;  %1157 = vmatmul.mubr.bf16.gmra.mrb[104].mxu0 %v611_v33 }
 0x217   :  { %973 = vmatprep.mubr.bf16.mxu1 %v7721_v1  ;;  %1166 = vmatprep.mubr.bf16.mxu0 %v7721_v1 }
 0x218   :  { %v534_v40 = vadd.f32 %v4964_v36, %v6299_v18  ;;  %v6415_v43 = vmax.f32 %v531_v39, 0.0 }
 0x21a   :  { %v6413_v41 = vmax.f32 %v534_v40, 0.0  ;;  %v4965_v42 = vpop.f32.mrb[48].mxu0  ;;  %7831 = vst [vmem:[#allocation51_spill] sm:$0xff] %v6415_v43 }
 0x21b   :  { %v4966_v44 = vpop.f32.mrb[49].mxu0 }
 0x21c   :  { %7830 = vst [vmem:[#allocation50_spill] sm:$0xff] %v6413_v41  ;;  %v4967_v46 = vadd.f32 %v4966_v44, %v4965_v42  ;;  %v4968_v50 = vpop.f32.mrb[50].mxu0  ;;  %v612_v52 = vpack.c.bf16 %v6413_v41, %v6415_v43 }
 0x21d   :  { %v4969_v51 = vpop.f32.mrb[51].mxu0 }
 0x21e   :  { %v4970_v53 = vadd.f32 %v4969_v51, %v4968_v50  ;;  %v539_v54 = vadd.f32 %v4967_v46, %v6299_v18  ;;  %974 = vmatmul.mubr.bf16.gmra.mrb[44].mxu1 %v612_v52  ;;  %1167 = vmatmul.mubr.bf16.gmra.mrb[108].mxu0 %v612_v52 }
 0x21f   :  { %983 = vmatprep.mubr.bf16.mxu1 %v7721_v1  ;;  %1176 = vmatprep.mubr.bf16.mxu0 %v7721_v1 }
 0x220   :  { %v542_v55 = vadd.f32 %v4970_v53, %v6299_v18  ;;  %v6425_v60 = vmax.f32 %v539_v54, 0.0  ;;  %v7723_v54 = vlaneseq }
 0x222   :  { %v6423_v56 = vmax.f32 %v542_v55, 0.0  ;;  %v4971_v57 = vpop.f32.mrb[52].mxu0  ;;  %7833 = vst [vmem:[#allocation53_spill] sm:$0xff] %v6425_v60 }
 0x223   :  { %v4972_v63 = vpop.f32.mrb[53].mxu0 }
 0x224   :  { %7832 = vst [vmem:[#allocation52_spill] sm:$0xff] %v6423_v56  ;;  %v4973_v0 = vadd.f32 %v4972_v63, %v4971_v57  ;;  %v4974_v2 = vpop.f32.mrb[54].mxu0  ;;  %v613_v4 = vpack.c.bf16 %v6423_v56, %v6425_v60  ;;  %v649_v57 = vld [vmem:[#allocation10] sm:$0xf] }
 0x225   :  { %v4975_v3 = vpop.f32.mrb[55].mxu0 }
 0x226   :  { %v4976_v5 = vadd.f32 %v4975_v3, %v4974_v2  ;;  %v547_v6 = vadd.f32 %v4973_v0, %v6299_v18  ;;  %984 = vmatmul.mubr.bf16.gmra.mrb[48].mxu1 %v613_v4  ;;  %1177 = vmatmul.mubr.bf16.gmra.mrb[112].mxu0 %v613_v4 }
 0x227   :  { %993 = vmatprep.mubr.bf16.mxu1 %v7721_v1  ;;  %1186 = vmatprep.mubr.bf16.mxu0 %v7721_v1 }
 0x228   :  { %v550_v8 = vadd.f32 %v4976_v5, %v6299_v18  ;;  %v6435_v14 = vmax.f32 %v547_v6, 0.0 }
 0x22a   :  { %v6433_v12 = vmax.f32 %v550_v8, 0.0  ;;  %v4977_v13 = vpop.f32.mrb[56].mxu0  ;;  %7835 = vst [vmem:[#allocation55_spill] sm:$0xff] %v6435_v14 }
 0x22b   :  { %v4978_v15 = vpop.f32.mrb[57].mxu0 }
 0x22c   :  { %7834 = vst [vmem:[#allocation54_spill] sm:$0xff] %v6433_v12  ;;  %v4979_v16 = vadd.f32 %v4978_v15, %v4977_v13  ;;  %v4980_v17 = vpop.f32.mrb[58].mxu0  ;;  %v614_v22 = vpack.c.bf16 %v6433_v12, %v6435_v14 }
 0x22d   :  { %v4981_v20 = vpop.f32.mrb[59].mxu0 }
 0x22e   :  { %v4982_v23 = vadd.f32 %v4981_v20, %v4980_v17  ;;  %v555_v28 = vadd.f32 %v4979_v16, %v6299_v18  ;;  %994 = vmatmul.mubr.bf16.gmra.mrb[52].mxu1 %v614_v22  ;;  %1187 = vmatmul.mubr.bf16.gmra.mrb[116].mxu0 %v614_v22 }
 0x22f   :  { %1003 = vmatprep.mubr.bf16.mxu1 %v7721_v1  ;;  %1196 = vmatprep.mubr.bf16.mxu0 %v7721_v1 }
 0x230   :  { %v558_v29 = vadd.f32 %v4982_v23, %v6299_v18  ;;  %v6445_v33 = vmax.f32 %v555_v28, 0.0 }
 0x232   :  { %v6443_v30 = vmax.f32 %v558_v29, 0.0  ;;  %v4983_v31 = vpop.f32.mrb[60].mxu0  ;;  %7837 = vst [vmem:[#allocation57_spill] sm:$0xff] %v6445_v33 }
 0x233   :  { %v4984_v35 = vpop.f32.mrb[61].mxu0 }
 0x234   :  { %7836 = vst [vmem:[#allocation56_spill] sm:$0xff] %v6443_v30  ;;  %v4985_v36 = vadd.f32 %v4984_v35, %v4983_v31  ;;  %v4986_v39 = vpop.f32.mrb[62].mxu0  ;;  %v615_v42 = vpack.c.bf16 %v6443_v30, %v6445_v33 }
 0x235   :  { %v4987_v40 = vpop.f32.mrb[63].mxu0 }
 0x236   :  { %v563_v44 = vadd.f32 %v4985_v36, %v6299_v18  ;;  %v4988_v46 = vadd.f32 %v4987_v40, %v4986_v39  ;;  %1004 = vmatmul.mubr.bf16.gmra.mrb[56].mxu1 %v615_v42  ;;  %1197 = vmatmul.mubr.bf16.gmra.mrb[120].mxu0 %v615_v42 }
 0x237   :  { %1013 = vmatprep.mubr.bf16.mxu1 %v7721_v1  ;;  %1206 = vmatprep.mubr.bf16.mxu0 %v7721_v1 }
 0x238   :  { %v566_v50 = vadd.f32 %v4988_v46, %v6299_v18  ;;  %v6453_v51 = vmax.f32 %v563_v44, 0.0  ;;  %v6462_v18 = vshrl.u32 %v7723_v54, 7 }
 0x23a   :  { %7838 = vst [vmem:[#allocation58_spill] sm:$0xff] %v6453_v51  ;;  %v6455_v52 = vmax.f32 %v566_v50, 0.0  ;;  %7840 = vst [vmem:[#allocation60_spill] sm:$0xff] %v6462_v18  ;;  %v6465_v55 = vsub.s32 2, %v6462_v18  ;;  %v6468_v63 = vsub.s32 3, %v6462_v18  ;;  %v6471_v0 = vsub.s32 0, %v6462_v18 }
 0x23b   :  { %v6477_v3 = vsub.s32 1, %v6462_v18 }
 0x23c   :  { %7839 = vst [vmem:[#allocation59_spill] sm:$0xff] %v6455_v52  ;;  %v616_v53 = vpack.c.bf16 %v6455_v52, %v6453_v51  ;;  %7841 = vst [vmem:[#allocation61_spill] sm:$0xff] %v6465_v55  ;;  %v6474_v2 = vrot.slane %v649_v57, %v6465_v55  ;;  %v6480_v4 = vrot.slane %v649_v57, %v6468_v63 }
 0x23d   :  { %7842 = vst [vmem:[#allocation62_spill] sm:$0xff] %v6468_v63  ;;  %7843 = vst [vmem:[#allocation63_spill] sm:$0xff] %v6471_v0  ;;  %v6483_v5 = vrot.slane %v649_v57, %v6471_v0  ;;  %v6487_v15 = vrot.slane %v649_v57, %v6477_v3 }
 0x23e   :  { %1014 = vmatmul.mubr.bf16.gmra.mrb[60].mxu1 %v616_v53  ;;  %1207 = vmatmul.mubr.bf16.gmra.mrb[124].mxu0 %v616_v53  ;;  %7844 = vst [vmem:[#allocation64_spill] sm:$0xff] %v6477_v3 }
 0x23f   :  { %3884 = vmatprep.mubr.bf16.mxu1 %v7721_v1  ;;  %4080 = vmatprep.mubr.bf16.mxu0 %v7721_v1 }
 0x299   :  { %v865_v6 = vpop.f32.mrb[0].mxu1  ;;  %v1058_v8 = vpop.f32.mrb[64].mxu0 }
 0x29a   :  { %v1059_v13 = vadd.f32 %v1058_v8, %v6474_v2  ;;  %v867_v16 = vpop.f32.mrb[1].mxu1  ;;  %v1060_v17 = vpop.f32.mrb[65].mxu0  ;;  %v866_v28 = vadd.f32 %v865_v6, %v6483_v5 }
 0x29b   :  { %v1061_v20 = vadd.f32 %v1060_v17, %v6480_v4  ;;  %v869_v22 = vpop.f32.mrb[2].mxu1  ;;  %v1062_v23 = vpop.f32.mrb[66].mxu0  ;;  %v868_v42 = vadd.f32 %v867_v16, %v6487_v15 }
 0x29c   :  { %v4684_v29 = vmul.f32 -1.442695, %v1059_v13  ;;  %v1063_v31 = vadd.f32 %v1062_v23, %v6474_v2  ;;  %v871_v35 = vpop.f32.mrb[3].mxu1  ;;  %v1064_v36 = vpop.f32.mrb[67].mxu0  ;;  %v870_v50 = vadd.f32 %v869_v22, %v6483_v5 }
 0x29d   :  { %v4685_v39 = vmul.f32 -1.442695, %v1061_v20  ;;  %v1065_v40 = vadd.f32 %v1064_v36, %v6480_v4  ;;  %v872_v53 = vadd.f32 %v871_v35, %v6487_v15 }
 0x29e   :  { %5310 = vpow2.f32 %v4684_v29  ;;  %v4686_v44 = vmul.f32 -1.442695, %v1063_v31 }
 0x29f   :  { %5312 = vpow2.f32 %v4685_v39  ;;  %v4687_v46 = vmul.f32 -1.442695, %v1065_v40 }
 0x2a0   :  { %5314 = vtanh.f32 %v866_v28 }
 0x2a1   :  { %5316 = vpow2.f32 %v4686_v44  ;;  %v875_v57 = vpop.f32.mrb[4].mxu1  ;;  %v1068_v6 = vpop.f32.mrb[68].mxu0 }
 0x2a2   :  { %5318 = vtanh.f32 %v868_v42  ;;  %v1069_v8 = vadd.f32 %v1068_v6, %v6474_v2  ;;  %v877_v13 = vpop.f32.mrb[5].mxu1  ;;  %v1070_v17 = vpop.f32.mrb[69].mxu0  ;;  %v876_v28 = vadd.f32 %v875_v57, %v6483_v5 }
 0x2a3   :  { %5320 = vpow2.f32 %v4687_v46  ;;  %v1071_v20 = vadd.f32 %v1070_v17, %v6480_v4  ;;  %v879_v16 = vpop.f32.mrb[6].mxu1  ;;  %v1072_v23 = vpop.f32.mrb[70].mxu0  ;;  %v878_v40 = vadd.f32 %v877_v13, %v6487_v15 }
 0x2a4   :  { %5322 = vtanh.f32 %v870_v50  ;;  %v4688_v29 = vmul.f32 -1.442695, %v1069_v8  ;;  %v1073_v22 = vadd.f32 %v1072_v23, %v6474_v2  ;;  %v881_v31 = vpop.f32.mrb[7].mxu1  ;;  %v1074_v35 = vpop.f32.mrb[71].mxu0 }
 0x2a5   :  { %5324 = vtanh.f32 %v872_v53  ;;  %v4689_v36 = vmul.f32 -1.442695, %v1071_v20  ;;  %v1075_v39 = vadd.f32 %v1074_v35, %v6480_v4 }
 0x2a6   :  { %5326 = vpow2.f32 %v4688_v29  ;;  %v4690_v42 = vmul.f32 -1.442695, %v1073_v22  ;;  %v880_v22 = vadd.f32 %v879_v16, %v6483_v5 }
 0x2a7   :  { %5328 = vpow2.f32 %v4689_v36  ;;  %v4691_v57 = vmul.f32 -1.442695, %v1075_v39 }
 0x2a8   :  { %v5311_v44 = vpop.eup %5310  ;;  %5330 = vtanh.f32 %v876_v28 }
 0x2a9   :  { %v5313_v46 = vpop.eup %5312  ;;  %v1473_v50 = vadd.f32 1.0, %v5311_v44  ;;  %5332 = vpow2.f32 %v4690_v42  ;;  %v885_v6 = vpop.f32.mrb[8].mxu1  ;;  %v882_v42 = vadd.f32 %v881_v31, %v6487_v15 }
 0x2aa   :  { %v1078_v8 = vpop.f32.mrb[72].mxu0  ;;  %v6502_v17 = vpop.eup %5314  ;;  %v1474_v23 = vadd.f32 1.0, %v5313_v46  ;;  %5334 = vtanh.f32 %v878_v40 }
 0x2ab   :  { %v1079_v53 = vadd.f32 %v1078_v8, %v6474_v2  ;;  %v6505_v20 = vpop.f32.mrb[9].mxu1  ;;  %v1080_v29 = vpop.f32.mrb[73].mxu0  ;;  %5336 = vrcp.f32 %v1473_v50 }
 0x2ac   :  { %v5317_v13 = vpop.eup %5316  ;;  %v6508_v28 = vpop.f32.mrb[10].mxu1  ;;  %5338 = vrcp.f32 %v1474_v23  ;;  %v1081_v1 = vadd.f32 %v1080_v29, %v6480_v4 }
 0x2ad   :  { %v1082_v35 = vpop.f32.mrb[74].mxu0  ;;  %v5319_v36 = vpop.eup %5318  ;;  %v1475_v39 = vadd.f32 1.0, %v5317_v13  ;;  %5340 = vpow2.f32 %v4691_v57  ;;  %v4692_v8 = vmul.f32 -1.442695, %v1079_v53 }
 0x2ae   :  { %v6511_v44 = vpop.f32.mrb[11].mxu1  ;;  %v1084_v40 = vpop.f32.mrb[75].mxu0  ;;  %v1083_v23 = vadd.f32 %v1082_v35, %v6474_v2  ;;  %v4693_v51 = vmul.f32 -1.442695, %v1081_v1 }
 0x2af   :  { %v5321_v46 = vpop.eup %5320  ;;  %5342 = vrcp.f32 %v1475_v39  ;;  %v1729_v39 = vld [vmem:[#allocation11] sm:$0x3] }
 0x2b0   :  { %v5323_v54 = vpop.eup %5322  ;;  %v1476_v50 = vadd.f32 1.0, %v5321_v46  ;;  %5344 = vtanh.f32 %v880_v22  ;;  %v886_v22 = vadd.f32 %v885_v6, %v6483_v5  ;;  %v6536_v12 = vrot.slane %v1729_v39, %v6477_v3 }
 0x2b1   :  { %v6514_v16 = vpop.eup %5324  ;;  %5346 = vtanh.f32 %v882_v42  ;;  %v6519_v53 = vpop.f32.mrb[12].mxu1  ;;  %v1085_v42 = vadd.f32 %v1084_v40, %v6480_v4  ;;  %v6533_v40 = vrot.slane %v1729_v39, %v6471_v0 }
 0x2b2   :  { %v5327_v52 = vpop.eup %5326  ;;  %5348 = vpow2.f32 %v4692_v8  ;;  %v1088_v29 = vpop.f32.mrb[76].mxu0  ;;  %v4694_v8 = vmul.f32 -1.442695, %v1083_v23 }
 0x2b3   :  { %v5329_v13 = vpop.eup %5328  ;;  %v1477_v31 = vadd.f32 1.0, %v5327_v52  ;;  %5350 = vrcp.f32 %v1476_v50  ;;  %v6523_v33 = vpop.f32.mrb[13].mxu1  ;;  %v1089_v47 = vadd.f32 %v1088_v29, %v6474_v2  ;;  %v4695_v23 = vmul.f32 -1.442695, %v1085_v42 }
 0x2b4   :  { %v6517_v30 = vpop.eup %5330  ;;  %v1478_v57 = vadd.f32 1.0, %v5329_v13  ;;  %v1090_v35 = vpop.f32.mrb[77].mxu0  ;;  %v888_v29 = vadd.f32 %v6505_v20, %v6487_v15  ;;  %v890_v20 = vadd.f32 %v6508_v28, %v6483_v5 }
 0x2b5   :  { %v5333_v46 = vpop.eup %5332  ;;  %5352 = vrcp.f32 %v1477_v31  ;;  %v6527_v50 = vpop.f32.mrb[14].mxu1  ;;  %v1091_v41 = vadd.f32 %v1090_v35, %v6480_v4  ;;  %v4696_v32 = vmul.f32 -1.442695, %v1089_v47 }
 0x2b6   :  { %v6525_v52 = vpop.eup %5334  ;;  %5354 = vrcp.f32 %v1478_v57  ;;  %v1479_v1 = vadd.f32 1.0, %v5333_v46  ;;  %v1092_v13 = vpop.f32.mrb[78].mxu0 }
 0x2b7   :  { %v5337_v45 = vpop.eup %5336  ;;  %5356 = vpow2.f32 %v4693_v51  ;;  %v6530_v31 = vpop.f32.mrb[15].mxu1 }
 0x2b8   :  { %v1094_v6 = vpop.f32.mrb[79].mxu0  ;;  %v5339_v14 = vpop.eup %5338  ;;  %5358 = vrcp.f32 %v1479_v1  ;;  %v1665_v46 = vmul.f32 %v5337_v45, %v6502_v17 }
 0x2b9   :  { %v5341_v57 = vpop.eup %5340  ;;  %5360 = vtanh.f32 %v886_v22  ;;  %v1666_v56 = vmul.f32 %v5339_v14, %v5319_v36  ;;  %v6546_v45 = vpop.f32.mrb[16].mxu1  ;;  %v1093_v36 = vadd.f32 %v1092_v13, %v6474_v2  ;;  %v1095_v13 = vadd.f32 %v1094_v6, %v6480_v4 }
 0x2ba   :  { %v5343_v51 = vpop.eup %5342  ;;  %v1480_v60 = vadd.f32 1.0, %v5341_v57  ;;  %5362 = vpow2.f32 %v4694_v8  ;;  %v1741_v39 = vmul.f32 %v6533_v40, %v1665_v46  ;;  %v1098_v14 = vpop.f32.mrb[80].mxu0 }
 0x2bb   :  { %v5345_v43 = vpop.eup %5344  ;;  %v1742_v1 = vmul.f32 %v6536_v12, %v1666_v56  ;;  %v1667_v34 = vmul.f32 %v5343_v51, %v5323_v54  ;;  %v6551_v42 = vpop.f32.mrb[17].mxu1  ;;  %v4697_v54 = vmul.f32 -1.442695, %v1091_v41  ;;  %v4698_v41 = vmul.f32 -1.442695, %v1093_v36 }
 0x2bc   :  { %v6544_v22 = vpop.eup %5346  ;;  %5364 = vrcp.f32 %v1480_v60  ;;  %v1100_v47 = vpop.f32.mrb[81].mxu0 }
 0x2bd   :  { %v5349_v17 = vpop.eup %5348  ;;  %5366 = vpow2.f32 %v4695_v23  ;;  %v1805_v35 = vadd.f32 %v1742_v1, %v1741_v39  ;;  %v6553_v57 = vpop.f32.mrb[18].mxu1 }
 0x2be   :  { %v5351_v8 = vpop.eup %5350  ;;  %v1481_v56 = vadd.f32 1.0, %v5349_v17  ;;  %5368 = vtanh.f32 %v888_v29  ;;  %v1102_v60 = vpop.f32.mrb[82].mxu0  ;;  %v892_v29 = vadd.f32 %v6511_v44, %v6487_v15  ;;  %v4699_v44 = vmul.f32 -1.442695, %v1095_v13 }
 0x2bf   :  { %v5353_v46 = vpop.eup %5352  ;;  %5370 = vpow2.f32 %v4696_v32  ;;  %v6555_v51 = vpop.f32.mrb[19].mxu1  ;;  %1806 = vadd.xlane.f32.xlu0 %v1805_v35  ;;  %v1668_v39 = vmul.f32 %v5351_v8, %v6514_v16  ;;  %v1743_v32 = vmul.f32 %v6533_v40, %v1667_v34  ;;  %v896_v34 = vadd.f32 %v6519_v53, %v6483_v5 }
 0x2c0   :  { %v6557_v19 = vpop.f32.mrb[83].mxu0  ;;  %v5355_v28 = vpop.eup %5354  ;;  %5372 = vrcp.f32 %v1481_v56  ;;  %v1669_v21 = vmul.f32 %v5353_v46, %v6517_v30  ;;  %v1099_v56 = vadd.f32 %v1098_v14, %v6474_v2  ;;  %v1101_v30 = vadd.f32 %v1100_v47, %v6480_v4 }
 0x2c1   :  { %v5357_v23 = vpop.eup %5356  ;;  %5374 = vtanh.f32 %v890_v20  ;;  %v1744_v6 = vmul.f32 %v6536_v12, %v1668_v39  ;;  %v1670_v20 = vmul.f32 %v5355_v28, %v6525_v52  ;;  %v6568_v36 = vpop.f32.mrb[20].mxu1  ;;  %v912_v10 = vadd.f32 %v6555_v51, %v6487_v15 }
 0x2c2   :  { %v5359_v1 = vpop.eup %5358  ;;  %v1482_v17 = vadd.f32 1.0, %v5357_v23  ;;  %5376 = vpow2.f32 %v4697_v54  ;;  %v1108_v16 = vpop.f32.mrb[84].mxu0  ;;  %v1745_v47 = vmul.f32 %v6533_v40, %v1669_v21 }
 0x2c3   :  { %v5361_v35 = vpop.eup %5360  ;;  %v1671_v7 = vmul.f32 %v5359_v1, %v5345_v43  ;;  %v6573_v54 = vpop.f32.mrb[21].mxu1  ;;  %v1808_v43 = vadd.f32 %v1744_v6, %v1743_v32  ;;  %v898_v1 = vadd.f32 %v6523_v33, %v6487_v15  ;;  %v1103_v32 = vadd.f32 %v1102_v60, %v6474_v2 }
 0x2c4   :  { %v5363_v9 = vpop.eup %5362  ;;  %5378 = vrcp.f32 %v1482_v17  ;;  %v6575_v14 = vpop.f32.mrb[85].mxu0  ;;  %v4701_v17 = vmul.f32 -1.442695, %v1101_v30  ;;  %v1105_v60 = vadd.f32 %v6557_v19, %v6480_v4 }
 0x2c5   :  { %v1483_v8 = vadd.f32 1.0, %v5363_v9  ;;  %5380 = vpow2.f32 %v4698_v41  ;;  %v6577_v52 = vpop.f32.mrb[22].mxu1  ;;  %v6579_v28 = vpop.f32.mrb[86].mxu0  ;;  %v4700_v9 = vmul.f32 -1.442695, %v1099_v56  ;;  %1809 = vadd.xlane.f32.xlu0 %v1808_v43  ;;  %v1746_v56 = vmul.f32 %v6536_v12, %v1670_v20 }
 0x2c6   :  { %v5365_v46 = vpop.eup %5364  ;;  %5382 = vtanh.f32 %v892_v29  ;;  %v6581_v23 = vpop.f32.mrb[23].mxu1  ;;  %v1747_v21 = vmul.f32 %v6533_v40, %v1671_v7 }
 0x2c7   :  { %v5367_v13 = vpop.eup %5366  ;;  %5384 = vrcp.f32 %v1483_v8  ;;  %v6583_v53 = vpop.f32.mrb[87].mxu0  ;;  %v1672_v25 = vmul.f32 %v5365_v46, %v6544_v22  ;;  %v1811_v24 = vadd.f32 %v1746_v56, %v1745_v47  ;;  %v4702_v46 = vmul.f32 -1.442695, %v1103_v32 }
 0x2c8   :  { %v5369_v41 = vpop.eup %5368  ;;  %v1484_v39 = vadd.f32 1.0, %v5367_v13  ;;  %5386 = vpow2.f32 %v4699_v44 }
 0x2c9   :  { %v5371_v29 = vpop.eup %5370  ;;  %5388 = vtanh.f32 %v896_v34  ;;  %v900_v34 = vadd.f32 %v6527_v50, %v6483_v5  ;;  %v6596_v20 = vpop.f32.mrb[24].mxu1  ;;  %v1748_v22 = vmul.f32 %v6536_v12, %v1672_v25  ;;  %1812 = vadd.xlane.f32.xlu1 %v1811_v24  ;;  %v902_v25 = vadd.f32 %v6530_v31, %v6487_v15 }
 0x2ca   :  { %v5373_v6 = vpop.eup %5372  ;;  %5390 = vrcp.f32 %v1484_v39  ;;  %v1485_v8 = vadd.f32 1.0, %v5371_v29  ;;  %v6598_v30 = vpop.f32.mrb[88].mxu0  ;;  %v1111_v31 = vadd.f32 %v6575_v14, %v6480_v4 }
 0x2cb   :  { %v5375_v13 = vpop.eup %5374  ;;  %5392 = vpow2.f32 %v4700_v9  ;;  %v1673_v33 = vmul.f32 %v5373_v6, %v5361_v35  ;;  %v6601_v43 = vpop.f32.mrb[25].mxu1  ;;  %v1814_v50 = vadd.f32 %v1748_v22, %v1747_v21 }
 0x2cc   :  { %v5377_v44 = vpop.eup %5376  ;;  %5394 = vtanh.f32 %v898_v1  ;;  %v6603_v35 = vpop.f32.mrb[89].mxu0  ;;  %v1109_v1 = vadd.f32 %v1108_v16, %v6474_v2 }
 0x2cd   :  { %5396 = vrcp.f32 %v1485_v8  ;;  %v1486_v7 = vadd.f32 1.0, %v5377_v44  ;;  %v6605_v47 = vpop.f32.mrb[26].mxu1  ;;  %v6607_v19 = vpop.f32.mrb[90].mxu0  ;;  %v906_v8 = vadd.f32 %v6546_v45, %v6483_v5  ;;  %1815 = vadd.xlane.f32.xlu1 %v1814_v50  ;;  %v1749_v16 = vmul.f32 %v6533_v40, %v1673_v33 }
 0x2ce   :  { %v5379_v9 = vpop.eup %5378  ;;  %5398 = vpow2.f32 %v4701_v17  ;;  %v6612_v29 = vpop.f32.mrb[27].mxu1  ;;  %v4703_v17 = vmul.f32 -1.442695, %v1105_v60  ;;  %v908_v45 = vadd.f32 %v6551_v42, %v6487_v15 }
 0x2cf   :  { %v5381_v39 = vpop.eup %5380  ;;  %5400 = vrcp.f32 %v1486_v7  ;;  %v6614_v24 = vpop.f32.mrb[91].mxu0  ;;  %v1674_v21 = vmul.f32 %v5379_v9, %v5369_v41  ;;  %v1113_v41 = vadd.f32 %v6579_v28, %v6474_v2 }
 0x2d0   :  { %v5383_v32 = vpop.eup %5382  ;;  %5402 = vtanh.f32 %v900_v34  ;;  %v1487_v56 = vadd.f32 1.0, %v5381_v39  ;;  %v4704_v39 = vmul.f32 -1.442695, %v1109_v1 }
 0x2d1   :  { %v5385_v6 = vpop.eup %5384  ;;  %5404 = vpow2.f32 %v4702_v46  ;;  %v1750_v60 = vmul.f32 %v6536_v12, %v1674_v21  ;;  %v6626_v46 = vpop.f32.mrb[28].mxu1 }
 0x2d2   :  { %v5387_v44 = vpop.eup %5386  ;;  %5406 = vrcp.f32 %v1487_v56  ;;  %v1675_v22 = vmul.f32 %v5385_v6, %v5375_v13  ;;  %v6628_v14 = vpop.f32.mrb[92].mxu0 }
 0x2d3   :  { %v5389_v7 = vpop.eup %5388  ;;  %5408 = vtanh.f32 %v902_v25  ;;  %v1488_v34 = vadd.f32 1.0, %v5387_v44  ;;  %v1817_v13 = vadd.f32 %v1750_v60, %v1749_v16  ;;  %v6631_v25 = vpop.f32.mrb[29].mxu1  ;;  %v4706_v60 = vmul.f32 -1.442695, %v1113_v41 }
 0x2d4   :  { %v5391_v11 = vpop.eup %5390  ;;  %5410 = vpow2.f32 %v4703_v17  ;;  %v1751_v50 = vmul.f32 %v6533_v40, %v1675_v22  ;;  %v6633_v1 = vpop.f32.mrb[93].mxu0  ;;  %v4705_v17 = vmul.f32 -1.442695, %v1111_v31  ;;  %v1115_v31 = vadd.f32 %v6583_v53, %v6480_v4 }
 0x2d5   :  { %v5393_v33 = vpop.eup %5392  ;;  %5412 = vrcp.f32 %v1488_v34  ;;  %v1676_v9 = vmul.f32 %v5391_v11, %v5383_v32  ;;  %v6635_v6 = vpop.f32.mrb[30].mxu1  ;;  %1818 = vadd.xlane.f32.xlu0 %v1817_v13 }
 0x2d6   :  { %v5395_v56 = vpop.eup %5394  ;;  %5414 = vtanh.f32 %v906_v8  ;;  %v1489_v42 = vadd.f32 1.0, %v5393_v33  ;;  %v6637_v28 = vpop.f32.mrb[94].mxu0  ;;  %v910_v8 = vadd.f32 %v6553_v57, %v6483_v5 }
 0x2d7   :  { %v5397_v21 = vpop.eup %5396  ;;  %5416 = vpow2.f32 %v4704_v39  ;;  %v1752_v44 = vmul.f32 %v6536_v12, %v1676_v9  ;;  %v6640_v11 = vpop.f32.mrb[31].mxu1 }
 0x2d8   :  { %v6642_v32 = vpop.f32.mrb[95].mxu0  ;;  %v5399_v16 = vpop.eup %5398  ;;  %5418 = vrcp.f32 %v1489_v42  ;;  %v1677_v13 = vmul.f32 %v5397_v21, %v5389_v7  ;;  %v1119_v42 = vadd.f32 %v6598_v30, %v6474_v2 }
 0x2d9   :  { %v5401_v22 = vpop.eup %5400  ;;  %5420 = vtanh.f32 %v908_v45  ;;  %v1490_v34 = vadd.f32 1.0, %v5399_v16  ;;  %v1820_v39 = vadd.f32 %v1752_v44, %v1751_v50  ;;  %v4707_v45 = vmul.f32 -1.442695, %v1115_v31  ;;  %v6653_v50 = vpop.f32.mrb[32].mxu1 }
 0x2da   :  { %v5403_v33 = vpop.eup %5402  ;;  %5422 = vpow2.f32 %v4705_v17  ;;  %v1678_v57 = vmul.f32 %v5401_v22, %v5395_v56  ;;  %v1753_v41 = vmul.f32 %v6533_v40, %v1677_v13  ;;  %v6655_v17 = vpop.f32.mrb[96].mxu0  ;;  %v916_v16 = vadd.f32 %v6568_v36, %v6483_v5 }
 0x2db   :  { %v5405_v9 = vpop.eup %5404  ;;  %5424 = vrcp.f32 %v1490_v34  ;;  %1821 = vadd.xlane.f32.xlu1 %v1820_v39  ;;  %v6658_v44 = vpop.f32.mrb[33].mxu1 }
 0x2dc   :  { %v5407_v58 = vpop.eup %5406  ;;  %5426 = vtanh.f32 %v910_v8  ;;  %v1491_v53 = vadd.f32 1.0, %v5405_v9  ;;  %v1754_v21 = vmul.f32 %v6536_v12, %v1678_v57  ;;  %v6660_v30 = vpop.f32.mrb[97].mxu0  ;;  %v1121_v8 = vadd.f32 %v6603_v35, %v6480_v4 }
 0x2dd   :  { %v5409_v7 = vpop.eup %5408  ;;  %5428 = vpow2.f32 %v4706_v60  ;;  %v1679_v51 = vmul.f32 %v5407_v58, %v5403_v33  ;;  %v6666_v31 = vpop.f32.mrb[34].mxu1  ;;  %v4708_v58 = vmul.f32 -1.442695, %v1119_v42  ;;  %v918_v35 = vadd.f32 %v6573_v54, %v6487_v15 }
 0x2de   :  { %v5411_v56 = vpop.eup %5410  ;;  %5430 = vrcp.f32 %v1491_v53  ;;  %v6668_v22 = vpop.f32.mrb[98].mxu0  ;;  %v1823_v39 = vadd.f32 %v1754_v21, %v1753_v41  ;;  %v4709_v21 = vmul.f32 -1.442695, %v1121_v8  ;;  %v1125_v54 = vadd.f32 %v6614_v24, %v6480_v4 }
 0x2df   :  { %v5413_v34 = vpop.eup %5412  ;;  %5432 = vtanh.f32 %v912_v10  ;;  %v1492_v60 = vadd.f32 1.0, %v5411_v56  ;;  %v6670_v33 = vpop.f32.mrb[35].mxu1  ;;  %v1755_v36 = vmul.f32 %v6533_v40, %v1679_v51  ;;  %v1123_v10 = vadd.f32 %v6607_v19, %v6474_v2 }
 0x2e0   :  { %v6672_v13 = vpop.f32.mrb[99].mxu0  ;;  %v5415_v9 = vpop.eup %5414  ;;  %5434 = vpow2.f32 %v4707_v45  ;;  %v1680_v57 = vmul.f32 %v5413_v34, %v5409_v7  ;;  %1824 = vadd.xlane.f32.xlu0 %v1823_v39  ;;  %v920_v51 = vadd.f32 %v6577_v52, %v6483_v5 }
 0x2e1   :  { %v5417_v53 = vpop.eup %5416  ;;  %5436 = vrcp.f32 %v1492_v60  ;;  %v6684_v19 = vpop.f32.mrb[36].mxu1  ;;  %v4710_v39 = vmul.f32 -1.442695, %v1123_v10  ;;  %v1129_v10 = vadd.f32 %v6628_v14, %v6474_v2  ;;  %v1131_v14 = vadd.f32 %v6633_v1, %v6480_v4 }
 0x2e2   :  { %v5419_v42 = vpop.eup %5418  ;;  %5438 = vtanh.f32 %v916_v16  ;;  %v1493_v41 = vadd.f32 1.0, %v5417_v53  ;;  %v1756_v56 = vmul.f32 %v6536_v12, %v1680_v57  ;;  %v6686_v60 = vpop.f32.mrb[100].mxu0  ;;  %v1133_v1 = vadd.f32 %v6637_v28, %v6474_v2 }
 0x2e3   :  { %v5421_v62 = vpop.eup %5420  ;;  %5440 = vpow2.f32 %v4708_v58  ;;  %v1681_v45 = vmul.f32 %v5419_v42, %v5415_v9  ;;  %v6688_v57 = vpop.f32.mrb[37].mxu1 }
 0x2e4   :  { %v5423_v7 = vpop.eup %5422  ;;  %5442 = vrcp.f32 %v1493_v41  ;;  %v1826_v34 = vadd.f32 %v1756_v56, %v1755_v36  ;;  %v6690_v58 = vpop.f32.mrb[101].mxu0  ;;  %v4714_v48 = vmul.f32 -1.442695, %v1133_v1 }
 0x2e5   :  { %v5425_v16 = vpop.eup %5424  ;;  %5444 = vtanh.f32 %v918_v35  ;;  %v1494_v8 = vadd.f32 1.0, %v5423_v7  ;;  %v1757_v53 = vmul.f32 %v6533_v40, %v1681_v45  ;;  %v6693_v24 = vpop.f32.mrb[38].mxu1  ;;  %v922_v35 = vadd.f32 %v6581_v23, %v6487_v15 }
 0x2e6   :  { %v5427_v9 = vpop.eup %5426  ;;  %5446 = vpow2.f32 %v4709_v21  ;;  %1827 = vadd.xlane.f32.xlu1 %v1826_v34  ;;  %v1682_v52 = vmul.f32 %v5425_v16, %v5421_v62  ;;  %v6695_v36 = vpop.f32.mrb[102].mxu0  ;;  %v4711_v45 = vmul.f32 -1.442695, %v1125_v54  ;;  %v926_v23 = vadd.f32 %v6596_v20, %v6483_v5 }
 0x2e7   :  { %v5429_v42 = vpop.eup %5428  ;;  %5448 = vrcp.f32 %v1494_v8  ;;  %v6701_v41 = vpop.f32.mrb[39].mxu1  ;;  %v928_v20 = vadd.f32 %v6601_v43, %v6487_v15 }
 0x2e8   :  { %v6703_v56 = vpop.f32.mrb[103].mxu0  ;;  %v5431_v21 = vpop.eup %5430  ;;  %5450 = vtanh.f32 %v920_v51  ;;  %v1495_v62 = vadd.f32 1.0, %v5429_v42  ;;  %v1758_v7 = vmul.f32 %v6536_v12, %v1682_v52  ;;  %v4712_v51 = vmul.f32 -1.442695, %v1129_v10 }
 0x2e9   :  { %v5433_v34 = vpop.eup %5432  ;;  %5452 = vpow2.f32 %v4710_v39  ;;  %v1683_v16 = vmul.f32 %v5431_v21, %v5427_v9  ;;  %v6711_v9 = vpop.f32.mrb[40].mxu1  ;;  %v4713_v10 = vmul.f32 -1.442695, %v1131_v14 }
 0x2ea   :  { %v5435_v8 = vpop.eup %5434  ;;  %5454 = vrcp.f32 %v1495_v62  ;;  %v1829_v59 = vadd.f32 %v1758_v7, %v1757_v53  ;;  %v6713_v52 = vpop.f32.mrb[104].mxu0 }
 0x2eb   :  { %v5437_v61 = vpop.eup %5436  ;;  %5456 = vtanh.f32 %v922_v35  ;;  %v1496_v49 = vadd.f32 1.0, %v5435_v8  ;;  %v1759_v39 = vmul.f32 %v6533_v40, %v1683_v16  ;;  %v6719_v53 = vpop.f32.mrb[41].mxu1  ;;  %v930_v8 = vadd.f32 %v6605_v47, %v6483_v5 }
 0x2ec   :  { %v5439_v42 = vpop.eup %5438  ;;  %5458 = vpow2.f32 %v4711_v45  ;;  %1830 = vadd.xlane.f32.xlu0 %v1829_v59  ;;  %v1684_v54 = vmul.f32 %v5437_v61, %v5433_v34  ;;  %v6721_v35 = vpop.f32.mrb[105].mxu0  ;;  %v1139_v47 = vadd.f32 %v6655_v17, %v6474_v2  ;;  %v936_v17 = vadd.f32 %v6626_v46, %v6483_v5 }
 0x2ed   :  { %v5441_v21 = vpop.eup %5440  ;;  %5460 = vrcp.f32 %v1496_v49  ;;  %v6724_v45 = vpop.f32.mrb[42].mxu1 }
 0x2ee   :  { %v5443_v59 = vpop.eup %5442  ;;  %5462 = vtanh.f32 %v926_v23  ;;  %v1497_v61 = vadd.f32 1.0, %v5441_v21  ;;  %v1760_v62 = vmul.f32 %v6536_v12, %v1684_v54  ;;  %v6726_v7 = vpop.f32.mrb[106].mxu0  ;;  %v1135_v23 = vadd.f32 %v6642_v32, %v6480_v4 }
 0x2ef   :  { %v5445_v49 = vpop.eup %5444  ;;  %5464 = vpow2.f32 %v4712_v51  ;;  %v1685_v43 = vmul.f32 %v5443_v59, %v5439_v42  ;;  %v6728_v34 = vpop.f32.mrb[43].mxu1 }
 0x2f0   :  { %v6730_v28 = vpop.f32.mrb[107].mxu0  ;;  %v5447_v16 = vpop.eup %5446  ;;  %5466 = vrcp.f32 %v1497_v61  ;;  %v1832_v14 = vadd.f32 %v1760_v62, %v1759_v39  ;;  %v932_v61 = vadd.f32 %v6612_v29, %v6487_v15 }
 0x2f1   :  { %v5449_v54 = vpop.eup %5448  ;;  %5468 = vtanh.f32 %v928_v20  ;;  %v1498_v21 = vadd.f32 1.0, %v5447_v16  ;;  %v1761_v42 = vmul.f32 %v6533_v40, %v1685_v43  ;;  %v4715_v20 = vmul.f32 -1.442695, %v1135_v23  ;;  %v6742_v62 = vpop.f32.mrb[44].mxu1 }
 0x2f2   :  { %v5451_v38 = vpop.eup %5450  ;;  %5470 = vpow2.f32 %v4713_v10  ;;  %1833 = vadd.xlane.f32.xlu1 %v1832_v14  ;;  %v1686_v51 = vmul.f32 %v5449_v54, %v5445_v49  ;;  %v6744_v10 = vpop.f32.mrb[108].mxu0 }
 0x2f3   :  { %v5453_v59 = vpop.eup %5452  ;;  %5472 = vrcp.f32 %v1498_v21  ;;  %v6746_v16 = vpop.f32.mrb[45].mxu1 }
 0x2f4   :  { %v5455_v32 = vpop.eup %5454  ;;  %5474 = vtanh.f32 %v930_v8  ;;  %v1499_v39 = vadd.f32 1.0, %v5453_v59  ;;  %v1762_v1 = vmul.f32 %v6536_v12, %v1686_v51  ;;  %v6748_v14 = vpop.f32.mrb[109].mxu0  ;;  %v1141_v8 = vadd.f32 %v6660_v30, %v6480_v4 }
 0x2f5   :  { %v5457_v49 = vpop.eup %5456  ;;  %5476 = vpow2.f32 %v4714_v48  ;;  %v1687_v43 = vmul.f32 %v5455_v32, %v5451_v38  ;;  %v6754_v54 = vpop.f32.mrb[46].mxu1  ;;  %v4716_v48 = vmul.f32 -1.442695, %v1139_v47 }
 0x2f6   :  { %v5459_v29 = vpop.eup %5458  ;;  %5478 = vrcp.f32 %v1499_v39  ;;  %v1835_v23 = vadd.f32 %v1762_v1, %v1761_v42  ;;  %v6756_v21 = vpop.f32.mrb[110].mxu0  ;;  %v938_v42 = vadd.f32 %v6631_v25, %v6487_v15  ;;  %v1145_v25 = vadd.f32 %v6672_v13, %v6480_v4 }
 0x2f7   :  { %v5461_v51 = vpop.eup %5460  ;;  %5480 = vtanh.f32 %v932_v61  ;;  %v1500_v38 = vadd.f32 1.0, %v5459_v29  ;;  %v6758_v59 = vpop.f32.mrb[47].mxu1  ;;  %v1763_v37 = vmul.f32 %v6533_v40, %v1687_v43  ;;  %v1143_v61 = vadd.f32 %v6668_v22, %v6474_v2 }
 0x2f8   :  { %v6760_v32 = vpop.f32.mrb[111].mxu0  ;;  %v5463_v39 = vpop.eup %5462  ;;  %5482 = vpow2.f32 %v4715_v20  ;;  %1836 = vadd.xlane.f32.xlu0 %v1835_v23  ;;  %v1688_v46 = vmul.f32 %v5461_v51, %v5457_v49  ;;  %v4717_v29 = vmul.f32 -1.442695, %v1141_v8  ;;  %v940_v43 = vadd.f32 %v6635_v6, %v6483_v5 }
 0x2f9   :  { %v5465_v30 = vpop.eup %5464  ;;  %5484 = vrcp.f32 %v1500_v38  ;;  %v6772_v51 = vpop.f32.mrb[48].mxu1  ;;  %v4718_v38 = vmul.f32 -1.442695, %v1143_v61  ;;  %v1149_v61 = vadd.f32 %v6686_v60, %v6474_v2  ;;  %v1151_v60 = vadd.f32 %v6690_v58, %v6480_v4 }
 0x2fa   :  { %v5467_v1 = vpop.eup %5466  ;;  %5486 = vtanh.f32 %v936_v17  ;;  %v1501_v47 = vadd.f32 1.0, %v5465_v30  ;;  %v1764_v27 = vmul.f32 %v6536_v12, %v1688_v46  ;;  %v6774_v22 = vpop.f32.mrb[112].mxu0  ;;  %v1153_v58 = vadd.f32 %v6695_v36, %v6474_v2 }
 0x2fb   :  { %v5469_v26 = vpop.eup %5468  ;;  %5488 = vpow2.f32 %v4716_v48  ;;  %v1689_v20 = vmul.f32 %v5467_v1, %v5463_v39  ;;  %v6776_v46 = vpop.f32.mrb[49].mxu1 }
 0x2fc   :  { %v5471_v49 = vpop.eup %5470  ;;  %5490 = vrcp.f32 %v1501_v47  ;;  %v1838_v23 = vadd.f32 %v1764_v27, %v1763_v37  ;;  %v6778_v48 = vpop.f32.mrb[113].mxu0  ;;  %v4722_v0 = vmul.f32 -1.442695, %v1153_v58 }
 0x2fd   :  { %v5473_v17 = vpop.eup %5472  ;;  %5492 = vtanh.f32 %v938_v42  ;;  %v1502_v8 = vadd.f32 1.0, %v5471_v49  ;;  %v1765_v30 = vmul.f32 %v6533_v40, %v1689_v20  ;;  %v6781_v13 = vpop.f32.mrb[50].mxu1  ;;  %v942_v42 = vadd.f32 %v6640_v11, %v6487_v15 }
 0x2fe   :  { %v5475_v39 = vpop.eup %5474  ;;  %5494 = vpow2.f32 %v4717_v29  ;;  %1839 = vadd.xlane.f32.xlu1 %v1838_v23  ;;  %v1690_v6 = vmul.f32 %v5473_v17, %v5469_v26  ;;  %v6783_v27 = vpop.f32.mrb[114].mxu0  ;;  %v4719_v20 = vmul.f32 -1.442695, %v1145_v25  ;;  %v946_v11 = vadd.f32 %v6653_v50, %v6483_v5 }
 0x2ff   :  { %v5477_v37 = vpop.eup %5476  ;;  %5496 = vrcp.f32 %v1502_v8  ;;  %v6789_v1 = vpop.f32.mrb[51].mxu1  ;;  %v948_v50 = vadd.f32 %v6658_v44, %v6487_v15 }
 0x300   :  { %v6791_v47 = vpop.f32.mrb[115].mxu0  ;;  %v5479_v29 = vpop.eup %5478  ;;  %5498 = vtanh.f32 %v940_v43  ;;  %v1503_v26 = vadd.f32 1.0, %v5477_v37  ;;  %v1766_v49 = vmul.f32 %v6536_v12, %v1690_v6  ;;  %v4720_v43 = vmul.f32 -1.442695, %v1149_v61 }
 0x301   :  { %v5481_v23 = vpop.eup %5480  ;;  %5500 = vpow2.f32 %v4718_v38  ;;  %v1691_v17 = vmul.f32 %v5479_v29, %v5475_v39  ;;  %v6799_v39 = vpop.f32.mrb[52].mxu1  ;;  %v4721_v61 = vmul.f32 -1.442695, %v1151_v60 }
 0x302   :  { %v5483_v8 = vpop.eup %5482  ;;  %5502 = vrcp.f32 %v1503_v26  ;;  %v1841_v63 = vadd.f32 %v1766_v49, %v1765_v30  ;;  %v6801_v6 = vpop.f32.mrb[116].mxu0 }
 0x303   :  { %v5485_v55 = vpop.eup %5484  ;;  %5504 = vtanh.f32 %v942_v42  ;;  %v1504_v3 = vadd.f32 1.0, %v5483_v8  ;;  %v1767_v38 = vmul.f32 %v6533_v40, %v1691_v17  ;;  %v6807_v30 = vpop.f32.mrb[53].mxu1  ;;  %v950_v8 = vadd.f32 %v6666_v31, %v6483_v5 }
 0x304   :  { %v5487_v37 = vpop.eup %5486  ;;  %5506 = vpow2.f32 %v4719_v20  ;;  %1842 = vadd.xlane.f32.xlu0 %v1841_v63  ;;  %v1692_v25 = vmul.f32 %v5485_v55, %v5481_v23  ;;  %v6809_v42 = vpop.f32.mrb[117].mxu0  ;;  %v1159_v31 = vadd.f32 %v6713_v52, %v6474_v2  ;;  %v956_v52 = vadd.f32 %v6684_v19, %v6483_v5 }
 0x305   :  { %v5489_v29 = vpop.eup %5488  ;;  %5508 = vrcp.f32 %v1504_v3  ;;  %v6812_v20 = vpop.f32.mrb[54].mxu1 }
 0x306   :  { %v5491_v63 = vpop.eup %5490  ;;  %5510 = vtanh.f32 %v946_v11  ;;  %v1505_v55 = vadd.f32 1.0, %v5489_v29  ;;  %v1768_v26 = vmul.f32 %v6536_v12, %v1692_v25  ;;  %v6814_v49 = vpop.f32.mrb[118].mxu0  ;;  %v1155_v11 = vadd.f32 %v6703_v56, %v6480_v4 }
 0x307   :  { %v5493_v3 = vpop.eup %5492  ;;  %5512 = vpow2.f32 %v4720_v43  ;;  %v1693_v44 = vmul.f32 %v5491_v63, %v5487_v37  ;;  %v6816_v23 = vpop.f32.mrb[55].mxu1 }
 0x308   :  { %v6818_v36 = vpop.f32.mrb[119].mxu0  ;;  %v5495_v17 = vpop.eup %5494  ;;  %5514 = vrcp.f32 %v1505_v55  ;;  %v1844_v60 = vadd.f32 %v1768_v26, %v1767_v38  ;;  %v952_v55 = vadd.f32 %v6670_v33, %v6487_v15 }
 0x309   :  { %v5497_v25 = vpop.eup %5496  ;;  %5516 = vtanh.f32 %v948_v50  ;;  %v1506_v29 = vadd.f32 1.0, %v5495_v17  ;;  %v1769_v37 = vmul.f32 %v6533_v40, %v1693_v44  ;;  %v4723_v50 = vmul.f32 -1.442695, %v1155_v11  ;;  %v6830_v26 = vpop.f32.mrb[56].mxu1 }
 0x30a   :  { %v5499_v18 = vpop.eup %5498  ;;  %5518 = vpow2.f32 %v4721_v61  ;;  %1845 = vadd.xlane.f32.xlu1 %v1844_v60  ;;  %v1694_v43 = vmul.f32 %v5497_v25, %v5493_v3  ;;  %v6832_v61 = vpop.f32.mrb[120].mxu0 }
 0x30b   :  { %v5501_v63 = vpop.eup %5500  ;;  %5520 = vrcp.f32 %v1506_v29  ;;  %v6834_v17 = vpop.f32.mrb[57].mxu1 }
 0x30c   :  { %v5503_v56 = vpop.eup %5502  ;;  %5522 = vtanh.f32 %v950_v8  ;;  %v1507_v38 = vadd.f32 1.0, %v5501_v63  ;;  %v1770_v58 = vmul.f32 %v6536_v12, %v1694_v43  ;;  %7845 = vst [vmem:[#allocation65_spill] sm:$0xff] %v6834_v17  ;;  %v6836_v60 = vpop.f32.mrb[121].mxu0  ;;  %v1161_v8 = vadd.f32 %v6721_v35, %v6480_v4 }
 0x30d   :  { %v5505_v3 = vpop.eup %5504  ;;  %5524 = vpow2.f32 %v4722_v0  ;;  %v1695_v44 = vmul.f32 %v5503_v56, %v5499_v18  ;;  %v6842_v25 = vpop.f32.mrb[58].mxu1  ;;  %v4724_v0 = vmul.f32 -1.442695, %v1159_v31 }
 0x30e   :  { %v5507_v33 = vpop.eup %5506  ;;  %5526 = vrcp.f32 %v1507_v38  ;;  %v1847_v11 = vadd.f32 %v1770_v58, %v1769_v37  ;;  %7846 = vst [vmem:[#allocation66_spill] sm:$0xff] %v6842_v25  ;;  %v6844_v29 = vpop.f32.mrb[122].mxu0  ;;  %v958_v37 = vadd.f32 %v6688_v57, %v6487_v15  ;;  %v1165_v57 = vadd.f32 %v6730_v28, %v6480_v4 }
 0x30f   :  { %v5509_v43 = vpop.eup %5508  ;;  %5528 = vtanh.f32 %v952_v55  ;;  %v1508_v18 = vadd.f32 1.0, %v5507_v33  ;;  %v6846_v63 = vpop.f32.mrb[59].mxu1  ;;  %v1771_v17 = vmul.f32 %v6533_v40, %v1695_v44  ;;  %v1163_v55 = vadd.f32 %v6726_v7, %v6474_v2 }
 0x310   :  { %7847 = vst [vmem:[#allocation67_spill] sm:$0xff] %v6846_v63  ;;  %v6848_v56 = vpop.f32.mrb[123].mxu0  ;;  %v5511_v38 = vpop.eup %5510  ;;  %5530 = vpow2.f32 %v4723_v50  ;;  %1848 = vadd.xlane.f32.xlu0 %v1847_v11  ;;  %v1696_v19 = vmul.f32 %v5509_v43, %v5505_v3  ;;  %v4725_v33 = vmul.f32 -1.442695, %v1161_v8  ;;  %v960_v44 = vadd.f32 %v6693_v24, %v6483_v5 }
 0x311   :  { %v5513_v35 = vpop.eup %5512  ;;  %5532 = vrcp.f32 %v1508_v18  ;;  %v6860_v43 = vpop.f32.mrb[60].mxu1  ;;  %v4726_v18 = vmul.f32 -1.442695, %v1163_v55  ;;  %v1169_v55 = vadd.f32 %v6744_v10, %v6474_v2  ;;  %v1171_v10 = vadd.f32 %v6748_v14, %v6480_v4 }
 0x312   :  { %v5515_v58 = vpop.eup %5514  ;;  %5534 = vtanh.f32 %v956_v52  ;;  %v1509_v31 = vadd.f32 1.0, %v5513_v35  ;;  %v1772_v63 = vmul.f32 %v6536_v12, %v1696_v19  ;;  %v6862_v7 = vpop.f32.mrb[124].mxu0 }
 0x313   :  { %v5517_v25 = vpop.eup %5516  ;;  %5536 = vpow2.f32 %v4724_v0  ;;  %v1697_v50 = vmul.f32 %v5515_v58, %v5511_v38  ;;  %v6864_v19 = vpop.f32.mrb[61].mxu1 }
 0x314   :  { %v5519_v3 = vpop.eup %5518  ;;  %5538 = vrcp.f32 %v1509_v31  ;;  %v1850_v11 = vadd.f32 %v1772_v63, %v1771_v17  ;;  %7848 = vst [vmem:[#allocation68_spill] sm:$0xff] %v6864_v19  ;;  %v6866_v0 = vpop.f32.mrb[125].mxu0 }
 0x315   :  { %v5521_v52 = vpop.eup %5520  ;;  %5540 = vtanh.f32 %v958_v37  ;;  %v1510_v8 = vadd.f32 1.0, %v5519_v3  ;;  %v1773_v35 = vmul.f32 %v6533_v40, %v1697_v50  ;;  %v6869_v28 = vpop.f32.mrb[62].mxu1  ;;  %v962_v37 = vadd.f32 %v6701_v41, %v6487_v15 }
 0x316   :  { %v5523_v38 = vpop.eup %5522  ;;  %5542 = vpow2.f32 %v4725_v33  ;;  %1851 = vadd.xlane.f32.xlu1 %v1850_v11  ;;  %v1698_v24 = vmul.f32 %v5521_v52, %v5517_v25  ;;  %7849 = vst [vmem:[#allocation69_spill] sm:$0xff] %v6869_v28  ;;  %v6871_v17 = vpop.f32.mrb[126].mxu0  ;;  %v4727_v50 = vmul.f32 -1.442695, %v1165_v57  ;;  %v966_v41 = vadd.f32 %v6711_v9, %v6483_v5 }
 0x317   :  { %v5525_v63 = vpop.eup %5524  ;;  %5544 = vrcp.f32 %v1510_v8  ;;  %v6877_v58 = vpop.f32.mrb[63].mxu1  ;;  %v1173_v9 = vadd.f32 %v6756_v21, %v6474_v2 }
 0x318   :  { %7850 = vst [vmem:[#allocation70_spill] sm:$0xff] %v6877_v58  ;;  %v6879_v31 = vpop.f32.mrb[127].mxu0  ;;  %v5527_v33 = vpop.eup %5526  ;;  %5546 = vtanh.f32 %v960_v44  ;;  %v1511_v25 = vadd.f32 1.0, %v5525_v63  ;;  %v1774_v3 = vmul.f32 %v6536_v12, %v1698_v24  ;;  %v4728_v44 = vmul.f32 -1.442695, %v1169_v55 }
 0x319   :  { %v5529_v11 = vpop.eup %5528  ;;  %5548 = vpow2.f32 %v4726_v18  ;;  %v1699_v52 = vmul.f32 %v5527_v33, %v5523_v38  ;;  %v968_v24 = vadd.f32 %v6719_v53, %v6487_v15  ;;  %v1175_v53 = vadd.f32 %v6760_v32, %v6480_v4 }
 0x31a   :  { %v5531_v8 = vpop.eup %5530  ;;  %5550 = vrcp.f32 %v1511_v25  ;;  %v1853_v58 = vadd.f32 %v1774_v3, %v1773_v35  ;;  %v4730_v3 = vmul.f32 -1.442695, %v1173_v9  ;;  %v976_v9 = vadd.f32 %v6742_v62, %v6483_v5 }
 0x31b   :  { %v5533_v28 = vpop.eup %5532  ;;  %5552 = vtanh.f32 %v962_v37  ;;  %v1512_v19 = vadd.f32 1.0, %v5531_v8  ;;  %v1775_v18 = vmul.f32 %v6533_v40, %v1699_v52  ;;  %v4729_v37 = vmul.f32 -1.442695, %v1171_v10 }
 0x31c   :  { %v5535_v63 = vpop.eup %5534  ;;  %5554 = vpow2.f32 %v4727_v50  ;;  %1854 = vadd.xlane.f32.xlu0 %v1853_v58  ;;  %v1700_v57 = vmul.f32 %v5533_v28, %v5529_v11  ;;  %v972_v10 = vadd.f32 %v6728_v34, %v6487_v15  ;;  %v1181_v34 = vadd.f32 %v6778_v48, %v6480_v4 }
 0x31d   :  { %v5537_v38 = vpop.eup %5536  ;;  %5556 = vrcp.f32 %v1512_v19  ;;  %v970_v19 = vadd.f32 %v6724_v45, %v6483_v5  ;;  %v1179_v45 = vadd.f32 %v6774_v22, %v6474_v2  ;;  %v1183_v62 = vadd.f32 %v6783_v27, %v6474_v2 }
 0x31e   :  { %v5539_v14 = vpop.eup %5538  ;;  %5558 = vtanh.f32 %v966_v41  ;;  %v1513_v35 = vadd.f32 1.0, %v5537_v38  ;;  %v1776_v55 = vmul.f32 %v6536_v12, %v1700_v57 }
 0x31f   :  { %v5541_v33 = vpop.eup %5540  ;;  %5560 = vpow2.f32 %v4728_v44  ;;  %v1701_v58 = vmul.f32 %v5539_v14, %v5535_v63  ;;  %v4731_v63 = vmul.f32 -1.442695, %v1175_v53 }
 0x320   :  { %v5543_v28 = vpop.eup %5542  ;;  %5562 = vrcp.f32 %v1513_v35  ;;  %v1856_v25 = vadd.f32 %v1776_v55, %v1775_v18 }
 0x321   :  { %v5545_v50 = vpop.eup %5544  ;;  %5564 = vtanh.f32 %v968_v24  ;;  %v1514_v21 = vadd.f32 1.0, %v5543_v28  ;;  %v1777_v8 = vmul.f32 %v6533_v40, %v1701_v58 }
 0x322   :  { %v5547_v11 = vpop.eup %5546  ;;  %5566 = vpow2.f32 %v4729_v37  ;;  %1857 = vadd.xlane.f32.xlu1 %v1856_v25  ;;  %v1702_v52 = vmul.f32 %v5545_v50, %v5541_v33  ;;  %v4732_v37 = vmul.f32 -1.442695, %v1179_v45  ;;  %v4733_v25 = vmul.f32 -1.442695, %v1181_v34 }
 0x323   :  { %v5549_v41 = vpop.eup %5548  ;;  %5568 = vrcp.f32 %v1514_v21 }
 0x324   :  { %v5551_v32 = vpop.eup %5550  ;;  %5570 = vtanh.f32 %v970_v19  ;;  %v1515_v44 = vadd.f32 1.0, %v5549_v41  ;;  %v1778_v57 = vmul.f32 %v6536_v12, %v1702_v52  ;;  %v978_v19 = vadd.f32 %v6746_v16, %v6487_v15 }
 0x325   :  { %v5553_v18 = vpop.eup %5552  ;;  %5572 = vpow2.f32 %v4730_v3  ;;  %v1703_v38 = vmul.f32 %v5551_v32, %v5547_v11  ;;  %v980_v52 = vadd.f32 %v6754_v54, %v6483_v5  ;;  %v1185_v16 = vadd.f32 %v6791_v47, %v6480_v4 }
 0x326   :  { %v5555_v24 = vpop.eup %5554  ;;  %5574 = vrcp.f32 %v1515_v44  ;;  %v1859_v14 = vadd.f32 %v1778_v57, %v1777_v8  ;;  %v982_v57 = vadd.f32 %v6758_v59, %v6487_v15  ;;  %v1189_v54 = vadd.f32 %v6801_v6, %v6474_v2 }
 0x327   :  { %v5557_v35 = vpop.eup %5556  ;;  %5576 = vtanh.f32 %v972_v10  ;;  %v1516_v22 = vadd.f32 1.0, %v5555_v24  ;;  %v1779_v58 = vmul.f32 %v6533_v40, %v1703_v38  ;;  %v4734_v10 = vmul.f32 -1.442695, %v1183_v62 }
 0x328   :  { %v5559_v55 = vpop.eup %5558  ;;  %5578 = vpow2.f32 %v4731_v63  ;;  %1860 = vadd.xlane.f32.xlu0 %v1859_v14  ;;  %v1704_v33 = vmul.f32 %v5557_v35, %v5553_v18  ;;  %v4735_v38 = vmul.f32 -1.442695, %v1185_v16  ;;  %v986_v35 = vadd.f32 %v6772_v51, %v6483_v5 }
 0x329   :  { %v5561_v28 = vpop.eup %5560  ;;  %5580 = vrcp.f32 %v1516_v22  ;;  %v1191_v59 = vadd.f32 %v6809_v42, %v6480_v4  ;;  %v988_v62 = vadd.f32 %v6776_v46, %v6487_v15  ;;  %v1193_v51 = vadd.f32 %v6814_v49, %v6474_v2 }
 0x32a   :  { %v5563_v48 = vpop.eup %5562  ;;  %5582 = vtanh.f32 %v976_v9  ;;  %v1517_v53 = vadd.f32 1.0, %v5561_v28  ;;  %v1780_v50 = vmul.f32 %v6536_v12, %v1704_v33  ;;  %v1195_v46 = vadd.f32 %v6818_v36, %v6480_v4 }
 0x32b   :  { %v5565_v21 = vpop.eup %5564  ;;  %5584 = vpow2.f32 %v4732_v37  ;;  %v1705_v3 = vmul.f32 %v5563_v48, %v5559_v55  ;;  %v4736_v55 = vmul.f32 -1.442695, %v1189_v54 }
 0x32c   :  { %v5567_v11 = vpop.eup %5566  ;;  %5586 = vrcp.f32 %v1517_v53  ;;  %v1862_v8 = vadd.f32 %v1780_v50, %v1779_v58  ;;  %v4737_v53 = vmul.f32 -1.442695, %v1191_v59 }
 0x32d   :  { %v5569_v41 = vpop.eup %5568  ;;  %5588 = vtanh.f32 %v978_v19  ;;  %v1518_v27 = vadd.f32 1.0, %v5567_v11  ;;  %v1781_v44 = vmul.f32 %v6533_v40, %v1705_v3  ;;  %v990_v11 = vadd.f32 %v6781_v13, %v6483_v5 }
 0x32e   :  { %v5571_v45 = vpop.eup %5570  ;;  %5590 = vpow2.f32 %v4733_v25  ;;  %1863 = vadd.xlane.f32.xlu1 %v1862_v8  ;;  %v1706_v32 = vmul.f32 %v5569_v41, %v5565_v21  ;;  %v4738_v8 = vmul.f32 -1.442695, %v1193_v51  ;;  %v1199_v13 = vadd.f32 %v6832_v61, %v6474_v2 }
 0x32f   :  { %v5573_v63 = vpop.eup %5572  ;;  %5592 = vrcp.f32 %v1518_v27 }
 0x330   :  { %v5575_v47 = vpop.eup %5574  ;;  %5594 = vtanh.f32 %v980_v52  ;;  %v1519_v18 = vadd.f32 1.0, %v5573_v63  ;;  %v1782_v24 = vmul.f32 %v6536_v12, %v1706_v32  ;;  %v992_v32 = vadd.f32 %v6789_v1, %v6487_v15 }
 0x331   :  { %v5577_v9 = vpop.eup %5576  ;;  %5596 = vpow2.f32 %v4734_v10  ;;  %v1707_v34 = vmul.f32 %v5575_v47, %v5571_v45  ;;  %v4739_v63 = vmul.f32 -1.442695, %v1195_v46  ;;  %v1201_v1 = vadd.f32 %v6836_v60, %v6480_v4 }
 0x332   :  { %v5579_v14 = vpop.eup %5578  ;;  %5598 = vrcp.f32 %v1519_v18  ;;  %v1865_v22 = vadd.f32 %v1782_v24, %v1781_v44 }
 0x333   :  { %v5581_v37 = vpop.eup %5580  ;;  %5600 = vtanh.f32 %v982_v57  ;;  %v1520_v6 = vadd.f32 1.0, %v5579_v14  ;;  %v1783_v28 = vmul.f32 %v6533_v40, %v1707_v34  ;;  %v4740_v34 = vmul.f32 -1.442695, %v1199_v13 }
 0x334   :  { %v5583_v33 = vpop.eup %5582  ;;  %5602 = vpow2.f32 %v4735_v38  ;;  %1866 = vadd.xlane.f32.xlu0 %v1865_v22  ;;  %v1708_v58 = vmul.f32 %v5581_v37, %v5577_v9  ;;  %v996_v38 = vadd.f32 %v6799_v39, %v6483_v5  ;;  %v998_v37 = vadd.f32 %v6807_v30, %v6487_v15 }
 0x335   :  { %v5585_v19 = vpop.eup %5584  ;;  %5604 = vrcp.f32 %v1520_v6  ;;  %v1203_v39 = vadd.f32 %v6844_v29, %v6474_v2  ;;  %v1205_v30 = vadd.f32 %v6848_v56, %v6480_v4 }
 0x336   :  { %v5587_v42 = vpop.eup %5586  ;;  %5606 = vtanh.f32 %v986_v35  ;;  %v1521_v48 = vadd.f32 1.0, %v5585_v19  ;;  %v1784_v25 = vmul.f32 %v6536_v12, %v1708_v58 }
 0x337   :  { %v5589_v50 = vpop.eup %5588  ;;  %5608 = vpow2.f32 %v4736_v55  ;;  %v1709_v21 = vmul.f32 %v5587_v42, %v5583_v33  ;;  %v4741_v55 = vmul.f32 -1.442695, %v1201_v1  ;;  %v4743_v46 = vmul.f32 -1.442695, %v1205_v30 }
 0x338   :  { %v5591_v3 = vpop.eup %5590  ;;  %5610 = vrcp.f32 %v1521_v48  ;;  %v1868_v52 = vadd.f32 %v1784_v25, %v1783_v28  ;;  %v4742_v48 = vmul.f32 -1.442695, %v1203_v39 }
 0x339   :  { %v5593_v16 = vpop.eup %5592  ;;  %5612 = vtanh.f32 %v988_v62  ;;  %v1522_v49 = vadd.f32 1.0, %v5591_v3  ;;  %v1785_v10 = vmul.f32 %v6533_v40, %v1709_v21  ;;  %v1000_v62 = vadd.f32 %v6812_v20, %v6483_v5 }
 0x33a   :  { %v5595_v41 = vpop.eup %5594  ;;  %5614 = vpow2.f32 %v4737_v53  ;;  %1869 = vadd.xlane.f32.xlu1 %v1868_v52  ;;  %v1710_v27 = vmul.f32 %v5593_v16, %v5589_v50  ;;  %v1002_v3 = vadd.f32 %v6816_v23, %v6487_v15  ;;  %v1209_v20 = vadd.f32 %v6862_v7, %v6474_v2 }
 0x33b   :  { %v5597_v45 = vpop.eup %5596  ;;  %5616 = vrcp.f32 %v1522_v49  ;;  %v1211_v23 = vadd.f32 %v6866_v0, %v6480_v4 }
 0x33c   :  { %v5599_v36 = vpop.eup %5598  ;;  %5618 = vtanh.f32 %v990_v11  ;;  %v1523_v44 = vadd.f32 1.0, %v5597_v45  ;;  %v1786_v57 = vmul.f32 %v6536_v12, %v1710_v27  ;;  %v4744_v45 = vmul.f32 -1.442695, %v1209_v20 }
 0x33d   :  { %v5601_v54 = vpop.eup %5600  ;;  %5620 = vpow2.f32 %v4738_v8  ;;  %v1711_v47 = vmul.f32 %v5599_v36, %v5595_v41  ;;  %v1006_v41 = vadd.f32 %v6830_v26, %v6483_v5  ;;  %v1213_v26 = vadd.f32 %v6871_v17, %v6474_v2 }
 0x33e   :  { %v5603_v18 = vpop.eup %5602  ;;  %5622 = vrcp.f32 %v1523_v44  ;;  %v1871_v24 = vadd.f32 %v1786_v57, %v1785_v10 }
 0x33f   :  { %v5605_v9 = vpop.eup %5604  ;;  %5624 = vtanh.f32 %v992_v32  ;;  %v1524_v61 = vadd.f32 1.0, %v5603_v18  ;;  %v1787_v59 = vmul.f32 %v6533_v40, %v1711_v47  ;;  %v4745_v47 = vmul.f32 -1.442695, %v1211_v23 }
 0x340   :  { %v5607_v14 = vpop.eup %5606  ;;  %5626 = vpow2.f32 %v4739_v63  ;;  %1872 = vadd.xlane.f32.xlu0 %v1871_v24  ;;  %v1712_v35 = vmul.f32 %v5605_v9, %v5601_v54  ;;  %v7851_v63 = vld [vmem:[#allocation65_spill] sm:$0xff]  ;;  %v7852_v9 = vld [vmem:[#allocation66_spill] sm:$0xff]  ;;  %v4746_v17 = vmul.f32 -1.442695, %v1213_v26 }
 0x341   :  { %v5609_v22 = vpop.eup %5608  ;;  %5628 = vrcp.f32 %v1524_v61  ;;  %v1008_v57 = vadd.f32 %v7851_v63, %v6487_v15  ;;  %v1010_v61 = vadd.f32 %v7852_v9, %v6483_v5 }
 0x342   :  { %v5611_v60 = vpop.eup %5610  ;;  %5630 = vtanh.f32 %v996_v38  ;;  %v1525_v6 = vadd.f32 1.0, %v5609_v22  ;;  %v1788_v33 = vmul.f32 %v6536_v12, %v1712_v35 }
 0x343   :  { %v5613_v58 = vpop.eup %5612  ;;  %5632 = vpow2.f32 %v4740_v34  ;;  %v1713_v28 = vmul.f32 %v5611_v60, %v5607_v14  ;;  %v1215_v34 = vadd.f32 %v6879_v31, %v6480_v4  ;;  %v7853_v60 = vld [vmem:[#allocation67_spill] sm:$0xff] }
 0x344   :  { %v5615_v19 = vpop.eup %5614  ;;  %5634 = vrcp.f32 %v1525_v6  ;;  %v1874_v51 = vadd.f32 %v1788_v33, %v1787_v59  ;;  %v1012_v6 = vadd.f32 %v7853_v60, %v6487_v15 }
 0x345   :  { %v5617_v42 = vpop.eup %5616  ;;  %5636 = vtanh.f32 %v998_v37  ;;  %v1526_v29 = vadd.f32 1.0, %v5615_v19  ;;  %v1789_v50 = vmul.f32 %v6533_v40, %v1713_v28  ;;  %v4747_v4 = vmul.f32 -1.442695, %v1215_v34 }
 0x346   :  { %v5619_v53 = vpop.eup %5618  ;;  %5638 = vpow2.f32 %v4741_v55  ;;  %1875 = vadd.xlane.f32.xlu1 %v1874_v51  ;;  %v1714_v25 = vmul.f32 %v5617_v42, %v5613_v58  ;;  %v1016_v42 = vadd.f32 %v6860_v43, %v6483_v5 }
 0x347   :  { %v5621_v21 = vpop.eup %5620  ;;  %5640 = vrcp.f32 %v1526_v29 }
 0x348   :  { %v5623_v56 = vpop.eup %5622  ;;  %5642 = vtanh.f32 %v1000_v62  ;;  %v1527_v11 = vadd.f32 1.0, %v5621_v21  ;;  %v1790_v52 = vmul.f32 %v6536_v12, %v1714_v25 }
 0x349   :  { %v5625_v16 = vpop.eup %5624  ;;  %5644 = vpow2.f32 %v4742_v48  ;;  %v1715_v49 = vmul.f32 %v5623_v56, %v5619_v53 }
 0x34a   :  { %v5627_v8 = vpop.eup %5626  ;;  %5646 = vrcp.f32 %v1527_v11  ;;  %v1877_v27 = vadd.f32 %v1790_v52, %v1789_v50 }
 0x34b   :  { %v5629_v10 = vpop.eup %5628  ;;  %5648 = vtanh.f32 %v1002_v3  ;;  %v1528_v7 = vadd.f32 1.0, %v5627_v8  ;;  %v1791_v36 = vmul.f32 %v6533_v40, %v1715_v49  ;;  %v7854_v3 = vld [vmem:[#allocation68_spill] sm:$0xff]  ;;  %v7855_v8 = vld [vmem:[#allocation69_spill] sm:$0xff] }
 0x34c   :  { %v5631_v32 = vpop.eup %5630  ;;  %5650 = vpow2.f32 %v4743_v46  ;;  %1878 = vadd.xlane.f32.xlu0 %v1877_v27  ;;  %v1716_v13 = vmul.f32 %v5629_v10, %v5625_v16  ;;  %v1018_v20 = vadd.f32 %v7854_v3, %v6487_v15 }
 0x34d   :  { %v5633_v44 = vpop.eup %5632  ;;  %5652 = vrcp.f32 %v1528_v7 }
 0x34e   :  { %v5635_v0 = vpop.eup %5634  ;;  %5654 = vtanh.f32 %v1006_v41  ;;  %v1529_v54 = vadd.f32 1.0, %v5633_v44  ;;  %v1792_v18 = vmul.f32 %v6536_v12, %v1716_v13  ;;  %v1020_v41 = vadd.f32 %v7855_v8, %v6483_v5  ;;  %v7856_v13 = vld [vmem:[#allocation70_spill] sm:$0xff] }
 0x34f   :  { %v5637_v38 = vpop.eup %5636  ;;  %5656 = vpow2.f32 %v4744_v45  ;;  %v1717_v1 = vmul.f32 %v5635_v0, %v5631_v32 }
 0x350   :  { %v5639_v24 = vpop.eup %5638  ;;  %5658 = vrcp.f32 %v1529_v54  ;;  %v1880_v14 = vadd.f32 %v1792_v18, %v1791_v36  ;;  %v1022_v36 = vadd.f32 %v7856_v13, %v6487_v15 }
 0x351   :  { %v5641_v35 = vpop.eup %5640  ;;  %5660 = vtanh.f32 %v1008_v57  ;;  %v1530_v2 = vadd.f32 1.0, %v5639_v24  ;;  %v1793_v37 = vmul.f32 %v6533_v40, %v1717_v1 }
 0x352   :  { %v5643_v59 = vpop.eup %5642  ;;  %5662 = vpow2.f32 %v4745_v47  ;;  %1881 = vadd.xlane.f32.xlu1 %v1880_v14  ;;  %v1718_v22 = vmul.f32 %v5641_v35, %v5637_v38 }
 0x353   :  { %v5645_v39 = vpop.eup %5644  ;;  %5664 = vrcp.f32 %v1530_v2 }
 0x354   :  { %v5647_v55 = vpop.eup %5646  ;;  %5666 = vtanh.f32 %v1010_v61  ;;  %v1531_v33 = vadd.f32 1.0, %v5645_v39  ;;  %v1794_v31 = vmul.f32 %v6536_v12, %v1718_v22 }
 0x355   :  { %v5649_v58 = vpop.eup %5648  ;;  %5668 = vpow2.f32 %v4746_v17  ;;  %v1719_v28 = vmul.f32 %v5647_v55, %v5643_v59 }
 0x356   :  { %v5651_v19 = vpop.eup %5650  ;;  %5670 = vrcp.f32 %v1531_v33  ;;  %v1883_v62 = vadd.f32 %v1794_v31, %v1793_v37  ;;  %v6998_v31 = vpop.xlane.xlu1 %1812 }
 0x357   :  { %v5653_v30 = vpop.eup %5652  ;;  %5672 = vtanh.f32 %v1012_v6  ;;  %v1532_v51 = vadd.f32 1.0, %v5651_v19  ;;  %v1795_v53 = vmul.f32 %v6533_v40, %v1719_v28 }
 0x358   :  { %v5655_v29 = vpop.eup %5654  ;;  %5674 = vpow2.f32 %v4747_v4  ;;  %1884 = vadd.xlane.f32.xlu0 %v1883_v62  ;;  %v1720_v48 = vmul.f32 %v5653_v30, %v5649_v58  ;;  %v7000_v58 = vpop.xlane.xlu0 %1806 }
 0x359   :  { %v5657_v25 = vpop.eup %5656  ;;  %5676 = vrcp.f32 %v1532_v51 }
 0x35a   :  { %v5659_v50 = vpop.eup %5658  ;;  %v1533_v21 = vadd.f32 1.0, %v5657_v25  ;;  %v1796_v56 = vmul.f32 %v6536_v12, %v1720_v48  ;;  %5678 = vtanh.f32 %v1016_v42  ;;  %v7002_v28 = vpop.xlane.xlu1 %1815  ;;  %v7858_v25 = vld [vmem:[#allocation60_spill] sm:$0xff] }
 0x35b   :  { %v5661_v11 = vpop.eup %5660  ;;  %v1721_v46 = vmul.f32 %v5659_v50, %v5655_v29 }
 0x35c   :  { %v5663_v52 = vpop.eup %5662  ;;  %5680 = vrcp.f32 %v1533_v21  ;;  %v1886_v43 = vadd.f32 %v1796_v56, %v1795_v53  ;;  %v7004_v19 = vpop.xlane.xlu0 %1809 }
 0x35d   :  { %v5665_v16 = vpop.eup %5664  ;;  %v1534_v49 = vadd.f32 1.0, %v5663_v52  ;;  %5682 = vtanh.f32 %v1018_v20  ;;  %v1797_v10 = vmul.f32 %v6533_v40, %v1721_v46 }
 0x35e   :  { %v5667_v23 = vpop.eup %5666  ;;  %1887 = vadd.xlane.f32.xlu1 %v1886_v43  ;;  %v1722_v27 = vmul.f32 %v5665_v16, %v5661_v11 }
 0x35f   :  { %v5669_v7 = vpop.eup %5668  ;;  %5684 = vrcp.f32 %v1534_v49 }
 0x360   :  { %v5671_v45 = vpop.eup %5670  ;;  %v1535_v32 = vadd.f32 1.0, %v5669_v7  ;;  %v1798_v44 = vmul.f32 %v6536_v12, %v1722_v27  ;;  %5686 = vtanh.f32 %v1020_v41 }
 0x361   :  { %v5673_v63 = vpop.eup %5672  ;;  %v1723_v57 = vmul.f32 %v5671_v45, %v5667_v23 }
 0x362   :  { %v5675_v26 = vpop.eup %5674  ;;  %5688 = vrcp.f32 %v1535_v32  ;;  %v1889_v5 = vadd.f32 %v1798_v44, %v1797_v10  ;;  %v7008_v30 = vpop.xlane.xlu0 %1818 }
 0x363   :  { %v5677_v0 = vpop.eup %5676  ;;  %v1536_v54 = vadd.f32 1.0, %v5675_v26  ;;  %5690 = vtanh.f32 %v1022_v36  ;;  %v1799_v18 = vmul.f32 %v6533_v40, %v1723_v57 }
 0x364   :  { %1890 = vadd.xlane.f32.xlu0 %v1889_v5  ;;  %v1724_v47 = vmul.f32 %v5677_v0, %v5673_v63  ;;  %v5679_v38 = vpop.eup %5678 }
 0x365   :  { %5692 = vrcp.f32 %v1536_v54 }
 0x366   :  { %v5681_v1 = vpop.eup %5680  ;;  %v1800_v15 = vmul.f32 %v6536_v12, %v1724_v47 }
 0x367   :  { %v1725_v24 = vmul.f32 %v5681_v1, %v5679_v38  ;;  %v5683_v9 = vpop.eup %5682 }
 0x368   :  { %v1892_v61 = vadd.f32 %v1800_v15, %v1799_v18  ;;  %v7006_v62 = vpop.xlane.xlu1 %1821 }
 0x369   :  { %v5685_v34 = vpop.eup %5684  ;;  %v1801_v35 = vmul.f32 %v6533_v40, %v1725_v24 }
 0x36a   :  { %1893 = vadd.xlane.f32.xlu1 %v1892_v61  ;;  %v1726_v14 = vmul.f32 %v5685_v34, %v5683_v9  ;;  %v5687_v2 = vpop.eup %5686 }
 0x36c   :  { %v5689_v17 = vpop.eup %5688  ;;  %v1802_v59 = vmul.f32 %v6536_v12, %v1726_v14 }
 0x36d   :  { %v1727_v22 = vmul.f32 %v5689_v17, %v5687_v2  ;;  %v5691_v37 = vpop.eup %5690  ;;  %v7012_v42 = vpop.xlane.xlu0 %1824 }
 0x36e   :  { %v1895_v39 = vadd.f32 %v1802_v59, %v1801_v35 }
 0x36f   :  { %v5693_v60 = vpop.eup %5692  ;;  %v1803_v55 = vmul.f32 %v6533_v40, %v1727_v22  ;;  %v7857_v40 = vlaneseq }
 0x370   :  { %1896 = vadd.xlane.f32.xlu0 %v1895_v39  ;;  %v1728_v6 = vmul.f32 %v5693_v60, %v5691_v37 }
 0x372   :  { %v1804_v33 = vmul.f32 %v6536_v12, %v1728_v6  ;;  %v1934_v12 = vand.u32 127, %v7857_v40 }
 0x373   :  { %v7010_v51 = vpop.xlane.xlu1 %1827 }
 0x374   :  { %v1898_v4 = vadd.f32 %v1804_v33, %v1803_v55  ;;  %v1939_v29 = vadd.s32 4294967288, %v1934_v12  ;;  %v7027_v20 = vsub.s32 %v1934_v12, %v7858_v25 }
 0x376   :  { %1899 = vadd.xlane.f32.xlu1 %v1898_v4  ;;  %v7020_v50 = vsub.s32 %v1939_v29, %v7858_v25  ;;  %v1949_v52 = vrot.slane %v6998_v31, %v7027_v20  ;;  %v1958_v49 = vrot.slane %v7008_v30, %v7027_v20  ;;  %v1938_v23 = vrot.slane %v7000_v58, %v7027_v20 }
 0x377   :  { %v1967_v10 = vrot.slane %v7012_v42, %v7027_v20 }
 0x378   :  { %v1953_v56 = vrot.slane %v7002_v28, %v7020_v50  ;;  %v1962_v11 = vrot.slane %v7006_v62, %v7020_v50  ;;  %v1943_v46 = vrot.slane %v7004_v19, %v7020_v50  ;;  %v1971_v43 = vrot.slane %v7010_v51, %v7020_v50 }
 0x379   :  { %v7017_v53 = vpop.xlane.xlu0 %1830 }
 0x37a   :  { %v1954_v27 = vsel %vm1944_vm0, %v1953_v56, %v1949_v52  ;;  %v1963_v45 = vsel %vm1944_vm0, %v1962_v11, %v1958_v49  ;;  %v1976_v32 = vrot.slane %v7017_v53, %v7027_v20  ;;  %v1945_v36 = vsel %vm1944_vm0, %v1943_v46, %v1938_v23 }
 0x37b   :  { %v1972_v44 = vsel %vm1944_vm0, %v1971_v43, %v1967_v10  ;;  %v2082_v57 = vsel %vm2081_vm1, %v1954_v27, %v1945_v36 }
 0x37c   :  { %v2084_v54 = vsel %vm2083_vm2, %v1963_v45, %v2082_v57 }
 0x37d   :  { %v2086_v18 = vsel %vm2085_vm3, %v1972_v44, %v2084_v54 }
 0x37f   :  { %v7015_v48 = vpop.xlane.xlu1 %1833 }
 0x380   :  { %v1980_v8 = vrot.slane %v7015_v48, %v7020_v50 }
 0x382   :  { %v1981_v26 = vsel %vm1944_vm0, %v1980_v8, %v1976_v32 }
 0x383   :  { %v2088_v9 = vsel %vm2087_vm4, %v1981_v26, %v2086_v18 }
 0x385   :  { %v7024_v3 = vpop.xlane.xlu0 %1836 }
 0x386   :  { %v1985_v63 = vrot.slane %v7024_v3, %v7027_v20 }
 0x38b   :  { %v7022_v21 = vpop.xlane.xlu1 %1839 }
 0x38c   :  { %v1989_v7 = vrot.slane %v7022_v21, %v7020_v50 }
 0x38e   :  { %v1990_v47 = vsel %vm1944_vm0, %v1989_v7, %v1985_v63 }
 0x38f   :  { %v2090_v61 = vsel %vm2089_vm5, %v1990_v47, %v2088_v9 }
 0x391   :  { %v7045_v41 = vpop.xlane.xlu0 %1842 }
 0x392   :  { %v1994_v5 = vrot.slane %v7045_v41, %v7027_v20 }
 0x397   :  { %v7039_v16 = vpop.xlane.xlu1 %1845 }
 0x398   :  { %v1998_v13 = vrot.slane %v7039_v16, %v7020_v50 }
 0x39a   :  { %v1999_v1 = vsel %vm1944_vm0, %v1998_v13, %v1994_v5 }
 0x39b   :  { %v2092_v14 = vsel %vm2091_vm6, %v1999_v1, %v2090_v61 }
 0x39d   :  { %v7067_v0 = vpop.xlane.xlu0 %1848 }
 0x39e   :  { %v2003_v15 = vrot.slane %v7067_v0, %v7027_v20 }
 0x3a3   :  { %v7072_v38 = vpop.xlane.xlu1 %1851 }
 0x3a4   :  { %v2007_v24 = vrot.slane %v7072_v38, %v7020_v50 }
 0x3a6   :  { %v2008_v34 = vsel %vm1944_vm0, %v2007_v24, %v2003_v15 }
 0x3a7   :  { %v2094_v35 = vsel %vm2093_vm8, %v2008_v34, %v2092_v14 }
 0x3a8   :  { %v2105_v2 = vsel %vm2104_vm7, %v2094_v35, -inf }
 0x3a9   :  { %2106 = vmax.xlane.f32.xlu0 %v2105_v2  ;;  %v7087_v59 = vpop.xlane.xlu0 %1854 }
 0x3aa   :  { %v2012_v27 = vrot.slane %v7087_v59, %v7027_v20 }
 0x3af   :  { %v7085_v17 = vpop.xlane.xlu1 %1857 }
 0x3b0   :  { %v2016_v11 = vrot.slane %v7085_v17, %v7020_v50 }
 0x3b2   :  { %v2017_v44 = vsel %vm1944_vm0, %v2016_v11, %v2012_v27 }
 0x3b5   :  { %v7091_v37 = vpop.xlane.xlu0 %1860 }
 0x3b6   :  { %v2021_v46 = vrot.slane %v7091_v37, %v7027_v20 }
 0x3bb   :  { %v7089_v22 = vpop.xlane.xlu1 %1863 }
 0x3bc   :  { %v2025_v29 = vrot.slane %v7089_v22, %v7020_v50 }
 0x3be   :  { %v2026_v10 = vsel %vm1944_vm0, %v2025_v29, %v2021_v46 }
 0x3bf   :  { %v2095_v26 = vsel %vm2081_vm1, %v2026_v10, %v2017_v44  ;;  %v7861_v10 = vld [vmem:[#allocation61_spill] sm:$0xff]  ;;  %v7863_v44 = vld [vmem:[#allocation62_spill] sm:$0xff] }
 0x3c1   :  { %v7095_v60 = vpop.xlane.xlu0 %1866 }
 0x3c2   :  { %v2030_v49 = vrot.slane %v7095_v60, %v7027_v20 }
 0x3c7   :  { %v7093_v39 = vpop.xlane.xlu1 %1869 }
 0x3c8   :  { %v2034_v56 = vrot.slane %v7093_v39, %v7020_v50 }
 0x3ca   :  { %v2035_v32 = vsel %vm1944_vm0, %v2034_v56, %v2030_v49 }
 0x3cb   :  { %v2096_v18 = vsel %vm2083_vm2, %v2035_v32, %v2095_v26 }
 0x3cd   :  { %v7099_v55 = vpop.xlane.xlu0 %1872 }
 0x3ce   :  { %v2039_v7 = vrot.slane %v7099_v55, %v7027_v20 }
 0x3d3   :  { %v7097_v6 = vpop.xlane.xlu1 %1875 }
 0x3d4   :  { %v2043_v52 = vrot.slane %v7097_v6, %v7020_v50 }
 0x3d6   :  { %v2044_v63 = vsel %vm1944_vm0, %v2043_v52, %v2039_v7  ;;  %v7859_v52 = vld [vmem:[#allocation63_spill] sm:$0xff] }
 0x3d7   :  { %v2097_v15 = vsel %vm2085_vm3, %v2044_v63, %v2096_v18 }
 0x3d9   :  { %v7103_v4 = vpop.xlane.xlu0 %1878 }
 0x3da   :  { %v2048_v13 = vrot.slane %v7103_v4, %v7027_v20 }
 0x3df   :  { %v7101_v33 = vpop.xlane.xlu1 %1881 }
 0x3e0   :  { %v2052_v8 = vrot.slane %v7101_v33, %v7020_v50 }
 0x3e2   :  { %v2053_v5 = vsel %vm1944_vm0, %v2052_v8, %v2048_v13  ;;  %v7860_v8 = vld [vmem:[#allocation64_spill] sm:$0xff] }
 0x3e3   :  { %v2098_v14 = vsel %vm2087_vm4, %v2053_v5, %v2097_v15  ;;  %v7183_v15 = vsub.s32 6, %v7858_v25 }
 0x3e5   :  { %v7107_v12 = vpop.xlane.xlu0 %1884  ;;  %7865 = vst [vmem:[#allocation67_spill] sm:$0xff] %v7183_v15 }
 0x3e6   :  { %v2057_v57 = vrot.slane %v7107_v12, %v7027_v20 }
 0x3eb   :  { %v7105_v40 = vpop.xlane.xlu1 %1887 }
 0x3ec   :  { %v2061_v45 = vrot.slane %v7105_v40, %v7020_v50 }
 0x3ee   :  { %v2062_v1 = vsel %vm1944_vm0, %v2061_v45, %v2057_v57 }
 0x3ef   :  { %v2099_v35 = vsel %vm2089_vm5, %v2062_v1, %v2098_v14  ;;  %v7189_v14 = vsub.s32 7, %v7858_v25 }
 0x3f1   :  { %v7125_v23 = vpop.xlane.xlu0 %1890  ;;  %7866 = vst [vmem:[#allocation68_spill] sm:$0xff] %v7189_v14 }
 0x3f2   :  { %v2066_v54 = vrot.slane %v7125_v23, %v7027_v20 }
 0x3f7   :  { %v7119_v43 = vpop.xlane.xlu1 %1893 }
 0x3f8   :  { %v2070_v36 = vrot.slane %v7119_v43, %v7020_v50 }
 0x3fa   :  { %v2071_v9 = vsel %vm1944_vm0, %v2070_v36, %v2066_v54  ;;  %v7172_v36 = vsub.s32 4, %v7858_v25  ;;  %v7177_v54 = vsub.s32 5, %v7858_v25 }
 0x3fb   :  { %v2100_v29 = vsel %vm2091_vm6, %v2071_v9, %v2099_v35 }
 0x3fc   :  { %7862 = vst [vmem:[#allocation65_spill] sm:$0xff] %v7172_v36  ;;  %7864 = vst [vmem:[#allocation66_spill] sm:$0xff] %v7177_v54 }
 0x3fd   :  { %v7147_v47 = vpop.xlane.xlu0 %1896 }
 0x3fe   :  { %v2075_v61 = vrot.slane %v7147_v47, %v7027_v20 }
 0x403   :  { %v7152_v24 = vpop.xlane.xlu1 %1899 }
 0x404   :  { %v2079_v34 = vrot.slane %v7152_v24, %v7020_v50 }
 0x406   :  { %v2080_v2 = vsel %vm1944_vm0, %v2079_v34, %v2075_v61 }
 0x407   :  { %v2101_v56 = vsel %vm2093_vm8, %v2080_v2, %v2100_v29 }
 0x408   :  { %v2108_v11 = vsel %vm2104_vm7, %v2101_v56, -inf }
 0x409   :  { %2109 = vmax.xlane.f32.xlu1 %v2108_v11 }
 0x436   :  { %v2107_v46 = vpop.xlane.xlu0 %2106 }
 0x437   :  { %v2116_v49 = vrot.slane %v2107_v46, %v7859_v52  ;;  %v2120_v27 = vrot.slane %v2107_v46, %v7860_v8  ;;  %v2124_v7 = vrot.slane %v2107_v46, %v7861_v10  ;;  %v2128_v63 = vrot.slane %v2107_v46, %v7863_v44 }
 0x438   :  { %v2136_v61 = vrot.slane %v2107_v46, %v7177_v54  ;;  %v2140_v2 = vrot.slane %v2107_v46, %v7183_v15 }
 0x439   :  { %v2193_v45 = vsub.f32 %v7000_v58, %v2116_v49  ;;  %v2194_v32 = vsub.f32 %v7004_v19, %v2116_v49  ;;  %v2195_v13 = vsub.f32 %v6998_v31, %v2120_v27  ;;  %v2198_v57 = vsub.f32 %v7006_v62, %v2124_v7 }
 0x43a   :  { %v2196_v18 = vsub.f32 %v7002_v28, %v2120_v27  ;;  %v2132_v19 = vrot.slane %v2107_v46, %v7172_v36  ;;  %v2200_v31 = vsub.f32 %v7010_v51, %v2128_v63  ;;  %v2197_v62 = vsub.f32 %v7008_v30, %v2124_v7 }
 0x43b   :  { %v2225_v26 = vmul.f32 1.442695, %v2193_v45  ;;  %v2227_v5 = vmul.f32 1.442695, %v2194_v32  ;;  %v2229_v58 = vmul.f32 1.442695, %v2195_v13  ;;  %v2199_v51 = vsub.f32 %v7012_v42, %v2128_v63 }
 0x43c   :  { %v2235_v1 = vmul.f32 1.442695, %v2198_v57  ;;  %v2231_v9 = vmul.f32 1.442695, %v2196_v18  ;;  %v2202_v34 = vsub.f32 %v7015_v48, %v2132_v19  ;;  %v2239_v28 = vmul.f32 1.442695, %v2200_v31 }
 0x43d   :  { %5694 = vpow2.f32 %v2225_v26  ;;  %v2233_v35 = vmul.f32 1.442695, %v2197_v62  ;;  %v2204_v29 = vsub.f32 %v7022_v21, %v2136_v61  ;;  %v2201_v48 = vsub.f32 %v7017_v53, %v2132_v19 }
 0x43e   :  { %5696 = vpow2.f32 %v2227_v5  ;;  %v2243_v30 = vmul.f32 1.442695, %v2202_v34  ;;  %v2237_v25 = vmul.f32 1.442695, %v2199_v51  ;;  %v2144_v42 = vrot.slane %v2107_v46, %v7189_v14 }
 0x43f   :  { %5698 = vpow2.f32 %v2229_v58  ;;  %v2206_v49 = vsub.f32 %v7039_v16, %v2140_v2  ;;  %v2247_v21 = vmul.f32 1.442695, %v2204_v29  ;;  %v2203_v45 = vsub.f32 %v7024_v3, %v2136_v61 }
 0x440   :  { %5700 = vpow2.f32 %v2235_v1  ;;  %v2241_v32 = vmul.f32 1.442695, %v2201_v48  ;;  %v2208_v53 = vsub.f32 %v7072_v38, %v2144_v42  ;;  %v2205_v3 = vsub.f32 %v7045_v41, %v2140_v2 }
 0x441   :  { %5702 = vpow2.f32 %v2231_v9  ;;  %v2251_v46 = vmul.f32 1.442695, %v2206_v49  ;;  %v2245_v63 = vmul.f32 1.442695, %v2203_v45  ;;  %v2207_v38 = vsub.f32 %v7067_v0, %v2144_v42 }
 0x442   :  { %5704 = vpow2.f32 %v2239_v28  ;;  %v2255_v57 = vmul.f32 1.442695, %v2208_v53  ;;  %v2249_v18 = vmul.f32 1.442695, %v2205_v3 }
 0x443   :  { %5706 = vpow2.f32 %v2233_v35  ;;  %v2253_v41 = vmul.f32 1.442695, %v2207_v38 }
 0x444   :  { %5708 = vpow2.f32 %v2243_v30 }
 0x445   :  { %5710 = vpow2.f32 %v2237_v25 }
 0x446   :  { %5712 = vpow2.f32 %v2247_v21 }
 0x447   :  { %v7194_v56 = vpop.eup %5694  ;;  %5714 = vpow2.f32 %v2241_v32 }
 0x448   :  { %v7196_v11 = vpop.eup %5696  ;;  %2322 = vperm.xlu0 %5068, %v7194_v56   ;;  %5716 = vpow2.f32 %v2251_v46 }
 0x449   :  { %2325 = vperm.xlu1 %5069, %v7196_v11   ;;  %v7203_v27 = vpop.eup %5698  ;;  %5718 = vpow2.f32 %v2245_v63 }
 0x44a   :  { %v7205_v7 = vpop.eup %5700  ;;  %5720 = vpow2.f32 %v2255_v57 }
 0x44b   :  { %v7211_v13 = vpop.eup %5702  ;;  %5722 = vpow2.f32 %v2249_v18 }
 0x44c   :  { %2337 = vperm.xlu0 %5068, %v7205_v7   ;;  %v7213_v16 = vpop.eup %5704  ;;  %5724 = vpow2.f32 %v2253_v41 }
 0x44d   :  { %2328 = vperm.xlu1 %5069, %v7203_v27   ;;  %v7218_v26 = vpop.eup %5706 }
 0x44e   :  { %v7220_v5 = vpop.eup %5708 }
 0x44f   :  { %v7225_v58 = vpop.eup %5710 }
 0x450   :  { %2343 = vperm.xlu0 %5068, %v7213_v16   ;;  %v7227_v19 = vpop.eup %5712 }
 0x451   :  { %2331 = vperm.xlu1 %5069, %v7211_v13   ;;  %v7231_v31 = vpop.eup %5714 }
 0x452   :  { %v7233_v1 = vpop.eup %5716 }
 0x453   :  { %v7237_v0 = vpop.eup %5718 }
 0x454   :  { %2349 = vperm.xlu0 %5068, %v7220_v5   ;;  %v7239_v62 = vpop.eup %5720 }
 0x455   :  { %2334 = vperm.xlu1 %5069, %v7218_v26   ;;  %v7243_v9 = vpop.eup %5722 }
 0x456   :  { %v7246_v61 = vpop.eup %5724 }
 0x458   :  { %2355 = vperm.xlu0 %5068, %v7227_v19  }
 0x459   :  { %2340 = vperm.xlu1 %5069, %v7225_v58  }
 0x45c   :  { %2361 = vperm.xlu0 %5068, %v7233_v1  }
 0x45d   :  { %2346 = vperm.xlu1 %5069, %v7231_v31  }
 0x460   :  { %2367 = vperm.xlu0 %5068, %v7239_v62  }
 0x461   :  { %2352 = vperm.xlu1 %5069, %v7237_v0  }
 0x465   :  { %2358 = vperm.xlu1 %5069, %v7243_v9  }
 0x469   :  { %2364 = vperm.xlu1 %5069, %v7246_v61  }
 0x496   :  { %v2110_v34 = vpop.xlane.xlu1 %2109 }
 0x497   :  { %v2148_v28 = vrot.slane %v2110_v34, %v7859_v52  ;;  %v2156_v51 = vrot.slane %v2110_v34, %v7861_v10  ;;  %v2152_v2 = vrot.slane %v2110_v34, %v7860_v8  ;;  %v2160_v30 = vrot.slane %v2110_v34, %v7863_v44 }
 0x498   :  { %v2164_v21 = vrot.slane %v2110_v34, %v7172_v36  ;;  %v2172_v3 = vrot.slane %v2110_v34, %v7183_v15  ;;  %v2176_v18 = vrot.slane %v2110_v34, %v7189_v14 }
 0x499   :  { %v2209_v35 = vsub.f32 %v7087_v59, %v2148_v28  ;;  %v2210_v29 = vsub.f32 %v7085_v17, %v2148_v28  ;;  %v2214_v48 = vsub.f32 %v7093_v39, %v2156_v51  ;;  %v2211_v42 = vsub.f32 %v7091_v37, %v2152_v2 }
 0x49a   :  { %v2216_v45 = vsub.f32 %v7097_v6, %v2160_v30  ;;  %v2212_v59 = vsub.f32 %v7089_v22, %v2152_v2  ;;  %v2168_v17 = vrot.slane %v2110_v34, %v7177_v54  ;;  %v2218_v46 = vsub.f32 %v7101_v33, %v2164_v21 }
 0x49b   :  { %v2257_v25 = vmul.f32 1.442695, %v2209_v35  ;;  %v2259_v49 = vmul.f32 1.442695, %v2210_v29  ;;  %v2267_v32 = vmul.f32 1.442695, %v2214_v48  ;;  %v2213_v63 = vsub.f32 %v7095_v60, %v2156_v51 }
 0x49c   :  { %v2261_v53 = vmul.f32 1.442695, %v2211_v42  ;;  %v2271_v39 = vmul.f32 1.442695, %v2216_v45  ;;  %v2263_v37 = vmul.f32 1.442695, %v2212_v59  ;;  %v2220_v57 = vsub.f32 %v7105_v40, %v2168_v17 }
 0x49d   :  { %5726 = vpow2.f32 %v2257_v25  ;;  %v2275_v6 = vmul.f32 1.442695, %v2218_v46  ;;  %v2215_v22 = vsub.f32 %v7099_v55, %v2160_v30  ;;  %v2265_v33 = vmul.f32 1.442695, %v2213_v63 }
 0x49e   :  { %5728 = vpow2.f32 %v2259_v49  ;;  %v2222_v60 = vsub.f32 %v7119_v43, %v2172_v3  ;;  %v2279_v41 = vmul.f32 1.442695, %v2220_v57  ;;  %v2217_v40 = vsub.f32 %v7103_v4, %v2164_v21 }
 0x49f   :  { %5730 = vpow2.f32 %v2267_v32  ;;  %v2269_v35 = vmul.f32 1.442695, %v2215_v22  ;;  %v2224_v55 = vsub.f32 %v7152_v24, %v2176_v18  ;;  %v2219_v29 = vsub.f32 %v7107_v12, %v2168_v17 }
 0x4a0   :  { %5732 = vpow2.f32 %v2261_v53  ;;  %v2283_v34 = vmul.f32 1.442695, %v2222_v60  ;;  %v2273_v30 = vmul.f32 1.442695, %v2217_v40  ;;  %v2221_v24 = vsub.f32 %v7125_v23, %v2172_v3 }
 0x4a1   :  { %5734 = vpow2.f32 %v2271_v39  ;;  %v2287_v4 = vmul.f32 1.442695, %v2224_v55  ;;  %v2277_v42 = vmul.f32 1.442695, %v2219_v29  ;;  %v2223_v21 = vsub.f32 %v7147_v47, %v2176_v18 }
 0x4a2   :  { %5736 = vpow2.f32 %v2263_v37  ;;  %v2281_v45 = vmul.f32 1.442695, %v2221_v24 }
 0x4a3   :  { %5738 = vpow2.f32 %v2275_v6  ;;  %v2285_v59 = vmul.f32 1.442695, %v2223_v21 }
 0x4a4   :  { %5740 = vpow2.f32 %v2265_v33 }
 0x4a5   :  { %5742 = vpow2.f32 %v2279_v41 }
 0x4a6   :  { %5744 = vpow2.f32 %v2269_v35 }
 0x4a7   :  { %v7265_v38 = vpop.eup %5726  ;;  %5746 = vpow2.f32 %v2283_v34 }
 0x4a8   :  { %2370 = vperm.xlu1 %5069, %v7265_v38   ;;  %v7271_v28 = vpop.eup %5728  ;;  %5748 = vpow2.f32 %v2273_v30 }
 0x4a9   :  { %v7273_v51 = vpop.eup %5730  ;;  %5750 = vpow2.f32 %v2287_v4 }
 0x4aa   :  { %2385 = vperm.xlu0 %5068, %v7273_v51   ;;  %v7279_v2 = vpop.eup %5732  ;;  %5752 = vpow2.f32 %v2277_v42 }
 0x4ab   :  { %v7281_v43 = vpop.eup %5734  ;;  %5754 = vpow2.f32 %v2281_v45 }
 0x4ac   :  { %2373 = vperm.xlu1 %5069, %v7271_v28   ;;  %v7286_v48 = vpop.eup %5736  ;;  %5756 = vpow2.f32 %v2285_v59 }
 0x4ad   :  { %v7288_v25 = vpop.eup %5738 }
 0x4ae   :  { %2391 = vperm.xlu0 %5068, %v7281_v43   ;;  %v7293_v12 = vpop.eup %5740 }
 0x4af   :  { %v7295_v49 = vpop.eup %5742 }
 0x4b0   :  { %2376 = vperm.xlu1 %5069, %v7279_v2   ;;  %v7300_v32 = vpop.eup %5744 }
 0x4b1   :  { %v7302_v23 = vpop.eup %5746 }
 0x4b2   :  { %2397 = vperm.xlu0 %5068, %v7288_v25   ;;  %v7306_v53 = vpop.eup %5748 }
 0x4b3   :  { %v7308_v17 = vpop.eup %5750 }
 0x4b4   :  { %2379 = vperm.xlu1 %5069, %v7286_v48   ;;  %7867 = vst [vmem:[#allocation69_spill] sm:$0xff] %v7308_v17  ;;  %v7312_v47 = vpop.eup %5752 }
 0x4b5   :  { %v7315_v46 = vpop.eup %5754 }
 0x4b6   :  { %2403 = vperm.xlu0 %5068, %v7295_v49   ;;  %v7318_v37 = vpop.eup %5756 }
 0x4b7   :  { %7868 = vst [vmem:[#allocation70_spill] sm:$0xff] %v7318_v37 }
 0x4b8   :  { %2382 = vperm.xlu1 %5069, %v7293_v12  }
 0x4ba   :  { %2409 = vperm.xlu0 %5068, %v7302_v23  }
 0x4bc   :  { %2388 = vperm.xlu1 %5069, %v7300_v32  }
 0x4be   :  { %2415 = vperm.xlu0 %5068, %v7308_v17  }
 0x4c0   :  { %2394 = vperm.xlu1 %5069, %v7306_v53  }
 0x4c4   :  { %2400 = vperm.xlu1 %5069, %v7312_v47  }
 0x4c7   :  { %v2323_v39 = vpop.permute.xlu0 %2322 }
 0x4c8   :  { %2406 = vperm.xlu1 %5069, %v7315_v46   ;;  %v2326_v63 = vpop.permute.xlu1 %2325  ;;  %v2420_v4 = vrot.slane %v2323_v39, %v7027_v20 }
 0x4c9   :  { %v2424_v30 = vrot.slane %v2326_v63, %v7020_v50 }
 0x4cb   :  { %v2338_v57 = vpop.permute.xlu0 %2337  ;;  %v2425_v39 = vsel %vm1944_vm0, %v2424_v30, %v2420_v4 }
 0x4cc   :  { %2412 = vperm.xlu1 %5069, %v7318_v37   ;;  %v2329_v3 = vpop.permute.xlu1 %2328  ;;  %v2442_v21 = vrot.slane %v2338_v57, %v7020_v50 }
 0x4cd   :  { %v2429_v24 = vrot.slane %v2329_v3, %v7027_v20 }
 0x4cf   :  { %v2344_v22 = vpop.permute.xlu0 %2343 }
 0x4d0   :  { %v2332_v6 = vpop.permute.xlu1 %2331 }
 0x4d1   :  { %v2433_v35 = vrot.slane %v2332_v6, %v7020_v50  ;;  %v2451_v6 = vrot.slane %v2344_v22, %v7020_v50 }
 0x4d3   :  { %v2350_v18 = vpop.permute.xlu0 %2349  ;;  %v2434_v59 = vsel %vm1944_vm0, %v2433_v35, %v2429_v24 }
 0x4d4   :  { %v2335_v33 = vpop.permute.xlu1 %2334  ;;  %v2460_v63 = vrot.slane %v2350_v18, %v7020_v50 }
 0x4d5   :  { %v2438_v55 = vrot.slane %v2335_v33, %v7027_v20 }
 0x4d7   :  { %v2356_v41 = vpop.permute.xlu0 %2355  ;;  %v2443_v37 = vsel %vm1944_vm0, %v2442_v21, %v2438_v55 }
 0x4d8   :  { %v2341_v60 = vpop.permute.xlu1 %2340 }
 0x4d9   :  { %v2447_v42 = vrot.slane %v2341_v60, %v7027_v20  ;;  %v2469_v60 = vrot.slane %v2356_v41, %v7020_v50 }
 0x4db   :  { %v2362_v34 = vpop.permute.xlu0 %2361  ;;  %v2452_v3 = vsel %vm1944_vm0, %v2451_v6, %v2447_v42 }
 0x4dc   :  { %v2347_v40 = vpop.permute.xlu1 %2346  ;;  %v2478_v22 = vrot.slane %v2362_v34, %v7020_v50 }
 0x4dd   :  { %v2456_v45 = vrot.slane %v2347_v40, %v7027_v20  ;;  %v2561_v40 = vsel %vm2081_vm1, %v2434_v59, %v2425_v39 }
 0x4de   :  { %v2562_v55 = vsel %vm2083_vm2, %v2443_v37, %v2561_v40 }
 0x4df   :  { %v2461_v35 = vsel %vm1944_vm0, %v2460_v63, %v2456_v45  ;;  %v2563_v24 = vsel %vm2085_vm3, %v2452_v3, %v2562_v55 }
 0x4e0   :  { %v2353_v29 = vpop.permute.xlu1 %2352  ;;  %v2564_v41 = vsel %vm2087_vm4, %v2461_v35, %v2563_v24 }
 0x4e1   :  { %v2465_v33 = vrot.slane %v2353_v29, %v7027_v20  ;;  %v2368_v29 = vpop.permute.xlu0 %2367 }
 0x4e3   :  { %v2470_v18 = vsel %vm1944_vm0, %v2469_v60, %v2465_v33 }
 0x4e4   :  { %v2359_v17 = vpop.permute.xlu1 %2358  ;;  %v2565_v21 = vsel %vm2089_vm5, %v2470_v18, %v2564_v41 }
 0x4e5   :  { %v2474_v57 = vrot.slane %v2359_v17, %v7027_v20  ;;  %v2487_v17 = vrot.slane %v2368_v29, %v7020_v50 }
 0x4e7   :  { %v2479_v30 = vsel %vm1944_vm0, %v2478_v22, %v2474_v57 }
 0x4e8   :  { %v2365_v4 = vpop.permute.xlu1 %2364  ;;  %v2566_v45 = vsel %vm2091_vm6, %v2479_v30, %v2565_v21 }
 0x4e9   :  { %v2483_v42 = vrot.slane %v2365_v4, %v7027_v20 }
 0x4eb   :  { %v2488_v34 = vsel %vm1944_vm0, %v2487_v17, %v2483_v42 }
 0x4ec   :  { %v2567_v37 = vsel %vm2093_vm8, %v2488_v34, %v2566_v45 }
 0x4ed   :  { %v2577_v59 = vsel %vm2104_vm7, %v2567_v37, 0.0 }
 0x4f0   :  { %2578 = vadd.xlane.f32.xlu1 %v2577_v59 }
 0x527   :  { %v2371_v6 = vpop.permute.xlu1 %2370 }
 0x528   :  { %v2492_v34 = vrot.slane %v2371_v6, %v7027_v20 }
 0x529   :  { %v2386_v63 = vpop.permute.xlu0 %2385 }
 0x52a   :  { %v2514_v42 = vrot.slane %v2386_v63, %v7020_v50 }
 0x52b   :  { %v2374_v33 = vpop.permute.xlu1 %2373 }
 0x52c   :  { %v2496_v4 = vrot.slane %v2374_v33, %v7020_v50 }
 0x52d   :  { %v2392_v3 = vpop.permute.xlu0 %2391 }
 0x52e   :  { %v2523_v45 = vrot.slane %v2392_v3, %v7020_v50 }
 0x52f   :  { %v2377_v39 = vpop.permute.xlu1 %2376 }
 0x530   :  { %v2501_v41 = vrot.slane %v2377_v39, %v7027_v20  ;;  %v2497_v39 = vsel %vm1944_vm0, %v2496_v4, %v2492_v34 }
 0x531   :  { %v2398_v57 = vpop.permute.xlu0 %2397 }
 0x533   :  { %v2380_v60 = vpop.permute.xlu1 %2379 }
 0x534   :  { %v2505_v55 = vrot.slane %v2380_v60, %v7020_v50  ;;  %v2532_v60 = vrot.slane %v2398_v57, %v7020_v50 }
 0x535   :  { %v2404_v22 = vpop.permute.xlu0 %2403 }
 0x536   :  { %v2506_v37 = vsel %vm1944_vm0, %v2505_v55, %v2501_v41 }
 0x537   :  { %v2383_v40 = vpop.permute.xlu1 %2382  ;;  %v2568_v6 = vsel %vm2081_vm1, %v2506_v37, %v2497_v39 }
 0x538   :  { %v2510_v18 = vrot.slane %v2383_v40, %v7027_v20 }
 0x539   :  { %v2410_v24 = vpop.permute.xlu0 %2409 }
 0x53a   :  { %v2515_v33 = vsel %vm1944_vm0, %v2514_v42, %v2510_v18  ;;  %v2550_v3 = vrot.slane %v2410_v24, %v7020_v50 }
 0x53b   :  { %v2389_v35 = vpop.permute.xlu1 %2388  ;;  %v2569_v57 = vsel %vm2083_vm2, %v2515_v33, %v2568_v6 }
 0x53c   :  { %v2519_v17 = vrot.slane %v2389_v35, %v7027_v20  ;;  %v2541_v35 = vrot.slane %v2404_v22, %v7020_v50 }
 0x53d   :  { %v2416_v55 = vpop.permute.xlu0 %2415 }
 0x53e   :  { %v2524_v63 = vsel %vm1944_vm0, %v2523_v45, %v2519_v17  ;;  %v2559_v17 = vrot.slane %v2416_v55, %v7020_v50 }
 0x53f   :  { %v2395_v29 = vpop.permute.xlu1 %2394  ;;  %v2570_v41 = vsel %vm2085_vm3, %v2524_v63, %v2569_v57  ;;  %v5134_v63 = vld [vmem:[#allocation13] ss:$48 sps:$4 sm:$0xff]  }
 0x540   :  { %v2528_v21 = vrot.slane %v2395_v29, %v7027_v20 }
 0x543   :  { %v2401_v30 = vpop.permute.xlu1 %2400 }
 0x544   :  { %v2537_v59 = vrot.slane %v2401_v30, %v7027_v20  ;;  %v2533_v30 = vsel %vm1944_vm0, %v2532_v60, %v2528_v21 }
 0x545   :  { %v2571_v42 = vsel %vm2087_vm4, %v2533_v30, %v2570_v41 }
 0x546   :  { %v2542_v18 = vsel %vm1944_vm0, %v2541_v35, %v2537_v59 }
 0x547   :  { %v2407_v40 = vpop.permute.xlu1 %2406  ;;  %v2572_v24 = vsel %vm2089_vm5, %v2542_v18, %v2571_v42 }
 0x548   :  { %v2546_v29 = vrot.slane %v2407_v40, %v7027_v20 }
 0x54a   :  { %v2551_v4 = vsel %vm1944_vm0, %v2550_v3, %v2546_v29  ;;  %v5136_v29 = vld [vmem:[#allocation13 + $0x4] ss:$48 sps:$4 sm:$0xff]  }
 0x54b   :  { %v2413_v22 = vpop.permute.xlu1 %2412  ;;  %v2573_v21 = vsel %vm2091_vm6, %v2551_v4, %v2572_v24  ;;  %3852 = vmatprep.subr.bf16.mxu1 %v5136_v29  ;;  %v5137_v24 = vld [vmem:[#allocation13 + $0x60] ss:$48 sps:$4 sm:$0xff]  }
 0x54c   :  { %v2555_v34 = vrot.slane %v2413_v22, %v7027_v20  ;;  %3853 = vmatpush1.bf16.msra.mxu1 %v5134_v63 }
 0x54e   :  { %v2560_v45 = vsel %vm1944_vm0, %v2559_v17, %v2555_v34 }
 0x54f   :  { %v2574_v37 = vsel %vm2093_vm8, %v2560_v45, %v2573_v21 }
 0x550   :  { %v2580_v59 = vsel %vm2104_vm7, %v2574_v37, 0.0 }
 0x551   :  { %2581 = vadd.xlane.f32.xlu0 %v2580_v59 }
 0x57d   :  { %v2579_v60 = vpop.xlane.xlu1 %2578 }
 0x57e   :  { %v2588_v33 = vrot.slane %v2579_v60, %v7859_v52  ;;  %v2592_v50 = vrot.slane %v2579_v60, %v7860_v8  ;;  %v2596_v20 = vrot.slane %v2579_v60, %v7861_v10  ;;  %v2600_v40 = vrot.slane %v2579_v60, %v7863_v44 }
 0x57f   :  { %v2604_v35 = vrot.slane %v2579_v60, %v7172_v36  ;;  %v2608_v30 = vrot.slane %v2579_v60, %v7177_v54  ;;  %v2616_v17 = vrot.slane %v2579_v60, %v7189_v14 }
 0x580   :  { %5758 = vrcp.f32 %v2588_v33  ;;  %v5142_v33 = vld [vmem:[#allocation13 + $0xc4] ss:$48 sps:$4 sm:$0xff]  }
 0x581   :  { %5760 = vrcp.f32 %v2592_v50  ;;  %v5145_v50 = vld [vmem:[#allocation13 + $0x124] ss:$48 sps:$4 sm:$0xff]  }
 0x582   :  { %5762 = vrcp.f32 %v2596_v20  ;;  %v5148_v20 = vld [vmem:[#allocation13 + $0x184] ss:$48 sps:$4 sm:$0xff]  }
 0x583   :  { %5764 = vrcp.f32 %v2600_v40  ;;  %v5149_v40 = vld [vmem:[#allocation13 + $0x1e0] ss:$48 sps:$4 sm:$0xff]  }
 0x584   :  { %5766 = vrcp.f32 %v2604_v35 }
 0x585   :  { %5768 = vrcp.f32 %v2608_v30 }
 0x58a   :  { %v5759_v39 = vpop.eup %5758 }
 0x58b   :  { %v2667_v6 = vmul.f32 %v5759_v39, %v7196_v11  ;;  %v2666_v3 = vmul.f32 %v5759_v39, %v7194_v56  ;;  %v5761_v55 = vpop.eup %5760  ;;  %v2612_v11 = vrot.slane %v2579_v60, %v7183_v15 }
 0x58c   :  { %v2669_v57 = vmul.f32 %v5761_v55, %v7203_v27  ;;  %v2670_v18 = vmul.f32 %v5761_v55, %v7211_v13  ;;  %v5763_v41 = vpop.eup %5762 }
 0x58d   :  { %2720 = vperm.xlu1 %5069, %v2667_v6   ;;  %2715 = vperm.xlu0 %5068, %v2666_v3   ;;  %v2672_v56 = vmul.f32 %v5763_v41, %v7218_v26  ;;  %v2673_v4 = vmul.f32 %v5763_v41, %v7205_v7  ;;  %v5765_v22 = vpop.eup %5764  ;;  %5770 = vrcp.f32 %v2612_v11  ;;  %v5139_v7 = vld [vmem:[#allocation13 + $0x64] ss:$48 sps:$4 sm:$0xff]  }
 0x58e   :  { %v2675_v27 = vmul.f32 %v5765_v22, %v7225_v58  ;;  %v2676_v13 = vmul.f32 %v5765_v22, %v7213_v16  ;;  %v5767_v42 = vpop.eup %5766  ;;  %5772 = vrcp.f32 %v2616_v17  ;;  %3854 = vmatprep.subr.bf16.mxu1 %v5139_v7 }
 0x58f   :  { %v2678_v34 = vmul.f32 %v5767_v42, %v7231_v31  ;;  %v2679_v26 = vmul.f32 %v5767_v42, %v7220_v5  ;;  %v5769_v45 = vpop.eup %5768  ;;  %3855 = vmatpush1.bf16.msra.mxu1 %v5137_v24 }
 0x590   :  { %v2681_v21 = vmul.f32 %v5769_v45, %v7237_v0  ;;  %v2682_v58 = vmul.f32 %v5769_v45, %v7227_v19  ;;  %v5140_v0 = vld [vmem:[#allocation13 + $0xc0] ss:$48 sps:$4 sm:$0xff]   ;;  %3856 = vmatprep.subr.bf16.mxu1 %v5142_v33  ;;  %v5157_v45 = vld [vmem:[#allocation13 + $0x24] ss:$48 sps:$4 sm:$0xff]  }
 0x591   :  { %2725 = vperm.xlu1 %5069, %v2669_v57   ;;  %2730 = vperm.xlu0 %5068, %v2670_v18   ;;  %v5143_v19 = vld [vmem:[#allocation13 + $0x120] ss:$48 sps:$4 sm:$0xff]   ;;  %v5175_v33 = vld [vmem:[#allocation13 + $0x204] ss:$48 sps:$4 sm:$0xff]  }
 0x592   :  { %4048 = vmatprep.subr.bf16.mxu0 %v5157_v45 }
 0x593   :  { %3857 = vmatpush1.bf16.msra.mxu1 %v5140_v0  ;;  %v5170_v0 = vld [vmem:[#allocation13 + $0x1a0] ss:$48 sps:$4 sm:$0xff]  }
 0x594   :  { %3858 = vmatprep.subr.bf16.mxu1 %v5145_v50  ;;  %v5178_v50 = vld [vmem:[#allocation13 + $0x264] ss:$48 sps:$4 sm:$0xff]  }
 0x595   :  { %2735 = vperm.xlu1 %5069, %v2672_v56   ;;  %2740 = vperm.xlu0 %5068, %v2673_v4  }
 0x597   :  { %v5771_v16 = vpop.eup %5770  ;;  %3859 = vmatpush1.bf16.msra.mxu1 %v5143_v19  ;;  %v5173_v19 = vld [vmem:[#allocation13 + $0x200] ss:$48 sps:$4 sm:$0xff]  }
 0x598   :  { %v2684_v37 = vmul.f32 %v5771_v16, %v7243_v9  ;;  %v2685_v31 = vmul.f32 %v5771_v16, %v7233_v1  ;;  %v5773_v59 = vpop.eup %5772  ;;  %v5146_v9 = vld [vmem:[#allocation13 + $0x180] ss:$48 sps:$4 sm:$0xff]   ;;  %3860 = vmatprep.subr.bf16.mxu1 %v5148_v20  ;;  %v5151_v1 = vld [vmem:[#allocation13 + $0x1e4] ss:$48 sps:$4 sm:$0xff]   ;;  %v5184_v20 = vld [vmem:[#allocation13 + $0xc] ss:$48 sps:$4 sm:$0xff]  }
 0x599   :  { %2745 = vperm.xlu1 %5069, %v2675_v27   ;;  %2750 = vperm.xlu0 %5068, %v2676_v13   ;;  %v2687_v5 = vmul.f32 %v5773_v59, %v7246_v61  ;;  %v2688_v60 = vmul.f32 %v5773_v59, %v7239_v62  ;;  %v5161_v16 = vld [vmem:[#allocation13 + $0xe0] ss:$48 sps:$4 sm:$0xff]   ;;  %v5172_v59 = vld [vmem:[#allocation13 + $0x1a4] ss:$48 sps:$4 sm:$0xff]  }
 0x59b   :  { %3861 = vmatpush1.bf16.msra.mxu1 %v5146_v9  ;;  %v5176_v9 = vld [vmem:[#allocation13 + $0x260] ss:$48 sps:$4 sm:$0xff]  }
 0x59c   :  { %3862 = vmatprep.subr.bf16.mxu1 %v5151_v1  ;;  %v5181_v1 = vld [vmem:[#allocation13 + $0x2c4] ss:$48 sps:$4 sm:$0xff]  }
 0x59d   :  { %2755 = vperm.xlu1 %5069, %v2678_v34   ;;  %2760 = vperm.xlu0 %5068, %v2679_v26  }
 0x59f   :  { %3863 = vmatpush1.bf16.msra.mxu1 %v5149_v40  ;;  %v5179_v40 = vld [vmem:[#allocation13 + $0x2c0] ss:$48 sps:$4 sm:$0xff]  }
 0x5a1   :  { %2765 = vperm.xlu1 %5069, %v2681_v21   ;;  %2770 = vperm.xlu0 %5068, %v2682_v58   ;;  %v5154_v21 = vld [vmem:[#allocation13 + $0x244] ss:$48 sps:$4 sm:$0xff]  }
 0x5a2   :  { %3864 = vmatprep.subr.bf16.mxu1 %v5154_v21  ;;  %v5160_v58 = vld [vmem:[#allocation13 + $0x84] ss:$48 sps:$4 sm:$0xff]   ;;  %v7884_v21 = vld [vmem:[#allocation49_spill] sm:$0xff] }
 0x5a5   :  { %2775 = vperm.xlu1 %5069, %v2684_v37   ;;  %2780 = vperm.xlu0 %5068, %v2685_v31   ;;  %v5164_v37 = vld [vmem:[#allocation13 + $0x140] ss:$48 sps:$4 sm:$0xff]   ;;  %v5166_v31 = vld [vmem:[#allocation13 + $0x144] ss:$48 sps:$4 sm:$0xff]  }
 0x5a9   :  { %2785 = vperm.xlu1 %5069, %v2687_v5   ;;  %2790 = vperm.xlu0 %5068, %v2688_v60   ;;  %v5167_v5 = vld [vmem:[#allocation13 + $0x2a0] ss:$48 sps:$4 sm:$0xff]   ;;  %v5169_v60 = vld [vmem:[#allocation13 + $0x2a4] ss:$48 sps:$4 sm:$0xff]  }
 0x5de   :  { %v2582_v61 = vpop.xlane.xlu0 %2581 }
 0x5df   :  { %v2620_v62 = vrot.slane %v2582_v61, %v7859_v52  ;;  %v2624_v39 = vrot.slane %v2582_v61, %v7860_v8  ;;  %v2628_v35 = vrot.slane %v2582_v61, %v7861_v10  ;;  %v2632_v63 = vrot.slane %v2582_v61, %v7863_v44  ;;  %v7898_v8 = vld [vmem:[#allocation43_spill] sm:$0xff]  ;;  %v7899_v52 = vld [vmem:[#allocation42_spill] sm:$0xff] }
 0x5e0   :  { %v2636_v6 = vrot.slane %v2582_v61, %v7172_v36  ;;  %v2640_v57 = vrot.slane %v2582_v61, %v7177_v54  ;;  %v2644_v56 = vrot.slane %v2582_v61, %v7183_v15  ;;  %v2648_v22 = vrot.slane %v2582_v61, %v7189_v14  ;;  %v7896_v14 = vld [vmem:[#allocation55_spill] sm:$0xff]  ;;  %v7897_v15 = vld [vmem:[#allocation54_spill] sm:$0xff] }
 0x5e1   :  { %5774 = vrcp.f32 %v2620_v62  ;;  %v3108_v54 = vadd.f32 %v7897_v15, %v7896_v14 }
 0x5e2   :  { %5776 = vrcp.f32 %v2624_v39 }
 0x5e3   :  { %5778 = vrcp.f32 %v2628_v35  ;;  %v3109_v15 = vrot.slane %v3108_v54, 4 }
 0x5e4   :  { %5780 = vrcp.f32 %v2632_v63  ;;  %v7871_v63 = vld [vmem:[#allocation28_spill] sm:$0xff] }
 0x5e5   :  { %5782 = vrcp.f32 %v2636_v6 }
 0x5e6   :  { %5784 = vrcp.f32 %v2640_v57 }
 0x5e7   :  { %5786 = vrcp.f32 %v2644_v56 }
 0x5e8   :  { %5788 = vrcp.f32 %v2648_v22 }
 0x5eb   :  { %v5775_v29 = vpop.eup %5774 }
 0x5ec   :  { %v2691_v3 = vmul.f32 %v5775_v29, %v7271_v28  ;;  %v2690_v55 = vmul.f32 %v5775_v29, %v7265_v38  ;;  %v5777_v30 = vpop.eup %5776  ;;  %v7872_v29 = vld [vmem:[#allocation29_spill] sm:$0xff] }
 0x5ed   :  { %v2694_v18 = vmul.f32 %v5777_v30, %v7286_v48  ;;  %v2693_v41 = vmul.f32 %v5777_v30, %v7279_v2  ;;  %v5779_v11 = vpop.eup %5778  ;;  %v3017_v6 = vadd.f32 %v7872_v29, %v7871_v63  ;;  %v7874_v30 = vld [vmem:[#allocation31_spill] sm:$0xff] }
 0x5ee   :  { %2800 = vperm.xlu0 %5068, %v2691_v3   ;;  %2795 = vperm.xlu1 %5069, %v2690_v55   ;;  %v2697_v28 = vmul.f32 %v5779_v11, %v7273_v51  ;;  %v2696_v38 = vmul.f32 %v5779_v11, %v7293_v12  ;;  %v5781_v4 = vpop.eup %5780  ;;  %v7873_v55 = vld [vmem:[#allocation30_spill] sm:$0xff] }
 0x5ef   :  { %v2700_v48 = vmul.f32 %v5781_v4, %v7281_v43  ;;  %v2699_v2 = vmul.f32 %v5781_v4, %v7300_v32  ;;  %v5783_v17 = vpop.eup %5782  ;;  %v3018_v3 = vrot.slane %v3017_v6, 4  ;;  %v3024_v57 = vadd.f32 %v7874_v30, %v7873_v55 }
 0x5f0   :  { %v2703_v27 = vmul.f32 %v5783_v17, %v7288_v25  ;;  %v2702_v51 = vmul.f32 %v5783_v17, %v7306_v53  ;;  %v5785_v13 = vpop.eup %5784  ;;  %v7869_v25 = vld [vmem:[#allocation69_spill] sm:$0xff]  ;;  %v7870_v53 = vld [vmem:[#allocation70_spill] sm:$0xff] }
 0x5f1   :  { %v2706_v12 = vmul.f32 %v5785_v13, %v7295_v49  ;;  %v2705_v42 = vmul.f32 %v5785_v13, %v7312_v47  ;;  %v5787_v34 = vpop.eup %5786  ;;  %v5152_v49 = vld [vmem:[#allocation13 + $0x240] ss:$48 sps:$4 sm:$0xff]   ;;  %v3025_v4 = vrot.slane %v3024_v57, 4 }
 0x5f2   :  { %2810 = vperm.xlu0 %5068, %v2694_v18   ;;  %2805 = vperm.xlu1 %5069, %v2693_v41   ;;  %v2709_v43 = vmul.f32 %v5787_v34, %v7302_v23  ;;  %v2708_v32 = vmul.f32 %v5787_v34, %v7315_v46  ;;  %v5789_v26 = vpop.eup %5788  ;;  %v5155_v47 = vld [vmem:[#allocation13 + $0x20] ss:$48 sps:$4 sm:$0xff]   ;;  %v5163_v46 = vld [vmem:[#allocation13 + $0xe4] ss:$48 sps:$4 sm:$0xff]  }
 0x5f3   :  { %v2712_v24 = vmul.f32 %v5789_v26, %v7869_v25  ;;  %v2711_v7 = vmul.f32 %v5789_v26, %v7870_v53  ;;  %4049 = vmatpush1.bf16.msra.mxu0 %v5155_v47  ;;  %3865 = vmatpush1.bf16.msra.mxu1 %v5152_v49  ;;  %v5158_v23 = vld [vmem:[#allocation13 + $0x80] ss:$48 sps:$4 sm:$0xff]  }
 0x5f4   :  { %4050 = vmatprep.subr.bf16.mxu0 %v5160_v58  ;;  %3866 = vmatprep.subr.bf16.mxu1 %v5169_v60  ;;  %v7875_v18 = vld [vmem:[#allocation32_spill] sm:$0xff]  ;;  %v7876_v41 = vld [vmem:[#allocation33_spill] sm:$0xff]  ;;  %v7878_v13 = vld [vmem:[#allocation34_spill] sm:$0xff] }
 0x5f5   :  { %v3031_v11 = vadd.f32 %v7876_v41, %v7875_v18  ;;  %v7879_v34 = vld [vmem:[#allocation45_spill] sm:$0xff]  ;;  %v7881_v26 = vld [vmem:[#allocation46_spill] sm:$0xff]  ;;  %v7882_v25 = vld [vmem:[#allocation47_spill] sm:$0xff] }
 0x5f6   :  { %2820 = vperm.xlu0 %5068, %v2697_v28   ;;  %2815 = vperm.xlu1 %5069, %v2696_v38   ;;  %v3019_v38 = vadd.f32 %v3018_v3, %v3017_v6  ;;  %v7883_v49 = vld [vmem:[#allocation48_spill] sm:$0xff] }
 0x5f7   :  { %4051 = vmatpush1.bf16.msra.mxu0 %v5158_v23  ;;  %3867 = vmatpush1.bf16.msra.mxu1 %v5167_v5  ;;  %v3032_v22 = vrot.slane %v3031_v11, 4  ;;  %v3087_v47 = vadd.f32 %v7884_v21, %v7883_v49  ;;  %v7889_v5 = vld [vmem:[#allocation38_spill] sm:$0xff] }
 0x5f8   :  { %4052 = vmatprep.subr.bf16.mxu0 %v5163_v46  ;;  %3901 = vmatprep.subr.bf16.mxu1 %v5184_v20  ;;  %v3020_v17 = vrot.slane %v3019_v38, 2 }
 0x5f9   :  { %v3088_v6 = vrot.slane %v3087_v47, 4 }
 0x5fa   :  { %2830 = vperm.xlu0 %5068, %v2700_v48   ;;  %2825 = vperm.xlu1 %5069, %v2699_v2   ;;  %v3021_v53 = vadd.f32 %v3020_v17, %v3019_v38 }
 0x5fb   :  { %4053 = vmatpush1.bf16.msra.mxu0 %v5161_v16  ;;  %v7886_v16 = vld [vmem:[#allocation37_spill] sm:$0xff] }
 0x5fc   :  { %4054 = vmatprep.subr.bf16.mxu0 %v5166_v31 }
 0x5fe   :  { %2840 = vperm.xlu0 %5068, %v2703_v27   ;;  %2835 = vperm.xlu1 %5069, %v2702_v51   ;;  %v3026_v27 = vadd.f32 %v3025_v4, %v3024_v57  ;;  %v7877_v51 = vld [vmem:[#allocation35_spill] sm:$0xff]  ;;  %v7894_v4 = vld [vmem:[#allocation53_spill] sm:$0xff] }
 0x5ff   :  { %4055 = vmatpush1.bf16.msra.mxu0 %v5164_v37  ;;  %v7887_v37 = vld [vmem:[#allocation36_spill] sm:$0xff]  ;;  %v7892_v57 = vld [vmem:[#allocation51_spill] sm:$0xff] }
 0x600   :  { %4056 = vmatprep.subr.bf16.mxu0 %v5172_v59  ;;  %v3045_v31 = vadd.f32 %v7887_v37, %v7886_v16  ;;  %v7888_v59 = vld [vmem:[#allocation39_spill] sm:$0xff] }
 0x601   :  { %v3052_v60 = vadd.f32 %v7889_v5, %v7888_v59 }
 0x602   :  { %2850 = vperm.xlu0 %5068, %v2706_v12   ;;  %2845 = vperm.xlu1 %5069, %v2705_v42   ;;  %v3038_v12 = vadd.f32 %v7878_v13, %v7877_v51  ;;  %v3033_v42 = vadd.f32 %v3032_v22, %v3031_v11  ;;  %v7893_v11 = vld [vmem:[#allocation50_spill] sm:$0xff]  ;;  %v7895_v22 = vld [vmem:[#allocation52_spill] sm:$0xff]  ;;  %v3046_v36 = vrot.slane %v3045_v31, 4 }
 0x603   :  { %4057 = vmatpush1.bf16.msra.mxu0 %v5170_v0  ;;  %v7890_v0 = vld [vmem:[#allocation41_spill] sm:$0xff]  ;;  %v3094_v38 = vadd.f32 %v7893_v11, %v7892_v57  ;;  %v3101_v17 = vadd.f32 %v7895_v22, %v7894_v4  ;;  %v3053_v44 = vrot.slane %v3052_v60, 4  ;;  %v3089_v11 = vadd.f32 %v3088_v6, %v3087_v47 }
 0x604   :  { %4058 = vmatprep.subr.bf16.mxu0 %v5175_v33  ;;  %v3039_v45 = vrot.slane %v3038_v12, 4  ;;  %v3034_v23 = vrot.slane %v3033_v42, 2  ;;  %v7891_v33 = vld [vmem:[#allocation40_spill] sm:$0xff]  ;;  %v3047_v14 = vadd.f32 %v3046_v36, %v3045_v31  ;;  %v7902_v36 = vld [vmem:[#allocation57_spill] sm:$0xff] }
 0x605   :  { %v3095_v4 = vrot.slane %v3094_v38, 4  ;;  %v3102_v57 = vrot.slane %v3101_v17, 4  ;;  %v3054_v5 = vadd.f32 %v3053_v44, %v3052_v60  ;;  %v7903_v44 = vld [vmem:[#allocation56_spill] sm:$0xff] }
 0x606   :  { %2860 = vperm.xlu0 %5068, %v2709_v43   ;;  %2855 = vperm.xlu1 %5069, %v2708_v32   ;;  %v7880_v43 = vld [vmem:[#allocation44_spill] sm:$0xff]  ;;  %v3035_v3 = vadd.f32 %v3034_v23, %v3033_v42 }
 0x607   :  { %4059 = vmatpush1.bf16.msra.mxu0 %v5173_v19  ;;  %v3073_v32 = vadd.f32 %v7880_v43, %v7879_v34  ;;  %v3059_v19 = vadd.f32 %v7891_v33, %v7890_v0  ;;  %v3066_v33 = vadd.f32 %v7899_v52, %v7898_v8  ;;  %v3103_v6 = vadd.f32 %v3102_v57, %v3101_v17 }
 0x608   :  { %4060 = vmatprep.subr.bf16.mxu0 %v5178_v50  ;;  %v3036_v22 = vrot.slane %v3035_v3, 1  ;;  %v3110_v8 = vadd.f32 %v3109_v15, %v3108_v54 }
 0x609   :  { %v3074_v50 = vrot.slane %v3073_v32, 4  ;;  %v3060_v10 = vrot.slane %v3059_v19, 4 }
 0x60a   :  { %2870 = vperm.xlu0 %5068, %v2712_v24   ;;  %2865 = vperm.xlu1 %5069, %v2711_v7   ;;  %v3080_v24 = vadd.f32 %v7882_v25, %v7881_v26  ;;  %v3027_v7 = vrot.slane %v3026_v27, 2 }
 0x60b   :  { %4061 = vmatpush1.bf16.msra.mxu0 %v5176_v9  ;;  %v3022_v9 = vrot.slane %v3021_v53, 1  ;;  %v3075_v0 = vadd.f32 %v3074_v50, %v3073_v32  ;;  %v3061_v59 = vadd.f32 %v3060_v10, %v3059_v19  ;;  %v3115_v10 = vadd.f32 %v7903_v44, %v7902_v36 }
 0x60c   :  { %4062 = vmatprep.subr.bf16.mxu0 %v5181_v1  ;;  %v7433_v61 = vpop.permute.xlu1 %2720  ;;  %v7435_v62 = vpop.permute.xlu0 %2715  ;;  %v3081_v20 = vrot.slane %v3080_v24, 4  ;;  %v3028_v1 = vadd.f32 %v3027_v7, %v3026_v27  ;;  %v3048_v19 = vrot.slane %v3047_v14, 2 }
 0x60d   :  { %v3023_v7 = vadd.f32 %v3022_v9, %v3021_v53  ;;  %v3076_v37 = vrot.slane %v3075_v0, 2  ;;  %v2874_v32 = vmul.f32 %v7433_v61, %v7872_v29  ;;  %v3096_v9 = vadd.f32 %v3095_v4, %v3094_v38 }
 0x60e   :  { %v3082_v27 = vadd.f32 %v3081_v20, %v3080_v24  ;;  %v2873_v24 = vmul.f32 %v7435_v62, %v7871_v63  ;;  %v3090_v20 = vrot.slane %v3089_v11, 2  ;;  %v3055_v61 = vrot.slane %v3054_v5, 2 }
 0x60f   :  { %4063 = vmatpush1.bf16.msra.mxu0 %v5179_v40  ;;  %v3040_v40 = vadd.f32 %v3039_v45, %v3038_v12  ;;  %v3029_v45 = vrot.slane %v3028_v1, 1  ;;  %v7489_v53 = vmul.f32 0.0625, %v3023_v7  ;;  %v3062_v29 = vrot.slane %v3061_v59, 2 }
 0x610   :  { %v7437_v39 = vpop.permute.xlu1 %2725  ;;  %v7439_v35 = vpop.permute.xlu0 %2730  ;;  %v3083_v52 = vrot.slane %v3082_v27, 2  ;;  %v3037_v62 = vadd.f32 %v3036_v22, %v3035_v3  ;;  %v3077_v63 = vadd.f32 %v3076_v37, %v3075_v0  ;;  %v3097_v57 = vrot.slane %v3096_v9, 2 }
 0x611   :  { %v3041_v23 = vrot.slane %v3040_v40, 2  ;;  %7901 = vst [vmem:[#allocation70_spill] sm:$0xff] %v7489_v53  ;;  %v3030_v50 = vadd.f32 %v3029_v45, %v3028_v1  ;;  %v2905_v1 = vadd.f32 %v2874_v32, %v2873_v24  ;;  %v3091_v45 = vadd.f32 %v3090_v20, %v3089_v11 }
 0x612   :  { %v3084_v7 = vadd.f32 %v3083_v52, %v3082_v27  ;;  %v2875_v54 = vmul.f32 %v7437_v39, %v7873_v55  ;;  %v2876_v15 = vmul.f32 %v7439_v35, %v7874_v30  ;;  %v3104_v38 = vrot.slane %v3103_v6, 2 }
 0x613   :  { %v3042_v47 = vadd.f32 %v3041_v23, %v3040_v40  ;;  %v3111_v4 = vrot.slane %v3110_v8, 2  ;;  %v3116_v17 = vrot.slane %v3115_v10, 4  ;;  %v3049_v23 = vadd.f32 %v3048_v19, %v3047_v14 }
 0x614   :  { %v7447_v56 = vpop.permute.xlu1 %2735  ;;  %v7449_v28 = vpop.permute.xlu0 %2740  ;;  %v3056_v53 = vadd.f32 %v3055_v61, %v3054_v5  ;;  %v3063_v44 = vadd.f32 %v3062_v29, %v3061_v59  ;;  %v3078_v52 = vrot.slane %v3077_v63, 1  ;;  %v3085_v37 = vrot.slane %v3084_v7, 1  ;;  %v7906_v61 = vld [vmem:[#allocation58_spill] sm:$0xff]  ;;  %v7907_v29 = vld [vmem:[#allocation59_spill] sm:$0xff] }
 0x615   :  { %v3043_v40 = vrot.slane %v3042_v47, 1  ;;  %v2906_v0 = vrot.slane %v2905_v1, 4  ;;  %v7507_v39 = vmul.f32 0.0625, %v3037_v62  ;;  %v3092_v55 = vrot.slane %v3091_v45, 1 }
 0x616   :  { %v2912_v30 = vadd.f32 %v2876_v15, %v2875_v54  ;;  %v3098_v22 = vadd.f32 %v3097_v57, %v3096_v9  ;;  %v3105_v27 = vadd.f32 %v3104_v38, %v3103_v6  ;;  %v3112_v14 = vadd.f32 %v3111_v4, %v3110_v8 }
 0x617   :  { %7905 = vst [vmem:[#allocation29_spill] sm:$0xff] %v7507_v39  ;;  %v3044_v35 = vadd.f32 %v3043_v40, %v3042_v47  ;;  %v3117_v5 = vadd.f32 %v3116_v17, %v3115_v10  ;;  %v3050_v59 = vrot.slane %v3049_v23, 1  ;;  %v3057_v32 = vrot.slane %v3056_v53, 1 }
 0x618   :  { %v7451_v48 = vpop.permute.xlu1 %2745  ;;  %v7453_v2 = vpop.permute.xlu0 %2750  ;;  %v3064_v24 = vrot.slane %v3063_v44, 1  ;;  %v3079_v20 = vadd.f32 %v3078_v52, %v3077_v63  ;;  %v3086_v19 = vadd.f32 %v3085_v37, %v3084_v7  ;;  %v2907_v36 = vadd.f32 %v2906_v0, %v2905_v1 }
 0x619   :  { %v3093_v47 = vadd.f32 %v3092_v55, %v3091_v45  ;;  %v2913_v40 = vrot.slane %v2912_v30, 4  ;;  %v2877_v9 = vmul.f32 %v7447_v56, %v7875_v18  ;;  %v2878_v8 = vmul.f32 %v7449_v28, %v7876_v41 }
 0x61a   :  { %v3099_v6 = vrot.slane %v3098_v22, 1  ;;  %v3106_v10 = vrot.slane %v3105_v27, 1  ;;  %v3118_v54 = vrot.slane %v3117_v5, 2  ;;  %v7517_v63 = vmul.f32 0.0625, %v3044_v35 }
 0x61b   :  { %v7519_v7 = vadd.f32 %v3050_v59, %v3049_v23  ;;  %v7521_v15 = vadd.f32 %v3057_v32, %v3056_v53  ;;  %v7523_v1 = vadd.f32 %v3064_v24, %v3063_v44  ;;  %v7526_v57 = vmul.f32 0.0625, %v3079_v20 }
 0x61c   :  { %v7463_v58 = vpop.permute.xlu1 %2755  ;;  %v7465_v46 = vpop.permute.xlu0 %2760  ;;  %v2908_v56 = vrot.slane %v2907_v36, 2  ;;  %v7528_v28 = vmul.f32 0.0625, %v3086_v19  ;;  %v7530_v4 = vmul.f32 0.0625, %v3093_v47  ;;  %v2914_v17 = vadd.f32 %v2913_v40, %v2912_v30  ;;  %v7913_v19 = vld [vmem:[#allocation41_spill] sm:$0xff]  ;;  %v7914_v47 = vld [vmem:[#allocation40_spill] sm:$0xff]  ;;  %v7915_v40 = vld [vmem:[#allocation43_spill] sm:$0xff] }
 0x61d   :  { %7885 = vst [vmem:[#allocation60_spill] sm:$0xff] %v7465_v46  ;;  %v3067_v46 = vrot.slane %v3066_v33, 4  ;;  %v7532_v23 = vadd.f32 %v3099_v6, %v3098_v22  ;;  %v7534_v53 = vadd.f32 %v3106_v10, %v3105_v27  ;;  %v7538_v52 = vadd.f32 %v3118_v54, %v3117_v5 }
 0x61e   :  { %v2879_v37 = vmul.f32 %v7451_v48, %v7877_v51  ;;  %v2880_v0 = vmul.f32 %v7453_v2, %v7878_v13  ;;  %v2909_v59 = vadd.f32 %v2908_v56, %v2907_v36  ;;  %v2915_v5 = vrot.slane %v2914_v17, 2  ;;  %v7908_v51 = vld [vmem:[#allocation36_spill] sm:$0xff]  ;;  %v7917_v56 = vld [vmem:[#allocation51_spill] sm:$0xff] }
 0x61f   :  { %v2881_v2 = vmul.f32 %v7463_v58, %v7886_v16  ;;  %v7916_v16 = vld [vmem:[#allocation42_spill] sm:$0xff] }
 0x620   :  { %v7481_v12 = vpop.permute.xlu1 %2765  ;;  %v7483_v42 = vpop.permute.xlu0 %2770 }
 0x621   :  { %7900 = vst [vmem:[#allocation69_spill] sm:$0xff] %v7483_v42  ;;  %v3068_v42 = vadd.f32 %v3067_v46, %v3066_v33  ;;  %v7501_v33 = vmul.f32 0.0625, %v3030_v50 }
 0x623   :  { %v3069_v46 = vrot.slane %v3068_v42, 2  ;;  %7904 = vst [vmem:[#allocation28_spill] sm:$0xff] %v7501_v33  ;;  %v3122_v33 = vadd.f32 %v7907_v29, %v7906_v61 }
 0x624   :  { %v7493_v31 = vpop.permute.xlu1 %2775  ;;  %v7495_v60 = vpop.permute.xlu0 %2780  ;;  %v7909_v13 = vld [vmem:[#allocation60_spill] sm:$0xff] }
 0x625   :  { %v7509_v50 = vadd.f32 %v3069_v46, %v3068_v42  ;;  %v3113_v42 = vrot.slane %v3112_v14, 1  ;;  %v3123_v18 = vrot.slane %v3122_v33, 4  ;;  %v2919_v46 = vadd.f32 %v2878_v8, %v2877_v9 }
 0x627   :  { %v3071_v45 = vrot.slane %v7509_v50, 1  ;;  %v7536_v44 = vadd.f32 %v3113_v42, %v3112_v14  ;;  %v3124_v30 = vadd.f32 %v3123_v18, %v3122_v33  ;;  %v2920_v24 = vrot.slane %v2919_v46, 4 }
 0x628   :  { %v7503_v3 = vpop.permute.xlu1 %2785  ;;  %v7505_v11 = vpop.permute.xlu0 %2790  ;;  %v7912_v33 = vld [vmem:[#allocation69_spill] sm:$0xff]  ;;  %v3120_v42 = vrot.slane %v7538_v52, 1 }
 0x629   :  { %v2887_v58 = vmul.f32 %v7503_v3, %v7915_v40  ;;  %v2888_v9 = vmul.f32 %v7505_v11, %v7916_v16  ;;  %v3125_v54 = vrot.slane %v3124_v30, 2  ;;  %v2921_v18 = vadd.f32 %v2920_v24, %v2919_v46  ;;  %v7919_v24 = vld [vmem:[#allocation53_spill] sm:$0xff] }
 0x62b   :  { %v2954_v11 = vadd.f32 %v2888_v9, %v2887_v58  ;;  %v2922_v46 = vrot.slane %v2921_v18, 2 }
 0x62d   :  { %v2923_v16 = vadd.f32 %v2922_v46, %v2921_v18 }
 0x66d   :  { %v2796_v62 = vpop.permute.xlu1 %2795  ;;  %v2801_v39 = vpop.permute.xlu0 %2800 }
 0x66e   :  { %v2889_v22 = vmul.f32 %v2796_v62, %v7879_v34  ;;  %v2890_v27 = vmul.f32 %v2801_v39, %v7880_v43  ;;  %v7911_v34 = vld [vmem:[#allocation38_spill] sm:$0xff]  ;;  %v2926_v39 = vadd.f32 %v2880_v0, %v2879_v37  ;;  %v2885_v62 = vmul.f32 %v7493_v31, %v7913_v19 }
 0x66f   :  { %v2884_v43 = vmul.f32 %v7912_v33, %v7911_v34  ;;  %v7918_v37 = vld [vmem:[#allocation50_spill] sm:$0xff] }
 0x670   :  { %v2961_v8 = vadd.f32 %v2890_v27, %v2889_v22  ;;  %v2927_v3 = vrot.slane %v2926_v39, 4 }
 0x671   :  { %v2806_v38 = vpop.permute.xlu1 %2805  ;;  %v2811_v41 = vpop.permute.xlu0 %2810 }
 0x672   :  { %v2891_v35 = vmul.f32 %v2806_v38, %v7881_v26  ;;  %v2892_v55 = vmul.f32 %v2811_v41, %v7882_v25  ;;  %v2882_v26 = vmul.f32 %v7909_v13, %v7908_v51  ;;  %v7910_v25 = vld [vmem:[#allocation39_spill] sm:$0xff]  ;;  %v2916_v38 = vadd.f32 %v2915_v5, %v2914_v17  ;;  %v7920_v17 = vld [vmem:[#allocation52_spill] sm:$0xff] }
 0x673   :  { %v2883_v36 = vmul.f32 %v7481_v12, %v7910_v25  ;;  %v2962_v22 = vrot.slane %v2961_v8, 4  ;;  %v7569_v51 = vadd.f32 %v3125_v54, %v3124_v30  ;;  %v2928_v34 = vadd.f32 %v2927_v3, %v2926_v39  ;;  %v7922_v39 = vld [vmem:[#allocation54_spill] sm:$0xff] }
 0x674   :  { %v2933_v41 = vadd.f32 %v2882_v26, %v2881_v2  ;;  %v2917_v2 = vrot.slane %v2916_v38, 1 }
 0x675   :  { %v2816_v14 = vpop.permute.xlu1 %2815  ;;  %v2821_v32 = vpop.permute.xlu0 %2820 }
 0x676   :  { %v2893_v20 = vmul.f32 %v2816_v14, %v7883_v49  ;;  %v2894_v48 = vmul.f32 %v2821_v32, %v7884_v21  ;;  %v2886_v49 = vmul.f32 %v7495_v60, %v7914_v47  ;;  %v2968_v21 = vadd.f32 %v2892_v55, %v2891_v35 }
 0x677   :  { %v2940_v60 = vadd.f32 %v2884_v43, %v2883_v36  ;;  %v2910_v35 = vrot.slane %v2909_v59, 1  ;;  %v2934_v26 = vrot.slane %v2933_v41, 4  ;;  %v2955_v47 = vrot.slane %v2954_v11, 4 }
 0x678   :  { %v2975_v6 = vadd.f32 %v2894_v48, %v2893_v20  ;;  %v2947_v55 = vadd.f32 %v2886_v49, %v2885_v62  ;;  %v2969_v14 = vrot.slane %v2968_v21, 4  ;;  %v2963_v49 = vadd.f32 %v2962_v22, %v2961_v8 }
 0x679   :  { %v2826_v12 = vpop.permute.xlu1 %2825  ;;  %v2831_v10 = vpop.permute.xlu0 %2830  ;;  %v2941_v25 = vrot.slane %v2940_v60, 4  ;;  %v7573_v62 = vadd.f32 %v2910_v35, %v2909_v59 }
 0x67a   :  { %v2895_v31 = vmul.f32 %v2826_v12, %v7917_v56  ;;  %v2896_v0 = vmul.f32 %v2831_v10, %v7918_v37  ;;  %v2976_v27 = vrot.slane %v2975_v6, 4  ;;  %v2948_v33 = vrot.slane %v2947_v55, 4  ;;  %v7921_v10 = vld [vmem:[#allocation55_spill] sm:$0xff] }
 0x67b   :  { %v2970_v43 = vadd.f32 %v2969_v14, %v2968_v21  ;;  %v7576_v56 = vadd.f32 %v2917_v2, %v2916_v38  ;;  %v2942_v37 = vadd.f32 %v2941_v25, %v2940_v60  ;;  %v2929_v21 = vrot.slane %v2928_v34, 2  ;;  %v7924_v38 = vld [vmem:[#allocation56_spill] sm:$0xff] }
 0x67c   :  { %v2982_v32 = vadd.f32 %v2896_v0, %v2895_v31  ;;  %v2977_v40 = vadd.f32 %v2976_v27, %v2975_v6  ;;  %v2935_v31 = vadd.f32 %v2934_v26, %v2933_v41  ;;  %v2949_v3 = vadd.f32 %v2948_v33, %v2947_v55 }
 0x67d   :  { %v2836_v20 = vpop.permute.xlu1 %2835  ;;  %v2841_v48 = vpop.permute.xlu0 %2840  ;;  %v2971_v59 = vrot.slane %v2970_v43, 2  ;;  %v2956_v14 = vadd.f32 %v2955_v47, %v2954_v11  ;;  %v2964_v8 = vrot.slane %v2963_v49, 2  ;;  %v2943_v60 = vrot.slane %v2942_v37, 2 }
 0x67e   :  { %v2897_v13 = vmul.f32 %v2836_v20, %v7919_v24  ;;  %v2898_v5 = vmul.f32 %v2841_v48, %v7920_v17  ;;  %v2983_v36 = vrot.slane %v2982_v32, 4  ;;  %v2978_v6 = vrot.slane %v2977_v40, 2  ;;  %v7923_v48 = vld [vmem:[#allocation57_spill] sm:$0xff] }
 0x67f   :  { %v2936_v41 = vrot.slane %v2935_v31, 2  ;;  %v2950_v55 = vrot.slane %v2949_v3, 2  ;;  %v2972_v2 = vadd.f32 %v2971_v59, %v2970_v43  ;;  %v2957_v11 = vrot.slane %v2956_v14, 2 }
 0x680   :  { %v2989_v19 = vadd.f32 %v2898_v5, %v2897_v13  ;;  %v2984_v9 = vadd.f32 %v2983_v36, %v2982_v32  ;;  %v2924_v32 = vrot.slane %v2923_v16, 1  ;;  %v2930_v5 = vadd.f32 %v2929_v21, %v2928_v34 }
 0x681   :  { %v2846_v30 = vpop.permute.xlu1 %2845  ;;  %v2851_v58 = vpop.permute.xlu0 %2850  ;;  %v2965_v25 = vadd.f32 %v2964_v8, %v2963_v49  ;;  %v2979_v36 = vadd.f32 %v2978_v6, %v2977_v40  ;;  %v2973_v21 = vrot.slane %v2972_v2, 1  ;;  %v2958_v49 = vadd.f32 %v2957_v11, %v2956_v14 }
 0x682   :  { %v2990_v12 = vrot.slane %v2989_v19, 4  ;;  %v2899_v54 = vmul.f32 %v2846_v30, %v7921_v10  ;;  %v2900_v0 = vmul.f32 %v2851_v58, %v7922_v39  ;;  %v2985_v20 = vrot.slane %v2984_v9, 2 }
 0x683   :  { %v2944_v39 = vadd.f32 %v2943_v60, %v2942_v37  ;;  %v2931_v34 = vrot.slane %v2930_v5, 1  ;;  %v2980_v40 = vrot.slane %v2979_v36, 1  ;;  %v2966_v6 = vrot.slane %v2965_v25, 1 }
 0x684   :  { %v2991_v35 = vadd.f32 %v2990_v12, %v2989_v19  ;;  %v2996_v22 = vadd.f32 %v2900_v0, %v2899_v54  ;;  %v2986_v30 = vadd.f32 %v2985_v20, %v2984_v9  ;;  %v2937_v54 = vadd.f32 %v2936_v41, %v2935_v31 }
 0x685   :  { %v2856_v27 = vpop.permute.xlu1 %2855  ;;  %v2861_v18 = vpop.permute.xlu0 %2860  ;;  %v2974_v31 = vadd.f32 %v2973_v21, %v2972_v2  ;;  %v2959_v60 = vrot.slane %v2958_v49, 1 }
 0x686   :  { %v2901_v46 = vmul.f32 %v2856_v27, %v7923_v48  ;;  %v2902_v24 = vmul.f32 %v2861_v18, %v7924_v38  ;;  %v2992_v13 = vrot.slane %v2991_v35, 2  ;;  %v2997_v17 = vrot.slane %v2996_v22, 4 }
 0x687   :  { %v2951_v18 = vadd.f32 %v2950_v55, %v2949_v3  ;;  %v2925_v48 = vadd.f32 %v2924_v32, %v2923_v16  ;;  %v2967_v3 = vadd.f32 %v2966_v6, %v2965_v25  ;;  %v3162_v16 = vsel %vm2081_vm1, %v7576_v56, %v7573_v62 }
 0x688   :  { %v3003_v26 = vadd.f32 %v2902_v24, %v2901_v46  ;;  %v2998_v33 = vadd.f32 %v2997_v17, %v2996_v22  ;;  %v2993_v0 = vadd.f32 %v2992_v13, %v2991_v35  ;;  %v2987_v22 = vrot.slane %v2986_v30, 1 }
 0x689   :  { %v2866_v19 = vpop.permute.xlu1 %2865  ;;  %v2871_v47 = vpop.permute.xlu0 %2870  ;;  %v2945_v46 = vrot.slane %v2944_v39, 1  ;;  %v2932_v24 = vadd.f32 %v2931_v34, %v2930_v5  ;;  %v2952_v41 = vrot.slane %v2951_v18, 1  ;;  %v2981_v13 = vadd.f32 %v2980_v40, %v2979_v36 }
 0x68a   :  { %v3004_v58 = vrot.slane %v3003_v26, 4  ;;  %v2903_v12 = vmul.f32 %v2866_v19, %v7906_v61  ;;  %v2904_v10 = vmul.f32 %v2871_v47, %v7907_v29  ;;  %v2999_v27 = vrot.slane %v2998_v33, 2 }
 0x68b   :  { %v2938_v61 = vrot.slane %v2937_v54, 1  ;;  %v2994_v29 = vrot.slane %v2993_v0, 1  ;;  %v2988_v14 = vadd.f32 %v2987_v22, %v2986_v30  ;;  %v2946_v2 = vadd.f32 %v2945_v46, %v2944_v39  ;;  %v5187_v22 = vld [vmem:[#allocation13 + $0x6c] ss:$48 sps:$4 sm:$0xff]  }
 0x68c   :  { %v3005_v43 = vadd.f32 %v3004_v58, %v3003_v26  ;;  %v3010_v59 = vadd.f32 %v2904_v10, %v2903_v12  ;;  %v3000_v8 = vadd.f32 %v2999_v27, %v2998_v33  ;;  %v3127_v26 = vrot.slane %v7569_v51, 1 }
 0x68d   :  { %v2939_v32 = vadd.f32 %v2938_v61, %v2937_v54  ;;  %v2995_v11 = vadd.f32 %v2994_v29, %v2993_v0  ;;  %v3169_v33 = vsel %vm2081_vm1, %v2974_v31, %v2967_v3  ;;  %v3163_v47 = vsel %vm2083_vm2, %v2925_v48, %v3162_v16  ;;  %v7927_v61 = vld [vmem:[#allocation29_spill] sm:$0xff] }
 0x68e   :  { %v3006_v9 = vrot.slane %v3005_v43, 2  ;;  %v3011_v20 = vrot.slane %v3010_v59, 4  ;;  %v3001_v37 = vrot.slane %v3000_v8, 1  ;;  %v2953_v36 = vadd.f32 %v2952_v41, %v2951_v18  ;;  %v5194_v16 = vld [vmem:[#allocation13 + $0x188] ss:$48 sps:$4 sm:$0xff]  }
 0x68f   :  { %v3170_v25 = vsel %vm2083_vm2, %v2981_v13, %v3169_v33  ;;  %v3164_v58 = vsel %vm2085_vm3, %v2932_v24, %v3163_v47  ;;  %v2960_v12 = vadd.f32 %v2959_v60, %v2958_v49  ;;  %v3141_v62 = vmul.f32 0.0625, %v7532_v23  ;;  %v5190_v24 = vld [vmem:[#allocation13 + $0xcc] ss:$48 sps:$4 sm:$0xff]   ;;  %v5188_v13 = vld [vmem:[#allocation13 + $0xc8] ss:$48 sps:$4 sm:$0xff]  }
 0x690   :  { %v3007_v35 = vadd.f32 %v3006_v9, %v3005_v43  ;;  %v3012_v38 = vadd.f32 %v3011_v20, %v3010_v59  ;;  %v3002_v19 = vadd.f32 %v3001_v37, %v3000_v8  ;;  %v3171_v10 = vsel %vm2085_vm3, %v2988_v14, %v3170_v25  ;;  %v5182_v8 = vld [vmem:[#allocation13 + $0x8] ss:$48 sps:$4 sm:$0xff]   ;;  %v5208_v47 = vld [vmem:[#allocation13 + $0x14] ss:$48 sps:$4 sm:$0xff]  }
 0x691   :  { %v3121_v56 = vadd.f32 %v3120_v42, %v7538_v52  ;;  %v3165_v54 = vsel %vm2087_vm4, %v2939_v32, %v3164_v58  ;;  %v3172_v39 = vsel %vm2087_vm4, %v2995_v11, %v3171_v10  ;;  %v3128_v0 = vadd.f32 %v3127_v26, %v7569_v51  ;;  %v7925_v9 = vld [vmem:[#allocation70_spill] sm:$0xff]  ;;  %v7926_v20 = vld [vmem:[#allocation28_spill] sm:$0xff]  ;;  %v5196_v26 = vld [vmem:[#allocation13 + $0x18c] ss:$48 sps:$4 sm:$0xff]  }
 0x692   :  { %v3008_v17 = vrot.slane %v3007_v35, 1  ;;  %v3013_v55 = vrot.slane %v3012_v38, 2  ;;  %v3166_v34 = vsel %vm2089_vm5, %v2946_v2, %v3165_v54  ;;  %v3173_v21 = vsel %vm2089_vm5, %v3002_v19, %v3172_v39  ;;  %v5185_v37 = vld [vmem:[#allocation13 + $0x68] ss:$48 sps:$4 sm:$0xff]   ;;  %v5199_v32 = vld [vmem:[#allocation13 + $0x1ec] ss:$48 sps:$4 sm:$0xff]  }
 0x693   :  { %v3072_v59 = vadd.f32 %v3071_v45, %v7509_v50  ;;  %v3142_v23 = vmul.f32 0.0625, %v7534_v53  ;;  %v3167_v18 = vsel %vm2091_vm6, %v2953_v36, %v3166_v34  ;;  %v3201_v42 = vsel %vm2081_vm1, %v7528_v28, %v7526_v57  ;;  %v5197_v11 = vld [vmem:[#allocation13 + $0x1e8] ss:$48 sps:$4 sm:$0xff]   ;;  %v5202_v2 = vld [vmem:[#allocation13 + $0x24c] ss:$48 sps:$4 sm:$0xff]  }
 0x694   :  { %v3014_v5 = vadd.f32 %v3013_v55, %v3012_v38  ;;  %v3009_v30 = vadd.f32 %v3008_v17, %v3007_v35  ;;  %v3143_v51 = vmul.f32 0.0625, %v7536_v44  ;;  %v3168_v49 = vsel %vm2093_vm8, %v2960_v12, %v3167_v18  ;;  %v5193_v17 = vld [vmem:[#allocation13 + $0x12c] ss:$48 sps:$4 sm:$0xff]   ;;  %v5191_v55 = vld [vmem:[#allocation13 + $0x128] ss:$48 sps:$4 sm:$0xff]  }
 0x695   :  { %v3134_v6 = vmul.f32 0.0625, %v7519_v7  ;;  %v3202_v50 = vsel %vm2083_vm2, %v7530_v4, %v3201_v42  ;;  %v3144_v45 = vmul.f32 0.0625, %v3121_v56  ;;  %v3194_v57 = vsel %vm2081_vm1, %v7926_v20, %v7925_v9  ;;  %v5200_v33 = vld [vmem:[#allocation13 + $0x248] ss:$48 sps:$4 sm:$0xff]   ;;  %v5205_v19 = vld [vmem:[#allocation13 + $0x2ac] ss:$48 sps:$4 sm:$0xff]  }
 0x696   :  { %v3015_v27 = vrot.slane %v3014_v5, 1  ;;  %v3174_v52 = vsel %vm2091_vm6, %v3009_v30, %v3173_v21  ;;  %v3135_v28 = vmul.f32 0.0625, %v7521_v15  ;;  %v3203_v44 = vsel %vm2085_vm3, %v3141_v62, %v3202_v50  ;;  %v5206_v36 = vld [vmem:[#allocation13 + $0x10] ss:$48 sps:$4 sm:$0xff]   ;;  %v5211_v25 = vld [vmem:[#allocation13 + $0x74] ss:$48 sps:$4 sm:$0xff]  }
 0x697   :  { %v3145_v48 = vmul.f32 0.0625, %v3128_v0  ;;  %v3195_v46 = vsel %vm2083_vm2, %v7927_v61, %v3194_v57  ;;  %v3136_v7 = vmul.f32 0.0625, %v7523_v1  ;;  %v3204_v4 = vsel %vm2087_vm4, %v3142_v23, %v3203_v44  ;;  %v5209_v30 = vld [vmem:[#allocation13 + $0x70] ss:$48 sps:$4 sm:$0xff]   ;;  %v5214_v58 = vld [vmem:[#allocation13 + $0xd4] ss:$48 sps:$4 sm:$0xff]  }
 0x698   :  { %v3016_v43 = vadd.f32 %v3015_v27, %v3014_v5  ;;  %v3196_v29 = vsel %vm2085_vm3, %v7517_v63, %v3195_v46  ;;  %v3137_v31 = vmul.f32 0.0625, %v3072_v59  ;;  %v3205_v15 = vsel %vm2089_vm5, %v3143_v51, %v3204_v4  ;;  %v5203_v5 = vld [vmem:[#allocation13 + $0x2a8] ss:$48 sps:$4 sm:$0xff]   ;;  %v5212_v12 = vld [vmem:[#allocation13 + $0xd0] ss:$48 sps:$4 sm:$0xff]  }
 0x699   :  { %v7928_v35 = vmov 0   ;;  %v3197_v38 = vsel %vm2087_vm4, %v3134_v6, %v3196_v29  ;;  %v3206_v1 = vsel %vm2091_vm6, %v3144_v45, %v3205_v15  ;;  %v5217_v10 = vld [vmem:[#allocation13 + $0x134] ss:$48 sps:$4 sm:$0xff]   ;;  %v5215_v27 = vld [vmem:[#allocation13 + $0x130] ss:$48 sps:$4 sm:$0xff]  }
 0x69a   :  { %v3175_v40 = vsel %vm2093_vm8, %v3016_v43, %v3174_v52  ;;  %v3198_v41 = vsel %vm2089_vm5, %v3135_v28, %v3197_v38  ;;  %v3207_v60 = vsel %vm2093_vm8, %v3145_v48, %v3206_v1  ;;  %v5220_v62 = vld [vmem:[#allocation13 + $0x194] ss:$48 sps:$4 sm:$0xff]   ;;  %v5218_v56 = vld [vmem:[#allocation13 + $0x190] ss:$48 sps:$4 sm:$0xff]   ;;  %v5232_v59 = vld [vmem:[#allocation13 + $0x1c] ss:$48 sps:$4 sm:$0xff]  }
 0x69b   :  { %v7616_v53 = vpack.c.bf16 %v3175_v40, %v3168_v49  ;;  %v3199_v63 = vsel %vm2091_vm6, %v3136_v7, %v3198_v41  ;;  %v5223_v54 = vld [vmem:[#allocation13 + $0x1f4] ss:$48 sps:$4 sm:$0xff]   ;;  %v5221_v39 = vld [vmem:[#allocation13 + $0x1f0] ss:$48 sps:$4 sm:$0xff]   ;;  %v5230_v23 = vld [vmem:[#allocation13 + $0x18] ss:$48 sps:$4 sm:$0xff]  }
 0x69c   :  { %v3200_v3 = vsel %vm2093_vm8, %v3137_v31, %v3199_v63  ;;  %v5226_v0 = vld [vmem:[#allocation13 + $0x254] ss:$48 sps:$4 sm:$0xff]   ;;  %v5224_v34 = vld [vmem:[#allocation13 + $0x250] ss:$48 sps:$4 sm:$0xff]   ;;  %v5235_v18 = vld [vmem:[#allocation13 + $0x7c] ss:$48 sps:$4 sm:$0xff]  }
 0x69d   :  { %3885 = vmatmul.mubr.bf16.vlgmr.msra.gmra.mrb[64].mxu1 %v7616_v53  ;;  %4081 = vmatmul.mubr.bf16.vlgmr.msra.gmra.mrb[128].mxu0 %v7616_v53  ;;  %v7640_v14 = vpack.c.bf16 %v3207_v60, %v3200_v3  ;;  %v5229_v21 = vld [vmem:[#allocation13 + $0x2b4] ss:$48 sps:$4 sm:$0xff]   ;;  %v5227_v43 = vld [vmem:[#allocation13 + $0x2b0] ss:$48 sps:$4 sm:$0xff]   ;;  %v5233_v52 = vld [vmem:[#allocation13 + $0x78] ss:$48 sps:$4 sm:$0xff]  }
 0x69e   :  { %3902 = vmatpush1.bf16.msra.mxu1 %v5182_v8  ;;  %3894 = vmatprep.mubr.bf16.mxu1 %v7928_v35  ;;  %v5238_v42 = vld [vmem:[#allocation13 + $0xdc] ss:$48 sps:$4 sm:$0xff]   ;;  %v5236_v51 = vld [vmem:[#allocation13 + $0xd8] ss:$48 sps:$4 sm:$0xff]   ;;  %v7653_v48 = vld [vmem:[#allocation19] ss:$0 sm:$0xff] }
 0x69f   :  { %3903 = vmatprep.subr.bf16.mxu1 %v5187_v22  ;;  %4086 = vmatprep.mubr.bf16.mxu0 %v7928_v35  ;;  %v5241_v49 = vld [vmem:[#allocation13 + $0x13c] ss:$48 sps:$4 sm:$0xff]   ;;  %v5239_v40 = vld [vmem:[#allocation13 + $0x138] ss:$48 sps:$4 sm:$0xff]   ;;  %v5279_v3 = vld [vmem:[#allocation17] sm:$0xff]  }
 0x6a0   :  { %v5244_v8 = vld [vmem:[#allocation13 + $0x19c] ss:$48 sps:$4 sm:$0xff]   ;;  %v5242_v6 = vld [vmem:[#allocation13 + $0x198] ss:$48 sps:$4 sm:$0xff]   ;;  %4581 = vrot.lane.b32.xlu1 %v7653_v48, %s6086_s10 }
 0x6a1   :  { %v5247_v50 = vld [vmem:[#allocation13 + $0x1fc] ss:$48 sps:$4 sm:$0xff]   ;;  %v5245_v45 = vld [vmem:[#allocation13 + $0x1f8] ss:$48 sps:$4 sm:$0xff]  }
 0x6a2   :  { %3904 = vmatpush1.bf16.msra.mxu1 %v5185_v37  ;;  %v5250_v22 = vld [vmem:[#allocation13 + $0x25c] ss:$48 sps:$4 sm:$0xff]   ;;  %v5248_v9 = vld [vmem:[#allocation13 + $0x258] ss:$48 sps:$4 sm:$0xff]  }
 0x6a3   :  { %3905 = vmatprep.subr.bf16.mxu1 %v5190_v24  ;;  %v5253_v20 = vld [vmem:[#allocation13 + $0x2bc] ss:$48 sps:$4 sm:$0xff]   ;;  %v5251_v57 = vld [vmem:[#allocation13 + $0x2b8] ss:$48 sps:$4 sm:$0xff]  }
 0x6a4   :  { %v5256_v28 = vld [vmem:[#allocation13 + $0x2c] ss:$48 sps:$4 sm:$0xff]   ;;  %v5254_v44 = vld [vmem:[#allocation13 + $0x28] ss:$48 sps:$4 sm:$0xff]  }
 0x6a5   :  { %3895 = vmatmul.mubr.bf16.gmra.mrb[68].mxu1 %v7640_v14  ;;  %4087 = vmatmul.mubr.bf16.gmra.mrb[132].mxu0 %v7640_v14  ;;  %v5259_v61 = vld [vmem:[#allocation13 + $0x8c] ss:$48 sps:$4 sm:$0xff]   ;;  %v5257_v46 = vld [vmem:[#allocation13 + $0x88] ss:$48 sps:$4 sm:$0xff]  }
 0x6a6   :  { %3906 = vmatpush1.bf16.msra.mxu1 %v5188_v13  ;;  %3933 = vmatprep.mubr.bf16.mxu1 %v7928_v35  ;;  %v5262_v7 = vld [vmem:[#allocation13 + $0xec] ss:$48 sps:$4 sm:$0xff]   ;;  %v5260_v4 = vld [vmem:[#allocation13 + $0xe8] ss:$48 sps:$4 sm:$0xff]   ;;  %v5278_v13 = vld [vmem:[#allocation17 + $0x40] sm:$0xff]  }
 0x6a7   :  { %3907 = vmatprep.subr.bf16.mxu1 %v5193_v17  ;;  %v5265_v29 = vld [vmem:[#allocation13 + $0x14c] ss:$48 sps:$4 sm:$0xff]   ;;  %v5263_v31 = vld [vmem:[#allocation13 + $0x148] ss:$48 sps:$4 sm:$0xff]   ;;  %4989 = vmatprep.subr.bf16.mxu0 %v5278_v13 }
 0x6a8   :  { %v5268_v15 = vld [vmem:[#allocation13 + $0x1ac] ss:$48 sps:$4 sm:$0xff]   ;;  %v5266_v37 = vld [vmem:[#allocation13 + $0x1a8] ss:$48 sps:$4 sm:$0xff]   ;;  %4990 = vmatpush3.bf16.msra.mxu0 %v5279_v3 }
 0x6a9   :  { %v5271_v38 = vld [vmem:[#allocation13 + $0x20c] ss:$48 sps:$4 sm:$0xff]   ;;  %v5269_v1 = vld [vmem:[#allocation13 + $0x208] ss:$48 sps:$4 sm:$0xff]  }
 0x6aa   :  { %3908 = vmatpush1.bf16.msra.mxu1 %v5191_v55  ;;  %v5274_v24 = vld [vmem:[#allocation13 + $0x26c] ss:$48 sps:$4 sm:$0xff]   ;;  %v5272_v41 = vld [vmem:[#allocation13 + $0x268] ss:$48 sps:$4 sm:$0xff]  }
 0x6ab   :  { %3909 = vmatprep.subr.bf16.mxu1 %v5196_v26  ;;  %v5277_v60 = vld [vmem:[#allocation13 + $0x2cc] ss:$48 sps:$4 sm:$0xff]   ;;  %v5275_v63 = vld [vmem:[#allocation13 + $0x2c8] ss:$48 sps:$4 sm:$0xff]   ;;  %v5282_v26 = vld [vmem:[#allocation17 + $0x50] sm:$0xff]  }
 0x6ac   :  { %v5280_v17 = vld [vmem:[#allocation17 + $0x48] sm:$0xff]  }
 0x6ad   :  { %v5281_v55 = vld [vmem:[#allocation17 + $0x8] sm:$0xff]   ;;  %4991 = vmatprep.subr.bf16.mxu0 %v5280_v17 }
 0x6ae   :  { %3910 = vmatpush1.bf16.msra.mxu1 %v5194_v16  ;;  %4992 = vmatpush3.bf16.msra.mxu0 %v5281_v55  ;;  %v5283_v16 = vld [vmem:[#allocation17 + $0x10] sm:$0xff]  }
 0x6af   :  { %3911 = vmatprep.subr.bf16.mxu1 %v5199_v32  ;;  %4993 = vmatprep.subr.bf16.mxu0 %v5282_v26  ;;  %v5284_v32 = vld [vmem:[#allocation17 + $0x58] sm:$0xff]  }
 0x6b2   :  { %3912 = vmatpush1.bf16.msra.mxu1 %v5197_v11  ;;  %4994 = vmatpush3.bf16.msra.mxu0 %v5283_v16  ;;  %v5285_v11 = vld [vmem:[#allocation17 + $0x18] sm:$0xff]  }
 0x6b3   :  { %3913 = vmatprep.subr.bf16.mxu1 %v5202_v2  ;;  %4995 = vmatprep.subr.bf16.mxu0 %v5284_v32  ;;  %v5286_v2 = vld [vmem:[#allocation17 + $0x60] sm:$0xff]  }
 0x6b6   :  { %3914 = vmatpush1.bf16.msra.mxu1 %v5200_v33  ;;  %4996 = vmatpush3.bf16.msra.mxu0 %v5285_v11  ;;  %v5288_v33 = vld [vmem:[#allocation17 + $0x68] sm:$0xff]  }
 0x6b7   :  { %3915 = vmatprep.subr.bf16.mxu1 %v5205_v19  ;;  %4997 = vmatprep.subr.bf16.mxu0 %v5286_v2  ;;  %v5290_v19 = vld [vmem:[#allocation17 + $0x70] sm:$0xff]  }
 0x6ba   :  { %3916 = vmatpush1.bf16.msra.mxu1 %v5203_v5  ;;  %v5291_v5 = vld [vmem:[#allocation17 + $0x30] sm:$0xff]  }
 0x6bb   :  { %3950 = vmatprep.subr.bf16.mxu1 %v5208_v47  ;;  %v5292_v47 = vld [vmem:[#allocation17 + $0x78] sm:$0xff]  }
 0x6bd   :  { %3934 = vmatmul.mubr.bf16.vlgmr.msra.gmra.mrb[72].mxu1 %v7616_v53 }
 0x6be   :  { %3951 = vmatpush1.bf16.msra.mxu1 %v5206_v36  ;;  %3943 = vmatprep.mubr.bf16.mxu1 %v7928_v35  ;;  %v5293_v36 = vld [vmem:[#allocation17 + $0x38] sm:$0xff]  }
 0x6bf   :  { %3952 = vmatprep.subr.bf16.mxu1 %v5211_v25  ;;  %v5294_v25 = vld [vmem:[#allocation17 + $0xc0] sm:$0xff]  }
 0x6c2   :  { %3953 = vmatpush1.bf16.msra.mxu1 %v5209_v30  ;;  %v5296_v30 = vld [vmem:[#allocation17 + $0xc8] sm:$0xff]  }
 0x6c3   :  { %3954 = vmatprep.subr.bf16.mxu1 %v5214_v58  ;;  %v5297_v58 = vld [vmem:[#allocation17 + $0x88] sm:$0xff]  }
 0x6c5   :  { %3944 = vmatmul.mubr.bf16.gmra.mrb[76].mxu1 %v7640_v14 }
 0x6c6   :  { %3955 = vmatpush1.bf16.msra.mxu1 %v5212_v12  ;;  %3982 = vmatprep.mubr.bf16.mxu1 %v7928_v35  ;;  %v5298_v12 = vld [vmem:[#allocation17 + $0xd0] sm:$0xff]  }
 0x6c7   :  { %3956 = vmatprep.subr.bf16.mxu1 %v5217_v10  ;;  %v5299_v10 = vld [vmem:[#allocation17 + $0x90] sm:$0xff]  }
 0x6ca   :  { %3957 = vmatpush1.bf16.msra.mxu1 %v5215_v27  ;;  %v5300_v27 = vld [vmem:[#allocation17 + $0xd8] sm:$0xff]  }
 0x6cb   :  { %3958 = vmatprep.subr.bf16.mxu1 %v5220_v62  ;;  %v5301_v62 = vld [vmem:[#allocation17 + $0x98] sm:$0xff]  }
 0x6ce   :  { %3959 = vmatpush1.bf16.msra.mxu1 %v5218_v56  ;;  %v5302_v56 = vld [vmem:[#allocation17 + $0xe0] sm:$0xff]  }
 0x6cf   :  { %3960 = vmatprep.subr.bf16.mxu1 %v5223_v54  ;;  %v5303_v54 = vld [vmem:[#allocation17 + $0xa0] sm:$0xff]  }
 0x6d2   :  { %3961 = vmatpush1.bf16.msra.mxu1 %v5221_v39  ;;  %v5304_v39 = vld [vmem:[#allocation17 + $0xe8] sm:$0xff]  }
 0x6d3   :  { %3962 = vmatprep.subr.bf16.mxu1 %v5226_v0  ;;  %v5305_v0 = vld [vmem:[#allocation17 + $0xa8] sm:$0xff]  }
 0x6d6   :  { %3963 = vmatpush1.bf16.msra.mxu1 %v5224_v34  ;;  %v5306_v34 = vld [vmem:[#allocation17 + $0xf0] sm:$0xff]  }
 0x6d7   :  { %3964 = vmatprep.subr.bf16.mxu1 %v5229_v21  ;;  %v5307_v21 = vld [vmem:[#allocation17 + $0xb0] sm:$0xff]  }
 0x6da   :  { %3965 = vmatpush1.bf16.msra.mxu1 %v5227_v43  ;;  %v5308_v43 = vld [vmem:[#allocation17 + $0xf8] sm:$0xff]  }
 0x6db   :  { %3999 = vmatprep.subr.bf16.mxu1 %v5232_v59  ;;  %v5309_v59 = vld [vmem:[#allocation17 + $0xb8] sm:$0xff]  }
 0x6dd   :  { %3983 = vmatmul.mubr.bf16.vlgmr.msra.gmra.mrb[80].mxu1 %v7616_v53 }
 0x6de   :  { %4000 = vmatpush1.bf16.msra.mxu1 %v5230_v23  ;;  %3992 = vmatprep.mubr.bf16.mxu1 %v7928_v35  ;;  %v7663_v23 = vld [vmem:[#allocation14] sm:$0xff] }
 0x6df   :  { %4001 = vmatprep.subr.bf16.mxu1 %v5235_v18  ;;  %v7929_v18 = vld [vmem:[#allocation63_spill] sm:$0xff] }
 0x6e2   :  { %4002 = vmatpush1.bf16.msra.mxu1 %v5233_v52  ;;  %v3315_v52 = vrot.slane %v7663_v23, %v7929_v18 }
 0x6e3   :  { %4003 = vmatprep.subr.bf16.mxu1 %v5238_v42  ;;  %v4171_v42 = vld [vmem:[#allocation16] sm:$0xf] }
 0x6e5   :  { %3993 = vmatmul.mubr.bf16.gmra.mrb[84].mxu1 %v7640_v14 }
 0x6e6   :  { %4004 = vmatpush1.bf16.msra.mxu1 %v5236_v51  ;;  %4031 = vmatprep.mubr.bf16.mxu1 %v7928_v35  ;;  %v7930_v51 = vld [vmem:[#allocation64_spill] sm:$0xff] }
 0x6e7   :  { %4005 = vmatprep.subr.bf16.mxu1 %v5241_v49  ;;  %v3319_v49 = vrot.slane %v7663_v23, %v7930_v51 }
 0x6ea   :  { %4006 = vmatpush1.bf16.msra.mxu1 %v5239_v40 }
 0x6eb   :  { %4007 = vmatprep.subr.bf16.mxu1 %v5244_v8 }
 0x6ee   :  { %4008 = vmatpush1.bf16.msra.mxu1 %v5242_v6 }
 0x6ef   :  { %4009 = vmatprep.subr.bf16.mxu1 %v5247_v50  ;;  %v4176_v50 = vrot.slane %v4171_v42, %v7929_v18 }
 0x6f2   :  { %4010 = vmatpush1.bf16.msra.mxu1 %v5245_v45 }
 0x6f3   :  { %4011 = vmatprep.subr.bf16.mxu1 %v5250_v22 }
 0x6f6   :  { %4012 = vmatpush1.bf16.msra.mxu1 %v5248_v9 }
 0x6f7   :  { %4013 = vmatprep.subr.bf16.mxu1 %v5253_v20  ;;  %v4180_v20 = vrot.slane %v4171_v42, %v7930_v51 }
 0x6fa   :  { %4014 = vmatpush1.bf16.msra.mxu1 %v5251_v57 }
 0x6fb   :  { %4097 = vmatprep.subr.bf16.mxu1 %v5256_v28 }
 0x6fd   :  { %4032 = vmatmul.mubr.bf16.vlgmr.msra.gmra.mrb[88].mxu1 %v7616_v53 }
 0x6fe   :  { %4098 = vmatpush1.bf16.msra.mxu1 %v5254_v44  ;;  %4041 = vmatprep.mubr.bf16.mxu1 %v7928_v35  ;;  %v7671_v44 = vld [vmem:[#allocation14 + $0x8] sm:$0xf] }
 0x6ff   :  { %4099 = vmatprep.subr.bf16.mxu1 %v5259_v61 }
 0x702   :  { %4100 = vmatpush1.bf16.msra.mxu1 %v5257_v46 }
 0x703   :  { %4101 = vmatprep.subr.bf16.mxu1 %v5262_v7 }
 0x705   :  { %4042 = vmatmul.mubr.bf16.gmra.mrb[92].mxu1 %v7640_v14 }
 0x706   :  { %4102 = vmatpush1.bf16.msra.mxu1 %v5260_v4  ;;  %4129 = vmatprep.mubr.bf16.mxu1 %v7928_v35 }
 0x707   :  { %4103 = vmatprep.subr.bf16.mxu1 %v5265_v29 }
 0x70a   :  { %4104 = vmatpush1.bf16.msra.mxu1 %v5263_v31 }
 0x70b   :  { %4105 = vmatprep.subr.bf16.mxu1 %v5268_v15 }
 0x70e   :  { %4106 = vmatpush1.bf16.msra.mxu1 %v5266_v37 }
 0x70f   :  { %4107 = vmatprep.subr.bf16.mxu1 %v5271_v38  ;;  %v3347_v38 = vrot.slane %v7671_v44, %v7929_v18 }
 0x712   :  { %4108 = vmatpush1.bf16.msra.mxu1 %v5269_v1 }
 0x713   :  { %4109 = vmatprep.subr.bf16.mxu1 %v5274_v24 }
 0x716   :  { %4110 = vmatpush1.bf16.msra.mxu1 %v5272_v41  ;;  %v3351_v41 = vrot.slane %v7671_v44, %v7930_v51 }
 0x717   :  { %4111 = vmatprep.subr.bf16.mxu1 %v5277_v60 }
 0x71a   :  { %4112 = vmatpush1.bf16.msra.mxu1 %v5275_v63 }
 0x71b   :  { %5017 = vmatprep.subr.bf16.mxu1 %v5294_v25 }
 0x71d   :  { %4130 = vmatmul.mubr.bf16.vlgmr.msra.gmra.mrb[96].mxu1 %v7616_v53  ;;  %v5287_v53 = vld [vmem:[#allocation17 + $0x20] sm:$0xff]  }
 0x71e   :  { %4135 = vmatprep.mubr.bf16.mxu1 %v7928_v35  ;;  %4998 = vmatpush3.bf16.msra.mxu0 %v5287_v53  ;;  %v5289_v35 = vld [vmem:[#allocation17 + $0x28] sm:$0xff]  }
 0x71f   :  { %4999 = vmatprep.subr.bf16.mxu0 %v5288_v33 }
 0x722   :  { %5000 = vmatpush3.bf16.msra.mxu0 %v5289_v35 }
 0x723   :  { %5001 = vmatprep.subr.bf16.mxu0 %v5290_v19 }
 0x725   :  { %4136 = vmatmul.mubr.bf16.gmra.mrb[100].mxu1 %v7640_v14  ;;  %v5295_v14 = vld [vmem:[#allocation17 + $0x80] sm:$0xff]  }
 0x726   :  { %5002 = vmatpush3.bf16.msra.mxu0 %v5291_v5  ;;  %5018 = vmatpush3.bf16.msra.mxu1 %v5295_v14 }
 0x727   :  { %5003 = vmatprep.subr.bf16.mxu0 %v5292_v47  ;;  %5019 = vmatprep.subr.bf16.mxu1 %v5296_v30 }
 0x72a   :  { %5004 = vmatpush3.bf16.msra.mxu0 %v5293_v36  ;;  %5020 = vmatpush3.bf16.msra.mxu1 %v5297_v58 }
 0x72b   :  { %5021 = vmatprep.subr.bf16.mxu1 %v5298_v12  ;;  %v7931_v12 = vld [vmem:[#allocation61_spill] sm:$0xff] }
 0x72e   :  { %5022 = vmatpush3.bf16.msra.mxu1 %v5299_v10  ;;  %v3323_v10 = vrot.slane %v7663_v23, %v7931_v12 }
 0x72f   :  { %5023 = vmatprep.subr.bf16.mxu1 %v5300_v27  ;;  %v7932_v27 = vld [vmem:[#allocation62_spill] sm:$0xff] }
 0x732   :  { %5024 = vmatpush3.bf16.msra.mxu1 %v5301_v62  ;;  %v3327_v62 = vrot.slane %v7663_v23, %v7932_v27 }
 0x733   :  { %5025 = vmatprep.subr.bf16.mxu1 %v5302_v56 }
 0x736   :  { %5026 = vmatpush3.bf16.msra.mxu1 %v5303_v54 }
 0x737   :  { %5027 = vmatprep.subr.bf16.mxu1 %v5304_v39  ;;  %v4184_v39 = vrot.slane %v4171_v42, %v7931_v12 }
 0x73a   :  { %5028 = vmatpush3.bf16.msra.mxu1 %v5305_v0 }
 0x73b   :  { %5029 = vmatprep.subr.bf16.mxu1 %v5306_v34 }
 0x73e   :  { %5030 = vmatpush3.bf16.msra.mxu1 %v5307_v21  ;;  %v4188_v21 = vrot.slane %v4171_v42, %v7932_v27 }
 0x73f   :  { %5031 = vmatprep.subr.bf16.mxu1 %v5308_v43 }
 0x742   :  { %5032 = vmatpush3.bf16.msra.mxu1 %v5309_v59 }
 0x770   :  { %v3886_v40 = vpop.f32.mrb[64].mxu1  ;;  %v4082_v8 = vpop.f32.mrb[128].mxu0 }
 0x771   :  { %v3887_v6 = vadd.f32 %v3886_v40, %v3315_v52  ;;  %v3888_v45 = vpop.f32.mrb[65].mxu1  ;;  %v4083_v22 = vpop.f32.mrb[129].mxu0 }
 0x772   :  { %v3889_v9 = vadd.f32 %v3888_v45, %v3319_v49  ;;  %v3890_v57 = vpop.f32.mrb[66].mxu1  ;;  %v4084_v28 = vpop.f32.mrb[130].mxu0 }
 0x773   :  { %v4146_v61 = vmax.f32 %v3887_v6, 0.0  ;;  %v3891_v46 = vadd.f32 %v3890_v57, %v3315_v52  ;;  %v3892_v7 = vpop.f32.mrb[67].mxu1  ;;  %v4085_v4 = vpop.f32.mrb[131].mxu0 }
 0x774   :  { %v4147_v29 = vmax.f32 %v3889_v9, 0.0  ;;  %v3893_v31 = vadd.f32 %v3892_v7, %v3319_v49  ;;  %v7933_v4 = vld [vmem:[#allocation65_spill] sm:$0xff] }
 0x775   :  { %v4193_v15 = vmul.f32 %v4176_v50, %v4146_v61  ;;  %v4154_v37 = vmax.f32 %v3891_v46, 0.0 }
 0x776   :  { %v4194_v1 = vmul.f32 %v4180_v20, %v4147_v29  ;;  %v4155_v24 = vmax.f32 %v3893_v31, 0.0  ;;  %v3331_v29 = vrot.slane %v7663_v23, %v7933_v4  ;;  %v7934_v31 = vld [vmem:[#allocation66_spill] sm:$0xff] }
 0x777   :  { %v4197_v60 = vmul.f32 %v4176_v50, %v4154_v37 }
 0x778   :  { %v4201_v63 = vadd.f32 %v4194_v1, %v4193_v15  ;;  %v4198_v13 = vmul.f32 %v4180_v20, %v4155_v24  ;;  %v3896_v3 = vpop.f32.mrb[68].mxu1  ;;  %v4088_v17 = vpop.f32.mrb[132].mxu0  ;;  %v3335_v15 = vrot.slane %v7663_v23, %v7934_v31 }
 0x779   :  { %v4089_v55 = vadd.f32 %v4088_v17, %v3347_v38  ;;  %v3897_v26 = vpop.f32.mrb[69].mxu1  ;;  %v4090_v16 = vpop.f32.mrb[133].mxu0 }
 0x77a   :  { %v4206_v32 = vadd.f32 %v4198_v13, %v4197_v60  ;;  %v4091_v11 = vadd.f32 %v4090_v16, %v3351_v41  ;;  %v3898_v2 = vpop.f32.mrb[70].mxu1  ;;  %v4092_v53 = vpop.f32.mrb[134].mxu0 }
 0x77b   :  { %v4093_v33 = vadd.f32 %v4092_v53, %v3347_v38  ;;  %v3899_v35 = vpop.f32.mrb[71].mxu1  ;;  %v4094_v19 = vpop.f32.mrb[135].mxu0  ;;  %v4162_v47 = vmax.f32 %v4089_v55, 0.0 }
 0x77c   :  { %v4095_v5 = vadd.f32 %v4094_v19, %v3351_v41  ;;  %v4163_v25 = vmax.f32 %v4091_v11, 0.0  ;;  %v7935_v35 = vld [vmem:[#allocation67_spill] sm:$0xff] }
 0x77d   :  { %v4166_v36 = vmax.f32 %v4093_v33, 0.0  ;;  %v3339_v19 = vrot.slane %v7663_v23, %v7935_v35 }
 0x77e   :  { %v4167_v14 = vmax.f32 %v4095_v5, 0.0  ;;  %v7936_v5 = vld [vmem:[#allocation68_spill] sm:$0xff] }
 0x77f   :  { %v4223_v30 = vpack.c.bf16 %v4166_v36, %v4162_v47  ;;  %v3343_v47 = vrot.slane %v7663_v23, %v7936_v5 }
 0x780   :  { %v4224_v58 = vpack.c.bf16 %v4167_v14, %v4163_v25 }
 0x790   :  { %v3935_v56 = vpop.f32.mrb[72].mxu1 }
 0x791   :  { %v3936_v54 = vadd.f32 %v3935_v56, %v3323_v10  ;;  %v3937_v0 = vpop.f32.mrb[73].mxu1 }
 0x792   :  { %v3938_v34 = vadd.f32 %v3937_v0, %v3327_v62  ;;  %v3939_v43 = vpop.f32.mrb[74].mxu1 }
 0x793   :  { %v4148_v59 = vmax.f32 %v3936_v54, 0.0  ;;  %v3940_v18 = vadd.f32 %v3939_v43, %v3323_v10  ;;  %v3941_v52 = vpop.f32.mrb[75].mxu1 }
 0x794   :  { %v4149_v51 = vmax.f32 %v3938_v34, 0.0  ;;  %v3942_v49 = vadd.f32 %v3941_v52, %v3327_v62 }
 0x795   :  { %v4195_v40 = vmul.f32 %v4184_v39, %v4148_v59  ;;  %v4156_v8 = vmax.f32 %v3940_v18, 0.0 }
 0x796   :  { %v4196_v6 = vmul.f32 %v4188_v21, %v4149_v51  ;;  %v4157_v50 = vmax.f32 %v3942_v49, 0.0 }
 0x797   :  { %v4199_v45 = vmul.f32 %v4184_v39, %v4156_v8  ;;  %v4202_v22 = vadd.f32 %v4201_v63, %v4195_v40 }
 0x798   :  { %v4200_v9 = vmul.f32 %v4188_v21, %v4157_v50  ;;  %v3945_v20 = vpop.f32.mrb[76].mxu1  ;;  %v3359_v50 = vrot.slane %v7671_v44, %v7932_v27 }
 0x799   :  { %v4207_v57 = vadd.f32 %v4206_v32, %v4199_v45  ;;  %v3946_v28 = vpop.f32.mrb[77].mxu1  ;;  %v4203_v61 = vadd.f32 %v4202_v22, %v4196_v6  ;;  %v3355_v6 = vrot.slane %v7671_v44, %v7931_v12  ;;  %v4582_v12 = vpop.permute.xlu1 %4581 }
 0x79a   :  { %v3947_v46 = vpop.f32.mrb[78].mxu1 }
 0x79b   :  { %v3948_v7 = vpop.f32.mrb[79].mxu1  ;;  %4204 = vadd.xlane.f32.xlu0 %v4203_v61  ;;  %v4208_v42 = vadd.f32 %v4207_v57, %v4200_v9 }
 0x79d   :  { %4209 = vadd.xlane.f32.xlu1 %v4208_v42 }
 0x7b0   :  { %v3984_v37 = vpop.f32.mrb[80].mxu1 }
 0x7b1   :  { %v3985_v38 = vadd.f32 %v3984_v37, %v3331_v29  ;;  %v3986_v1 = vpop.f32.mrb[81].mxu1 }
 0x7b2   :  { %v3987_v24 = vadd.f32 %v3986_v1, %v3335_v15  ;;  %v3988_v41 = vpop.f32.mrb[82].mxu1 }
 0x7b3   :  { %v3989_v60 = vadd.f32 %v3988_v41, %v3331_v29  ;;  %v3990_v63 = vpop.f32.mrb[83].mxu1  ;;  %v4150_v3 = vmax.f32 %v3985_v38, 0.0 }
 0x7b4   :  { %v3991_v13 = vadd.f32 %v3990_v63, %v3335_v15  ;;  %v4151_v55 = vmax.f32 %v3987_v24, 0.0 }
 0x7b5   :  { %v4158_v17 = vmax.f32 %v3989_v60, 0.0 }
 0x7b6   :  { %v4159_v26 = vmax.f32 %v3991_v13, 0.0 }
 0x7b7   :  { %v4219_v16 = vpack.c.bf16 %v4158_v17, %v4150_v3 }
 0x7b8   :  { %v4220_v32 = vpack.c.bf16 %v4159_v26, %v4151_v55  ;;  %v3994_v11 = vpop.f32.mrb[84].mxu1 }
 0x7b9   :  { %v3995_v2 = vpop.f32.mrb[85].mxu1 }
 0x7ba   :  { %v3996_v53 = vpop.f32.mrb[86].mxu1  ;;  %4515 = vmatprep.mubr.bf16.mxu0 %v4220_v32 }
 0x7bb   :  { %v3997_v33 = vpop.f32.mrb[87].mxu1  ;;  %4516 = vmatmul.mubr.bf16.vlgmr.msra.gmra.mrb[136].mxu0 %v4219_v16 }
 0x7bc   :  { %4523 = vmatprep.mubr.bf16.mxu0 %v4224_v58 }
 0x7c3   :  { %4524 = vmatmul.mubr.bf16.gmra.mrb[140].mxu0 %v4223_v30 }
 0x7d0   :  { %v4033_v36 = vpop.f32.mrb[88].mxu1 }
 0x7d1   :  { %v4034_v25 = vadd.f32 %v4033_v36, %v3339_v19  ;;  %v4035_v14 = vpop.f32.mrb[89].mxu1 }
 0x7d2   :  { %v4036_v10 = vadd.f32 %v4035_v14, %v3343_v47  ;;  %v4037_v62 = vpop.f32.mrb[90].mxu1 }
 0x7d3   :  { %v4038_v56 = vadd.f32 %v4037_v62, %v3339_v19  ;;  %v4039_v54 = vpop.f32.mrb[91].mxu1  ;;  %v4152_v0 = vmax.f32 %v4034_v25, 0.0 }
 0x7d4   :  { %v4040_v39 = vadd.f32 %v4039_v54, %v3343_v47  ;;  %v4153_v21 = vmax.f32 %v4036_v10, 0.0 }
 0x7d5   :  { %v4160_v34 = vmax.f32 %v4038_v56, 0.0 }
 0x7d6   :  { %v4161_v43 = vmax.f32 %v4040_v39, 0.0 }
 0x7d7   :  { %v4221_v58 = vpack.c.bf16 %v4160_v34, %v4152_v0 }
 0x7d8   :  { %v4222_v30 = vpack.c.bf16 %v4161_v43, %v4153_v21  ;;  %v4043_v59 = vpop.f32.mrb[92].mxu1 }
 0x7d9   :  { %v4044_v18 = vpop.f32.mrb[93].mxu1 }
 0x7da   :  { %v4045_v52 = vpop.f32.mrb[94].mxu1  ;;  %4564 = vmatprep.mubr.bf16.mxu1 %v4222_v30 }
 0x7db   :  { %v4046_v51 = vpop.f32.mrb[95].mxu1  ;;  %4565 = vmatmul.mubr.bf16.vlgmr.msra.gmra.mrb[104].mxu1 %v4221_v58 }
 0x7f0   :  { %v4131_v23 = vpop.f32.mrb[96].mxu1 }
 0x7f1   :  { %v4132_v49 = vpop.f32.mrb[97].mxu1 }
 0x7f2   :  { %v4133_v40 = vpop.f32.mrb[98].mxu1 }
 0x7f3   :  { %v4134_v8 = vpop.f32.mrb[99].mxu1 }
 0x7f8   :  { %v4137_v45 = vpop.f32.mrb[100].mxu1 }
 0x7f9   :  { %v4138_v22 = vadd.f32 %v4137_v45, %v3355_v6  ;;  %v4139_v9 = vpop.f32.mrb[101].mxu1 }
 0x7fa   :  { %v4140_v20 = vadd.f32 %v4139_v9, %v3359_v50  ;;  %v4141_v57 = vpop.f32.mrb[102].mxu1 }
 0x7fb   :  { %v4142_v28 = vadd.f32 %v4141_v57, %v3355_v6  ;;  %v4143_v61 = vpop.f32.mrb[103].mxu1  ;;  %v4164_v7 = vmax.f32 %v4138_v22, 0.0 }
 0x7fc   :  { %v4144_v46 = vadd.f32 %v4143_v61, %v3359_v50  ;;  %v4165_v4 = vmax.f32 %v4140_v20, 0.0 }
 0x7fd   :  { %v4168_v42 = vmax.f32 %v4142_v28, 0.0 }
 0x7fe   :  { %v4169_v29 = vmax.f32 %v4144_v46, 0.0 }
 0x7ff   :  { %v4225_v31 = vpack.c.bf16 %v4168_v42, %v4164_v7 }
 0x800   :  { %v4226_v15 = vpack.c.bf16 %v4169_v29, %v4165_v4 }
 0x802   :  { %4572 = vmatprep.mubr.bf16.mxu1 %v4226_v15 }
 0x803   :  { %4573 = vmatmul.mubr.bf16.gmra.mrb[108].mxu1 %v4225_v31 }
 0x828   :  { %v4205_v37 = vpop.xlane.xlu0 %4204 }
 0x829   :  { %v4217_v44 = vadd.f32 %v7653_v48, %v4205_v37 }
 0x82a   :  { %v4210_v27 = vpop.xlane.xlu1 %4209 }
 0x82b   :  { %4589 = vst.msk [vmem:[#allocation20] sm:$0xff] %vm4588_vm9, %v4217_v44  ;;  %v4218_v38 = vadd.f32 %v7653_v48, %v4210_v27 }
 0x82d   :  { %4590 = vst.msk [vmem:[#allocation20 + $0x8] sm:$0xff] %vm4588_vm9, %v4218_v38 }
 0x88e   :  { %v5005_v1 = vpop.f32.mrb[136].mxu0 }
 0x88f   :  { %v5006_v24 = vpop.f32.mrb[137].mxu0 }
 0x890   :  { %v5007_v41 = vadd.f32 %v5006_v24, %v5005_v1  ;;  %v5008_v60 = vpop.f32.mrb[138].mxu0 }
 0x891   :  { %v5009_v63 = vpop.f32.mrb[139].mxu0 }
 0x892   :  { %v5010_v13 = vadd.f32 %v5009_v63, %v5008_v60 }
 0x896   :  { %v5011_v3 = vpop.f32.mrb[140].mxu0 }
 0x897   :  { %v5012_v17 = vpop.f32.mrb[141].mxu0 }
 0x898   :  { %v5013_v55 = vadd.f32 %v5012_v17, %v5011_v3  ;;  %v5014_v26 = vpop.f32.mrb[142].mxu0 }
 0x899   :  { %v5015_v16 = vpop.f32.mrb[143].mxu0 }
 0x89a   :  { %v5016_v32 = vadd.f32 %v5015_v16, %v5014_v26 }
 0x8ae   :  { %v5033_v11 = vpop.f32.mrb[104].mxu1 }
 0x8af   :  { %v5034_v2 = vpop.f32.mrb[105].mxu1 }
 0x8b0   :  { %v5035_v53 = vadd.f32 %v5034_v2, %v5033_v11  ;;  %v5036_v33 = vpop.f32.mrb[106].mxu1 }
 0x8b1   :  { %v5037_v35 = vpop.f32.mrb[107].mxu1 }
 0x8b2   :  { %v4567_v19 = vadd.f32 %v5035_v53, %v5007_v41  ;;  %v5038_v48 = vadd.f32 %v5037_v35, %v5036_v33 }
 0x8b4   :  { %v4570_v5 = vadd.f32 %v5038_v48, %v5010_v13  ;;  %v4584_v47 = vadd.f32 %v4582_v12, %v4567_v19 }
 0x8b6   :  { %v4585_v36 = vadd.f32 %v4582_v12, %v4570_v5  ;;  %4593 = vrot.lane.b32.xlu0 %v4584_v47, %s6087_s4 }
 0x8b8   :  { %4595 = vrot.lane.b32.xlu1 %v4585_v36, %s6087_s4 }
 0x8d6   :  { %v5039_v25 = vpop.f32.mrb[108].mxu1 }
 0x8d7   :  { %v5040_v14 = vpop.f32.mrb[109].mxu1 }
 0x8d8   :  { %v5041_v10 = vadd.f32 %v5040_v14, %v5039_v25  ;;  %v5042_v62 = vpop.f32.mrb[110].mxu1 }
 0x8d9   :  { %v5043_v56 = vpop.f32.mrb[111].mxu1 }
 0x8da   :  { %v4575_v54 = vadd.f32 %v5041_v10, %v5013_v55  ;;  %v5044_v39 = vadd.f32 %v5043_v56, %v5042_v62 }
 0x8dc   :  { %v4586_v0 = vadd.f32 %v4582_v12, %v4575_v54  ;;  %v4578_v34 = vadd.f32 %v5044_v39, %v5016_v32 }
 0x8de   :  { %v4587_v21 = vadd.f32 %v4582_v12, %v4578_v34  ;;  %4604 = vrot.lane.b32.xlu0 %v4586_v0, %s6087_s4 }
 0x8e0   :  { %4606 = vrot.lane.b32.xlu1 %v4587_v21, %s6087_s4 }
 0x928   :  { %v4594_v43 = vpop.permute.xlu0 %4593 }
 0x929   :  { %4600 = vst.msk [vmem:[#allocation20] sm:$0xff] %vm4599_vm10, %v4594_v43 }
 0x92a   :  { %v4596_v58 = vpop.permute.xlu1 %4595 }
 0x92b   :  { %4601 = vst.msk [vmem:[#allocation20 + $0x8] sm:$0xff] %vm4599_vm10, %v4596_v58 }
 0x950   :  { %v4605_v30 = vpop.permute.xlu0 %4604 }
 0x951   :  { %4611 = vst.msk [vmem:[#allocation20] sm:$0xff] %vm4610_vm11, %v4605_v30 }
 0x952   :  { %v4607_v59 = vpop.permute.xlu1 %4606 }
 0x953   :  { %4612 = vst.msk [vmem:[#allocation20 + $0x8] sm:$0xff] %vm4610_vm11, %v4607_v59 }
 0x954   :  { %6043 = shalt.err (!%p6040_p8)
}
 0x955   :  { %s6044_s30 = scalar_lea.hbm %s7720_s11, 256 }
 0x956   :  { %p6045_p9 = scmp.ne.s32.totalorder %s7720_s11, %s6044_s30  ;;  %p6048_p10 = scmp.lt.u32.totalorder %s6044_s30, %s7720_s11 }
 0x958   :  { %p6050_p11 = pnand %p6048_p10, %p6045_p9 }
 0x95a   :  { %6053 = shalt.err (!%p6050_p11)
}
 0x95b   :  { %s6089_s19 = smov 128   ;;  %s6090_s20 = smov 8  }
 0x95c   :  { %4624 = dma.vmem_to_hbm [thread:$0]  %s4619_s29, 256, %s7720_s11, [#allocation4], %s6089_s19, %s6089_s19, %s6090_s20  }
 0x95d   :  { %6066 = dma.done.wait [#allocation4], 256  }
 0x95e   :  { %6067 = vsyncadd [#allocation4], 4294967040 }
 0x95f   :  { %4628 = vsyncpa [#allocation3], 1 }
 0x960   :  { %4629 = vsyncpa [#allocation6], 1 }
 0x961   :  { %4630 = vsyncpa [#allocation9], 1 }
 0x962   :  { %4631 = vsyncpa [#allocation12], 1 }
 0x963   :  { %4632 = vsyncpa [#allocation15], 1 }
 0x964   :  { %4633 = vsyncpa [#allocation18], 1 }
 0x965   :  { %4634 = vsyncpa [#allocation4], 1 }

// kernel: tpu_custom_call.1
= control target key start
LH: loop header
LB: loop body
LE: loop exit
PB: predicated region body
PF: predicated region fallthrough
CT: control target
= control target key end

     0   :  { %16 = vsyncpa [#allocation3], 0  ;;  %s7709_s0 = inlined_call_operand.hbm [shape: f32[256,256], index: 0, kind: input, shape index: {}]   ;;  %s7710_s1 = inlined_call_operand.hbm [shape: bf16[256,128], index: 1, kind: input, shape index: {}]   ;;  %s7711_s2 = inlined_call_operand.hbm [shape: f32[1,128], index: 2, kind: input, shape index: {}]   ;;  %s7712_s3 = inlined_call_operand.hbm [shape: bf16[128,512], index: 3, kind: input, shape index: {}]   ;;  %s7713_s4 = inlined_call_operand.hbm [shape: f32[1,512], index: 4, kind: input, shape index: {}]   ;;  %s7714_s5 = inlined_call_operand.hbm [shape: f32[1,256], index: 5, kind: input, shape index: {}]   ;;  %s7715_s6 = inlined_call_operand.hbm [shape: bf16[128,1536], index: 6, kind: input, shape index: {}]   ;;  %s7716_s7 = inlined_call_operand.hbm [shape: f32[1,1536], index: 7, kind: input, shape index: {}]   ;;  %s7717_s8 = inlined_call_operand.hbm [shape: f32[1,512], index: 8, kind: input, shape index: {}]   ;;  %s7718_s9 = inlined_call_operand.hbm [shape: bf16[512,6], index: 9, kind: input, shape index: {}]   ;;  %s7719_s10 = inlined_call_operand.hbm [shape: f32[1,7], index: 10, kind: input, shape index: {}]   ;;  %s7720_s11 = inlined_call_operand.hbm [shape: f32[16,7], index: 11, kind: output, shape index: {}]  }
   0x1   :  { %17 = vsyncpa [#allocation6], 0 }
   0x2   :  { %18 = vsyncpa [#allocation9], 0 }
   0x3   :  { %19 = vsyncpa [#allocation12], 0 }
   0x4   :  { %20 = vsyncpa [#allocation15], 0 }
   0x5   :  { %21 = vsyncpa [#allocation18], 0 }
   0x6   :  { %22 = vsyncpa [#allocation4], 0  ;;  %s6068_s17 = smov [#allocation5]   ;;  %s5790_s21 = scalar_lea.hbm %s7710_s1, 2048 }
   0x7   :  { %s40_s18 = sshll.u32 %s6068_s17, 4  ;;  %p5791_p0 = scmp.ne.s32.totalorder %s7710_s1, %s5790_s21  ;;  %s41_s18 = int_to_ptr.vmem [resolvable:$true] %s40_s18 }
   0x8   :  { %p5794_p1 = scmp.lt.u32.totalorder %s5790_s21, %s7710_s1 }
   0xa   :  { %p5796_p2 = pnand %p5794_p1, %p5791_p0 }
   0xc   :  { %5799 = shalt.err (!%p5796_p2)
}
   0xd   :  { %s5800_s26 = scalar_lea.vmem %s41_s18, 2048  ;;  %p5805_p4 = scmp.lt.s32.totalorder %s41_s18, %s41_s18 }
   0xe   :  { %p5801_p3 = scmp.ne.s32.totalorder %s41_s18, %s5800_s26  ;;  %p5806_p5 = scmp.lt.s32.totalorder %s5800_s26, %s5800_s26 }
  0x10   :  { %p5807_p6 = por %p5806_p5, %p5805_p4 }
  0x12   :  { %p5808_p7 = pnand %p5807_p6, %p5801_p3 }
  0x14   :  { %5811 = shalt.err (!%p5808_p7)
}
  0x15   :  { %s6069_s27 = smov 64   ;;  %s6070_s28 = smov 4  }
  0x16   :  { %46 = dma.hbm_to_vmem [thread:$0]  %s7710_s1, 2048, %s41_s18, [#allocation6], %s6069_s27, %s6069_s27, %s6070_s28  }
  0x17   :  { %s6071_s12 = smov [#allocation8]   ;;  %s6072_s14 = smov [#allocation11]  }
  0x18   :  { %s62_s13 = sshll.u32 %s6071_s12, 4  ;;  %s85_s15 = sshll.u32 %s6072_s14, 4  ;;  %s63_s13 = int_to_ptr.vmem [resolvable:$true] %s62_s13  ;;  %s86_s15 = int_to_ptr.vmem [resolvable:$true] %s85_s15 }
  0x19   :  { %s5812_s19 = scalar_lea.hbm %s7712_s3, 4096 }
  0x1a   :  { %p5813_p8 = scmp.ne.s32.totalorder %s7712_s3, %s5812_s19  ;;  %p5816_p9 = scmp.lt.u32.totalorder %s5812_s19, %s7712_s3 }
  0x1c   :  { %p5818_p10 = pnand %p5816_p9, %p5813_p8 }
  0x1e   :  { %5821 = shalt.err (!%p5818_p10)
}
  0x1f   :  { %s5822_s1 = scalar_lea.vmem %s63_s13, 4096  ;;  %p5827_p12 = scmp.lt.s32.totalorder %s63_s13, %s63_s13 }
  0x20   :  { %p5823_p11 = scmp.ne.s32.totalorder %s63_s13, %s5822_s1  ;;  %p5828_p13 = scmp.lt.s32.totalorder %s5822_s1, %s5822_s1 }
  0x22   :  { %p5829_p0 = por %p5828_p13, %p5827_p12 }
  0x24   :  { %p5830_p1 = pnand %p5829_p0, %p5823_p11 }
  0x26   :  { %5833 = shalt.err (!%p5830_p1)
}
  0x27   :  { %s6073_s18 = smov 256   ;;  %s6074_s24 = smov 16  }
  0x28   :  { %68 = dma.hbm_to_vmem [thread:$0]  %s7712_s3, 4096, %s63_s13, [#allocation9], %s6073_s18, %s6073_s18, %s6074_s24  }
  0x29   :  { %s5834_s12 = scalar_lea.hbm %s7714_s5, 32 }
  0x2a   :  { %p5835_p2 = scmp.ne.s32.totalorder %s7714_s5, %s5834_s12  ;;  %p5838_p3 = scmp.lt.u32.totalorder %s5834_s12, %s7714_s5 }
  0x2c   :  { %p5840_p4 = pnand %p5838_p3, %p5835_p2 }
  0x2e   :  { %5843 = shalt.err (!%p5840_p4)
}
  0x2f   :  { %s5844_s20 = scalar_lea.vmem %s86_s15, 32  ;;  %p5849_p6 = scmp.lt.s32.totalorder %s86_s15, %s86_s15 }
  0x30   :  { %p5845_p5 = scmp.ne.s32.totalorder %s86_s15, %s5844_s20  ;;  %p5850_p7 = scmp.lt.s32.totalorder %s5844_s20, %s5844_s20 }
  0x32   :  { %p5851_p8 = por %p5850_p7, %p5849_p6 }
  0x34   :  { %p5852_p9 = pnand %p5851_p8, %p5845_p5 }
  0x36   :  { %5855 = shalt.err (!%p5852_p9)
}
  0x37   :  { %88 = dma.hbm_to_vmem [thread:$0]  %s7714_s5, 32, %s86_s15, [#allocation12]  }
  0x38   :  { %s6075_s21 = smov [#allocation14]   ;;  %s6076_s23 = smov [#allocation17]  }
  0x39   :  { %s107_s22 = sshll.u32 %s6075_s21, 4  ;;  %s126_s1 = sshll.u32 %s6076_s23, 4  ;;  %s108_s22 = int_to_ptr.vmem [resolvable:$true] %s107_s22  ;;  %s127_s1 = int_to_ptr.vmem [resolvable:$true] %s126_s1 }
  0x3a   :  { %s5856_s29 = scalar_lea.hbm %s7716_s7, 192 }
  0x3b   :  { %p5857_p10 = scmp.ne.s32.totalorder %s7716_s7, %s5856_s29  ;;  %p5860_p11 = scmp.lt.u32.totalorder %s5856_s29, %s7716_s7 }
  0x3d   :  { %p5862_p12 = pnand %p5860_p11, %p5857_p10 }
  0x3f   :  { %5865 = shalt.err (!%p5862_p12)
}
  0x40   :  { %s5866_s5 = scalar_lea.vmem %s108_s22, 192  ;;  %p5871_p0 = scmp.lt.s32.totalorder %s108_s22, %s108_s22 }
  0x41   :  { %p5867_p13 = scmp.ne.s32.totalorder %s108_s22, %s5866_s5  ;;  %p5872_p1 = scmp.lt.s32.totalorder %s5866_s5, %s5866_s5 }
  0x43   :  { %p5873_p2 = por %p5872_p1, %p5871_p0 }
  0x45   :  { %p5874_p3 = pnand %p5873_p2, %p5867_p13 }
  0x47   :  { %5877 = shalt.err (!%p5874_p3)
}
  0x48   :  { %110 = dma.hbm_to_vmem [thread:$0]  %s7716_s7, 192, %s108_s22, [#allocation15]  }
  0x49   :  { %s5878_s3 = scalar_lea.hbm %s7718_s9, 4096 }
  0x4a   :  { %p5879_p4 = scmp.ne.s32.totalorder %s7718_s9, %s5878_s3  ;;  %p5882_p5 = scmp.lt.u32.totalorder %s5878_s3, %s7718_s9 }
  0x4c   :  { %p5884_p6 = pnand %p5882_p5, %p5879_p4 }
  0x4e   :  { %5887 = shalt.err (!%p5884_p6)
}
  0x4f   :  { %s5888_s26 = scalar_lea.vmem %s127_s1, 4096  ;;  %p5893_p8 = scmp.lt.s32.totalorder %s127_s1, %s127_s1 }
  0x50   :  { %p5889_p7 = scmp.ne.s32.totalorder %s127_s1, %s5888_s26  ;;  %p5894_p9 = scmp.lt.s32.totalorder %s5888_s26, %s5888_s26 }
  0x52   :  { %p5895_p10 = por %p5894_p9, %p5893_p8 }
  0x54   :  { %p5896_p11 = pnand %p5895_p10, %p5889_p7 }
  0x56   :  { %5899 = shalt.err (!%p5896_p11)
}
  0x57   :  { %132 = dma.hbm_to_vmem [thread:$0]  %s7718_s9, 4096, %s127_s1, [#allocation18], %s6069_s27, %s6069_s27, %s6070_s28  }
  0x58   :  { %s6077_s29 = smov [#allocation2]   ;;  %s6078_s12 = smov [#allocation7]  }
  0x59   :  { %s28_s30 = sshll.u32 %s6077_s29, 4  ;;  %s53_s14 = sshll.u32 %s6078_s12, 4  ;;  %s29_s30 = int_to_ptr.vmem [resolvable:$true] %s28_s30  ;;  %s54_s14 = int_to_ptr.vmem [resolvable:$true] %s53_s14 }
  0x5a   :  { %s5900_s15 = scalar_lea.hbm %s7709_s0, 8192 }
  0x5b   :  { %p5901_p12 = scmp.ne.s32.totalorder %s7709_s0, %s5900_s15  ;;  %p5904_p13 = scmp.lt.u32.totalorder %s5900_s15, %s7709_s0 }
  0x5d   :  { %p5906_p0 = pnand %p5904_p13, %p5901_p12 }
  0x5f   :  { %5909 = shalt.err (!%p5906_p0)
}
  0x60   :  { %s5910_s9 = scalar_lea.vmem %s29_s30, 8192  ;;  %p5915_p2 = scmp.lt.s32.totalorder %s29_s30, %s29_s30 }
  0x61   :  { %p5911_p1 = scmp.ne.s32.totalorder %s29_s30, %s5910_s9  ;;  %p5916_p3 = scmp.lt.s32.totalorder %s5910_s9, %s5910_s9 }
  0x63   :  { %p5917_p4 = por %p5916_p3, %p5915_p2 }
  0x65   :  { %p5918_p5 = pnand %p5917_p4, %p5911_p1 }
  0x67   :  { %5921 = shalt.err (!%p5918_p5)
}
  0x68   :  { %34 = dma.hbm_to_vmem [thread:$0]  %s7709_s0, 8192, %s29_s30, [#allocation3], %s6073_s18, %s6073_s18, %s6074_s24  }
  0x69   :  { %s5922_s21 = scalar_lea.hbm %s7711_s2, 16 }
  0x6a   :  { %p5923_p6 = scmp.ne.s32.totalorder %s7711_s2, %s5922_s21  ;;  %p5926_p7 = scmp.lt.u32.totalorder %s5922_s21, %s7711_s2 }
  0x6c   :  { %p5928_p8 = pnand %p5926_p7, %p5923_p6 }
  0x6e   :  { %5931 = shalt.err (!%p5928_p8)
}
  0x6f   :  { %s5932_s22 = scalar_lea.vmem %s54_s14, 16  ;;  %s5936_s29 = scalar_lea.vmem %s54_s14, 32 }
  0x70   :  { %p5933_p9 = scmp.ne.s32.totalorder %s54_s14, %s5932_s22  ;;  %p5937_p10 = scmp.lt.s32.totalorder %s54_s14, %s54_s14 }
  0x71   :  { %p5938_p11 = scmp.lt.s32.totalorder %s5936_s29, %s5932_s22 }
  0x73   :  { %p5939_p12 = por %p5938_p11, %p5937_p10 }
  0x75   :  { %p5940_p13 = pnand %p5939_p12, %p5933_p9 }
  0x77   :  { %5943 = shalt.err (!%p5940_p13)
}
  0x78   :  { %56 = dma.hbm_to_vmem [thread:$0]  %s7711_s2, 16, %s54_s14, [#allocation6]  }
  0x79   :  { %s6079_s24 = smov [#allocation10]   ;;  %s6080_s12 = smov [#allocation13]  }
  0x7a   :  { %s75_s30 = sshll.u32 %s6079_s24, 4  ;;  %s94_s16 = sshll.u32 %s6080_s12, 4  ;;  %s76_s30 = int_to_ptr.vmem [resolvable:$true] %s75_s30  ;;  %s95_s16 = int_to_ptr.vmem [resolvable:$true] %s94_s16 }
  0x7b   :  { %s5944_s17 = scalar_lea.hbm %s7713_s4, 64 }
  0x7c   :  { %p5945_p0 = scmp.ne.s32.totalorder %s7713_s4, %s5944_s17  ;;  %p5948_p1 = scmp.lt.u32.totalorder %s5944_s17, %s7713_s4 }
  0x7e   :  { %p5950_p2 = pnand %p5948_p1, %p5945_p0 }
  0x80   :  { %5953 = shalt.err (!%p5950_p2)
}
  0x81   :  { %s5954_s2 = scalar_lea.vmem %s76_s30, 64  ;;  %p5959_p4 = scmp.lt.s32.totalorder %s76_s30, %s76_s30 }
  0x82   :  { %p5955_p3 = scmp.ne.s32.totalorder %s76_s30, %s5954_s2  ;;  %p5960_p5 = scmp.lt.s32.totalorder %s5954_s2, %s5954_s2 }
  0x84   :  { %p5961_p6 = por %p5960_p5, %p5959_p4 }
  0x86   :  { %p5962_p7 = pnand %p5961_p6, %p5955_p3 }
  0x88   :  { %5965 = shalt.err (!%p5962_p7)
}
  0x89   :  { %78 = dma.hbm_to_vmem [thread:$0]  %s7713_s4, 64, %s76_s30, [#allocation9]  }
  0x8a   :  { %s5966_s13 = scalar_lea.hbm %s7715_s6, 12288 }
  0x8b   :  { %p5967_p8 = scmp.ne.s32.totalorder %s7715_s6, %s5966_s13  ;;  %p5970_p9 = scmp.lt.u32.totalorder %s5966_s13, %s7715_s6 }
  0x8d   :  { %p5972_p10 = pnand %p5970_p9, %p5967_p8 }
  0x8f   :  { %5975 = shalt.err (!%p5972_p10)
}
  0x90   :  { %s5976_s7 = scalar_lea.vmem %s95_s16, 12288  ;;  %p5981_p12 = scmp.lt.s32.totalorder %s95_s16, %s95_s16 }
  0x91   :  { %p5977_p11 = scmp.ne.s32.totalorder %s95_s16, %s5976_s7  ;;  %p5982_p13 = scmp.lt.s32.totalorder %s5976_s7, %s5976_s7 }
  0x93   :  { %p5983_p0 = por %p5982_p13, %p5981_p12 }
  0x95   :  { %p5984_p1 = pnand %p5983_p0, %p5977_p11 }
  0x97   :  { %5987 = shalt.err (!%p5984_p1)
}
  0x98   :  { %s6081_s4 = smov 768   ;;  %s6082_s22 = smov 48  }
  0x99   :  { %100 = dma.hbm_to_vmem [thread:$0]  %s7715_s6, 12288, %s95_s16, [#allocation12], %s6081_s4, %s6081_s4, %s6082_s22  }
  0x9a   :  { %s6083_s18 = smov [#allocation16]   ;;  %s6084_s30 = smov [#allocation19]  }
  0x9b   :  { %s117_s24 = sshll.u32 %s6083_s18, 4  ;;  %s139_s12 = sshll.u32 %s6084_s30, 4  ;;  %s118_s24 = int_to_ptr.vmem [resolvable:$true] %s117_s24  ;;  %s140_s12 = int_to_ptr.vmem [resolvable:$true] %s139_s12 }
  0x9c   :  { %s5988_s17 = scalar_lea.hbm %s7717_s8, 64 }
  0x9d   :  { %p5989_p2 = scmp.ne.s32.totalorder %s7717_s8, %s5988_s17  ;;  %p5992_p3 = scmp.lt.u32.totalorder %s5988_s17, %s7717_s8 }
  0x9f   :  { %p5994_p4 = pnand %p5992_p3, %p5989_p2 }
  0xa1   :  { %5997 = shalt.err (!%p5994_p4)
}
  0xa2   :  { %s5998_s6 = scalar_lea.vmem %s118_s24, 64  ;;  %p6003_p6 = scmp.lt.s32.totalorder %s118_s24, %s118_s24 }
  0xa3   :  { %p5999_p5 = scmp.ne.s32.totalorder %s118_s24, %s5998_s6  ;;  %p6004_p7 = scmp.lt.s32.totalorder %s5998_s6, %s5998_s6 }
  0xa5   :  { %p6005_p8 = por %p6004_p7, %p6003_p6 }
  0xa7   :  { %p6006_p9 = pnand %p6005_p8, %p5999_p5 }
  0xa9   :  { %6009 = shalt.err (!%p6006_p9)
}
  0xaa   :  { %120 = dma.hbm_to_vmem [thread:$0]  %s7717_s8, 64, %s118_s24, [#allocation15]  }
  0xab   :  { %s6010_s28 = scalar_lea.hbm %s7719_s10, 16 }
  0xac   :  { %p6011_p10 = scmp.ne.s32.totalorder %s7719_s10, %s6010_s28  ;;  %p6014_p11 = scmp.lt.u32.totalorder %s6010_s28, %s7719_s10 }
  0xae   :  { %p6016_p12 = pnand %p6014_p11, %p6011_p10 }
  0xb0   :  { %6019 = shalt.err (!%p6016_p12)
}
  0xb1   :  { %s6020_s25 = scalar_lea.vmem %s140_s12, 16  ;;  %s6024_s26 = scalar_lea.vmem %s140_s12, 32 }
  0xb2   :  { %p6021_p13 = scmp.ne.s32.totalorder %s140_s12, %s6020_s25  ;;  %p6025_p0 = scmp.lt.s32.totalorder %s140_s12, %s140_s12 }
  0xb3   :  { %p6026_p1 = scmp.lt.s32.totalorder %s6024_s26, %s6020_s25 }
  0xb5   :  { %p6027_p2 = por %p6026_p1, %p6025_p0 }
  0xb7   :  { %p6028_p3 = pnand %p6027_p2, %p6021_p13 }
  0xb9   :  { %6031 = shalt.err (!%p6028_p3)
}
  0xba   :  { %142 = dma.hbm_to_vmem [thread:$0]  %s7719_s10, 16, %s140_s12, [#allocation18]  }
  0xbb   :  { %6054 = dma.done.wait [#allocation3], 8192  }
  0xbc   :  { %6055 = vsyncadd [#allocation3], 4294959104 }
  0xbd   :  { %6056 = dma.done.wait [#allocation6], 2064  }
  0xbe   :  { %6057 = vsyncadd [#allocation6], 4294965232 }
  0xbf   :  { %6058 = dma.done.wait [#allocation9], 4160  }
  0xc0   :  { %6059 = vsyncadd [#allocation9], 4294963136 }
  0xc1   :  { %6060 = dma.done.wait [#allocation12], 12320  }
  0xc2   :  { %6061 = vsyncadd [#allocation12], 4294954976 }
  0xc3   :  { %6062 = dma.done.wait [#allocation15], 256  }
  0xc4   :  { %6063 = vsyncadd [#allocation15], 4294967040 }
  0xc5   :  { %6064 = dma.done.wait [#allocation18], 4112  }
  0xc6   :  { %6065 = vsyncadd [#allocation18], 4294963184  ;;  %v5070_v0 = vld [vmem:[#allocation5 + $0x40] sm:$0xff]   ;;  %v5072_v2 = vld [vmem:[#allocation5 + $0x48] sm:$0xff]   ;;  %vm1944_vm0 = vcmask 130112   ;;  %vm2081_vm1 = vcmask 1041409  }
  0xc7   :  { %v5071_v1 = vld [vmem:[#allocation5] sm:$0xff]   ;;  %4877 = vmatprep.subr.bf16.mxu0 %v5070_v0  ;;  %v5073_v3 = vld [vmem:[#allocation5 + $0x8] sm:$0xff]   ;;  %v5074_v4 = vld [vmem:[#allocation5 + $0x50] sm:$0xff]   ;;  %vm2083_vm2 = vcmask 1042434   ;;  %vm2085_vm3 = vcmask 1043459   ;;  %vm2087_vm4 = vcmask 1044484  }
  0xc8   :  { %4878 = vmatpush3.bf16.msra.mxu0 %v5071_v1  ;;  %v5075_v5 = vld [vmem:[#allocation5 + $0x10] sm:$0xff]   ;;  %v5076_v6 = vld [vmem:[#allocation5 + $0x58] sm:$0xff]   ;;  %v5078_v8 = vld [vmem:[#allocation5 + $0x60] sm:$0xff]   ;;  %vm2089_vm5 = vcmask 1045509   ;;  %vm2091_vm6 = vcmask 1046534   ;;  %vm2104_vm7 = vcmask 130048  }
  0xc9   :  { %4879 = vmatprep.subr.bf16.mxu0 %v5072_v2  ;;  %v5077_v7 = vld [vmem:[#allocation5 + $0x18] sm:$0xff]   ;;  %v5079_v9 = vld [vmem:[#allocation5 + $0x20] sm:$0xff]   ;;  %v5080_v10 = vld [vmem:[#allocation5 + $0x68] sm:$0xff]   ;;  %vm2093_vm8 = vcmask 1047559   ;;  %s6086_s10 = smov 127   ;;  %vm4588_vm9 = vcmask 7168  }
  0xca   :  { %v178_v11 = vld [vmem:[#allocation2 + $0x8] sm:$0xff]  ;;  %v180_v12 = vld [vmem:[#allocation2 + $0x18] sm:$0xff]  ;;  %v5082_v15 = vld [vmem:[#allocation5 + $0x70] sm:$0xff]   ;;  %s6087_s4 = smov 1   ;;  %vm4599_vm10 = vcmask 31752   ;;  %vm4610_vm11 = vcmask 56352  }
  0xcb   :  { %v242_v13 = vpack.c.bf16 %v180_v12, %v178_v11  ;;  %v5081_v14 = vld [vmem:[#allocation5 + $0x28] sm:$0xff]   ;;  %v5083_v16 = vld [vmem:[#allocation5 + $0x30] sm:$0xff]   ;;  %v5084_v17 = vld [vmem:[#allocation5 + $0x78] sm:$0xff]   ;;  %s6088_s22 = smov [#allocation20]  }
  0xcc   :  { %4880 = vmatpush3.bf16.msra.mxu0 %v5073_v3  ;;  %v5085_v18 = vld [vmem:[#allocation5 + $0x38] sm:$0xff]   ;;  %v177_v19 = vld [vmem:[#allocation2] sm:$0xff]  ;;  %v179_v20 = vld [vmem:[#allocation2 + $0x10] sm:$0xff]  ;;  %s4618_s29 = sshll.u32 %s6088_s22, 4  ;;  %s4619_s29 = int_to_ptr.vmem [resolvable:$true] %s4618_s29 }
  0xcd   :  { %4881 = vmatprep.subr.bf16.mxu0 %v5074_v4  ;;  %440 = vmatprep.mubr.bf16.mxu0 %v242_v13  ;;  %v182_v21 = vld [vmem:[#allocation2 + $0x28] sm:$0xff]  ;;  %v184_v22 = vld [vmem:[#allocation2 + $0x38] sm:$0xff]  ;;  %v241_v23 = vpack.c.bf16 %v179_v20, %v177_v19  ;;  %v181_v27 = vld [vmem:[#allocation2 + $0x20] sm:$0xff]  ;;  %s6032_s0 = scalar_lea.vmem %s4619_s29, 256  ;;  %p6037_p5 = scmp.lt.s32.totalorder %s4619_s29, %s4619_s29 }
  0xce   :  { %v244_v24 = vpack.c.bf16 %v184_v22, %v182_v21  ;;  %v5086_v25 = vld [vmem:[#allocation8 + $0x8] ss:$16 sps:$4 sm:$0xff]   ;;  %v5088_v26 = vld [vmem:[#allocation8 + $0xc] ss:$16 sps:$4 sm:$0xff]   ;;  %v5107_v47 = vld [vmem:[#allocation8 + $0x4] ss:$16 sps:$4 sm:$0xff]   ;;  %p6033_p4 = scmp.ne.s32.totalorder %s4619_s29, %s6032_s0  ;;  %p6038_p6 = scmp.lt.s32.totalorder %s6032_s0, %s6032_s0 }
  0xcf   :  { %v183_v28 = vld [vmem:[#allocation2 + $0x30] sm:$0xff]  ;;  %v186_v29 = vld [vmem:[#allocation2 + $0x48] sm:$0xff]  ;;  %v188_v30 = vld [vmem:[#allocation2 + $0x58] sm:$0xff]  ;;  %831 = vmatprep.subr.bf16.mxu1 %v5107_v47 }
  0xd0   :  { %4882 = vmatpush3.bf16.msra.mxu0 %v5075_v5  ;;  %v5089_v31 = vld [vmem:[#allocation8 + $0x28] ss:$16 sps:$4 sm:$0xff]   ;;  %v5091_v32 = vld [vmem:[#allocation8 + $0x2c] ss:$16 sps:$4 sm:$0xff]   ;;  %v243_v33 = vpack.c.bf16 %v183_v28, %v181_v27  ;;  %v246_v34 = vpack.c.bf16 %v188_v30, %v186_v29  ;;  %v5109_v48 = vld [vmem:[#allocation8] ss:$16 sps:$4 sm:$0xff]   ;;  %p6039_p7 = por %p6038_p6, %p6037_p5 }
  0xd1   :  { %4883 = vmatprep.subr.bf16.mxu0 %v5076_v6  ;;  %v5092_v35 = vld [vmem:[#allocation8 + $0x48] ss:$16 sps:$4 sm:$0xff]   ;;  %v185_v36 = vld [vmem:[#allocation2 + $0x40] sm:$0xff]  ;;  %v187_v38 = vld [vmem:[#allocation2 + $0x50] sm:$0xff]  ;;  %832 = vmatpush1.bf16.msra.mxu1 %v5109_v48 }
  0xd2   :  { %v5094_v37 = vld [vmem:[#allocation8 + $0x4c] ss:$16 sps:$4 sm:$0xff]   ;;  %v5095_v42 = vld [vmem:[#allocation8 + $0x68] ss:$16 sps:$4 sm:$0xff]   ;;  %v245_v44 = vpack.c.bf16 %v187_v38, %v185_v36  ;;  %v5110_v49 = vld [vmem:[#allocation8 + $0x24] ss:$16 sps:$4 sm:$0xff]   ;;  %p6040_p8 = pnand %p6039_p7, %p6033_p4 }
  0xd3   :  { %v5097_v39 = vld [vmem:[#allocation8 + $0x6c] ss:$16 sps:$4 sm:$0xff]   ;;  %v5098_v45 = vld [vmem:[#allocation8 + $0x88] ss:$16 sps:$4 sm:$0xff]   ;;  %v5112_v54 = vld [vmem:[#allocation8 + $0x20] ss:$16 sps:$4 sm:$0xff]   ;;  %833 = vmatprep.subr.bf16.mxu1 %v5110_v49 }
  0xd4   :  { %4884 = vmatpush3.bf16.msra.mxu0 %v5077_v7  ;;  %v190_v40 = vld [vmem:[#allocation2 + $0x68] sm:$0xff]  ;;  %v192_v41 = vld [vmem:[#allocation2 + $0x78] sm:$0xff]  ;;  %v189_v50 = vld [vmem:[#allocation2 + $0x60] sm:$0xff] }
  0xd5   :  { %4885 = vmatprep.subr.bf16.mxu0 %v5078_v8  ;;  %v5100_v43 = vld [vmem:[#allocation8 + $0x8c] ss:$16 sps:$4 sm:$0xff]   ;;  %v248_v46 = vpack.c.bf16 %v192_v41, %v190_v40  ;;  %v5113_v56 = vld [vmem:[#allocation8 + $0x44] ss:$16 sps:$4 sm:$0xff]   ;;  %v5101_v57 = vld [vmem:[#allocation8 + $0xa8] ss:$16 sps:$4 sm:$0xff]   ;;  %834 = vmatpush1.bf16.msra.mxu1 %v5112_v54 }
  0xd6   :  { %v191_v51 = vld [vmem:[#allocation2 + $0x70] sm:$0xff]  ;;  %v194_v53 = vld [vmem:[#allocation2 + $0x88] sm:$0xff]  ;;  %v196_v55 = vld [vmem:[#allocation2 + $0x98] sm:$0xff]  ;;  %835 = vmatprep.subr.bf16.mxu1 %v5113_v56 }
  0xd7   :  { %v5103_v52 = vld [vmem:[#allocation8 + $0xac] ss:$16 sps:$4 sm:$0xff]   ;;  %v247_v59 = vpack.c.bf16 %v191_v51, %v189_v50  ;;  %v5104_v60 = vld [vmem:[#allocation8 + $0xc8] ss:$16 sps:$4 sm:$0xff]   ;;  %v5115_v61 = vld [vmem:[#allocation8 + $0x40] ss:$16 sps:$4 sm:$0xff]   ;;  %v250_v63 = vpack.c.bf16 %v196_v55, %v194_v53 }
  0xd8   :  { %4886 = vmatpush3.bf16.msra.mxu0 %v5079_v9  ;;  %v5106_v58 = vld [vmem:[#allocation8 + $0xcc] ss:$16 sps:$4 sm:$0xff]   ;;  %v5116_v62 = vld [vmem:[#allocation8 + $0x64] ss:$16 sps:$4 sm:$0xff]   ;;  %v5118_v1 = vld [vmem:[#allocation8 + $0x60] ss:$16 sps:$4 sm:$0xff]  }
  0xd9   :  { %4887 = vmatprep.subr.bf16.mxu0 %v5080_v10  ;;  %v5121_v0 = vld [vmem:[#allocation8 + $0xec] ss:$16 sps:$4 sm:$0xff]   ;;  %v5122_v4 = vld [vmem:[#allocation8 + $0x84] ss:$16 sps:$4 sm:$0xff]   ;;  %836 = vmatpush1.bf16.msra.mxu1 %v5115_v61  ;;  %v5119_v7 = vld [vmem:[#allocation8 + $0xe8] ss:$16 sps:$4 sm:$0xff]  }
  0xda   :  { %v193_v2 = vld [vmem:[#allocation2 + $0x80] sm:$0xff]  ;;  %v195_v3 = vld [vmem:[#allocation2 + $0x90] sm:$0xff]  ;;  %v198_v5 = vld [vmem:[#allocation2 + $0xa8] sm:$0xff]  ;;  %837 = vmatprep.subr.bf16.mxu1 %v5116_v62 }
  0xdb   :  { %v200_v6 = vld [vmem:[#allocation2 + $0xb8] sm:$0xff]  ;;  %v5124_v8 = vld [vmem:[#allocation8 + $0x80] ss:$16 sps:$4 sm:$0xff]   ;;  %v249_v9 = vpack.c.bf16 %v195_v3, %v193_v2  ;;  %v202_v13 = vld [vmem:[#allocation2 + $0xc8] sm:$0xff] }
  0xdc   :  { %4888 = vmatpush3.bf16.msra.mxu0 %v5081_v14  ;;  %v252_v10 = vpack.c.bf16 %v200_v6, %v198_v5  ;;  %v197_v11 = vld [vmem:[#allocation2 + $0xa0] sm:$0xff]  ;;  %v199_v12 = vld [vmem:[#allocation2 + $0xb0] sm:$0xff]  ;;  %v204_v14 = vld [vmem:[#allocation2 + $0xd8] sm:$0xff] }
  0xdd   :  { %4889 = vmatprep.subr.bf16.mxu0 %v5082_v15  ;;  %838 = vmatpush1.bf16.msra.mxu1 %v5118_v1  ;;  %v251_v15 = vpack.c.bf16 %v199_v12, %v197_v11  ;;  %v206_v19 = vld [vmem:[#allocation2 + $0xe8] sm:$0xff]  ;;  %v208_v20 = vld [vmem:[#allocation2 + $0xf8] sm:$0xff]  ;;  %v209_v29 = vld [vmem:[#allocation2 + $0x100] sm:$0xff]  ;;  %v7721_v1 = vmov 0  }
  0xde   :  { %839 = vmatprep.subr.bf16.mxu1 %v5122_v4  ;;  %v256_v22 = vpack.c.bf16 %v208_v20, %v206_v19  ;;  %v211_v30 = vld [vmem:[#allocation2 + $0x110] sm:$0xff]  ;;  %v220_v38 = vld [vmem:[#allocation2 + $0x158] sm:$0xff]  ;;  %v217_v41 = vld [vmem:[#allocation2 + $0x140] sm:$0xff]  ;;  %863 = vmatprep.mubr.bf16.mxu1 %v7721_v1 }
  0xdf   :  { %v215_v36 = vld [vmem:[#allocation2 + $0x130] sm:$0xff]  ;;  %v221_v47 = vld [vmem:[#allocation2 + $0x160] sm:$0xff]  ;;  %v226_v50 = vld [vmem:[#allocation2 + $0x188] sm:$0xff]  ;;  %5069 = vset.pattern.permute.xlu1 %v7721_v1  ;;  %5068 = vset.pattern.permute.xlu0 %v7721_v1 }
  0xe0   :  { %4890 = vmatpush3.bf16.msra.mxu0 %v5083_v16  ;;  %v254_v16 = vpack.c.bf16 %v204_v14, %v202_v13  ;;  %v223_v48 = vld [vmem:[#allocation2 + $0x170] sm:$0xff]  ;;  %v228_v51 = vld [vmem:[#allocation2 + $0x198] sm:$0xff]  ;;  %v229_v2 = vld [vmem:[#allocation2 + $0x1a0] sm:$0xff] }
  0xe1   :  { %4891 = vmatprep.subr.bf16.mxu0 %v5084_v17  ;;  %840 = vmatpush1.bf16.msra.mxu1 %v5124_v8  ;;  %v201_v17 = vld [vmem:[#allocation2 + $0xc0] sm:$0xff]  ;;  %v263_v53 = vpack.c.bf16 %v223_v48, %v221_v47  ;;  %v266_v54 = vpack.c.bf16 %v228_v51, %v226_v50  ;;  %v232_v61 = vld [vmem:[#allocation2 + $0x1b8] sm:$0xff]  ;;  %v231_v3 = vld [vmem:[#allocation2 + $0x1b0] sm:$0xff] }
  0xe2   :  { %v5125_v49 = vld [vmem:[#allocation8 + $0xa4] ss:$16 sps:$4 sm:$0xff]   ;;  %v5130_v56 = vld [vmem:[#allocation8 + $0xc0] ss:$16 sps:$4 sm:$0xff]   ;;  %v267_v6 = vpack.c.bf16 %v231_v3, %v229_v2 }
  0xe3   :  { %841 = vmatprep.subr.bf16.mxu1 %v5125_v49  ;;  %v5128_v55 = vld [vmem:[#allocation8 + $0xc4] ss:$16 sps:$4 sm:$0xff]   ;;  %v5133_v62 = vld [vmem:[#allocation8 + $0xe0] ss:$16 sps:$4 sm:$0xff]  }
  0xe4   :  { %4892 = vmatpush3.bf16.msra.mxu0 %v5085_v18  ;;  %v203_v18 = vld [vmem:[#allocation2 + $0xd0] sm:$0xff]  ;;  %v234_v4 = vld [vmem:[#allocation2 + $0x1c8] sm:$0xff]  ;;  %v236_v5 = vld [vmem:[#allocation2 + $0x1d8] sm:$0xff] }
  0xe5   :  { %1024 = vmatprep.subr.bf16.mxu0 %v5088_v26  ;;  %v253_v21 = vpack.c.bf16 %v203_v18, %v201_v17  ;;  %v212_v26 = vld [vmem:[#allocation2 + $0x118] sm:$0xff]  ;;  %v233_v8 = vld [vmem:[#allocation2 + $0x1c0] sm:$0xff] }
  0xe6   :  { %v240_v11 = vld [vmem:[#allocation2 + $0x1f8] sm:$0xff]  ;;  %v237_v14 = vld [vmem:[#allocation2 + $0x1e0] sm:$0xff] }
  0xe7   :  { %441 = vmatmul.mubr.bf16.vlgmr.msra.gmra.mrb[0].mxu0 %v241_v23  ;;  %v205_v23 = vld [vmem:[#allocation2 + $0xe0] sm:$0xff] }
  0xe8   :  { %448 = vmatprep.mubr.bf16.mxu0 %v244_v24  ;;  %1025 = vmatpush1.bf16.msra.mxu0 %v5086_v25  ;;  %v207_v24 = vld [vmem:[#allocation2 + $0xf0] sm:$0xff]  ;;  %v210_v25 = vld [vmem:[#allocation2 + $0x108] sm:$0xff]  ;;  %v6299_v18 = vld [vmem:[#allocation7] ss:$0 sm:$0xff] }
  0xe9   :  { %1026 = vmatprep.subr.bf16.mxu0 %v5091_v32  ;;  %v255_v27 = vpack.c.bf16 %v207_v24, %v205_v23  ;;  %v258_v28 = vpack.c.bf16 %v212_v26, %v210_v25  ;;  %v216_v32 = vld [vmem:[#allocation2 + $0x138] sm:$0xff] }
  0xec   :  { %1027 = vmatpush1.bf16.msra.mxu0 %v5089_v31  ;;  %v214_v31 = vld [vmem:[#allocation2 + $0x128] sm:$0xff] }
  0xed   :  { %1028 = vmatprep.subr.bf16.mxu0 %v5094_v37  ;;  %v218_v37 = vld [vmem:[#allocation2 + $0x148] sm:$0xff] }
  0xee   :  { %v262_v40 = vpack.c.bf16 %v220_v38, %v218_v37 }
  0xef   :  { %449 = vmatmul.mubr.bf16.gmra.mrb[4].mxu0 %v243_v33  ;;  %v257_v33 = vpack.c.bf16 %v211_v30, %v209_v29 }
  0xf0   :  { %456 = vmatprep.mubr.bf16.mxu0 %v246_v34  ;;  %1029 = vmatpush1.bf16.msra.mxu0 %v5092_v35  ;;  %v260_v34 = vpack.c.bf16 %v216_v32, %v214_v31  ;;  %v213_v35 = vld [vmem:[#allocation2 + $0x120] sm:$0xff] }
  0xf1   :  { %1030 = vmatprep.subr.bf16.mxu0 %v5097_v39  ;;  %v259_v39 = vpack.c.bf16 %v215_v36, %v213_v35 }
  0xf4   :  { %1031 = vmatpush1.bf16.msra.mxu0 %v5095_v42  ;;  %v219_v42 = vld [vmem:[#allocation2 + $0x150] sm:$0xff] }
  0xf5   :  { %1032 = vmatprep.subr.bf16.mxu0 %v5100_v43  ;;  %v222_v43 = vld [vmem:[#allocation2 + $0x168] sm:$0xff] }
  0xf7   :  { %457 = vmatmul.mubr.bf16.gmra.mrb[8].mxu0 %v245_v44  ;;  %v224_v44 = vld [vmem:[#allocation2 + $0x178] sm:$0xff] }
  0xf8   :  { %464 = vmatprep.mubr.bf16.mxu0 %v248_v46  ;;  %1033 = vmatpush1.bf16.msra.mxu0 %v5098_v45  ;;  %v261_v45 = vpack.c.bf16 %v219_v42, %v217_v41  ;;  %v264_v46 = vpack.c.bf16 %v224_v44, %v222_v43 }
  0xf9   :  { %1034 = vmatprep.subr.bf16.mxu0 %v5103_v52  ;;  %v5127_v52 = vld [vmem:[#allocation8 + $0xa0] ss:$16 sps:$4 sm:$0xff]  }
  0xfa   :  { %842 = vmatpush1.bf16.msra.mxu1 %v5127_v52 }
  0xfb   :  { %843 = vmatprep.subr.bf16.mxu1 %v5128_v55 }
  0xfc   :  { %1035 = vmatpush1.bf16.msra.mxu0 %v5101_v57  ;;  %v225_v57 = vld [vmem:[#allocation2 + $0x180] sm:$0xff] }
  0xfd   :  { %1036 = vmatprep.subr.bf16.mxu0 %v5106_v58  ;;  %v227_v58 = vld [vmem:[#allocation2 + $0x190] sm:$0xff] }
  0xfe   :  { %844 = vmatpush1.bf16.msra.mxu1 %v5130_v56 }
  0xff   :  { %465 = vmatmul.mubr.bf16.gmra.mrb[12].mxu0 %v247_v59  ;;  %v5131_v59 = vld [vmem:[#allocation8 + $0xe4] ss:$16 sps:$4 sm:$0xff]  }
 0x100   :  { %472 = vmatprep.mubr.bf16.mxu0 %v250_v63  ;;  %1037 = vmatpush1.bf16.msra.mxu0 %v5104_v60  ;;  %v230_v60 = vld [vmem:[#allocation2 + $0x1a8] sm:$0xff]  ;;  %v265_v63 = vpack.c.bf16 %v227_v58, %v225_v57 }
 0x101   :  { %1038 = vmatprep.subr.bf16.mxu0 %v5121_v0  ;;  %845 = vmatprep.subr.bf16.mxu1 %v5131_v59  ;;  %v268_v0 = vpack.c.bf16 %v232_v61, %v230_v60 }
 0x102   :  { %846 = vmatpush1.bf16.msra.mxu1 %v5133_v62 }
 0x104   :  { %1039 = vmatpush1.bf16.msra.mxu0 %v5119_v7  ;;  %v270_v7 = vpack.c.bf16 %v236_v5, %v234_v4 }
 0x107   :  { %473 = vmatmul.mubr.bf16.gmra.mrb[16].mxu0 %v249_v9  ;;  %v235_v9 = vld [vmem:[#allocation2 + $0x1d0] sm:$0xff] }
 0x108   :  { %480 = vmatprep.mubr.bf16.mxu0 %v252_v10  ;;  %v238_v10 = vld [vmem:[#allocation2 + $0x1e8] sm:$0xff]  ;;  %v269_v12 = vpack.c.bf16 %v235_v9, %v233_v8 }
 0x109   :  { %v272_v13 = vpack.c.bf16 %v240_v11, %v238_v10 }
 0x10f   :  { %481 = vmatmul.mubr.bf16.gmra.mrb[20].mxu0 %v251_v15  ;;  %v239_v15 = vld [vmem:[#allocation2 + $0x1f0] sm:$0xff] }
 0x110   :  { %488 = vmatprep.mubr.bf16.mxu0 %v254_v16  ;;  %v271_v16 = vpack.c.bf16 %v239_v15, %v237_v14 }
 0x117   :  { %489 = vmatmul.mubr.bf16.gmra.mrb[24].mxu0 %v253_v21 }
 0x118   :  { %496 = vmatprep.mubr.bf16.mxu0 %v256_v22 }
 0x11f   :  { %497 = vmatmul.mubr.bf16.gmra.mrb[28].mxu0 %v255_v27 }
 0x120   :  { %504 = vmatprep.mubr.bf16.mxu0 %v258_v28 }
 0x127   :  { %505 = vmatmul.mubr.bf16.gmra.mrb[32].mxu0 %v257_v33 }
 0x128   :  { %512 = vmatprep.mubr.bf16.mxu0 %v260_v34 }
 0x12f   :  { %513 = vmatmul.mubr.bf16.gmra.mrb[36].mxu0 %v259_v39 }
 0x130   :  { %520 = vmatprep.mubr.bf16.mxu0 %v262_v40 }
 0x137   :  { %521 = vmatmul.mubr.bf16.gmra.mrb[40].mxu0 %v261_v45 }
 0x138   :  { %528 = vmatprep.mubr.bf16.mxu0 %v264_v46 }
 0x13f   :  { %529 = vmatmul.mubr.bf16.gmra.mrb[44].mxu0 %v263_v53 }
 0x140   :  { %536 = vmatprep.mubr.bf16.mxu0 %v266_v54 }
 0x147   :  { %537 = vmatmul.mubr.bf16.gmra.mrb[48].mxu0 %v265_v63 }
 0x148   :  { %544 = vmatprep.mubr.bf16.mxu0 %v268_v0 }
 0x14f   :  { %545 = vmatmul.mubr.bf16.gmra.mrb[52].mxu0 %v267_v6 }
 0x150   :  { %552 = vmatprep.mubr.bf16.mxu0 %v270_v7 }
 0x157   :  { %553 = vmatmul.mubr.bf16.gmra.mrb[56].mxu0 %v269_v12 }
 0x158   :  { %560 = vmatprep.mubr.bf16.mxu0 %v272_v13 }
 0x15f   :  { %561 = vmatmul.mubr.bf16.gmra.mrb[60].mxu0 %v271_v16 }
 0x160   :  { %1056 = vmatprep.mubr.bf16.mxu0 %v7721_v1 }
 0x1ba   :  { %v4893_v17 = vpop.f32.mrb[0].mxu0 }
 0x1bb   :  { %v4894_v19 = vpop.f32.mrb[1].mxu0 }
 0x1bc   :  { %v4895_v20 = vadd.f32 %v4894_v19, %v4893_v17  ;;  %v4896_v21 = vpop.f32.mrb[2].mxu0 }
 0x1bd   :  { %v4897_v22 = vpop.f32.mrb[3].mxu0 }
 0x1be   :  { %v443_v23 = vadd.f32 %v4895_v20, %v6299_v18  ;;  %v4898_v24 = vadd.f32 %v4897_v22, %v4896_v21 }
 0x1c0   :  { %v446_v25 = vadd.f32 %v4898_v24, %v6299_v18  ;;  %v6303_v26 = vmax.f32 %v443_v23, 0.0 }
 0x1c2   :  { %7808 = vst [vmem:[#allocation28_spill] sm:$0xff] %v6303_v26  ;;  %v6305_v27 = vmax.f32 %v446_v25, 0.0  ;;  %v4899_v28 = vpop.f32.mrb[4].mxu0 }
 0x1c3   :  { %v4900_v29 = vpop.f32.mrb[5].mxu0 }
 0x1c4   :  { %7809 = vst [vmem:[#allocation29_spill] sm:$0xff] %v6305_v27  ;;  %v4901_v30 = vadd.f32 %v4900_v29, %v4899_v28  ;;  %v4902_v31 = vpop.f32.mrb[6].mxu0  ;;  %v601_v32 = vpack.c.bf16 %v6305_v27, %v6303_v26 }
 0x1c5   :  { %v4903_v33 = vpop.f32.mrb[7].mxu0 }
 0x1c6   :  { %v451_v34 = vadd.f32 %v4901_v30, %v6299_v18  ;;  %v4904_v35 = vadd.f32 %v4903_v33, %v4902_v31  ;;  %864 = vmatmul.mubr.bf16.vlgmr.msra.gmra.mrb[0].mxu1 %v601_v32  ;;  %1057 = vmatmul.mubr.bf16.vlgmr.msra.gmra.mrb[64].mxu0 %v601_v32 }
 0x1c7   :  { %873 = vmatprep.mubr.bf16.mxu1 %v7721_v1  ;;  %1066 = vmatprep.mubr.bf16.mxu0 %v7721_v1 }
 0x1c8   :  { %v454_v36 = vadd.f32 %v4904_v35, %v6299_v18  ;;  %v6313_v37 = vmax.f32 %v451_v34, 0.0 }
 0x1ca   :  { %7810 = vst [vmem:[#allocation30_spill] sm:$0xff] %v6313_v37  ;;  %v6315_v38 = vmax.f32 %v454_v36, 0.0  ;;  %v4905_v39 = vpop.f32.mrb[8].mxu0 }
 0x1cb   :  { %v4906_v40 = vpop.f32.mrb[9].mxu0 }
 0x1cc   :  { %7811 = vst [vmem:[#allocation31_spill] sm:$0xff] %v6315_v38  ;;  %v4907_v41 = vadd.f32 %v4906_v40, %v4905_v39  ;;  %v4908_v42 = vpop.f32.mrb[10].mxu0  ;;  %v602_v43 = vpack.c.bf16 %v6315_v38, %v6313_v37 }
 0x1cd   :  { %v4909_v44 = vpop.f32.mrb[11].mxu0 }
 0x1ce   :  { %v459_v45 = vadd.f32 %v4907_v41, %v6299_v18  ;;  %v4910_v46 = vadd.f32 %v4909_v44, %v4908_v42  ;;  %874 = vmatmul.mubr.bf16.gmra.mrb[4].mxu1 %v602_v43  ;;  %1067 = vmatmul.mubr.bf16.gmra.mrb[68].mxu0 %v602_v43 }
 0x1cf   :  { %883 = vmatprep.mubr.bf16.mxu1 %v7721_v1  ;;  %1076 = vmatprep.mubr.bf16.mxu0 %v7721_v1 }
 0x1d0   :  { %v462_v47 = vadd.f32 %v4910_v46, %v6299_v18  ;;  %v6323_v48 = vmax.f32 %v459_v45, 0.0 }
 0x1d2   :  { %7812 = vst [vmem:[#allocation32_spill] sm:$0xff] %v6323_v48  ;;  %v6325_v49 = vmax.f32 %v462_v47, 0.0  ;;  %v4911_v50 = vpop.f32.mrb[12].mxu0 }
 0x1d3   :  { %v4912_v51 = vpop.f32.mrb[13].mxu0 }
 0x1d4   :  { %7813 = vst [vmem:[#allocation33_spill] sm:$0xff] %v6325_v49  ;;  %v4913_v52 = vadd.f32 %v4912_v51, %v4911_v50  ;;  %v4914_v53 = vpop.f32.mrb[14].mxu0  ;;  %v603_v54 = vpack.c.bf16 %v6325_v49, %v6323_v48 }
 0x1d5   :  { %v4915_v55 = vpop.f32.mrb[15].mxu0 }
 0x1d6   :  { %v4916_v56 = vadd.f32 %v4915_v55, %v4914_v53  ;;  %884 = vmatmul.mubr.bf16.gmra.mrb[8].mxu1 %v603_v54  ;;  %1077 = vmatmul.mubr.bf16.gmra.mrb[72].mxu0 %v603_v54  ;;  %v467_v57 = vadd.f32 %v4913_v52, %v6299_v18 }
 0x1d7   :  { %893 = vmatprep.mubr.bf16.mxu1 %v7721_v1  ;;  %1086 = vmatprep.mubr.bf16.mxu0 %v7721_v1 }
 0x1d8   :  { %v470_v58 = vadd.f32 %v4916_v56, %v6299_v18  ;;  %v6335_v61 = vmax.f32 %v467_v57, 0.0 }
 0x1da   :  { %v6333_v59 = vmax.f32 %v470_v58, 0.0  ;;  %v4917_v60 = vpop.f32.mrb[16].mxu0  ;;  %7815 = vst [vmem:[#allocation35_spill] sm:$0xff] %v6335_v61 }
 0x1db   :  { %v4918_v62 = vpop.f32.mrb[17].mxu0 }
 0x1dc   :  { %7814 = vst [vmem:[#allocation34_spill] sm:$0xff] %v6333_v59  ;;  %v4919_v63 = vadd.f32 %v4918_v62, %v4917_v60  ;;  %v4920_v0 = vpop.f32.mrb[18].mxu0  ;;  %v604_v3 = vpack.c.bf16 %v6333_v59, %v6335_v61 }
 0x1dd   :  { %v4921_v2 = vpop.f32.mrb[19].mxu0 }
 0x1de   :  { %v4922_v4 = vadd.f32 %v4921_v2, %v4920_v0  ;;  %v475_v5 = vadd.f32 %v4919_v63, %v6299_v18  ;;  %894 = vmatmul.mubr.bf16.gmra.mrb[12].mxu1 %v604_v3  ;;  %1087 = vmatmul.mubr.bf16.gmra.mrb[76].mxu0 %v604_v3 }
 0x1df   :  { %903 = vmatprep.mubr.bf16.mxu1 %v7721_v1  ;;  %1096 = vmatprep.mubr.bf16.mxu0 %v7721_v1 }
 0x1e0   :  { %v478_v6 = vadd.f32 %v4922_v4, %v6299_v18  ;;  %v6345_v9 = vmax.f32 %v475_v5, 0.0 }
 0x1e2   :  { %v6343_v7 = vmax.f32 %v478_v6, 0.0  ;;  %v4923_v8 = vpop.f32.mrb[20].mxu0  ;;  %7817 = vst [vmem:[#allocation37_spill] sm:$0xff] %v6345_v9 }
 0x1e3   :  { %v4924_v10 = vpop.f32.mrb[21].mxu0 }
 0x1e4   :  { %7816 = vst [vmem:[#allocation36_spill] sm:$0xff] %v6343_v7  ;;  %v4925_v11 = vadd.f32 %v4924_v10, %v4923_v8  ;;  %v4926_v12 = vpop.f32.mrb[22].mxu0  ;;  %v605_v14 = vpack.c.bf16 %v6343_v7, %v6345_v9 }
 0x1e5   :  { %v4927_v13 = vpop.f32.mrb[23].mxu0 }
 0x1e6   :  { %v4928_v15 = vadd.f32 %v4927_v13, %v4926_v12  ;;  %v483_v16 = vadd.f32 %v4925_v11, %v6299_v18  ;;  %904 = vmatmul.mubr.bf16.gmra.mrb[16].mxu1 %v605_v14  ;;  %1097 = vmatmul.mubr.bf16.gmra.mrb[80].mxu0 %v605_v14 }
 0x1e7   :  { %913 = vmatprep.mubr.bf16.mxu1 %v7721_v1  ;;  %1106 = vmatprep.mubr.bf16.mxu0 %v7721_v1 }
 0x1e8   :  { %v486_v17 = vadd.f32 %v4928_v15, %v6299_v18  ;;  %v6355_v21 = vmax.f32 %v483_v16, 0.0 }
 0x1ea   :  { %v6353_v19 = vmax.f32 %v486_v17, 0.0  ;;  %v4929_v20 = vpop.f32.mrb[24].mxu0  ;;  %7819 = vst [vmem:[#allocation39_spill] sm:$0xff] %v6355_v21 }
 0x1eb   :  { %v4930_v22 = vpop.f32.mrb[25].mxu0 }
 0x1ec   :  { %7818 = vst [vmem:[#allocation38_spill] sm:$0xff] %v6353_v19  ;;  %v4931_v23 = vadd.f32 %v4930_v22, %v4929_v20  ;;  %v4932_v24 = vpop.f32.mrb[26].mxu0  ;;  %v606_v28 = vpack.c.bf16 %v6353_v19, %v6355_v21 }
 0x1ed   :  { %v4933_v25 = vpop.f32.mrb[27].mxu0 }
 0x1ee   :  { %v4934_v29 = vadd.f32 %v4933_v25, %v4932_v24  ;;  %v491_v30 = vadd.f32 %v4931_v23, %v6299_v18  ;;  %914 = vmatmul.mubr.bf16.gmra.mrb[20].mxu1 %v606_v28  ;;  %1107 = vmatmul.mubr.bf16.gmra.mrb[84].mxu0 %v606_v28 }
 0x1ef   :  { %923 = vmatprep.mubr.bf16.mxu1 %v7721_v1  ;;  %1116 = vmatprep.mubr.bf16.mxu0 %v7721_v1 }
 0x1f0   :  { %v494_v31 = vadd.f32 %v4934_v29, %v6299_v18  ;;  %v6365_v34 = vmax.f32 %v491_v30, 0.0 }
 0x1f2   :  { %v6363_v32 = vmax.f32 %v494_v31, 0.0  ;;  %v4935_v33 = vpop.f32.mrb[28].mxu0  ;;  %7821 = vst [vmem:[#allocation41_spill] sm:$0xff] %v6365_v34 }
 0x1f3   :  { %v4936_v35 = vpop.f32.mrb[29].mxu0 }
 0x1f4   :  { %7820 = vst [vmem:[#allocation40_spill] sm:$0xff] %v6363_v32  ;;  %v4937_v36 = vadd.f32 %v4936_v35, %v4935_v33  ;;  %v4938_v39 = vpop.f32.mrb[30].mxu0  ;;  %v607_v41 = vpack.c.bf16 %v6363_v32, %v6365_v34 }
 0x1f5   :  { %v4939_v40 = vpop.f32.mrb[31].mxu0 }
 0x1f6   :  { %v4940_v42 = vadd.f32 %v4939_v40, %v4938_v39  ;;  %v499_v43 = vadd.f32 %v4937_v36, %v6299_v18  ;;  %924 = vmatmul.mubr.bf16.gmra.mrb[24].mxu1 %v607_v41  ;;  %1117 = vmatmul.mubr.bf16.gmra.mrb[88].mxu0 %v607_v41 }
 0x1f7   :  { %933 = vmatprep.mubr.bf16.mxu1 %v7721_v1  ;;  %1126 = vmatprep.mubr.bf16.mxu0 %v7721_v1 }
 0x1f8   :  { %v502_v44 = vadd.f32 %v4940_v42, %v6299_v18  ;;  %v6375_v47 = vmax.f32 %v499_v43, 0.0 }
 0x1fa   :  { %v6373_v45 = vmax.f32 %v502_v44, 0.0  ;;  %v4941_v46 = vpop.f32.mrb[32].mxu0  ;;  %7823 = vst [vmem:[#allocation43_spill] sm:$0xff] %v6375_v47 }
 0x1fb   :  { %v4942_v50 = vpop.f32.mrb[33].mxu0 }
 0x1fc   :  { %7822 = vst [vmem:[#allocation42_spill] sm:$0xff] %v6373_v45  ;;  %v4943_v51 = vadd.f32 %v4942_v50, %v4941_v46  ;;  %v4944_v52 = vpop.f32.mrb[34].mxu0  ;;  %v608_v54 = vpack.c.bf16 %v6373_v45, %v6375_v47 }
 0x1fd   :  { %v4945_v53 = vpop.f32.mrb[35].mxu0 }
 0x1fe   :  { %v4946_v55 = vadd.f32 %v4945_v53, %v4944_v52  ;;  %v507_v56 = vadd.f32 %v4943_v51, %v6299_v18  ;;  %934 = vmatmul.mubr.bf16.gmra.mrb[28].mxu1 %v608_v54  ;;  %1127 = vmatmul.mubr.bf16.gmra.mrb[92].mxu0 %v608_v54 }
 0x1ff   :  { %943 = vmatprep.mubr.bf16.mxu1 %v7721_v1  ;;  %1136 = vmatprep.mubr.bf16.mxu0 %v7721_v1 }
 0x200   :  { %v510_v57 = vadd.f32 %v4946_v55, %v6299_v18  ;;  %v6385_v62 = vmax.f32 %v507_v56, 0.0 }
 0x202   :  { %v6383_v58 = vmax.f32 %v510_v57, 0.0  ;;  %v4947_v60 = vpop.f32.mrb[36].mxu0  ;;  %7825 = vst [vmem:[#allocation45_spill] sm:$0xff] %v6385_v62 }
 0x203   :  { %v4948_v63 = vpop.f32.mrb[37].mxu0 }
 0x204   :  { %7824 = vst [vmem:[#allocation44_spill] sm:$0xff] %v6383_v58  ;;  %v4949_v0 = vadd.f32 %v4948_v63, %v4947_v60  ;;  %v4950_v2 = vpop.f32.mrb[38].mxu0  ;;  %v609_v4 = vpack.c.bf16 %v6383_v58, %v6385_v62 }
 0x205   :  { %v4951_v3 = vpop.f32.mrb[39].mxu0 }
 0x206   :  { %v515_v5 = vadd.f32 %v4949_v0, %v6299_v18  ;;  %v4952_v6 = vadd.f32 %v4951_v3, %v4950_v2  ;;  %944 = vmatmul.mubr.bf16.gmra.mrb[32].mxu1 %v609_v4  ;;  %1137 = vmatmul.mubr.bf16.gmra.mrb[96].mxu0 %v609_v4 }
 0x207   :  { %953 = vmatprep.mubr.bf16.mxu1 %v7721_v1  ;;  %1146 = vmatprep.mubr.bf16.mxu0 %v7721_v1 }
 0x208   :  { %v518_v8 = vadd.f32 %v4952_v6, %v6299_v18  ;;  %v6393_v10 = vmax.f32 %v515_v5, 0.0 }
 0x20a   :  { %7826 = vst [vmem:[#allocation46_spill] sm:$0xff] %v6393_v10  ;;  %v6395_v11 = vmax.f32 %v518_v8, 0.0  ;;  %v4953_v12 = vpop.f32.mrb[40].mxu0 }
 0x20b   :  { %v4954_v13 = vpop.f32.mrb[41].mxu0 }
 0x20c   :  { %7827 = vst [vmem:[#allocation47_spill] sm:$0xff] %v6395_v11  ;;  %v4955_v14 = vadd.f32 %v4954_v13, %v4953_v12  ;;  %v4956_v15 = vpop.f32.mrb[42].mxu0  ;;  %v610_v16 = vpack.c.bf16 %v6395_v11, %v6393_v10 }
 0x20d   :  { %v4957_v17 = vpop.f32.mrb[43].mxu0 }
 0x20e   :  { %v523_v20 = vadd.f32 %v4955_v14, %v6299_v18  ;;  %v4958_v22 = vadd.f32 %v4957_v17, %v4956_v15  ;;  %954 = vmatmul.mubr.bf16.gmra.mrb[36].mxu1 %v610_v16  ;;  %1147 = vmatmul.mubr.bf16.gmra.mrb[100].mxu0 %v610_v16 }
 0x20f   :  { %963 = vmatprep.mubr.bf16.mxu1 %v7721_v1  ;;  %1156 = vmatprep.mubr.bf16.mxu0 %v7721_v1 }
 0x210   :  { %v526_v23 = vadd.f32 %v4958_v22, %v6299_v18  ;;  %v6403_v24 = vmax.f32 %v523_v20, 0.0 }
 0x212   :  { %7828 = vst [vmem:[#allocation48_spill] sm:$0xff] %v6403_v24  ;;  %v6405_v25 = vmax.f32 %v526_v23, 0.0  ;;  %v4959_v28 = vpop.f32.mrb[44].mxu0 }
 0x213   :  { %v4960_v29 = vpop.f32.mrb[45].mxu0 }
 0x214   :  { %7829 = vst [vmem:[#allocation49_spill] sm:$0xff] %v6405_v25  ;;  %v4961_v30 = vadd.f32 %v4960_v29, %v4959_v28  ;;  %v4962_v31 = vpop.f32.mrb[46].mxu0  ;;  %v611_v33 = vpack.c.bf16 %v6405_v25, %v6403_v24 }
 0x215   :  { %v4963_v35 = vpop.f32.mrb[47].mxu0 }
 0x216   :  { %v4964_v36 = vadd.f32 %v4963_v35, %v4962_v31  ;;  %v531_v39 = vadd.f32 %v4961_v30, %v6299_v18  ;;  %964 = vmatmul.mubr.bf16.gmra.mrb[40].mxu1 %v611_v33  ;;  %1157 = vmatmul.mubr.bf16.gmra.mrb[104].mxu0 %v611_v33 }
 0x217   :  { %973 = vmatprep.mubr.bf16.mxu1 %v7721_v1  ;;  %1166 = vmatprep.mubr.bf16.mxu0 %v7721_v1 }
 0x218   :  { %v534_v40 = vadd.f32 %v4964_v36, %v6299_v18  ;;  %v6415_v43 = vmax.f32 %v531_v39, 0.0 }
 0x21a   :  { %v6413_v41 = vmax.f32 %v534_v40, 0.0  ;;  %v4965_v42 = vpop.f32.mrb[48].mxu0  ;;  %7831 = vst [vmem:[#allocation51_spill] sm:$0xff] %v6415_v43 }
 0x21b   :  { %v4966_v44 = vpop.f32.mrb[49].mxu0 }
 0x21c   :  { %7830 = vst [vmem:[#allocation50_spill] sm:$0xff] %v6413_v41  ;;  %v4967_v46 = vadd.f32 %v4966_v44, %v4965_v42  ;;  %v4968_v50 = vpop.f32.mrb[50].mxu0  ;;  %v612_v52 = vpack.c.bf16 %v6413_v41, %v6415_v43 }
 0x21d   :  { %v4969_v51 = vpop.f32.mrb[51].mxu0 }
 0x21e   :  { %v4970_v53 = vadd.f32 %v4969_v51, %v4968_v50  ;;  %v539_v54 = vadd.f32 %v4967_v46, %v6299_v18  ;;  %974 = vmatmul.mubr.bf16.gmra.mrb[44].mxu1 %v612_v52  ;;  %1167 = vmatmul.mubr.bf16.gmra.mrb[108].mxu0 %v612_v52 }
 0x21f   :  { %983 = vmatprep.mubr.bf16.mxu1 %v7721_v1  ;;  %1176 = vmatprep.mubr.bf16.mxu0 %v7721_v1 }
 0x220   :  { %v542_v55 = vadd.f32 %v4970_v53, %v6299_v18  ;;  %v6425_v60 = vmax.f32 %v539_v54, 0.0  ;;  %v7723_v54 = vlaneseq }
 0x222   :  { %v6423_v56 = vmax.f32 %v542_v55, 0.0  ;;  %v4971_v57 = vpop.f32.mrb[52].mxu0  ;;  %7833 = vst [vmem:[#allocation53_spill] sm:$0xff] %v6425_v60 }
 0x223   :  { %v4972_v63 = vpop.f32.mrb[53].mxu0 }
 0x224   :  { %7832 = vst [vmem:[#allocation52_spill] sm:$0xff] %v6423_v56  ;;  %v4973_v0 = vadd.f32 %v4972_v63, %v4971_v57  ;;  %v4974_v2 = vpop.f32.mrb[54].mxu0  ;;  %v613_v4 = vpack.c.bf16 %v6423_v56, %v6425_v60  ;;  %v649_v57 = vld [vmem:[#allocation10] sm:$0xf] }
 0x225   :  { %v4975_v3 = vpop.f32.mrb[55].mxu0 }
 0x226   :  { %v4976_v5 = vadd.f32 %v4975_v3, %v4974_v2  ;;  %v547_v6 = vadd.f32 %v4973_v0, %v6299_v18  ;;  %984 = vmatmul.mubr.bf16.gmra.mrb[48].mxu1 %v613_v4  ;;  %1177 = vmatmul.mubr.bf16.gmra.mrb[112].mxu0 %v613_v4 }
 0x227   :  { %993 = vmatprep.mubr.bf16.mxu1 %v7721_v1  ;;  %1186 = vmatprep.mubr.bf16.mxu0 %v7721_v1 }
 0x228   :  { %v550_v8 = vadd.f32 %v4976_v5, %v6299_v18  ;;  %v6435_v14 = vmax.f32 %v547_v6, 0.0 }
 0x22a   :  { %v6433_v12 = vmax.f32 %v550_v8, 0.0  ;;  %v4977_v13 = vpop.f32.mrb[56].mxu0  ;;  %7835 = vst [vmem:[#allocation55_spill] sm:$0xff] %v6435_v14 }
 0x22b   :  { %v4978_v15 = vpop.f32.mrb[57].mxu0 }
 0x22c   :  { %7834 = vst [vmem:[#allocation54_spill] sm:$0xff] %v6433_v12  ;;  %v4979_v16 = vadd.f32 %v4978_v15, %v4977_v13  ;;  %v4980_v17 = vpop.f32.mrb[58].mxu0  ;;  %v614_v22 = vpack.c.bf16 %v6433_v12, %v6435_v14 }
 0x22d   :  { %v4981_v20 = vpop.f32.mrb[59].mxu0 }
 0x22e   :  { %v4982_v23 = vadd.f32 %v4981_v20, %v4980_v17  ;;  %v555_v28 = vadd.f32 %v4979_v16, %v6299_v18  ;;  %994 = vmatmul.mubr.bf16.gmra.mrb[52].mxu1 %v614_v22  ;;  %1187 = vmatmul.mubr.bf16.gmra.mrb[116].mxu0 %v614_v22 }
 0x22f   :  { %1003 = vmatprep.mubr.bf16.mxu1 %v7721_v1  ;;  %1196 = vmatprep.mubr.bf16.mxu0 %v7721_v1 }
 0x230   :  { %v558_v29 = vadd.f32 %v4982_v23, %v6299_v18  ;;  %v6445_v33 = vmax.f32 %v555_v28, 0.0 }
 0x232   :  { %v6443_v30 = vmax.f32 %v558_v29, 0.0  ;;  %v4983_v31 = vpop.f32.mrb[60].mxu0  ;;  %7837 = vst [vmem:[#allocation57_spill] sm:$0xff] %v6445_v33 }
 0x233   :  { %v4984_v35 = vpop.f32.mrb[61].mxu0 }
 0x234   :  { %7836 = vst [vmem:[#allocation56_spill] sm:$0xff] %v6443_v30  ;;  %v4985_v36 = vadd.f32 %v4984_v35, %v4983_v31  ;;  %v4986_v39 = vpop.f32.mrb[62].mxu0  ;;  %v615_v42 = vpack.c.bf16 %v6443_v30, %v6445_v33 }
 0x235   :  { %v4987_v40 = vpop.f32.mrb[63].mxu0 }
 0x236   :  { %v563_v44 = vadd.f32 %v4985_v36, %v6299_v18  ;;  %v4988_v46 = vadd.f32 %v4987_v40, %v4986_v39  ;;  %1004 = vmatmul.mubr.bf16.gmra.mrb[56].mxu1 %v615_v42  ;;  %1197 = vmatmul.mubr.bf16.gmra.mrb[120].mxu0 %v615_v42 }
 0x237   :  { %1013 = vmatprep.mubr.bf16.mxu1 %v7721_v1  ;;  %1206 = vmatprep.mubr.bf16.mxu0 %v7721_v1 }
 0x238   :  { %v566_v50 = vadd.f32 %v4988_v46, %v6299_v18  ;;  %v6453_v51 = vmax.f32 %v563_v44, 0.0  ;;  %v6462_v18 = vshrl.u32 %v7723_v54, 7 }
 0x23a   :  { %7838 = vst [vmem:[#allocation58_spill] sm:$0xff] %v6453_v51  ;;  %v6455_v52 = vmax.f32 %v566_v50, 0.0  ;;  %7840 = vst [vmem:[#allocation60_spill] sm:$0xff] %v6462_v18  ;;  %v6465_v55 = vsub.s32 2, %v6462_v18  ;;  %v6468_v63 = vsub.s32 3, %v6462_v18  ;;  %v6471_v0 = vsub.s32 0, %v6462_v18 }
 0x23b   :  { %v6477_v3 = vsub.s32 1, %v6462_v18 }
 0x23c   :  { %7839 = vst [vmem:[#allocation59_spill] sm:$0xff] %v6455_v52  ;;  %v616_v53 = vpack.c.bf16 %v6455_v52, %v6453_v51  ;;  %7841 = vst [vmem:[#allocation61_spill] sm:$0xff] %v6465_v55  ;;  %v6474_v2 = vrot.slane %v649_v57, %v6465_v55  ;;  %v6480_v4 = vrot.slane %v649_v57, %v6468_v63 }
 0x23d   :  { %7842 = vst [vmem:[#allocation62_spill] sm:$0xff] %v6468_v63  ;;  %7843 = vst [vmem:[#allocation63_spill] sm:$0xff] %v6471_v0  ;;  %v6483_v5 = vrot.slane %v649_v57, %v6471_v0  ;;  %v6487_v15 = vrot.slane %v649_v57, %v6477_v3 }
 0x23e   :  { %1014 = vmatmul.mubr.bf16.gmra.mrb[60].mxu1 %v616_v53  ;;  %1207 = vmatmul.mubr.bf16.gmra.mrb[124].mxu0 %v616_v53  ;;  %7844 = vst [vmem:[#allocation64_spill] sm:$0xff] %v6477_v3 }
 0x23f   :  { %3884 = vmatprep.mubr.bf16.mxu1 %v7721_v1  ;;  %4080 = vmatprep.mubr.bf16.mxu0 %v7721_v1 }
 0x299   :  { %v865_v6 = vpop.f32.mrb[0].mxu1  ;;  %v1058_v8 = vpop.f32.mrb[64].mxu0 }
 0x29a   :  { %v1059_v13 = vadd.f32 %v1058_v8, %v6474_v2  ;;  %v867_v16 = vpop.f32.mrb[1].mxu1  ;;  %v1060_v17 = vpop.f32.mrb[65].mxu0  ;;  %v866_v28 = vadd.f32 %v865_v6, %v6483_v5 }
 0x29b   :  { %v1061_v20 = vadd.f32 %v1060_v17, %v6480_v4  ;;  %v869_v22 = vpop.f32.mrb[2].mxu1  ;;  %v1062_v23 = vpop.f32.mrb[66].mxu0  ;;  %v868_v42 = vadd.f32 %v867_v16, %v6487_v15 }
 0x29c   :  { %v4684_v29 = vmul.f32 -1.442695, %v1059_v13  ;;  %v1063_v31 = vadd.f32 %v1062_v23, %v6474_v2  ;;  %v871_v35 = vpop.f32.mrb[3].mxu1  ;;  %v1064_v36 = vpop.f32.mrb[67].mxu0  ;;  %v870_v50 = vadd.f32 %v869_v22, %v6483_v5 }
 0x29d   :  { %v4685_v39 = vmul.f32 -1.442695, %v1061_v20  ;;  %v1065_v40 = vadd.f32 %v1064_v36, %v6480_v4  ;;  %v872_v53 = vadd.f32 %v871_v35, %v6487_v15 }
 0x29e   :  { %5310 = vpow2.f32 %v4684_v29  ;;  %v4686_v44 = vmul.f32 -1.442695, %v1063_v31 }
 0x29f   :  { %5312 = vpow2.f32 %v4685_v39  ;;  %v4687_v46 = vmul.f32 -1.442695, %v1065_v40 }
 0x2a0   :  { %5314 = vtanh.f32 %v866_v28 }
 0x2a1   :  { %5316 = vpow2.f32 %v4686_v44  ;;  %v875_v57 = vpop.f32.mrb[4].mxu1  ;;  %v1068_v6 = vpop.f32.mrb[68].mxu0 }
 0x2a2   :  { %5318 = vtanh.f32 %v868_v42  ;;  %v1069_v8 = vadd.f32 %v1068_v6, %v6474_v2  ;;  %v877_v13 = vpop.f32.mrb[5].mxu1  ;;  %v1070_v17 = vpop.f32.mrb[69].mxu0  ;;  %v876_v28 = vadd.f32 %v875_v57, %v6483_v5 }
 0x2a3   :  { %5320 = vpow2.f32 %v4687_v46  ;;  %v1071_v20 = vadd.f32 %v1070_v17, %v6480_v4  ;;  %v879_v16 = vpop.f32.mrb[6].mxu1  ;;  %v1072_v23 = vpop.f32.mrb[70].mxu0  ;;  %v878_v40 = vadd.f32 %v877_v13, %v6487_v15 }
 0x2a4   :  { %5322 = vtanh.f32 %v870_v50  ;;  %v4688_v29 = vmul.f32 -1.442695, %v1069_v8  ;;  %v1073_v22 = vadd.f32 %v1072_v23, %v6474_v2  ;;  %v881_v31 = vpop.f32.mrb[7].mxu1  ;;  %v1074_v35 = vpop.f32.mrb[71].mxu0 }
 0x2a5   :  { %5324 = vtanh.f32 %v872_v53  ;;  %v4689_v36 = vmul.f32 -1.442695, %v1071_v20  ;;  %v1075_v39 = vadd.f32 %v1074_v35, %v6480_v4 }
 0x2a6   :  { %5326 = vpow2.f32 %v4688_v29  ;;  %v4690_v42 = vmul.f32 -1.442695, %v1073_v22  ;;  %v880_v22 = vadd.f32 %v879_v16, %v6483_v5 }
 0x2a7   :  { %5328 = vpow2.f32 %v4689_v36  ;;  %v4691_v57 = vmul.f32 -1.442695, %v1075_v39 }
 0x2a8   :  { %v5311_v44 = vpop.eup %5310  ;;  %5330 = vtanh.f32 %v876_v28 }
 0x2a9   :  { %v5313_v46 = vpop.eup %5312  ;;  %v1473_v50 = vadd.f32 1.0, %v5311_v44  ;;  %5332 = vpow2.f32 %v4690_v42  ;;  %v885_v6 = vpop.f32.mrb[8].mxu1  ;;  %v882_v42 = vadd.f32 %v881_v31, %v6487_v15 }
 0x2aa   :  { %v1078_v8 = vpop.f32.mrb[72].mxu0  ;;  %v6502_v17 = vpop.eup %5314  ;;  %v1474_v23 = vadd.f32 1.0, %v5313_v46  ;;  %5334 = vtanh.f32 %v878_v40 }
 0x2ab   :  { %v1079_v53 = vadd.f32 %v1078_v8, %v6474_v2  ;;  %v6505_v20 = vpop.f32.mrb[9].mxu1  ;;  %v1080_v29 = vpop.f32.mrb[73].mxu0  ;;  %5336 = vrcp.f32 %v1473_v50 }
 0x2ac   :  { %v5317_v13 = vpop.eup %5316  ;;  %v6508_v28 = vpop.f32.mrb[10].mxu1  ;;  %5338 = vrcp.f32 %v1474_v23  ;;  %v1081_v1 = vadd.f32 %v1080_v29, %v6480_v4 }
 0x2ad   :  { %v1082_v35 = vpop.f32.mrb[74].mxu0  ;;  %v5319_v36 = vpop.eup %5318  ;;  %v1475_v39 = vadd.f32 1.0, %v5317_v13  ;;  %5340 = vpow2.f32 %v4691_v57  ;;  %v4692_v8 = vmul.f32 -1.442695, %v1079_v53 }
 0x2ae   :  { %v6511_v44 = vpop.f32.mrb[11].mxu1  ;;  %v1084_v40 = vpop.f32.mrb[75].mxu0  ;;  %v1083_v23 = vadd.f32 %v1082_v35, %v6474_v2  ;;  %v4693_v51 = vmul.f32 -1.442695, %v1081_v1 }
 0x2af   :  { %v5321_v46 = vpop.eup %5320  ;;  %5342 = vrcp.f32 %v1475_v39  ;;  %v1729_v39 = vld [vmem:[#allocation11] sm:$0x3] }
 0x2b0   :  { %v5323_v54 = vpop.eup %5322  ;;  %v1476_v50 = vadd.f32 1.0, %v5321_v46  ;;  %5344 = vtanh.f32 %v880_v22  ;;  %v886_v22 = vadd.f32 %v885_v6, %v6483_v5  ;;  %v6536_v12 = vrot.slane %v1729_v39, %v6477_v3 }
 0x2b1   :  { %v6514_v16 = vpop.eup %5324  ;;  %5346 = vtanh.f32 %v882_v42  ;;  %v6519_v53 = vpop.f32.mrb[12].mxu1  ;;  %v1085_v42 = vadd.f32 %v1084_v40, %v6480_v4  ;;  %v6533_v40 = vrot.slane %v1729_v39, %v6471_v0 }
 0x2b2   :  { %v5327_v52 = vpop.eup %5326  ;;  %5348 = vpow2.f32 %v4692_v8  ;;  %v1088_v29 = vpop.f32.mrb[76].mxu0  ;;  %v4694_v8 = vmul.f32 -1.442695, %v1083_v23 }
 0x2b3   :  { %v5329_v13 = vpop.eup %5328  ;;  %v1477_v31 = vadd.f32 1.0, %v5327_v52  ;;  %5350 = vrcp.f32 %v1476_v50  ;;  %v6523_v33 = vpop.f32.mrb[13].mxu1  ;;  %v1089_v47 = vadd.f32 %v1088_v29, %v6474_v2  ;;  %v4695_v23 = vmul.f32 -1.442695, %v1085_v42 }
 0x2b4   :  { %v6517_v30 = vpop.eup %5330  ;;  %v1478_v57 = vadd.f32 1.0, %v5329_v13  ;;  %v1090_v35 = vpop.f32.mrb[77].mxu0  ;;  %v888_v29 = vadd.f32 %v6505_v20, %v6487_v15  ;;  %v890_v20 = vadd.f32 %v6508_v28, %v6483_v5 }
 0x2b5   :  { %v5333_v46 = vpop.eup %5332  ;;  %5352 = vrcp.f32 %v1477_v31  ;;  %v6527_v50 = vpop.f32.mrb[14].mxu1  ;;  %v1091_v41 = vadd.f32 %v1090_v35, %v6480_v4  ;;  %v4696_v32 = vmul.f32 -1.442695, %v1089_v47 }
 0x2b6   :  { %v6525_v52 = vpop.eup %5334  ;;  %5354 = vrcp.f32 %v1478_v57  ;;  %v1479_v1 = vadd.f32 1.0, %v5333_v46  ;;  %v1092_v13 = vpop.f32.mrb[78].mxu0 }
 0x2b7   :  { %v5337_v45 = vpop.eup %5336  ;;  %5356 = vpow2.f32 %v4693_v51  ;;  %v6530_v31 = vpop.f32.mrb[15].mxu1 }
 0x2b8   :  { %v1094_v6 = vpop.f32.mrb[79].mxu0  ;;  %v5339_v14 = vpop.eup %5338  ;;  %5358 = vrcp.f32 %v1479_v1  ;;  %v1665_v46 = vmul.f32 %v5337_v45, %v6502_v17 }
 0x2b9   :  { %v5341_v57 = vpop.eup %5340  ;;  %5360 = vtanh.f32 %v886_v22  ;;  %v1666_v56 = vmul.f32 %v5339_v14, %v5319_v36  ;;  %v6546_v45 = vpop.f32.mrb[16].mxu1  ;;  %v1093_v36 = vadd.f32 %v1092_v13, %v6474_v2  ;;  %v1095_v13 = vadd.f32 %v1094_v6, %v6480_v4 }
 0x2ba   :  { %v5343_v51 = vpop.eup %5342  ;;  %v1480_v60 = vadd.f32 1.0, %v5341_v57  ;;  %5362 = vpow2.f32 %v4694_v8  ;;  %v1741_v39 = vmul.f32 %v6533_v40, %v1665_v46  ;;  %v1098_v14 = vpop.f32.mrb[80].mxu0 }
 0x2bb   :  { %v5345_v43 = vpop.eup %5344  ;;  %v1742_v1 = vmul.f32 %v6536_v12, %v1666_v56  ;;  %v1667_v34 = vmul.f32 %v5343_v51, %v5323_v54  ;;  %v6551_v42 = vpop.f32.mrb[17].mxu1  ;;  %v4697_v54 = vmul.f32 -1.442695, %v1091_v41  ;;  %v4698_v41 = vmul.f32 -1.442695, %v1093_v36 }
 0x2bc   :  { %v6544_v22 = vpop.eup %5346  ;;  %5364 = vrcp.f32 %v1480_v60  ;;  %v1100_v47 = vpop.f32.mrb[81].mxu0 }
 0x2bd   :  { %v5349_v17 = vpop.eup %5348  ;;  %5366 = vpow2.f32 %v4695_v23  ;;  %v1805_v35 = vadd.f32 %v1742_v1, %v1741_v39  ;;  %v6553_v57 = vpop.f32.mrb[18].mxu1 }
 0x2be   :  { %v5351_v8 = vpop.eup %5350  ;;  %v1481_v56 = vadd.f32 1.0, %v5349_v17  ;;  %5368 = vtanh.f32 %v888_v29  ;;  %v1102_v60 = vpop.f32.mrb[82].mxu0  ;;  %v892_v29 = vadd.f32 %v6511_v44, %v6487_v15  ;;  %v4699_v44 = vmul.f32 -1.442695, %v1095_v13 }
 0x2bf   :  { %v5353_v46 = vpop.eup %5352  ;;  %5370 = vpow2.f32 %v4696_v32  ;;  %v6555_v51 = vpop.f32.mrb[19].mxu1  ;;  %1806 = vadd.xlane.f32.xlu0 %v1805_v35  ;;  %v1668_v39 = vmul.f32 %v5351_v8, %v6514_v16  ;;  %v1743_v32 = vmul.f32 %v6533_v40, %v1667_v34  ;;  %v896_v34 = vadd.f32 %v6519_v53, %v6483_v5 }
 0x2c0   :  { %v6557_v19 = vpop.f32.mrb[83].mxu0  ;;  %v5355_v28 = vpop.eup %5354  ;;  %5372 = vrcp.f32 %v1481_v56  ;;  %v1669_v21 = vmul.f32 %v5353_v46, %v6517_v30  ;;  %v1099_v56 = vadd.f32 %v1098_v14, %v6474_v2  ;;  %v1101_v30 = vadd.f32 %v1100_v47, %v6480_v4 }
 0x2c1   :  { %v5357_v23 = vpop.eup %5356  ;;  %5374 = vtanh.f32 %v890_v20  ;;  %v1744_v6 = vmul.f32 %v6536_v12, %v1668_v39  ;;  %v1670_v20 = vmul.f32 %v5355_v28, %v6525_v52  ;;  %v6568_v36 = vpop.f32.mrb[20].mxu1  ;;  %v912_v10 = vadd.f32 %v6555_v51, %v6487_v15 }
 0x2c2   :  { %v5359_v1 = vpop.eup %5358  ;;  %v1482_v17 = vadd.f32 1.0, %v5357_v23  ;;  %5376 = vpow2.f32 %v4697_v54  ;;  %v1108_v16 = vpop.f32.mrb[84].mxu0  ;;  %v1745_v47 = vmul.f32 %v6533_v40, %v1669_v21 }
 0x2c3   :  { %v5361_v35 = vpop.eup %5360  ;;  %v1671_v7 = vmul.f32 %v5359_v1, %v5345_v43  ;;  %v6573_v54 = vpop.f32.mrb[21].mxu1  ;;  %v1808_v43 = vadd.f32 %v1744_v6, %v1743_v32  ;;  %v898_v1 = vadd.f32 %v6523_v33, %v6487_v15  ;;  %v1103_v32 = vadd.f32 %v1102_v60, %v6474_v2 }
 0x2c4   :  { %v5363_v9 = vpop.eup %5362  ;;  %5378 = vrcp.f32 %v1482_v17  ;;  %v6575_v14 = vpop.f32.mrb[85].mxu0  ;;  %v4701_v17 = vmul.f32 -1.442695, %v1101_v30  ;;  %v1105_v60 = vadd.f32 %v6557_v19, %v6480_v4 }
 0x2c5   :  { %v1483_v8 = vadd.f32 1.0, %v5363_v9  ;;  %5380 = vpow2.f32 %v4698_v41  ;;  %v6577_v52 = vpop.f32.mrb[22].mxu1  ;;  %v6579_v28 = vpop.f32.mrb[86].mxu0  ;;  %v4700_v9 = vmul.f32 -1.442695, %v1099_v56  ;;  %1809 = vadd.xlane.f32.xlu0 %v1808_v43  ;;  %v1746_v56 = vmul.f32 %v6536_v12, %v1670_v20 }
 0x2c6   :  { %v5365_v46 = vpop.eup %5364  ;;  %5382 = vtanh.f32 %v892_v29  ;;  %v6581_v23 = vpop.f32.mrb[23].mxu1  ;;  %v1747_v21 = vmul.f32 %v6533_v40, %v1671_v7 }
 0x2c7   :  { %v5367_v13 = vpop.eup %5366  ;;  %5384 = vrcp.f32 %v1483_v8  ;;  %v6583_v53 = vpop.f32.mrb[87].mxu0  ;;  %v1672_v25 = vmul.f32 %v5365_v46, %v6544_v22  ;;  %v1811_v24 = vadd.f32 %v1746_v56, %v1745_v47  ;;  %v4702_v46 = vmul.f32 -1.442695, %v1103_v32 }
 0x2c8   :  { %v5369_v41 = vpop.eup %5368  ;;  %v1484_v39 = vadd.f32 1.0, %v5367_v13  ;;  %5386 = vpow2.f32 %v4699_v44 }
 0x2c9   :  { %v5371_v29 = vpop.eup %5370  ;;  %5388 = vtanh.f32 %v896_v34  ;;  %v900_v34 = vadd.f32 %v6527_v50, %v6483_v5  ;;  %v6596_v20 = vpop.f32.mrb[24].mxu1  ;;  %v1748_v22 = vmul.f32 %v6536_v12, %v1672_v25  ;;  %1812 = vadd.xlane.f32.xlu1 %v1811_v24  ;;  %v902_v25 = vadd.f32 %v6530_v31, %v6487_v15 }
 0x2ca   :  { %v5373_v6 = vpop.eup %5372  ;;  %5390 = vrcp.f32 %v1484_v39  ;;  %v1485_v8 = vadd.f32 1.0, %v5371_v29  ;;  %v6598_v30 = vpop.f32.mrb[88].mxu0  ;;  %v1111_v31 = vadd.f32 %v6575_v14, %v6480_v4 }
 0x2cb   :  { %v5375_v13 = vpop.eup %5374  ;;  %5392 = vpow2.f32 %v4700_v9  ;;  %v1673_v33 = vmul.f32 %v5373_v6, %v5361_v35  ;;  %v6601_v43 = vpop.f32.mrb[25].mxu1  ;;  %v1814_v50 = vadd.f32 %v1748_v22, %v1747_v21 }
 0x2cc   :  { %v5377_v44 = vpop.eup %5376  ;;  %5394 = vtanh.f32 %v898_v1  ;;  %v6603_v35 = vpop.f32.mrb[89].mxu0  ;;  %v1109_v1 = vadd.f32 %v1108_v16, %v6474_v2 }
 0x2cd   :  { %5396 = vrcp.f32 %v1485_v8  ;;  %v1486_v7 = vadd.f32 1.0, %v5377_v44  ;;  %v6605_v47 = vpop.f32.mrb[26].mxu1  ;;  %v6607_v19 = vpop.f32.mrb[90].mxu0  ;;  %v906_v8 = vadd.f32 %v6546_v45, %v6483_v5  ;;  %1815 = vadd.xlane.f32.xlu1 %v1814_v50  ;;  %v1749_v16 = vmul.f32 %v6533_v40, %v1673_v33 }
 0x2ce   :  { %v5379_v9 = vpop.eup %5378  ;;  %5398 = vpow2.f32 %v4701_v17  ;;  %v6612_v29 = vpop.f32.mrb[27].mxu1  ;;  %v4703_v17 = vmul.f32 -1.442695, %v1105_v60  ;;  %v908_v45 = vadd.f32 %v6551_v42, %v6487_v15 }
 0x2cf   :  { %v5381_v39 = vpop.eup %5380  ;;  %5400 = vrcp.f32 %v1486_v7  ;;  %v6614_v24 = vpop.f32.mrb[91].mxu0  ;;  %v1674_v21 = vmul.f32 %v5379_v9, %v5369_v41  ;;  %v1113_v41 = vadd.f32 %v6579_v28, %v6474_v2 }
 0x2d0   :  { %v5383_v32 = vpop.eup %5382  ;;  %5402 = vtanh.f32 %v900_v34  ;;  %v1487_v56 = vadd.f32 1.0, %v5381_v39  ;;  %v4704_v39 = vmul.f32 -1.442695, %v1109_v1 }
 0x2d1   :  { %v5385_v6 = vpop.eup %5384  ;;  %5404 = vpow2.f32 %v4702_v46  ;;  %v1750_v60 = vmul.f32 %v6536_v12, %v1674_v21  ;;  %v6626_v46 = vpop.f32.mrb[28].mxu1 }
 0x2d2   :  { %v5387_v44 = vpop.eup %5386  ;;  %5406 = vrcp.f32 %v1487_v56  ;;  %v1675_v22 = vmul.f32 %v5385_v6, %v5375_v13  ;;  %v6628_v14 = vpop.f32.mrb[92].mxu0 }
 0x2d3   :  { %v5389_v7 = vpop.eup %5388  ;;  %5408 = vtanh.f32 %v902_v25  ;;  %v1488_v34 = vadd.f32 1.0, %v5387_v44  ;;  %v1817_v13 = vadd.f32 %v1750_v60, %v1749_v16  ;;  %v6631_v25 = vpop.f32.mrb[29].mxu1  ;;  %v4706_v60 = vmul.f32 -1.442695, %v1113_v41 }
 0x2d4   :  { %v5391_v11 = vpop.eup %5390  ;;  %5410 = vpow2.f32 %v4703_v17  ;;  %v1751_v50 = vmul.f32 %v6533_v40, %v1675_v22  ;;  %v6633_v1 = vpop.f32.mrb[93].mxu0  ;;  %v4705_v17 = vmul.f32 -1.442695, %v1111_v31  ;;  %v1115_v31 = vadd.f32 %v6583_v53, %v6480_v4 }
 0x2d5   :  { %v5393_v33 = vpop.eup %5392  ;;  %5412 = vrcp.f32 %v1488_v34  ;;  %v1676_v9 = vmul.f32 %v5391_v11, %v5383_v32  ;;  %v6635_v6 = vpop.f32.mrb[30].mxu1  ;;  %1818 = vadd.xlane.f32.xlu0 %v1817_v13 }
 0x2d6   :  { %v5395_v56 = vpop.eup %5394  ;;  %5414 = vtanh.f32 %v906_v8  ;;  %v1489_v42 = vadd.f32 1.0, %v5393_v33  ;;  %v6637_v28 = vpop.f32.mrb[94].mxu0  ;;  %v910_v8 = vadd.f32 %v6553_v57, %v6483_v5 }
 0x2d7   :  { %v5397_v21 = vpop.eup %5396  ;;  %5416 = vpow2.f32 %v4704_v39  ;;  %v1752_v44 = vmul.f32 %v6536_v12, %v1676_v9  ;;  %v6640_v11 = vpop.f32.mrb[31].mxu1 }
 0x2d8   :  { %v6642_v32 = vpop.f32.mrb[95].mxu0  ;;  %v5399_v16 = vpop.eup %5398  ;;  %5418 = vrcp.f32 %v1489_v42  ;;  %v1677_v13 = vmul.f32 %v5397_v21, %v5389_v7  ;;  %v1119_v42 = vadd.f32 %v6598_v30, %v6474_v2 }
 0x2d9   :  { %v5401_v22 = vpop.eup %5400  ;;  %5420 = vtanh.f32 %v908_v45  ;;  %v1490_v34 = vadd.f32 1.0, %v5399_v16  ;;  %v1820_v39 = vadd.f32 %v1752_v44, %v1751_v50  ;;  %v4707_v45 = vmul.f32 -1.442695, %v1115_v31  ;;  %v6653_v50 = vpop.f32.mrb[32].mxu1 }
 0x2da   :  { %v5403_v33 = vpop.eup %5402  ;;  %5422 = vpow2.f32 %v4705_v17  ;;  %v1678_v57 = vmul.f32 %v5401_v22, %v5395_v56  ;;  %v1753_v41 = vmul.f32 %v6533_v40, %v1677_v13  ;;  %v6655_v17 = vpop.f32.mrb[96].mxu0  ;;  %v916_v16 = vadd.f32 %v6568_v36, %v6483_v5 }
 0x2db   :  { %v5405_v9 = vpop.eup %5404  ;;  %5424 = vrcp.f32 %v1490_v34  ;;  %1821 = vadd.xlane.f32.xlu1 %v1820_v39  ;;  %v6658_v44 = vpop.f32.mrb[33].mxu1 }
 0x2dc   :  { %v5407_v58 = vpop.eup %5406  ;;  %5426 = vtanh.f32 %v910_v8  ;;  %v1491_v53 = vadd.f32 1.0, %v5405_v9  ;;  %v1754_v21 = vmul.f32 %v6536_v12, %v1678_v57  ;;  %v6660_v30 = vpop.f32.mrb[97].mxu0  ;;  %v1121_v8 = vadd.f32 %v6603_v35, %v6480_v4 }
 0x2dd   :  { %v5409_v7 = vpop.eup %5408  ;;  %5428 = vpow2.f32 %v4706_v60  ;;  %v1679_v51 = vmul.f32 %v5407_v58, %v5403_v33  ;;  %v6666_v31 = vpop.f32.mrb[34].mxu1  ;;  %v4708_v58 = vmul.f32 -1.442695, %v1119_v42  ;;  %v918_v35 = vadd.f32 %v6573_v54, %v6487_v15 }
 0x2de   :  { %v5411_v56 = vpop.eup %5410  ;;  %5430 = vrcp.f32 %v1491_v53  ;;  %v6668_v22 = vpop.f32.mrb[98].mxu0  ;;  %v1823_v39 = vadd.f32 %v1754_v21, %v1753_v41  ;;  %v4709_v21 = vmul.f32 -1.442695, %v1121_v8  ;;  %v1125_v54 = vadd.f32 %v6614_v24, %v6480_v4 }
 0x2df   :  { %v5413_v34 = vpop.eup %5412  ;;  %5432 = vtanh.f32 %v912_v10  ;;  %v1492_v60 = vadd.f32 1.0, %v5411_v56  ;;  %v6670_v33 = vpop.f32.mrb[35].mxu1  ;;  %v1755_v36 = vmul.f32 %v6533_v40, %v1679_v51  ;;  %v1123_v10 = vadd.f32 %v6607_v19, %v6474_v2 }
 0x2e0   :  { %v6672_v13 = vpop.f32.mrb[99].mxu0  ;;  %v5415_v9 = vpop.eup %5414  ;;  %5434 = vpow2.f32 %v4707_v45  ;;  %v1680_v57 = vmul.f32 %v5413_v34, %v5409_v7  ;;  %1824 = vadd.xlane.f32.xlu0 %v1823_v39  ;;  %v920_v51 = vadd.f32 %v6577_v52, %v6483_v5 }
 0x2e1   :  { %v5417_v53 = vpop.eup %5416  ;;  %5436 = vrcp.f32 %v1492_v60  ;;  %v6684_v19 = vpop.f32.mrb[36].mxu1  ;;  %v4710_v39 = vmul.f32 -1.442695, %v1123_v10  ;;  %v1129_v10 = vadd.f32 %v6628_v14, %v6474_v2  ;;  %v1131_v14 = vadd.f32 %v6633_v1, %v6480_v4 }
 0x2e2   :  { %v5419_v42 = vpop.eup %5418  ;;  %5438 = vtanh.f32 %v916_v16  ;;  %v1493_v41 = vadd.f32 1.0, %v5417_v53  ;;  %v1756_v56 = vmul.f32 %v6536_v12, %v1680_v57  ;;  %v6686_v60 = vpop.f32.mrb[100].mxu0  ;;  %v1133_v1 = vadd.f32 %v6637_v28, %v6474_v2 }
 0x2e3   :  { %v5421_v62 = vpop.eup %5420  ;;  %5440 = vpow2.f32 %v4708_v58  ;;  %v1681_v45 = vmul.f32 %v5419_v42, %v5415_v9  ;;  %v6688_v57 = vpop.f32.mrb[37].mxu1 }
 0x2e4   :  { %v5423_v7 = vpop.eup %5422  ;;  %5442 = vrcp.f32 %v1493_v41  ;;  %v1826_v34 = vadd.f32 %v1756_v56, %v1755_v36  ;;  %v6690_v58 = vpop.f32.mrb[101].mxu0  ;;  %v4714_v48 = vmul.f32 -1.442695, %v1133_v1 }
 0x2e5   :  { %v5425_v16 = vpop.eup %5424  ;;  %5444 = vtanh.f32 %v918_v35  ;;  %v1494_v8 = vadd.f32 1.0, %v5423_v7  ;;  %v1757_v53 = vmul.f32 %v6533_v40, %v1681_v45  ;;  %v6693_v24 = vpop.f32.mrb[38].mxu1  ;;  %v922_v35 = vadd.f32 %v6581_v23, %v6487_v15 }
 0x2e6   :  { %v5427_v9 = vpop.eup %5426  ;;  %5446 = vpow2.f32 %v4709_v21  ;;  %1827 = vadd.xlane.f32.xlu1 %v1826_v34  ;;  %v1682_v52 = vmul.f32 %v5425_v16, %v5421_v62  ;;  %v6695_v36 = vpop.f32.mrb[102].mxu0  ;;  %v4711_v45 = vmul.f32 -1.442695, %v1125_v54  ;;  %v926_v23 = vadd.f32 %v6596_v20, %v6483_v5 }
 0x2e7   :  { %v5429_v42 = vpop.eup %5428  ;;  %5448 = vrcp.f32 %v1494_v8  ;;  %v6701_v41 = vpop.f32.mrb[39].mxu1  ;;  %v928_v20 = vadd.f32 %v6601_v43, %v6487_v15 }
 0x2e8   :  { %v6703_v56 = vpop.f32.mrb[103].mxu0  ;;  %v5431_v21 = vpop.eup %5430  ;;  %5450 = vtanh.f32 %v920_v51  ;;  %v1495_v62 = vadd.f32 1.0, %v5429_v42  ;;  %v1758_v7 = vmul.f32 %v6536_v12, %v1682_v52  ;;  %v4712_v51 = vmul.f32 -1.442695, %v1129_v10 }
 0x2e9   :  { %v5433_v34 = vpop.eup %5432  ;;  %5452 = vpow2.f32 %v4710_v39  ;;  %v1683_v16 = vmul.f32 %v5431_v21, %v5427_v9  ;;  %v6711_v9 = vpop.f32.mrb[40].mxu1  ;;  %v4713_v10 = vmul.f32 -1.442695, %v1131_v14 }
 0x2ea   :  { %v5435_v8 = vpop.eup %5434  ;;  %5454 = vrcp.f32 %v1495_v62  ;;  %v1829_v59 = vadd.f32 %v1758_v7, %v1757_v53  ;;  %v6713_v52 = vpop.f32.mrb[104].mxu0 }
 0x2eb   :  { %v5437_v61 = vpop.eup %5436  ;;  %5456 = vtanh.f32 %v922_v35  ;;  %v1496_v49 = vadd.f32 1.0, %v5435_v8  ;;  %v1759_v39 = vmul.f32 %v6533_v40, %v1683_v16  ;;  %v6719_v53 = vpop.f32.mrb[41].mxu1  ;;  %v930_v8 = vadd.f32 %v6605_v47, %v6483_v5 }
 0x2ec   :  { %v5439_v42 = vpop.eup %5438  ;;  %5458 = vpow2.f32 %v4711_v45  ;;  %1830 = vadd.xlane.f32.xlu0 %v1829_v59  ;;  %v1684_v54 = vmul.f32 %v5437_v61, %v5433_v34  ;;  %v6721_v35 = vpop.f32.mrb[105].mxu0  ;;  %v1139_v47 = vadd.f32 %v6655_v17, %v6474_v2  ;;  %v936_v17 = vadd.f32 %v6626_v46, %v6483_v5 }
 0x2ed   :  { %v5441_v21 = vpop.eup %5440  ;;  %5460 = vrcp.f32 %v1496_v49  ;;  %v6724_v45 = vpop.f32.mrb[42].mxu1 }
 0x2ee   :  { %v5443_v59 = vpop.eup %5442  ;;  %5462 = vtanh.f32 %v926_v23  ;;  %v1497_v61 = vadd.f32 1.0, %v5441_v21  ;;  %v1760_v62 = vmul.f32 %v6536_v12, %v1684_v54  ;;  %v6726_v7 = vpop.f32.mrb[106].mxu0  ;;  %v1135_v23 = vadd.f32 %v6642_v32, %v6480_v4 }
 0x2ef   :  { %v5445_v49 = vpop.eup %5444  ;;  %5464 = vpow2.f32 %v4712_v51  ;;  %v1685_v43 = vmul.f32 %v5443_v59, %v5439_v42  ;;  %v6728_v34 = vpop.f32.mrb[43].mxu1 }
 0x2f0   :  { %v6730_v28 = vpop.f32.mrb[107].mxu0  ;;  %v5447_v16 = vpop.eup %5446  ;;  %5466 = vrcp.f32 %v1497_v61  ;;  %v1832_v14 = vadd.f32 %v1760_v62, %v1759_v39  ;;  %v932_v61 = vadd.f32 %v6612_v29, %v6487_v15 }
 0x2f1   :  { %v5449_v54 = vpop.eup %5448  ;;  %5468 = vtanh.f32 %v928_v20  ;;  %v1498_v21 = vadd.f32 1.0, %v5447_v16  ;;  %v1761_v42 = vmul.f32 %v6533_v40, %v1685_v43  ;;  %v4715_v20 = vmul.f32 -1.442695, %v1135_v23  ;;  %v6742_v62 = vpop.f32.mrb[44].mxu1 }
 0x2f2   :  { %v5451_v38 = vpop.eup %5450  ;;  %5470 = vpow2.f32 %v4713_v10  ;;  %1833 = vadd.xlane.f32.xlu1 %v1832_v14  ;;  %v1686_v51 = vmul.f32 %v5449_v54, %v5445_v49  ;;  %v6744_v10 = vpop.f32.mrb[108].mxu0 }
 0x2f3   :  { %v5453_v59 = vpop.eup %5452  ;;  %5472 = vrcp.f32 %v1498_v21  ;;  %v6746_v16 = vpop.f32.mrb[45].mxu1 }
 0x2f4   :  { %v5455_v32 = vpop.eup %5454  ;;  %5474 = vtanh.f32 %v930_v8  ;;  %v1499_v39 = vadd.f32 1.0, %v5453_v59  ;;  %v1762_v1 = vmul.f32 %v6536_v12, %v1686_v51  ;;  %v6748_v14 = vpop.f32.mrb[109].mxu0  ;;  %v1141_v8 = vadd.f32 %v6660_v30, %v6480_v4 }
 0x2f5   :  { %v5457_v49 = vpop.eup %5456  ;;  %5476 = vpow2.f32 %v4714_v48  ;;  %v1687_v43 = vmul.f32 %v5455_v32, %v5451_v38  ;;  %v6754_v54 = vpop.f32.mrb[46].mxu1  ;;  %v4716_v48 = vmul.f32 -1.442695, %v1139_v47 }
 0x2f6   :  { %v5459_v29 = vpop.eup %5458  ;;  %5478 = vrcp.f32 %v1499_v39  ;;  %v1835_v23 = vadd.f32 %v1762_v1, %v1761_v42  ;;  %v6756_v21 = vpop.f32.mrb[110].mxu0  ;;  %v938_v42 = vadd.f32 %v6631_v25, %v6487_v15  ;;  %v1145_v25 = vadd.f32 %v6672_v13, %v6480_v4 }
 0x2f7   :  { %v5461_v51 = vpop.eup %5460  ;;  %5480 = vtanh.f32 %v932_v61  ;;  %v1500_v38 = vadd.f32 1.0, %v5459_v29  ;;  %v6758_v59 = vpop.f32.mrb[47].mxu1  ;;  %v1763_v37 = vmul.f32 %v6533_v40, %v1687_v43  ;;  %v1143_v61 = vadd.f32 %v6668_v22, %v6474_v2 }
 0x2f8   :  { %v6760_v32 = vpop.f32.mrb[111].mxu0  ;;  %v5463_v39 = vpop.eup %5462  ;;  %5482 = vpow2.f32 %v4715_v20  ;;  %1836 = vadd.xlane.f32.xlu0 %v1835_v23  ;;  %v1688_v46 = vmul.f32 %v5461_v51, %v5457_v49  ;;  %v4717_v29 = vmul.f32 -1.442695, %v1141_v8  ;;  %v940_v43 = vadd.f32 %v6635_v6, %v6483_v5 }
 0x2f9   :  { %v5465_v30 = vpop.eup %5464  ;;  %5484 = vrcp.f32 %v1500_v38  ;;  %v6772_v51 = vpop.f32.mrb[48].mxu1  ;;  %v4718_v38 = vmul.f32 -1.442695, %v1143_v61  ;;  %v1149_v61 = vadd.f32 %v6686_v60, %v6474_v2  ;;  %v1151_v60 = vadd.f32 %v6690_v58, %v6480_v4 }
 0x2fa   :  { %v5467_v1 = vpop.eup %5466  ;;  %5486 = vtanh.f32 %v936_v17  ;;  %v1501_v47 = vadd.f32 1.0, %v5465_v30  ;;  %v1764_v27 = vmul.f32 %v6536_v12, %v1688_v46  ;;  %v6774_v22 = vpop.f32.mrb[112].mxu0  ;;  %v1153_v58 = vadd.f32 %v6695_v36, %v6474_v2 }
 0x2fb   :  { %v5469_v26 = vpop.eup %5468  ;;  %5488 = vpow2.f32 %v4716_v48  ;;  %v1689_v20 = vmul.f32 %v5467_v1, %v5463_v39  ;;  %v6776_v46 = vpop.f32.mrb[49].mxu1 }
 0x2fc   :  { %v5471_v49 = vpop.eup %5470  ;;  %5490 = vrcp.f32 %v1501_v47  ;;  %v1838_v23 = vadd.f32 %v1764_v27, %v1763_v37  ;;  %v6778_v48 = vpop.f32.mrb[113].mxu0  ;;  %v4722_v0 = vmul.f32 -1.442695, %v1153_v58 }
 0x2fd   :  { %v5473_v17 = vpop.eup %5472  ;;  %5492 = vtanh.f32 %v938_v42  ;;  %v1502_v8 = vadd.f32 1.0, %v5471_v49  ;;  %v1765_v30 = vmul.f32 %v6533_v40, %v1689_v20  ;;  %v6781_v13 = vpop.f32.mrb[50].mxu1  ;;  %v942_v42 = vadd.f32 %v6640_v11, %v6487_v15 }
 0x2fe   :  { %v5475_v39 = vpop.eup %5474  ;;  %5494 = vpow2.f32 %v4717_v29  ;;  %1839 = vadd.xlane.f32.xlu1 %v1838_v23  ;;  %v1690_v6 = vmul.f32 %v5473_v17, %v5469_v26  ;;  %v6783_v27 = vpop.f32.mrb[114].mxu0  ;;  %v4719_v20 = vmul.f32 -1.442695, %v1145_v25  ;;  %v946_v11 = vadd.f32 %v6653_v50, %v6483_v5 }
 0x2ff   :  { %v5477_v37 = vpop.eup %5476  ;;  %5496 = vrcp.f32 %v1502_v8  ;;  %v6789_v1 = vpop.f32.mrb[51].mxu1  ;;  %v948_v50 = vadd.f32 %v6658_v44, %v6487_v15 }
 0x300   :  { %v6791_v47 = vpop.f32.mrb[115].mxu0  ;;  %v5479_v29 = vpop.eup %5478  ;;  %5498 = vtanh.f32 %v940_v43  ;;  %v1503_v26 = vadd.f32 1.0, %v5477_v37  ;;  %v1766_v49 = vmul.f32 %v6536_v12, %v1690_v6  ;;  %v4720_v43 = vmul.f32 -1.442695, %v1149_v61 }
 0x301   :  { %v5481_v23 = vpop.eup %5480  ;;  %5500 = vpow2.f32 %v4718_v38  ;;  %v1691_v17 = vmul.f32 %v5479_v29, %v5475_v39  ;;  %v6799_v39 = vpop.f32.mrb[52].mxu1  ;;  %v4721_v61 = vmul.f32 -1.442695, %v1151_v60 }
 0x302   :  { %v5483_v8 = vpop.eup %5482  ;;  %5502 = vrcp.f32 %v1503_v26  ;;  %v1841_v63 = vadd.f32 %v1766_v49, %v1765_v30  ;;  %v6801_v6 = vpop.f32.mrb[116].mxu0 }
 0x303   :  { %v5485_v55 = vpop.eup %5484  ;;  %5504 = vtanh.f32 %v942_v42  ;;  %v1504_v3 = vadd.f32 1.0, %v5483_v8  ;;  %v1767_v38 = vmul.f32 %v6533_v40, %v1691_v17  ;;  %v6807_v30 = vpop.f32.mrb[53].mxu1  ;;  %v950_v8 = vadd.f32 %v6666_v31, %v6483_v5 }
 0x304   :  { %v5487_v37 = vpop.eup %5486  ;;  %5506 = vpow2.f32 %v4719_v20  ;;  %1842 = vadd.xlane.f32.xlu0 %v1841_v63  ;;  %v1692_v25 = vmul.f32 %v5485_v55, %v5481_v23  ;;  %v6809_v42 = vpop.f32.mrb[117].mxu0  ;;  %v1159_v31 = vadd.f32 %v6713_v52, %v6474_v2  ;;  %v956_v52 = vadd.f32 %v6684_v19, %v6483_v5 }
 0x305   :  { %v5489_v29 = vpop.eup %5488  ;;  %5508 = vrcp.f32 %v1504_v3  ;;  %v6812_v20 = vpop.f32.mrb[54].mxu1 }
 0x306   :  { %v5491_v63 = vpop.eup %5490  ;;  %5510 = vtanh.f32 %v946_v11  ;;  %v1505_v55 = vadd.f32 1.0, %v5489_v29  ;;  %v1768_v26 = vmul.f32 %v6536_v12, %v1692_v25  ;;  %v6814_v49 = vpop.f32.mrb[118].mxu0  ;;  %v1155_v11 = vadd.f32 %v6703_v56, %v6480_v4 }
 0x307   :  { %v5493_v3 = vpop.eup %5492  ;;  %5512 = vpow2.f32 %v4720_v43  ;;  %v1693_v44 = vmul.f32 %v5491_v63, %v5487_v37  ;;  %v6816_v23 = vpop.f32.mrb[55].mxu1 }
 0x308   :  { %v6818_v36 = vpop.f32.mrb[119].mxu0  ;;  %v5495_v17 = vpop.eup %5494  ;;  %5514 = vrcp.f32 %v1505_v55  ;;  %v1844_v60 = vadd.f32 %v1768_v26, %v1767_v38  ;;  %v952_v55 = vadd.f32 %v6670_v33, %v6487_v15 }
 0x309   :  { %v5497_v25 = vpop.eup %5496  ;;  %5516 = vtanh.f32 %v948_v50  ;;  %v1506_v29 = vadd.f32 1.0, %v5495_v17  ;;  %v1769_v37 = vmul.f32 %v6533_v40, %v1693_v44  ;;  %v4723_v50 = vmul.f32 -1.442695, %v1155_v11  ;;  %v6830_v26 = vpop.f32.mrb[56].mxu1 }
 0x30a   :  { %v5499_v18 = vpop.eup %5498  ;;  %5518 = vpow2.f32 %v4721_v61  ;;  %1845 = vadd.xlane.f32.xlu1 %v1844_v60  ;;  %v1694_v43 = vmul.f32 %v5497_v25, %v5493_v3  ;;  %v6832_v61 = vpop.f32.mrb[120].mxu0 }
 0x30b   :  { %v5501_v63 = vpop.eup %5500  ;;  %5520 = vrcp.f32 %v1506_v29  ;;  %v6834_v17 = vpop.f32.mrb[57].mxu1 }
 0x30c   :  { %v5503_v56 = vpop.eup %5502  ;;  %5522 = vtanh.f32 %v950_v8  ;;  %v1507_v38 = vadd.f32 1.0, %v5501_v63  ;;  %v1770_v58 = vmul.f32 %v6536_v12, %v1694_v43  ;;  %7845 = vst [vmem:[#allocation65_spill] sm:$0xff] %v6834_v17  ;;  %v6836_v60 = vpop.f32.mrb[121].mxu0  ;;  %v1161_v8 = vadd.f32 %v6721_v35, %v6480_v4 }
 0x30d   :  { %v5505_v3 = vpop.eup %5504  ;;  %5524 = vpow2.f32 %v4722_v0  ;;  %v1695_v44 = vmul.f32 %v5503_v56, %v5499_v18  ;;  %v6842_v25 = vpop.f32.mrb[58].mxu1  ;;  %v4724_v0 = vmul.f32 -1.442695, %v1159_v31 }
 0x30e   :  { %v5507_v33 = vpop.eup %5506  ;;  %5526 = vrcp.f32 %v1507_v38  ;;  %v1847_v11 = vadd.f32 %v1770_v58, %v1769_v37  ;;  %7846 = vst [vmem:[#allocation66_spill] sm:$0xff] %v6842_v25  ;;  %v6844_v29 = vpop.f32.mrb[122].mxu0  ;;  %v958_v37 = vadd.f32 %v6688_v57, %v6487_v15  ;;  %v1165_v57 = vadd.f32 %v6730_v28, %v6480_v4 }
 0x30f   :  { %v5509_v43 = vpop.eup %5508  ;;  %5528 = vtanh.f32 %v952_v55  ;;  %v1508_v18 = vadd.f32 1.0, %v5507_v33  ;;  %v6846_v63 = vpop.f32.mrb[59].mxu1  ;;  %v1771_v17 = vmul.f32 %v6533_v40, %v1695_v44  ;;  %v1163_v55 = vadd.f32 %v6726_v7, %v6474_v2 }
 0x310   :  { %7847 = vst [vmem:[#allocation67_spill] sm:$0xff] %v6846_v63  ;;  %v6848_v56 = vpop.f32.mrb[123].mxu0  ;;  %v5511_v38 = vpop.eup %5510  ;;  %5530 = vpow2.f32 %v4723_v50  ;;  %1848 = vadd.xlane.f32.xlu0 %v1847_v11  ;;  %v1696_v19 = vmul.f32 %v5509_v43, %v5505_v3  ;;  %v4725_v33 = vmul.f32 -1.442695, %v1161_v8  ;;  %v960_v44 = vadd.f32 %v6693_v24, %v6483_v5 }
 0x311   :  { %v5513_v35 = vpop.eup %5512  ;;  %5532 = vrcp.f32 %v1508_v18  ;;  %v6860_v43 = vpop.f32.mrb[60].mxu1  ;;  %v4726_v18 = vmul.f32 -1.442695, %v1163_v55  ;;  %v1169_v55 = vadd.f32 %v6744_v10, %v6474_v2  ;;  %v1171_v10 = vadd.f32 %v6748_v14, %v6480_v4 }
 0x312   :  { %v5515_v58 = vpop.eup %5514  ;;  %5534 = vtanh.f32 %v956_v52  ;;  %v1509_v31 = vadd.f32 1.0, %v5513_v35  ;;  %v1772_v63 = vmul.f32 %v6536_v12, %v1696_v19  ;;  %v6862_v7 = vpop.f32.mrb[124].mxu0 }
 0x313   :  { %v5517_v25 = vpop.eup %5516  ;;  %5536 = vpow2.f32 %v4724_v0  ;;  %v1697_v50 = vmul.f32 %v5515_v58, %v5511_v38  ;;  %v6864_v19 = vpop.f32.mrb[61].mxu1 }
 0x314   :  { %v5519_v3 = vpop.eup %5518  ;;  %5538 = vrcp.f32 %v1509_v31  ;;  %v1850_v11 = vadd.f32 %v1772_v63, %v1771_v17  ;;  %7848 = vst [vmem:[#allocation68_spill] sm:$0xff] %v6864_v19  ;;  %v6866_v0 = vpop.f32.mrb[125].mxu0 }
 0x315   :  { %v5521_v52 = vpop.eup %5520  ;;  %5540 = vtanh.f32 %v958_v37  ;;  %v1510_v8 = vadd.f32 1.0, %v5519_v3  ;;  %v1773_v35 = vmul.f32 %v6533_v40, %v1697_v50  ;;  %v6869_v28 = vpop.f32.mrb[62].mxu1  ;;  %v962_v37 = vadd.f32 %v6701_v41, %v6487_v15 }
 0x316   :  { %v5523_v38 = vpop.eup %5522  ;;  %5542 = vpow2.f32 %v4725_v33  ;;  %1851 = vadd.xlane.f32.xlu1 %v1850_v11  ;;  %v1698_v24 = vmul.f32 %v5521_v52, %v5517_v25  ;;  %7849 = vst [vmem:[#allocation69_spill] sm:$0xff] %v6869_v28  ;;  %v6871_v17 = vpop.f32.mrb[126].mxu0  ;;  %v4727_v50 = vmul.f32 -1.442695, %v1165_v57  ;;  %v966_v41 = vadd.f32 %v6711_v9, %v6483_v5 }
 0x317   :  { %v5525_v63 = vpop.eup %5524  ;;  %5544 = vrcp.f32 %v1510_v8  ;;  %v6877_v58 = vpop.f32.mrb[63].mxu1  ;;  %v1173_v9 = vadd.f32 %v6756_v21, %v6474_v2 }
 0x318   :  { %7850 = vst [vmem:[#allocation70_spill] sm:$0xff] %v6877_v58  ;;  %v6879_v31 = vpop.f32.mrb[127].mxu0  ;;  %v5527_v33 = vpop.eup %5526  ;;  %5546 = vtanh.f32 %v960_v44  ;;  %v1511_v25 = vadd.f32 1.0, %v5525_v63  ;;  %v1774_v3 = vmul.f32 %v6536_v12, %v1698_v24  ;;  %v4728_v44 = vmul.f32 -1.442695, %v1169_v55 }
 0x319   :  { %v5529_v11 = vpop.eup %5528  ;;  %5548 = vpow2.f32 %v4726_v18  ;;  %v1699_v52 = vmul.f32 %v5527_v33, %v5523_v38  ;;  %v968_v24 = vadd.f32 %v6719_v53, %v6487_v15  ;;  %v1175_v53 = vadd.f32 %v6760_v32, %v6480_v4 }
 0x31a   :  { %v5531_v8 = vpop.eup %5530  ;;  %5550 = vrcp.f32 %v1511_v25  ;;  %v1853_v58 = vadd.f32 %v1774_v3, %v1773_v35  ;;  %v4730_v3 = vmul.f32 -1.442695, %v1173_v9  ;;  %v976_v9 = vadd.f32 %v6742_v62, %v6483_v5 }
 0x31b   :  { %v5533_v28 = vpop.eup %5532  ;;  %5552 = vtanh.f32 %v962_v37  ;;  %v1512_v19 = vadd.f32 1.0, %v5531_v8  ;;  %v1775_v18 = vmul.f32 %v6533_v40, %v1699_v52  ;;  %v4729_v37 = vmul.f32 -1.442695, %v1171_v10 }
 0x31c   :  { %v5535_v63 = vpop.eup %5534  ;;  %5554 = vpow2.f32 %v4727_v50  ;;  %1854 = vadd.xlane.f32.xlu0 %v1853_v58  ;;  %v1700_v57 = vmul.f32 %v5533_v28, %v5529_v11  ;;  %v972_v10 = vadd.f32 %v6728_v34, %v6487_v15  ;;  %v1181_v34 = vadd.f32 %v6778_v48, %v6480_v4 }
 0x31d   :  { %v5537_v38 = vpop.eup %5536  ;;  %5556 = vrcp.f32 %v1512_v19  ;;  %v970_v19 = vadd.f32 %v6724_v45, %v6483_v5  ;;  %v1179_v45 = vadd.f32 %v6774_v22, %v6474_v2  ;;  %v1183_v62 = vadd.f32 %v6783_v27, %v6474_v2 }
 0x31e   :  { %v5539_v14 = vpop.eup %5538  ;;  %5558 = vtanh.f32 %v966_v41  ;;  %v1513_v35 = vadd.f32 1.0, %v5537_v38  ;;  %v1776_v55 = vmul.f32 %v6536_v12, %v1700_v57 }
 0x31f   :  { %v5541_v33 = vpop.eup %5540  ;;  %5560 = vpow2.f32 %v4728_v44  ;;  %v1701_v58 = vmul.f32 %v5539_v14, %v5535_v63  ;;  %v4731_v63 = vmul.f32 -1.442695, %v1175_v53 }
 0x320   :  { %v5543_v28 = vpop.eup %5542  ;;  %5562 = vrcp.f32 %v1513_v35  ;;  %v1856_v25 = vadd.f32 %v1776_v55, %v1775_v18 }
 0x321   :  { %v5545_v50 = vpop.eup %5544  ;;  %5564 = vtanh.f32 %v968_v24  ;;  %v1514_v21 = vadd.f32 1.0, %v5543_v28  ;;  %v1777_v8 = vmul.f32 %v6533_v40, %v1701_v58 }
 0x322   :  { %v5547_v11 = vpop.eup %5546  ;;  %5566 = vpow2.f32 %v4729_v37  ;;  %1857 = vadd.xlane.f32.xlu1 %v1856_v25  ;;  %v1702_v52 = vmul.f32 %v5545_v50, %v5541_v33  ;;  %v4732_v37 = vmul.f32 -1.442695, %v1179_v45  ;;  %v4733_v25 = vmul.f32 -1.442695, %v1181_v34 }
 0x323   :  { %v5549_v41 = vpop.eup %5548  ;;  %5568 = vrcp.f32 %v1514_v21 }
 0x324   :  { %v5551_v32 = vpop.eup %5550  ;;  %5570 = vtanh.f32 %v970_v19  ;;  %v1515_v44 = vadd.f32 1.0, %v5549_v41  ;;  %v1778_v57 = vmul.f32 %v6536_v12, %v1702_v52  ;;  %v978_v19 = vadd.f32 %v6746_v16, %v6487_v15 }
 0x325   :  { %v5553_v18 = vpop.eup %5552  ;;  %5572 = vpow2.f32 %v4730_v3  ;;  %v1703_v38 = vmul.f32 %v5551_v32, %v5547_v11  ;;  %v980_v52 = vadd.f32 %v6754_v54, %v6483_v5  ;;  %v1185_v16 = vadd.f32 %v6791_v47, %v6480_v4 }
 0x326   :  { %v5555_v24 = vpop.eup %5554  ;;  %5574 = vrcp.f32 %v1515_v44  ;;  %v1859_v14 = vadd.f32 %v1778_v57, %v1777_v8  ;;  %v982_v57 = vadd.f32 %v6758_v59, %v6487_v15  ;;  %v1189_v54 = vadd.f32 %v6801_v6, %v6474_v2 }
 0x327   :  { %v5557_v35 = vpop.eup %5556  ;;  %5576 = vtanh.f32 %v972_v10  ;;  %v1516_v22 = vadd.f32 1.0, %v5555_v24  ;;  %v1779_v58 = vmul.f32 %v6533_v40, %v1703_v38  ;;  %v4734_v10 = vmul.f32 -1.442695, %v1183_v62 }
 0x328   :  { %v5559_v55 = vpop.eup %5558  ;;  %5578 = vpow2.f32 %v4731_v63  ;;  %1860 = vadd.xlane.f32.xlu0 %v1859_v14  ;;  %v1704_v33 = vmul.f32 %v5557_v35, %v5553_v18  ;;  %v4735_v38 = vmul.f32 -1.442695, %v1185_v16  ;;  %v986_v35 = vadd.f32 %v6772_v51, %v6483_v5 }
 0x329   :  { %v5561_v28 = vpop.eup %5560  ;;  %5580 = vrcp.f32 %v1516_v22  ;;  %v1191_v59 = vadd.f32 %v6809_v42, %v6480_v4  ;;  %v988_v62 = vadd.f32 %v6776_v46, %v6487_v15  ;;  %v1193_v51 = vadd.f32 %v6814_v49, %v6474_v2 }
 0x32a   :  { %v5563_v48 = vpop.eup %5562  ;;  %5582 = vtanh.f32 %v976_v9  ;;  %v1517_v53 = vadd.f32 1.0, %v5561_v28  ;;  %v1780_v50 = vmul.f32 %v6536_v12, %v1704_v33  ;;  %v1195_v46 = vadd.f32 %v6818_v36, %v6480_v4 }
 0x32b   :  { %v5565_v21 = vpop.eup %5564  ;;  %5584 = vpow2.f32 %v4732_v37  ;;  %v1705_v3 = vmul.f32 %v5563_v48, %v5559_v55  ;;  %v4736_v55 = vmul.f32 -1.442695, %v1189_v54 }
 0x32c   :  { %v5567_v11 = vpop.eup %5566  ;;  %5586 = vrcp.f32 %v1517_v53  ;;  %v1862_v8 = vadd.f32 %v1780_v50, %v1779_v58  ;;  %v4737_v53 = vmul.f32 -1.442695, %v1191_v59 }
 0x32d   :  { %v5569_v41 = vpop.eup %5568  ;;  %5588 = vtanh.f32 %v978_v19  ;;  %v1518_v27 = vadd.f32 1.0, %v5567_v11  ;;  %v1781_v44 = vmul.f32 %v6533_v40, %v1705_v3  ;;  %v990_v11 = vadd.f32 %v6781_v13, %v6483_v5 }
 0x32e   :  { %v5571_v45 = vpop.eup %5570  ;;  %5590 = vpow2.f32 %v4733_v25  ;;  %1863 = vadd.xlane.f32.xlu1 %v1862_v8  ;;  %v1706_v32 = vmul.f32 %v5569_v41, %v5565_v21  ;;  %v4738_v8 = vmul.f32 -1.442695, %v1193_v51  ;;  %v1199_v13 = vadd.f32 %v6832_v61, %v6474_v2 }
 0x32f   :  { %v5573_v63 = vpop.eup %5572  ;;  %5592 = vrcp.f32 %v1518_v27 }
 0x330   :  { %v5575_v47 = vpop.eup %5574  ;;  %5594 = vtanh.f32 %v980_v52  ;;  %v1519_v18 = vadd.f32 1.0, %v5573_v63  ;;  %v1782_v24 = vmul.f32 %v6536_v12, %v1706_v32  ;;  %v992_v32 = vadd.f32 %v6789_v1, %v6487_v15 }
 0x331   :  { %v5577_v9 = vpop.eup %5576  ;;  %5596 = vpow2.f32 %v4734_v10  ;;  %v1707_v34 = vmul.f32 %v5575_v47, %v5571_v45  ;;  %v4739_v63 = vmul.f32 -1.442695, %v1195_v46  ;;  %v1201_v1 = vadd.f32 %v6836_v60, %v6480_v4 }
 0x332   :  { %v5579_v14 = vpop.eup %5578  ;;  %5598 = vrcp.f32 %v1519_v18  ;;  %v1865_v22 = vadd.f32 %v1782_v24, %v1781_v44 }
 0x333   :  { %v5581_v37 = vpop.eup %5580  ;;  %5600 = vtanh.f32 %v982_v57  ;;  %v1520_v6 = vadd.f32 1.0, %v5579_v14  ;;  %v1783_v28 = vmul.f32 %v6533_v40, %v1707_v34  ;;  %v4740_v34 = vmul.f32 -1.442695, %v1199_v13 }
 0x334   :  { %v5583_v33 = vpop.eup %5582  ;;  %5602 = vpow2.f32 %v4735_v38  ;;  %1866 = vadd.xlane.f32.xlu0 %v1865_v22  ;;  %v1708_v58 = vmul.f32 %v5581_v37, %v5577_v9  ;;  %v996_v38 = vadd.f32 %v6799_v39, %v6483_v5  ;;  %v998_v37 = vadd.f32 %v6807_v30, %v6487_v15 }
 0x335   :  { %v5585_v19 = vpop.eup %5584  ;;  %5604 = vrcp.f32 %v1520_v6  ;;  %v1203_v39 = vadd.f32 %v6844_v29, %v6474_v2  ;;  %v1205_v30 = vadd.f32 %v6848_v56, %v6480_v4 }
 0x336   :  { %v5587_v42 = vpop.eup %5586  ;;  %5606 = vtanh.f32 %v986_v35  ;;  %v1521_v48 = vadd.f32 1.0, %v5585_v19  ;;  %v1784_v25 = vmul.f32 %v6536_v12, %v1708_v58 }
 0x337   :  { %v5589_v50 = vpop.eup %5588  ;;  %5608 = vpow2.f32 %v4736_v55  ;;  %v1709_v21 = vmul.f32 %v5587_v42, %v5583_v33  ;;  %v4741_v55 = vmul.f32 -1.442695, %v1201_v1  ;;  %v4743_v46 = vmul.f32 -1.442695, %v1205_v30 }
 0x338   :  { %v5591_v3 = vpop.eup %5590  ;;  %5610 = vrcp.f32 %v1521_v48  ;;  %v1868_v52 = vadd.f32 %v1784_v25, %v1783_v28  ;;  %v4742_v48 = vmul.f32 -1.442695, %v1203_v39 }
 0x339   :  { %v5593_v16 = vpop.eup %5592  ;;  %5612 = vtanh.f32 %v988_v62  ;;  %v1522_v49 = vadd.f32 1.0, %v5591_v3  ;;  %v1785_v10 = vmul.f32 %v6533_v40, %v1709_v21  ;;  %v1000_v62 = vadd.f32 %v6812_v20, %v6483_v5 }
 0x33a   :  { %v5595_v41 = vpop.eup %5594  ;;  %5614 = vpow2.f32 %v4737_v53  ;;  %1869 = vadd.xlane.f32.xlu1 %v1868_v52  ;;  %v1710_v27 = vmul.f32 %v5593_v16, %v5589_v50  ;;  %v1002_v3 = vadd.f32 %v6816_v23, %v6487_v15  ;;  %v1209_v20 = vadd.f32 %v6862_v7, %v6474_v2 }
 0x33b   :  { %v5597_v45 = vpop.eup %5596  ;;  %5616 = vrcp.f32 %v1522_v49  ;;  %v1211_v23 = vadd.f32 %v6866_v0, %v6480_v4 }
 0x33c   :  { %v5599_v36 = vpop.eup %5598  ;;  %5618 = vtanh.f32 %v990_v11  ;;  %v1523_v44 = vadd.f32 1.0, %v5597_v45  ;;  %v1786_v57 = vmul.f32 %v6536_v12, %v1710_v27  ;;  %v4744_v45 = vmul.f32 -1.442695, %v1209_v20 }
 0x33d   :  { %v5601_v54 = vpop.eup %5600  ;;  %5620 = vpow2.f32 %v4738_v8  ;;  %v1711_v47 = vmul.f32 %v5599_v36, %v5595_v41  ;;  %v1006_v41 = vadd.f32 %v6830_v26, %v6483_v5  ;;  %v1213_v26 = vadd.f32 %v6871_v17, %v6474_v2 }
 0x33e   :  { %v5603_v18 = vpop.eup %5602  ;;  %5622 = vrcp.f32 %v1523_v44  ;;  %v1871_v24 = vadd.f32 %v1786_v57, %v1785_v10 }
 0x33f   :  { %v5605_v9 = vpop.eup %5604  ;;  %5624 = vtanh.f32 %v992_v32  ;;  %v1524_v61 = vadd.f32 1.0, %v5603_v18  ;;  %v1787_v59 = vmul.f32 %v6533_v40, %v1711_v47  ;;  %v4745_v47 = vmul.f32 -1.442695, %v1211_v23 }
 0x340   :  { %v5607_v14 = vpop.eup %5606  ;;  %5626 = vpow2.f32 %v4739_v63  ;;  %1872 = vadd.xlane.f32.xlu0 %v1871_v24  ;;  %v1712_v35 = vmul.f32 %v5605_v9, %v5601_v54  ;;  %v7851_v63 = vld [vmem:[#allocation65_spill] sm:$0xff]  ;;  %v7852_v9 = vld [vmem:[#allocation66_spill] sm:$0xff]  ;;  %v4746_v17 = vmul.f32 -1.442695, %v1213_v26 }
 0x341   :  { %v5609_v22 = vpop.eup %5608  ;;  %5628 = vrcp.f32 %v1524_v61  ;;  %v1008_v57 = vadd.f32 %v7851_v63, %v6487_v15  ;;  %v1010_v61 = vadd.f32 %v7852_v9, %v6483_v5 }
 0x342   :  { %v5611_v60 = vpop.eup %5610  ;;  %5630 = vtanh.f32 %v996_v38  ;;  %v1525_v6 = vadd.f32 1.0, %v5609_v22  ;;  %v1788_v33 = vmul.f32 %v6536_v12, %v1712_v35 }
 0x343   :  { %v5613_v58 = vpop.eup %5612  ;;  %5632 = vpow2.f32 %v4740_v34  ;;  %v1713_v28 = vmul.f32 %v5611_v60, %v5607_v14  ;;  %v1215_v34 = vadd.f32 %v6879_v31, %v6480_v4  ;;  %v7853_v60 = vld [vmem:[#allocation67_spill] sm:$0xff] }
 0x344   :  { %v5615_v19 = vpop.eup %5614  ;;  %5634 = vrcp.f32 %v1525_v6  ;;  %v1874_v51 = vadd.f32 %v1788_v33, %v1787_v59  ;;  %v1012_v6 = vadd.f32 %v7853_v60, %v6487_v15 }
 0x345   :  { %v5617_v42 = vpop.eup %5616  ;;  %5636 = vtanh.f32 %v998_v37  ;;  %v1526_v29 = vadd.f32 1.0, %v5615_v19  ;;  %v1789_v50 = vmul.f32 %v6533_v40, %v1713_v28  ;;  %v4747_v4 = vmul.f32 -1.442695, %v1215_v34 }
 0x346   :  { %v5619_v53 = vpop.eup %5618  ;;  %5638 = vpow2.f32 %v4741_v55  ;;  %1875 = vadd.xlane.f32.xlu1 %v1874_v51  ;;  %v1714_v25 = vmul.f32 %v5617_v42, %v5613_v58  ;;  %v1016_v42 = vadd.f32 %v6860_v43, %v6483_v5 }
 0x347   :  { %v5621_v21 = vpop.eup %5620  ;;  %5640 = vrcp.f32 %v1526_v29 }
 0x348   :  { %v5623_v56 = vpop.eup %5622  ;;  %5642 = vtanh.f32 %v1000_v62  ;;  %v1527_v11 = vadd.f32 1.0, %v5621_v21  ;;  %v1790_v52 = vmul.f32 %v6536_v12, %v1714_v25 }
 0x349   :  { %v5625_v16 = vpop.eup %5624  ;;  %5644 = vpow2.f32 %v4742_v48  ;;  %v1715_v49 = vmul.f32 %v5623_v56, %v5619_v53 }
 0x34a   :  { %v5627_v8 = vpop.eup %5626  ;;  %5646 = vrcp.f32 %v1527_v11  ;;  %v1877_v27 = vadd.f32 %v1790_v52, %v1789_v50 }
 0x34b   :  { %v5629_v10 = vpop.eup %5628  ;;  %5648 = vtanh.f32 %v1002_v3  ;;  %v1528_v7 = vadd.f32 1.0, %v5627_v8  ;;  %v1791_v36 = vmul.f32 %v6533_v40, %v1715_v49  ;;  %v7854_v3 = vld [vmem:[#allocation68_spill] sm:$0xff]  ;;  %v7855_v8 = vld [vmem:[#allocation69_spill] sm:$0xff] }
 0x34c   :  { %v5631_v32 = vpop.eup %5630  ;;  %5650 = vpow2.f32 %v4743_v46  ;;  %1878 = vadd.xlane.f32.xlu0 %v1877_v27  ;;  %v1716_v13 = vmul.f32 %v5629_v10, %v5625_v16  ;;  %v1018_v20 = vadd.f32 %v7854_v3, %v6487_v15 }
 0x34d   :  { %v5633_v44 = vpop.eup %5632  ;;  %5652 = vrcp.f32 %v1528_v7 }
 0x34e   :  { %v5635_v0 = vpop.eup %5634  ;;  %5654 = vtanh.f32 %v1006_v41  ;;  %v1529_v54 = vadd.f32 1.0, %v5633_v44  ;;  %v1792_v18 = vmul.f32 %v6536_v12, %v1716_v13  ;;  %v1020_v41 = vadd.f32 %v7855_v8, %v6483_v5  ;;  %v7856_v13 = vld [vmem:[#allocation70_spill] sm:$0xff] }
 0x34f   :  { %v5637_v38 = vpop.eup %5636  ;;  %5656 = vpow2.f32 %v4744_v45  ;;  %v1717_v1 = vmul.f32 %v5635_v0, %v5631_v32 }
 0x350   :  { %v5639_v24 = vpop.eup %5638  ;;  %5658 = vrcp.f32 %v1529_v54  ;;  %v1880_v14 = vadd.f32 %v1792_v18, %v1791_v36  ;;  %v1022_v36 = vadd.f32 %v7856_v13, %v6487_v15 }
 0x351   :  { %v5641_v35 = vpop.eup %5640  ;;  %5660 = vtanh.f32 %v1008_v57  ;;  %v1530_v2 = vadd.f32 1.0, %v5639_v24  ;;  %v1793_v37 = vmul.f32 %v6533_v40, %v1717_v1 }
 0x352   :  { %v5643_v59 = vpop.eup %5642  ;;  %5662 = vpow2.f32 %v4745_v47  ;;  %1881 = vadd.xlane.f32.xlu1 %v1880_v14  ;;  %v1718_v22 = vmul.f32 %v5641_v35, %v5637_v38 }
 0x353   :  { %v5645_v39 = vpop.eup %5644  ;;  %5664 = vrcp.f32 %v1530_v2 }
 0x354   :  { %v5647_v55 = vpop.eup %5646  ;;  %5666 = vtanh.f32 %v1010_v61  ;;  %v1531_v33 = vadd.f32 1.0, %v5645_v39  ;;  %v1794_v31 = vmul.f32 %v6536_v12, %v1718_v22 }
 0x355   :  { %v5649_v58 = vpop.eup %5648  ;;  %5668 = vpow2.f32 %v4746_v17  ;;  %v1719_v28 = vmul.f32 %v5647_v55, %v5643_v59 }
 0x356   :  { %v5651_v19 = vpop.eup %5650  ;;  %5670 = vrcp.f32 %v1531_v33  ;;  %v1883_v62 = vadd.f32 %v1794_v31, %v1793_v37  ;;  %v6998_v31 = vpop.xlane.xlu1 %1812 }
 0x357   :  { %v5653_v30 = vpop.eup %5652  ;;  %5672 = vtanh.f32 %v1012_v6  ;;  %v1532_v51 = vadd.f32 1.0, %v5651_v19  ;;  %v1795_v53 = vmul.f32 %v6533_v40, %v1719_v28 }
 0x358   :  { %v5655_v29 = vpop.eup %5654  ;;  %5674 = vpow2.f32 %v4747_v4  ;;  %1884 = vadd.xlane.f32.xlu0 %v1883_v62  ;;  %v1720_v48 = vmul.f32 %v5653_v30, %v5649_v58  ;;  %v7000_v58 = vpop.xlane.xlu0 %1806 }
 0x359   :  { %v5657_v25 = vpop.eup %5656  ;;  %5676 = vrcp.f32 %v1532_v51 }
 0x35a   :  { %v5659_v50 = vpop.eup %5658  ;;  %v1533_v21 = vadd.f32 1.0, %v5657_v25  ;;  %v1796_v56 = vmul.f32 %v6536_v12, %v1720_v48  ;;  %5678 = vtanh.f32 %v1016_v42  ;;  %v7002_v28 = vpop.xlane.xlu1 %1815  ;;  %v7858_v25 = vld [vmem:[#allocation60_spill] sm:$0xff] }
 0x35b   :  { %v5661_v11 = vpop.eup %5660  ;;  %v1721_v46 = vmul.f32 %v5659_v50, %v5655_v29 }
 0x35c   :  { %v5663_v52 = vpop.eup %5662  ;;  %5680 = vrcp.f32 %v1533_v21  ;;  %v1886_v43 = vadd.f32 %v1796_v56, %v1795_v53  ;;  %v7004_v19 = vpop.xlane.xlu0 %1809 }
 0x35d   :  { %v5665_v16 = vpop.eup %5664  ;;  %v1534_v49 = vadd.f32 1.0, %v5663_v52  ;;  %5682 = vtanh.f32 %v1018_v20  ;;  %v1797_v10 = vmul.f32 %v6533_v40, %v1721_v46 }
 0x35e   :  { %v5667_v23 = vpop.eup %5666  ;;  %1887 = vadd.xlane.f32.xlu1 %v1886_v43  ;;  %v1722_v27 = vmul.f32 %v5665_v16, %v5661_v11 }
 0x35f   :  { %v5669_v7 = vpop.eup %5668  ;;  %5684 = vrcp.f32 %v1534_v49 }
 0x360   :  { %v5671_v45 = vpop.eup %5670  ;;  %v1535_v32 = vadd.f32 1.0, %v5669_v7  ;;  %v1798_v44 = vmul.f32 %v6536_v12, %v1722_v27  ;;  %5686 = vtanh.f32 %v1020_v41 }
 0x361   :  { %v5673_v63 = vpop.eup %5672  ;;  %v1723_v57 = vmul.f32 %v5671_v45, %v5667_v23 }
 0x362   :  { %v5675_v26 = vpop.eup %5674  ;;  %5688 = vrcp.f32 %v1535_v32  ;;  %v1889_v5 = vadd.f32 %v1798_v44, %v1797_v10  ;;  %v7008_v30 = vpop.xlane.xlu0 %1818 }
 0x363   :  { %v5677_v0 = vpop.eup %5676  ;;  %v1536_v54 = vadd.f32 1.0, %v5675_v26  ;;  %5690 = vtanh.f32 %v1022_v36  ;;  %v1799_v18 = vmul.f32 %v6533_v40, %v1723_v57 }
 0x364   :  { %1890 = vadd.xlane.f32.xlu0 %v1889_v5  ;;  %v1724_v47 = vmul.f32 %v5677_v0, %v5673_v63  ;;  %v5679_v38 = vpop.eup %5678 }
 0x365   :  { %5692 = vrcp.f32 %v1536_v54 }
 0x366   :  { %v5681_v1 = vpop.eup %5680  ;;  %v1800_v15 = vmul.f32 %v6536_v12, %v1724_v47 }
 0x367   :  { %v1725_v24 = vmul.f32 %v5681_v1, %v5679_v38  ;;  %v5683_v9 = vpop.eup %5682 }
 0x368   :  { %v1892_v61 = vadd.f32 %v1800_v15, %v1799_v18  ;;  %v7006_v62 = vpop.xlane.xlu1 %1821 }
 0x369   :  { %v5685_v34 = vpop.eup %5684  ;;  %v1801_v35 = vmul.f32 %v6533_v40, %v1725_v24 }
 0x36a   :  { %1893 = vadd.xlane.f32.xlu1 %v1892_v61  ;;  %v1726_v14 = vmul.f32 %v5685_v34, %v5683_v9  ;;  %v5687_v2 = vpop.eup %5686 }
 0x36c   :  { %v5689_v17 = vpop.eup %5688  ;;  %v1802_v59 = vmul.f32 %v6536_v12, %v1726_v14 }
 0x36d   :  { %v1727_v22 = vmul.f32 %v5689_v17, %v5687_v2  ;;  %v5691_v37 = vpop.eup %5690  ;;  %v7012_v42 = vpop.xlane.xlu0 %1824 }
 0x36e   :  { %v1895_v39 = vadd.f32 %v1802_v59, %v1801_v35 }
 0x36f   :  { %v5693_v60 = vpop.eup %5692  ;;  %v1803_v55 = vmul.f32 %v6533_v40, %v1727_v22  ;;  %v7857_v40 = vlaneseq }
 0x370   :  { %1896 = vadd.xlane.f32.xlu0 %v1895_v39  ;;  %v1728_v6 = vmul.f32 %v5693_v60, %v5691_v37 }
 0x372   :  { %v1804_v33 = vmul.f32 %v6536_v12, %v1728_v6  ;;  %v1934_v12 = vand.u32 127, %v7857_v40 }
 0x373   :  { %v7010_v51 = vpop.xlane.xlu1 %1827 }
 0x374   :  { %v1898_v4 = vadd.f32 %v1804_v33, %v1803_v55  ;;  %v1939_v29 = vadd.s32 4294967288, %v1934_v12  ;;  %v7027_v20 = vsub.s32 %v1934_v12, %v7858_v25 }
 0x376   :  { %1899 = vadd.xlane.f32.xlu1 %v1898_v4  ;;  %v7020_v50 = vsub.s32 %v1939_v29, %v7858_v25  ;;  %v1949_v52 = vrot.slane %v6998_v31, %v7027_v20  ;;  %v1958_v49 = vrot.slane %v7008_v30, %v7027_v20  ;;  %v1938_v23 = vrot.slane %v7000_v58, %v7027_v20 }
 0x377   :  { %v1967_v10 = vrot.slane %v7012_v42, %v7027_v20 }
 0x378   :  { %v1953_v56 = vrot.slane %v7002_v28, %v7020_v50  ;;  %v1962_v11 = vrot.slane %v7006_v62, %v7020_v50  ;;  %v1943_v46 = vrot.slane %v7004_v19, %v7020_v50  ;;  %v1971_v43 = vrot.slane %v7010_v51, %v7020_v50 }
 0x379   :  { %v7017_v53 = vpop.xlane.xlu0 %1830 }
 0x37a   :  { %v1954_v27 = vsel %vm1944_vm0, %v1953_v56, %v1949_v52  ;;  %v1963_v45 = vsel %vm1944_vm0, %v1962_v11, %v1958_v49  ;;  %v1976_v32 = vrot.slane %v7017_v53, %v7027_v20  ;;  %v1945_v36 = vsel %vm1944_vm0, %v1943_v46, %v1938_v23 }
 0x37b   :  { %v1972_v44 = vsel %vm1944_vm0, %v1971_v43, %v1967_v10  ;;  %v2082_v57 = vsel %vm2081_vm1, %v1954_v27, %v1945_v36 }
 0x37c   :  { %v2084_v54 = vsel %vm2083_vm2, %v1963_v45, %v2082_v57 }
 0x37d   :  { %v2086_v18 = vsel %vm2085_vm3, %v1972_v44, %v2084_v54 }
 0x37f   :  { %v7015_v48 = vpop.xlane.xlu1 %1833 }
 0x380   :  { %v1980_v8 = vrot.slane %v7015_v48, %v7020_v50 }
 0x382   :  { %v1981_v26 = vsel %vm1944_vm0, %v1980_v8, %v1976_v32 }
 0x383   :  { %v2088_v9 = vsel %vm2087_vm4, %v1981_v26, %v2086_v18 }
 0x385   :  { %v7024_v3 = vpop.xlane.xlu0 %1836 }
 0x386   :  { %v1985_v63 = vrot.slane %v7024_v3, %v7027_v20 }
 0x38b   :  { %v7022_v21 = vpop.xlane.xlu1 %1839 }
 0x38c   :  { %v1989_v7 = vrot.slane %v7022_v21, %v7020_v50 }
 0x38e   :  { %v1990_v47 = vsel %vm1944_vm0, %v1989_v7, %v1985_v63 }
 0x38f   :  { %v2090_v61 = vsel %vm2089_vm5, %v1990_v47, %v2088_v9 }
 0x391   :  { %v7045_v41 = vpop.xlane.xlu0 %1842 }
 0x392   :  { %v1994_v5 = vrot.slane %v7045_v41, %v7027_v20 }
 0x397   :  { %v7039_v16 = vpop.xlane.xlu1 %1845 }
 0x398   :  { %v1998_v13 = vrot.slane %v7039_v16, %v7020_v50 }
 0x39a   :  { %v1999_v1 = vsel %vm1944_vm0, %v1998_v13, %v1994_v5 }
 0x39b   :  { %v2092_v14 = vsel %vm2091_vm6, %v1999_v1, %v2090_v61 }
 0x39d   :  { %v7067_v0 = vpop.xlane.xlu0 %1848 }
 0x39e   :  { %v2003_v15 = vrot.slane %v7067_v0, %v7027_v20 }
 0x3a3   :  { %v7072_v38 = vpop.xlane.xlu1 %1851 }
 0x3a4   :  { %v2007_v24 = vrot.slane %v7072_v38, %v7020_v50 }
 0x3a6   :  { %v2008_v34 = vsel %vm1944_vm0, %v2007_v24, %v2003_v15 }
 0x3a7   :  { %v2094_v35 = vsel %vm2093_vm8, %v2008_v34, %v2092_v14 }
 0x3a8   :  { %v2105_v2 = vsel %vm2104_vm7, %v2094_v35, -inf }
 0x3a9   :  { %2106 = vmax.xlane.f32.xlu0 %v2105_v2  ;;  %v7087_v59 = vpop.xlane.xlu0 %1854 }
 0x3aa   :  { %v2012_v27 = vrot.slane %v7087_v59, %v7027_v20 }
 0x3af   :  { %v7085_v17 = vpop.xlane.xlu1 %1857 }
 0x3b0   :  { %v2016_v11 = vrot.slane %v7085_v17, %v7020_v50 }
 0x3b2   :  { %v2017_v44 = vsel %vm1944_vm0, %v2016_v11, %v2012_v27 }
 0x3b5   :  { %v7091_v37 = vpop.xlane.xlu0 %1860 }
 0x3b6   :  { %v2021_v46 = vrot.slane %v7091_v37, %v7027_v20 }
 0x3bb   :  { %v7089_v22 = vpop.xlane.xlu1 %1863 }
 0x3bc   :  { %v2025_v29 = vrot.slane %v7089_v22, %v7020_v50 }
 0x3be   :  { %v2026_v10 = vsel %vm1944_vm0, %v2025_v29, %v2021_v46 }
 0x3bf   :  { %v2095_v26 = vsel %vm2081_vm1, %v2026_v10, %v2017_v44  ;;  %v7861_v10 = vld [vmem:[#allocation61_spill] sm:$0xff]  ;;  %v7863_v44 = vld [vmem:[#allocation62_spill] sm:$0xff] }
 0x3c1   :  { %v7095_v60 = vpop.xlane.xlu0 %1866 }
 0x3c2   :  { %v2030_v49 = vrot.slane %v7095_v60, %v7027_v20 }
 0x3c7   :  { %v7093_v39 = vpop.xlane.xlu1 %1869 }
 0x3c8   :  { %v2034_v56 = vrot.slane %v7093_v39, %v7020_v50 }
 0x3ca   :  { %v2035_v32 = vsel %vm1944_vm0, %v2034_v56, %v2030_v49 }
 0x3cb   :  { %v2096_v18 = vsel %vm2083_vm2, %v2035_v32, %v2095_v26 }
 0x3cd   :  { %v7099_v55 = vpop.xlane.xlu0 %1872 }
 0x3ce   :  { %v2039_v7 = vrot.slane %v7099_v55, %v7027_v20 }
 0x3d3   :  { %v7097_v6 = vpop.xlane.xlu1 %1875 }
 0x3d4   :  { %v2043_v52 = vrot.slane %v7097_v6, %v7020_v50 }
 0x3d6   :  { %v2044_v63 = vsel %vm1944_vm0, %v2043_v52, %v2039_v7  ;;  %v7859_v52 = vld [vmem:[#allocation63_spill] sm:$0xff] }
 0x3d7   :  { %v2097_v15 = vsel %vm2085_vm3, %v2044_v63, %v2096_v18 }
 0x3d9   :  { %v7103_v4 = vpop.xlane.xlu0 %1878 }
 0x3da   :  { %v2048_v13 = vrot.slane %v7103_v4, %v7027_v20 }
 0x3df   :  { %v7101_v33 = vpop.xlane.xlu1 %1881 }
 0x3e0   :  { %v2052_v8 = vrot.slane %v7101_v33, %v7020_v50 }
 0x3e2   :  { %v2053_v5 = vsel %vm1944_vm0, %v2052_v8, %v2048_v13  ;;  %v7860_v8 = vld [vmem:[#allocation64_spill] sm:$0xff] }
 0x3e3   :  { %v2098_v14 = vsel %vm2087_vm4, %v2053_v5, %v2097_v15  ;;  %v7183_v15 = vsub.s32 6, %v7858_v25 }
 0x3e5   :  { %v7107_v12 = vpop.xlane.xlu0 %1884  ;;  %7865 = vst [vmem:[#allocation67_spill] sm:$0xff] %v7183_v15 }
 0x3e6   :  { %v2057_v57 = vrot.slane %v7107_v12, %v7027_v20 }
 0x3eb   :  { %v7105_v40 = vpop.xlane.xlu1 %1887 }
 0x3ec   :  { %v2061_v45 = vrot.slane %v7105_v40, %v7020_v50 }
 0x3ee   :  { %v2062_v1 = vsel %vm1944_vm0, %v2061_v45, %v2057_v57 }
 0x3ef   :  { %v2099_v35 = vsel %vm2089_vm5, %v2062_v1, %v2098_v14  ;;  %v7189_v14 = vsub.s32 7, %v7858_v25 }
 0x3f1   :  { %v7125_v23 = vpop.xlane.xlu0 %1890  ;;  %7866 = vst [vmem:[#allocation68_spill] sm:$0xff] %v7189_v14 }
 0x3f2   :  { %v2066_v54 = vrot.slane %v7125_v23, %v7027_v20 }
 0x3f7   :  { %v7119_v43 = vpop.xlane.xlu1 %1893 }
 0x3f8   :  { %v2070_v36 = vrot.slane %v7119_v43, %v7020_v50 }
 0x3fa   :  { %v2071_v9 = vsel %vm1944_vm0, %v2070_v36, %v2066_v54  ;;  %v7172_v36 = vsub.s32 4, %v7858_v25  ;;  %v7177_v54 = vsub.s32 5, %v7858_v25 }
 0x3fb   :  { %v2100_v29 = vsel %vm2091_vm6, %v2071_v9, %v2099_v35 }
 0x3fc   :  { %7862 = vst [vmem:[#allocation65_spill] sm:$0xff] %v7172_v36  ;;  %7864 = vst [vmem:[#allocation66_spill] sm:$0xff] %v7177_v54 }
 0x3fd   :  { %v7147_v47 = vpop.xlane.xlu0 %1896 }
 0x3fe   :  { %v2075_v61 = vrot.slane %v7147_v47, %v7027_v20 }
 0x403   :  { %v7152_v24 = vpop.xlane.xlu1 %1899 }
 0x404   :  { %v2079_v34 = vrot.slane %v7152_v24, %v7020_v50 }
 0x406   :  { %v2080_v2 = vsel %vm1944_vm0, %v2079_v34, %v2075_v61 }
 0x407   :  { %v2101_v56 = vsel %vm2093_vm8, %v2080_v2, %v2100_v29 }
 0x408   :  { %v2108_v11 = vsel %vm2104_vm7, %v2101_v56, -inf }
 0x409   :  { %2109 = vmax.xlane.f32.xlu1 %v2108_v11 }
 0x436   :  { %v2107_v46 = vpop.xlane.xlu0 %2106 }
 0x437   :  { %v2116_v49 = vrot.slane %v2107_v46, %v7859_v52  ;;  %v2120_v27 = vrot.slane %v2107_v46, %v7860_v8  ;;  %v2124_v7 = vrot.slane %v2107_v46, %v7861_v10  ;;  %v2128_v63 = vrot.slane %v2107_v46, %v7863_v44 }
 0x438   :  { %v2136_v61 = vrot.slane %v2107_v46, %v7177_v54  ;;  %v2140_v2 = vrot.slane %v2107_v46, %v7183_v15 }
 0x439   :  { %v2193_v45 = vsub.f32 %v7000_v58, %v2116_v49  ;;  %v2194_v32 = vsub.f32 %v7004_v19, %v2116_v49  ;;  %v2195_v13 = vsub.f32 %v6998_v31, %v2120_v27  ;;  %v2198_v57 = vsub.f32 %v7006_v62, %v2124_v7 }
 0x43a   :  { %v2196_v18 = vsub.f32 %v7002_v28, %v2120_v27  ;;  %v2132_v19 = vrot.slane %v2107_v46, %v7172_v36  ;;  %v2200_v31 = vsub.f32 %v7010_v51, %v2128_v63  ;;  %v2197_v62 = vsub.f32 %v7008_v30, %v2124_v7 }
 0x43b   :  { %v2225_v26 = vmul.f32 1.442695, %v2193_v45  ;;  %v2227_v5 = vmul.f32 1.442695, %v2194_v32  ;;  %v2229_v58 = vmul.f32 1.442695, %v2195_v13  ;;  %v2199_v51 = vsub.f32 %v7012_v42, %v2128_v63 }
 0x43c   :  { %v2235_v1 = vmul.f32 1.442695, %v2198_v57  ;;  %v2231_v9 = vmul.f32 1.442695, %v2196_v18  ;;  %v2202_v34 = vsub.f32 %v7015_v48, %v2132_v19  ;;  %v2239_v28 = vmul.f32 1.442695, %v2200_v31 }
 0x43d   :  { %5694 = vpow2.f32 %v2225_v26  ;;  %v2233_v35 = vmul.f32 1.442695, %v2197_v62  ;;  %v2204_v29 = vsub.f32 %v7022_v21, %v2136_v61  ;;  %v2201_v48 = vsub.f32 %v7017_v53, %v2132_v19 }
 0x43e   :  { %5696 = vpow2.f32 %v2227_v5  ;;  %v2243_v30 = vmul.f32 1.442695, %v2202_v34  ;;  %v2237_v25 = vmul.f32 1.442695, %v2199_v51  ;;  %v2144_v42 = vrot.slane %v2107_v46, %v7189_v14 }
 0x43f   :  { %5698 = vpow2.f32 %v2229_v58  ;;  %v2206_v49 = vsub.f32 %v7039_v16, %v2140_v2  ;;  %v2247_v21 = vmul.f32 1.442695, %v2204_v29  ;;  %v2203_v45 = vsub.f32 %v7024_v3, %v2136_v61 }
 0x440   :  { %5700 = vpow2.f32 %v2235_v1  ;;  %v2241_v32 = vmul.f32 1.442695, %v2201_v48  ;;  %v2208_v53 = vsub.f32 %v7072_v38, %v2144_v42  ;;  %v2205_v3 = vsub.f32 %v7045_v41, %v2140_v2 }
 0x441   :  { %5702 = vpow2.f32 %v2231_v9  ;;  %v2251_v46 = vmul.f32 1.442695, %v2206_v49  ;;  %v2245_v63 = vmul.f32 1.442695, %v2203_v45  ;;  %v2207_v38 = vsub.f32 %v7067_v0, %v2144_v42 }
 0x442   :  { %5704 = vpow2.f32 %v2239_v28  ;;  %v2255_v57 = vmul.f32 1.442695, %v2208_v53  ;;  %v2249_v18 = vmul.f32 1.442695, %v2205_v3 }
 0x443   :  { %5706 = vpow2.f32 %v2233_v35  ;;  %v2253_v41 = vmul.f32 1.442695, %v2207_v38 }
 0x444   :  { %5708 = vpow2.f32 %v2243_v30 }
 0x445   :  { %5710 = vpow2.f32 %v2237_v25 }
 0x446   :  { %5712 = vpow2.f32 %v2247_v21 }
 0x447   :  { %v7194_v56 = vpop.eup %5694  ;;  %5714 = vpow2.f32 %v2241_v32 }
 0x448   :  { %v7196_v11 = vpop.eup %5696  ;;  %2322 = vperm.xlu0 %5068, %v7194_v56   ;;  %5716 = vpow2.f32 %v2251_v46 }
 0x449   :  { %2325 = vperm.xlu1 %5069, %v7196_v11   ;;  %v7203_v27 = vpop.eup %5698  ;;  %5718 = vpow2.f32 %v2245_v63 }
 0x44a   :  { %v7205_v7 = vpop.eup %5700  ;;  %5720 = vpow2.f32 %v2255_v57 }
 0x44b   :  { %v7211_v13 = vpop.eup %5702  ;;  %5722 = vpow2.f32 %v2249_v18 }
 0x44c   :  { %2337 = vperm.xlu0 %5068, %v7205_v7   ;;  %v7213_v16 = vpop.eup %5704  ;;  %5724 = vpow2.f32 %v2253_v41 }
 0x44d   :  { %2328 = vperm.xlu1 %5069, %v7203_v27   ;;  %v7218_v26 = vpop.eup %5706 }
 0x44e   :  { %v7220_v5 = vpop.eup %5708 }
 0x44f   :  { %v7225_v58 = vpop.eup %5710 }
 0x450   :  { %2343 = vperm.xlu0 %5068, %v7213_v16   ;;  %v7227_v19 = vpop.eup %5712 }
 0x451   :  { %2331 = vperm.xlu1 %5069, %v7211_v13   ;;  %v7231_v31 = vpop.eup %5714 }
 0x452   :  { %v7233_v1 = vpop.eup %5716 }
 0x453   :  { %v7237_v0 = vpop.eup %5718 }
 0x454   :  { %2349 = vperm.xlu0 %5068, %v7220_v5   ;;  %v7239_v62 = vpop.eup %5720 }
 0x455   :  { %2334 = vperm.xlu1 %5069, %v7218_v26   ;;  %v7243_v9 = vpop.eup %5722 }
 0x456   :  { %v7246_v61 = vpop.eup %5724 }
 0x458   :  { %2355 = vperm.xlu0 %5068, %v7227_v19  }
 0x459   :  { %2340 = vperm.xlu1 %5069, %v7225_v58  }
 0x45c   :  { %2361 = vperm.xlu0 %5068, %v7233_v1  }
 0x45d   :  { %2346 = vperm.xlu1 %5069, %v7231_v31  }
 0x460   :  { %2367 = vperm.xlu0 %5068, %v7239_v62  }
 0x461   :  { %2352 = vperm.xlu1 %5069, %v7237_v0  }
 0x465   :  { %2358 = vperm.xlu1 %5069, %v7243_v9  }
 0x469   :  { %2364 = vperm.xlu1 %5069, %v7246_v61  }
 0x496   :  { %v2110_v34 = vpop.xlane.xlu1 %2109 }
 0x497   :  { %v2148_v28 = vrot.slane %v2110_v34, %v7859_v52  ;;  %v2156_v51 = vrot.slane %v2110_v34, %v7861_v10  ;;  %v2152_v2 = vrot.slane %v2110_v34, %v7860_v8  ;;  %v2160_v30 = vrot.slane %v2110_v34, %v7863_v44 }
 0x498   :  { %v2164_v21 = vrot.slane %v2110_v34, %v7172_v36  ;;  %v2172_v3 = vrot.slane %v2110_v34, %v7183_v15  ;;  %v2176_v18 = vrot.slane %v2110_v34, %v7189_v14 }
 0x499   :  { %v2209_v35 = vsub.f32 %v7087_v59, %v2148_v28  ;;  %v2210_v29 = vsub.f32 %v7085_v17, %v2148_v28  ;;  %v2214_v48 = vsub.f32 %v7093_v39, %v2156_v51  ;;  %v2211_v42 = vsub.f32 %v7091_v37, %v2152_v2 }
 0x49a   :  { %v2216_v45 = vsub.f32 %v7097_v6, %v2160_v30  ;;  %v2212_v59 = vsub.f32 %v7089_v22, %v2152_v2  ;;  %v2168_v17 = vrot.slane %v2110_v34, %v7177_v54  ;;  %v2218_v46 = vsub.f32 %v7101_v33, %v2164_v21 }
 0x49b   :  { %v2257_v25 = vmul.f32 1.442695, %v2209_v35  ;;  %v2259_v49 = vmul.f32 1.442695, %v2210_v29  ;;  %v2267_v32 = vmul.f32 1.442695, %v2214_v48  ;;  %v2213_v63 = vsub.f32 %v7095_v60, %v2156_v51 }
 0x49c   :  { %v2261_v53 = vmul.f32 1.442695, %v2211_v42  ;;  %v2271_v39 = vmul.f32 1.442695, %v2216_v45  ;;  %v2263_v37 = vmul.f32 1.442695, %v2212_v59  ;;  %v2220_v57 = vsub.f32 %v7105_v40, %v2168_v17 }
 0x49d   :  { %5726 = vpow2.f32 %v2257_v25  ;;  %v2275_v6 = vmul.f32 1.442695, %v2218_v46  ;;  %v2215_v22 = vsub.f32 %v7099_v55, %v2160_v30  ;;  %v2265_v33 = vmul.f32 1.442695, %v2213_v63 }
 0x49e   :  { %5728 = vpow2.f32 %v2259_v49  ;;  %v2222_v60 = vsub.f32 %v7119_v43, %v2172_v3  ;;  %v2279_v41 = vmul.f32 1.442695, %v2220_v57  ;;  %v2217_v40 = vsub.f32 %v7103_v4, %v2164_v21 }
 0x49f   :  { %5730 = vpow2.f32 %v2267_v32  ;;  %v2269_v35 = vmul.f32 1.442695, %v2215_v22  ;;  %v2224_v55 = vsub.f32 %v7152_v24, %v2176_v18  ;;  %v2219_v29 = vsub.f32 %v7107_v12, %v2168_v17 }
 0x4a0   :  { %5732 = vpow2.f32 %v2261_v53  ;;  %v2283_v34 = vmul.f32 1.442695, %v2222_v60  ;;  %v2273_v30 = vmul.f32 1.442695, %v2217_v40  ;;  %v2221_v24 = vsub.f32 %v7125_v23, %v2172_v3 }
 0x4a1   :  { %5734 = vpow2.f32 %v2271_v39  ;;  %v2287_v4 = vmul.f32 1.442695, %v2224_v55  ;;  %v2277_v42 = vmul.f32 1.442695, %v2219_v29  ;;  %v2223_v21 = vsub.f32 %v7147_v47, %v2176_v18 }
 0x4a2   :  { %5736 = vpow2.f32 %v2263_v37  ;;  %v2281_v45 = vmul.f32 1.442695, %v2221_v24 }
 0x4a3   :  { %5738 = vpow2.f32 %v2275_v6  ;;  %v2285_v59 = vmul.f32 1.442695, %v2223_v21 }
 0x4a4   :  { %5740 = vpow2.f32 %v2265_v33 }
 0x4a5   :  { %5742 = vpow2.f32 %v2279_v41 }
 0x4a6   :  { %5744 = vpow2.f32 %v2269_v35 }
 0x4a7   :  { %v7265_v38 = vpop.eup %5726  ;;  %5746 = vpow2.f32 %v2283_v34 }
 0x4a8   :  { %2370 = vperm.xlu1 %5069, %v7265_v38   ;;  %v7271_v28 = vpop.eup %5728  ;;  %5748 = vpow2.f32 %v2273_v30 }
 0x4a9   :  { %v7273_v51 = vpop.eup %5730  ;;  %5750 = vpow2.f32 %v2287_v4 }
 0x4aa   :  { %2385 = vperm.xlu0 %5068, %v7273_v51   ;;  %v7279_v2 = vpop.eup %5732  ;;  %5752 = vpow2.f32 %v2277_v42 }
 0x4ab   :  { %v7281_v43 = vpop.eup %5734  ;;  %5754 = vpow2.f32 %v2281_v45 }
 0x4ac   :  { %2373 = vperm.xlu1 %5069, %v7271_v28   ;;  %v7286_v48 = vpop.eup %5736  ;;  %5756 = vpow2.f32 %v2285_v59 }
 0x4ad   :  { %v7288_v25 = vpop.eup %5738 }
 0x4ae   :  { %2391 = vperm.xlu0 %5068, %v7281_v43   ;;  %v7293_v12 = vpop.eup %5740 }
 0x4af   :  { %v7295_v49 = vpop.eup %5742 }
 0x4b0   :  { %2376 = vperm.xlu1 %5069, %v7279_v2   ;;  %v7300_v32 = vpop.eup %5744 }
 0x4b1   :  { %v7302_v23 = vpop.eup %5746 }
 0x4b2   :  { %2397 = vperm.xlu0 %5068, %v7288_v25   ;;  %v7306_v53 = vpop.eup %5748 }
 0x4b3   :  { %v7308_v17 = vpop.eup %5750 }
 0x4b4   :  { %2379 = vperm.xlu1 %5069, %v7286_v48   ;;  %7867 = vst [vmem:[#allocation69_spill] sm:$0xff] %v7308_v17  ;;  %v7312_v47 = vpop.eup %5752 }
 0x4b5   :  { %v7315_v46 = vpop.eup %5754 }
 0x4b6   :  { %2403 = vperm.xlu0 %5068, %v7295_v49   ;;  %v7318_v37 = vpop.eup %5756 }
 0x4b7   :  { %7868 = vst [vmem:[#allocation70_spill] sm:$0xff] %v7318_v37 }
 0x4b8   :  { %2382 = vperm.xlu1 %5069, %v7293_v12  }
 0x4ba   :  { %2409 = vperm.xlu0 %5068, %v7302_v23  }
 0x4bc   :  { %2388 = vperm.xlu1 %5069, %v7300_v32  }
 0x4be   :  { %2415 = vperm.xlu0 %5068, %v7308_v17  }
 0x4c0   :  { %2394 = vperm.xlu1 %5069, %v7306_v53  }
 0x4c4   :  { %2400 = vperm.xlu1 %5069, %v7312_v47  }
 0x4c7   :  { %v2323_v39 = vpop.permute.xlu0 %2322 }
 0x4c8   :  { %2406 = vperm.xlu1 %5069, %v7315_v46   ;;  %v2326_v63 = vpop.permute.xlu1 %2325  ;;  %v2420_v4 = vrot.slane %v2323_v39, %v7027_v20 }
 0x4c9   :  { %v2424_v30 = vrot.slane %v2326_v63, %v7020_v50 }
 0x4cb   :  { %v2338_v57 = vpop.permute.xlu0 %2337  ;;  %v2425_v39 = vsel %vm1944_vm0, %v2424_v30, %v2420_v4 }
 0x4cc   :  { %2412 = vperm.xlu1 %5069, %v7318_v37   ;;  %v2329_v3 = vpop.permute.xlu1 %2328  ;;  %v2442_v21 = vrot.slane %v2338_v57, %v7020_v50 }
 0x4cd   :  { %v2429_v24 = vrot.slane %v2329_v3, %v7027_v20 }
 0x4cf   :  { %v2344_v22 = vpop.permute.xlu0 %2343 }
 0x4d0   :  { %v2332_v6 = vpop.permute.xlu1 %2331 }
 0x4d1   :  { %v2433_v35 = vrot.slane %v2332_v6, %v7020_v50  ;;  %v2451_v6 = vrot.slane %v2344_v22, %v7020_v50 }
 0x4d3   :  { %v2350_v18 = vpop.permute.xlu0 %2349  ;;  %v2434_v59 = vsel %vm1944_vm0, %v2433_v35, %v2429_v24 }
 0x4d4   :  { %v2335_v33 = vpop.permute.xlu1 %2334  ;;  %v2460_v63 = vrot.slane %v2350_v18, %v7020_v50 }
 0x4d5   :  { %v2438_v55 = vrot.slane %v2335_v33, %v7027_v20 }
 0x4d7   :  { %v2356_v41 = vpop.permute.xlu0 %2355  ;;  %v2443_v37 = vsel %vm1944_vm0, %v2442_v21, %v2438_v55 }
 0x4d8   :  { %v2341_v60 = vpop.permute.xlu1 %2340 }
 0x4d9   :  { %v2447_v42 = vrot.slane %v2341_v60, %v7027_v20  ;;  %v2469_v60 = vrot.slane %v2356_v41, %v7020_v50 }
 0x4db   :  { %v2362_v34 = vpop.permute.xlu0 %2361  ;;  %v2452_v3 = vsel %vm1944_vm0, %v2451_v6, %v2447_v42 }
 0x4dc   :  { %v2347_v40 = vpop.permute.xlu1 %2346  ;;  %v2478_v22 = vrot.slane %v2362_v34, %v7020_v50 }
 0x4dd   :  { %v2456_v45 = vrot.slane %v2347_v40, %v7027_v20  ;;  %v2561_v40 = vsel %vm2081_vm1, %v2434_v59, %v2425_v39 }
 0x4de   :  { %v2562_v55 = vsel %vm2083_vm2, %v2443_v37, %v2561_v40 }
 0x4df   :  { %v2461_v35 = vsel %vm1944_vm0, %v2460_v63, %v2456_v45  ;;  %v2563_v24 = vsel %vm2085_vm3, %v2452_v3, %v2562_v55 }
 0x4e0   :  { %v2353_v29 = vpop.permute.xlu1 %2352  ;;  %v2564_v41 = vsel %vm2087_vm4, %v2461_v35, %v2563_v24 }
 0x4e1   :  { %v2465_v33 = vrot.slane %v2353_v29, %v7027_v20  ;;  %v2368_v29 = vpop.permute.xlu0 %2367 }
 0x4e3   :  { %v2470_v18 = vsel %vm1944_vm0, %v2469_v60, %v2465_v33 }
 0x4e4   :  { %v2359_v17 = vpop.permute.xlu1 %2358  ;;  %v2565_v21 = vsel %vm2089_vm5, %v2470_v18, %v2564_v41 }
 0x4e5   :  { %v2474_v57 = vrot.slane %v2359_v17, %v7027_v20  ;;  %v2487_v17 = vrot.slane %v2368_v29, %v7020_v50 }
 0x4e7   :  { %v2479_v30 = vsel %vm1944_vm0, %v2478_v22, %v2474_v57 }
 0x4e8   :  { %v2365_v4 = vpop.permute.xlu1 %2364  ;;  %v2566_v45 = vsel %vm2091_vm6, %v2479_v30, %v2565_v21 }
 0x4e9   :  { %v2483_v42 = vrot.slane %v2365_v4, %v7027_v20 }
 0x4eb   :  { %v2488_v34 = vsel %vm1944_vm0, %v2487_v17, %v2483_v42 }
 0x4ec   :  { %v2567_v37 = vsel %vm2093_vm8, %v2488_v34, %v2566_v45 }
 0x4ed   :  { %v2577_v59 = vsel %vm2104_vm7, %v2567_v37, 0.0 }
 0x4f0   :  { %2578 = vadd.xlane.f32.xlu1 %v2577_v59 }
 0x527   :  { %v2371_v6 = vpop.permute.xlu1 %2370 }
 0x528   :  { %v2492_v34 = vrot.slane %v2371_v6, %v7027_v20 }
 0x529   :  { %v2386_v63 = vpop.permute.xlu0 %2385 }
 0x52a   :  { %v2514_v42 = vrot.slane %v2386_v63, %v7020_v50 }
 0x52b   :  { %v2374_v33 = vpop.permute.xlu1 %2373 }
 0x52c   :  { %v2496_v4 = vrot.slane %v2374_v33, %v7020_v50 }
 0x52d   :  { %v2392_v3 = vpop.permute.xlu0 %2391 }
 0x52e   :  { %v2523_v45 = vrot.slane %v2392_v3, %v7020_v50 }
 0x52f   :  { %v2377_v39 = vpop.permute.xlu1 %2376 }
 0x530   :  { %v2501_v41 = vrot.slane %v2377_v39, %v7027_v20  ;;  %v2497_v39 = vsel %vm1944_vm0, %v2496_v4, %v2492_v34 }
 0x531   :  { %v2398_v57 = vpop.permute.xlu0 %2397 }
 0x533   :  { %v2380_v60 = vpop.permute.xlu1 %2379 }
 0x534   :  { %v2505_v55 = vrot.slane %v2380_v60, %v7020_v50  ;;  %v2532_v60 = vrot.slane %v2398_v57, %v7020_v50 }
 0x535   :  { %v2404_v22 = vpop.permute.xlu0 %2403 }
 0x536   :  { %v2506_v37 = vsel %vm1944_vm0, %v2505_v55, %v2501_v41 }
 0x537   :  { %v2383_v40 = vpop.permute.xlu1 %2382  ;;  %v2568_v6 = vsel %vm2081_vm1, %v2506_v37, %v2497_v39 }
 0x538   :  { %v2510_v18 = vrot.slane %v2383_v40, %v7027_v20 }
 0x539   :  { %v2410_v24 = vpop.permute.xlu0 %2409 }
 0x53a   :  { %v2515_v33 = vsel %vm1944_vm0, %v2514_v42, %v2510_v18  ;;  %v2550_v3 = vrot.slane %v2410_v24, %v7020_v50 }
 0x53b   :  { %v2389_v35 = vpop.permute.xlu1 %2388  ;;  %v2569_v57 = vsel %vm2083_vm2, %v2515_v33, %v2568_v6 }
 0x53c   :  { %v2519_v17 = vrot.slane %v2389_v35, %v7027_v20  ;;  %v2541_v35 = vrot.slane %v2404_v22, %v7020_v50 }
 0x53d   :  { %v2416_v55 = vpop.permute.xlu0 %2415 }
 0x53e   :  { %v2524_v63 = vsel %vm1944_vm0, %v2523_v45, %v2519_v17  ;;  %v2559_v17 = vrot.slane %v2416_v55, %v7020_v50 }
 0x53f   :  { %v2395_v29 = vpop.permute.xlu1 %2394  ;;  %v2570_v41 = vsel %vm2085_vm3, %v2524_v63, %v2569_v57  ;;  %v5134_v63 = vld [vmem:[#allocation13] ss:$48 sps:$4 sm:$0xff]  }
 0x540   :  { %v2528_v21 = vrot.slane %v2395_v29, %v7027_v20 }
 0x543   :  { %v2401_v30 = vpop.permute.xlu1 %2400 }
 0x544   :  { %v2537_v59 = vrot.slane %v2401_v30, %v7027_v20  ;;  %v2533_v30 = vsel %vm1944_vm0, %v2532_v60, %v2528_v21 }
 0x545   :  { %v2571_v42 = vsel %vm2087_vm4, %v2533_v30, %v2570_v41 }
 0x546   :  { %v2542_v18 = vsel %vm1944_vm0, %v2541_v35, %v2537_v59 }
 0x547   :  { %v2407_v40 = vpop.permute.xlu1 %2406  ;;  %v2572_v24 = vsel %vm2089_vm5, %v2542_v18, %v2571_v42 }
 0x548   :  { %v2546_v29 = vrot.slane %v2407_v40, %v7027_v20 }
 0x54a   :  { %v2551_v4 = vsel %vm1944_vm0, %v2550_v3, %v2546_v29  ;;  %v5136_v29 = vld [vmem:[#allocation13 + $0x4] ss:$48 sps:$4 sm:$0xff]  }
 0x54b   :  { %v2413_v22 = vpop.permute.xlu1 %2412  ;;  %v2573_v21 = vsel %vm2091_vm6, %v2551_v4, %v2572_v24  ;;  %3852 = vmatprep.subr.bf16.mxu1 %v5136_v29  ;;  %v5137_v24 = vld [vmem:[#allocation13 + $0x60] ss:$48 sps:$4 sm:$0xff]  }
 0x54c   :  { %v2555_v34 = vrot.slane %v2413_v22, %v7027_v20  ;;  %3853 = vmatpush1.bf16.msra.mxu1 %v5134_v63 }
 0x54e   :  { %v2560_v45 = vsel %vm1944_vm0, %v2559_v17, %v2555_v34 }
 0x54f   :  { %v2574_v37 = vsel %vm2093_vm8, %v2560_v45, %v2573_v21 }
 0x550   :  { %v2580_v59 = vsel %vm2104_vm7, %v2574_v37, 0.0 }
 0x551   :  { %2581 = vadd.xlane.f32.xlu0 %v2580_v59 }
 0x57d   :  { %v2579_v60 = vpop.xlane.xlu1 %2578 }
 0x57e   :  { %v2588_v33 = vrot.slane %v2579_v60, %v7859_v52  ;;  %v2592_v50 = vrot.slane %v2579_v60, %v7860_v8  ;;  %v2596_v20 = vrot.slane %v2579_v60, %v7861_v10  ;;  %v2600_v40 = vrot.slane %v2579_v60, %v7863_v44 }
 0x57f   :  { %v2604_v35 = vrot.slane %v2579_v60, %v7172_v36  ;;  %v2608_v30 = vrot.slane %v2579_v60, %v7177_v54  ;;  %v2616_v17 = vrot.slane %v2579_v60, %v7189_v14 }
 0x580   :  { %5758 = vrcp.f32 %v2588_v33  ;;  %v5142_v33 = vld [vmem:[#allocation13 + $0xc4] ss:$48 sps:$4 sm:$0xff]  }
 0x581   :  { %5760 = vrcp.f32 %v2592_v50  ;;  %v5145_v50 = vld [vmem:[#allocation13 + $0x124] ss:$48 sps:$4 sm:$0xff]  }
 0x582   :  { %5762 = vrcp.f32 %v2596_v20  ;;  %v5148_v20 = vld [vmem:[#allocation13 + $0x184] ss:$48 sps:$4 sm:$0xff]  }
 0x583   :  { %5764 = vrcp.f32 %v2600_v40  ;;  %v5149_v40 = vld [vmem:[#allocation13 + $0x1e0] ss:$48 sps:$4 sm:$0xff]  }
 0x584   :  { %5766 = vrcp.f32 %v2604_v35 }
 0x585   :  { %5768 = vrcp.f32 %v2608_v30 }
 0x58a   :  { %v5759_v39 = vpop.eup %5758 }
 0x58b   :  { %v2667_v6 = vmul.f32 %v5759_v39, %v7196_v11  ;;  %v2666_v3 = vmul.f32 %v5759_v39, %v7194_v56  ;;  %v5761_v55 = vpop.eup %5760  ;;  %v2612_v11 = vrot.slane %v2579_v60, %v7183_v15 }
 0x58c   :  { %v2669_v57 = vmul.f32 %v5761_v55, %v7203_v27  ;;  %v2670_v18 = vmul.f32 %v5761_v55, %v7211_v13  ;;  %v5763_v41 = vpop.eup %5762 }
 0x58d   :  { %2720 = vperm.xlu1 %5069, %v2667_v6   ;;  %2715 = vperm.xlu0 %5068, %v2666_v3   ;;  %v2672_v56 = vmul.f32 %v5763_v41, %v7218_v26  ;;  %v2673_v4 = vmul.f32 %v5763_v41, %v7205_v7  ;;  %v5765_v22 = vpop.eup %5764  ;;  %5770 = vrcp.f32 %v2612_v11  ;;  %v5139_v7 = vld [vmem:[#allocation13 + $0x64] ss:$48 sps:$4 sm:$0xff]  }
 0x58e   :  { %v2675_v27 = vmul.f32 %v5765_v22, %v7225_v58  ;;  %v2676_v13 = vmul.f32 %v5765_v22, %v7213_v16  ;;  %v5767_v42 = vpop.eup %5766  ;;  %5772 = vrcp.f32 %v2616_v17  ;;  %3854 = vmatprep.subr.bf16.mxu1 %v5139_v7 }
 0x58f   :  { %v2678_v34 = vmul.f32 %v5767_v42, %v7231_v31  ;;  %v2679_v26 = vmul.f32 %v5767_v42, %v7220_v5  ;;  %v5769_v45 = vpop.eup %5768  ;;  %3855 = vmatpush1.bf16.msra.mxu1 %v5137_v24 }
 0x590   :  { %v2681_v21 = vmul.f32 %v5769_v45, %v7237_v0  ;;  %v2682_v58 = vmul.f32 %v5769_v45, %v7227_v19  ;;  %v5140_v0 = vld [vmem:[#allocation13 + $0xc0] ss:$48 sps:$4 sm:$0xff]   ;;  %3856 = vmatprep.subr.bf16.mxu1 %v5142_v33  ;;  %v5157_v45 = vld [vmem:[#allocation13 + $0x24] ss:$48 sps:$4 sm:$0xff]  }
 0x591   :  { %2725 = vperm.xlu1 %5069, %v2669_v57   ;;  %2730 = vperm.xlu0 %5068, %v2670_v18   ;;  %v5143_v19 = vld [vmem:[#allocation13 + $0x120] ss:$48 sps:$4 sm:$0xff]   ;;  %v5175_v33 = vld [vmem:[#allocation13 + $0x204] ss:$48 sps:$4 sm:$0xff]  }
 0x592   :  { %4048 = vmatprep.subr.bf16.mxu0 %v5157_v45 }
 0x593   :  { %3857 = vmatpush1.bf16.msra.mxu1 %v5140_v0  ;;  %v5170_v0 = vld [vmem:[#allocation13 + $0x1a0] ss:$48 sps:$4 sm:$0xff]  }
 0x594   :  { %3858 = vmatprep.subr.bf16.mxu1 %v5145_v50  ;;  %v5178_v50 = vld [vmem:[#allocation13 + $0x264] ss:$48 sps:$4 sm:$0xff]  }
 0x595   :  { %2735 = vperm.xlu1 %5069, %v2672_v56   ;;  %2740 = vperm.xlu0 %5068, %v2673_v4  }
 0x597   :  { %v5771_v16 = vpop.eup %5770  ;;  %3859 = vmatpush1.bf16.msra.mxu1 %v5143_v19  ;;  %v5173_v19 = vld [vmem:[#allocation13 + $0x200] ss:$48 sps:$4 sm:$0xff]  }
 0x598   :  { %v2684_v37 = vmul.f32 %v5771_v16, %v7243_v9  ;;  %v2685_v31 = vmul.f32 %v5771_v16, %v7233_v1  ;;  %v5773_v59 = vpop.eup %5772  ;;  %v5146_v9 = vld [vmem:[#allocation13 + $0x180] ss:$48 sps:$4 sm:$0xff]   ;;  %3860 = vmatprep.subr.bf16.mxu1 %v5148_v20  ;;  %v5151_v1 = vld [vmem:[#allocation13 + $0x1e4] ss:$48 sps:$4 sm:$0xff]   ;;  %v5184_v20 = vld [vmem:[#allocation13 + $0xc] ss:$48 sps:$4 sm:$0xff]  }
 0x599   :  { %2745 = vperm.xlu1 %5069, %v2675_v27   ;;  %2750 = vperm.xlu0 %5068, %v2676_v13   ;;  %v2687_v5 = vmul.f32 %v5773_v59, %v7246_v61  ;;  %v2688_v60 = vmul.f32 %v5773_v59, %v7239_v62  ;;  %v5161_v16 = vld [vmem:[#allocation13 + $0xe0] ss:$48 sps:$4 sm:$0xff]   ;;  %v5172_v59 = vld [vmem:[#allocation13 + $0x1a4] ss:$48 sps:$4 sm:$0xff]  }
 0x59b   :  { %3861 = vmatpush1.bf16.msra.mxu1 %v5146_v9  ;;  %v5176_v9 = vld [vmem:[#allocation13 + $0x260] ss:$48 sps:$4 sm:$0xff]  }
 0x59c   :  { %3862 = vmatprep.subr.bf16.mxu1 %v5151_v1  ;;  %v5181_v1 = vld [vmem:[#allocation13 + $0x2c4] ss:$48 sps:$4 sm:$0xff]  }
 0x59d   :  { %2755 = vperm.xlu1 %5069, %v2678_v34   ;;  %2760 = vperm.xlu0 %5068, %v2679_v26  }
 0x59f   :  { %3863 = vmatpush1.bf16.msra.mxu1 %v5149_v40  ;;  %v5179_v40 = vld [vmem:[#allocation13 + $0x2c0] ss:$48 sps:$4 sm:$0xff]  }
 0x5a1   :  { %2765 = vperm.xlu1 %5069, %v2681_v21   ;;  %2770 = vperm.xlu0 %5068, %v2682_v58   ;;  %v5154_v21 = vld [vmem:[#allocation13 + $0x244] ss:$48 sps:$4 sm:$0xff]  }
 0x5a2   :  { %3864 = vmatprep.subr.bf16.mxu1 %v5154_v21  ;;  %v5160_v58 = vld [vmem:[#allocation13 + $0x84] ss:$48 sps:$4 sm:$0xff]   ;;  %v7884_v21 = vld [vmem:[#allocation49_spill] sm:$0xff] }
 0x5a5   :  { %2775 = vperm.xlu1 %5069, %v2684_v37   ;;  %2780 = vperm.xlu0 %5068, %v2685_v31   ;;  %v5164_v37 = vld [vmem:[#allocation13 + $0x140] ss:$48 sps:$4 sm:$0xff]   ;;  %v5166_v31 = vld [vmem:[#allocation13 + $0x144] ss:$48 sps:$4 sm:$0xff]  }
 0x5a9   :  { %2785 = vperm.xlu1 %5069, %v2687_v5   ;;  %2790 = vperm.xlu0 %5068, %v2688_v60   ;;  %v5167_v5 = vld [vmem:[#allocation13 + $0x2a0] ss:$48 sps:$4 sm:$0xff]   ;;  %v5169_v60 = vld [vmem:[#allocation13 + $0x2a4] ss:$48 sps:$4 sm:$0xff]  }
 0x5de   :  { %v2582_v61 = vpop.xlane.xlu0 %2581 }
 0x5df   :  { %v2620_v62 = vrot.slane %v2582_v61, %v7859_v52  ;;  %v2624_v39 = vrot.slane %v2582_v61, %v7860_v8  ;;  %v2628_v35 = vrot.slane %v2582_v61, %v7861_v10  ;;  %v2632_v63 = vrot.slane %v2582_v61, %v7863_v44  ;;  %v7898_v8 = vld [vmem:[#allocation43_spill] sm:$0xff]  ;;  %v7899_v52 = vld [vmem:[#allocation42_spill] sm:$0xff] }
 0x5e0   :  { %v2636_v6 = vrot.slane %v2582_v61, %v7172_v36  ;;  %v2640_v57 = vrot.slane %v2582_v61, %v7177_v54  ;;  %v2644_v56 = vrot.slane %v2582_v61, %v7183_v15  ;;  %v2648_v22 = vrot.slane %v2582_v61, %v7189_v14  ;;  %v7896_v14 = vld [vmem:[#allocation55_spill] sm:$0xff]  ;;  %v7897_v15 = vld [vmem:[#allocation54_spill] sm:$0xff] }
 0x5e1   :  { %5774 = vrcp.f32 %v2620_v62  ;;  %v3108_v54 = vadd.f32 %v7897_v15, %v7896_v14 }
 0x5e2   :  { %5776 = vrcp.f32 %v2624_v39 }
 0x5e3   :  { %5778 = vrcp.f32 %v2628_v35  ;;  %v3109_v15 = vrot.slane %v3108_v54, 4 }
 0x5e4   :  { %5780 = vrcp.f32 %v2632_v63  ;;  %v7871_v63 = vld [vmem:[#allocation28_spill] sm:$0xff] }
 0x5e5   :  { %5782 = vrcp.f32 %v2636_v6 }
 0x5e6   :  { %5784 = vrcp.f32 %v2640_v57 }
 0x5e7   :  { %5786 = vrcp.f32 %v2644_v56 }
 0x5e8   :  { %5788 = vrcp.f32 %v2648_v22 }
 0x5eb   :  { %v5775_v29 = vpop.eup %5774 }
 0x5ec   :  { %v2691_v3 = vmul.f32 %v5775_v29, %v7271_v28  ;;  %v2690_v55 = vmul.f32 %v5775_v29, %v7265_v38  ;;  %v5777_v30 = vpop.eup %5776  ;;  %v7872_v29 = vld [vmem:[#allocation29_spill] sm:$0xff] }
 0x5ed   :  { %v2694_v18 = vmul.f32 %v5777_v30, %v7286_v48  ;;  %v2693_v41 = vmul.f32 %v5777_v30, %v7279_v2  ;;  %v5779_v11 = vpop.eup %5778  ;;  %v3017_v6 = vadd.f32 %v7872_v29, %v7871_v63  ;;  %v7874_v30 = vld [vmem:[#allocation31_spill] sm:$0xff] }
 0x5ee   :  { %2800 = vperm.xlu0 %5068, %v2691_v3   ;;  %2795 = vperm.xlu1 %5069, %v2690_v55   ;;  %v2697_v28 = vmul.f32 %v5779_v11, %v7273_v51  ;;  %v2696_v38 = vmul.f32 %v5779_v11, %v7293_v12  ;;  %v5781_v4 = vpop.eup %5780  ;;  %v7873_v55 = vld [vmem:[#allocation30_spill] sm:$0xff] }
 0x5ef   :  { %v2700_v48 = vmul.f32 %v5781_v4, %v7281_v43  ;;  %v2699_v2 = vmul.f32 %v5781_v4, %v7300_v32  ;;  %v5783_v17 = vpop.eup %5782  ;;  %v3018_v3 = vrot.slane %v3017_v6, 4  ;;  %v3024_v57 = vadd.f32 %v7874_v30, %v7873_v55 }
 0x5f0   :  { %v2703_v27 = vmul.f32 %v5783_v17, %v7288_v25  ;;  %v2702_v51 = vmul.f32 %v5783_v17, %v7306_v53  ;;  %v5785_v13 = vpop.eup %5784  ;;  %v7869_v25 = vld [vmem:[#allocation69_spill] sm:$0xff]  ;;  %v7870_v53 = vld [vmem:[#allocation70_spill] sm:$0xff] }
 0x5f1   :  { %v2706_v12 = vmul.f32 %v5785_v13, %v7295_v49  ;;  %v2705_v42 = vmul.f32 %v5785_v13, %v7312_v47  ;;  %v5787_v34 = vpop.eup %5786  ;;  %v5152_v49 = vld [vmem:[#allocation13 + $0x240] ss:$48 sps:$4 sm:$0xff]   ;;  %v3025_v4 = vrot.slane %v3024_v57, 4 }
 0x5f2   :  { %2810 = vperm.xlu0 %5068, %v2694_v18   ;;  %2805 = vperm.xlu1 %5069, %v2693_v41   ;;  %v2709_v43 = vmul.f32 %v5787_v34, %v7302_v23  ;;  %v2708_v32 = vmul.f32 %v5787_v34, %v7315_v46  ;;  %v5789_v26 = vpop.eup %5788  ;;  %v5155_v47 = vld [vmem:[#allocation13 + $0x20] ss:$48 sps:$4 sm:$0xff]   ;;  %v5163_v46 = vld [vmem:[#allocation13 + $0xe4] ss:$48 sps:$4 sm:$0xff]  }
 0x5f3   :  { %v2712_v24 = vmul.f32 %v5789_v26, %v7869_v25  ;;  %v2711_v7 = vmul.f32 %v5789_v26, %v7870_v53  ;;  %4049 = vmatpush1.bf16.msra.mxu0 %v5155_v47  ;;  %3865 = vmatpush1.bf16.msra.mxu1 %v5152_v49  ;;  %v5158_v23 = vld [vmem:[#allocation13 + $0x80] ss:$48 sps:$4 sm:$0xff]  }
 0x5f4   :  { %4050 = vmatprep.subr.bf16.mxu0 %v5160_v58  ;;  %3866 = vmatprep.subr.bf16.mxu1 %v5169_v60  ;;  %v7875_v18 = vld [vmem:[#allocation32_spill] sm:$0xff]  ;;  %v7876_v41 = vld [vmem:[#allocation33_spill] sm:$0xff]  ;;  %v7878_v13 = vld [vmem:[#allocation34_spill] sm:$0xff] }
 0x5f5   :  { %v3031_v11 = vadd.f32 %v7876_v41, %v7875_v18  ;;  %v7879_v34 = vld [vmem:[#allocation45_spill] sm:$0xff]  ;;  %v7881_v26 = vld [vmem:[#allocation46_spill] sm:$0xff]  ;;  %v7882_v25 = vld [vmem:[#allocation47_spill] sm:$0xff] }
 0x5f6   :  { %2820 = vperm.xlu0 %5068, %v2697_v28   ;;  %2815 = vperm.xlu1 %5069, %v2696_v38   ;;  %v3019_v38 = vadd.f32 %v3018_v3, %v3017_v6  ;;  %v7883_v49 = vld [vmem:[#allocation48_spill] sm:$0xff] }
 0x5f7   :  { %4051 = vmatpush1.bf16.msra.mxu0 %v5158_v23  ;;  %3867 = vmatpush1.bf16.msra.mxu1 %v5167_v5  ;;  %v3032_v22 = vrot.slane %v3031_v11, 4  ;;  %v3087_v47 = vadd.f32 %v7884_v21, %v7883_v49  ;;  %v7889_v5 = vld [vmem:[#allocation38_spill] sm:$0xff] }
 0x5f8   :  { %4052 = vmatprep.subr.bf16.mxu0 %v5163_v46  ;;  %3901 = vmatprep.subr.bf16.mxu1 %v5184_v20  ;;  %v3020_v17 = vrot.slane %v3019_v38, 2 }
 0x5f9   :  { %v3088_v6 = vrot.slane %v3087_v47, 4 }
 0x5fa   :  { %2830 = vperm.xlu0 %5068, %v2700_v48   ;;  %2825 = vperm.xlu1 %5069, %v2699_v2   ;;  %v3021_v53 = vadd.f32 %v3020_v17, %v3019_v38 }
 0x5fb   :  { %4053 = vmatpush1.bf16.msra.mxu0 %v5161_v16  ;;  %v7886_v16 = vld [vmem:[#allocation37_spill] sm:$0xff] }
 0x5fc   :  { %4054 = vmatprep.subr.bf16.mxu0 %v5166_v31 }
 0x5fe   :  { %2840 = vperm.xlu0 %5068, %v2703_v27   ;;  %2835 = vperm.xlu1 %5069, %v2702_v51   ;;  %v3026_v27 = vadd.f32 %v3025_v4, %v3024_v57  ;;  %v7877_v51 = vld [vmem:[#allocation35_spill] sm:$0xff]  ;;  %v7894_v4 = vld [vmem:[#allocation53_spill] sm:$0xff] }
 0x5ff   :  { %4055 = vmatpush1.bf16.msra.mxu0 %v5164_v37  ;;  %v7887_v37 = vld [vmem:[#allocation36_spill] sm:$0xff]  ;;  %v7892_v57 = vld [vmem:[#allocation51_spill] sm:$0xff] }
 0x600   :  { %4056 = vmatprep.subr.bf16.mxu0 %v5172_v59  ;;  %v3045_v31 = vadd.f32 %v7887_v37, %v7886_v16  ;;  %v7888_v59 = vld [vmem:[#allocation39_spill] sm:$0xff] }
 0x601   :  { %v3052_v60 = vadd.f32 %v7889_v5, %v7888_v59 }
 0x602   :  { %2850 = vperm.xlu0 %5068, %v2706_v12   ;;  %2845 = vperm.xlu1 %5069, %v2705_v42   ;;  %v3038_v12 = vadd.f32 %v7878_v13, %v7877_v51  ;;  %v3033_v42 = vadd.f32 %v3032_v22, %v3031_v11  ;;  %v7893_v11 = vld [vmem:[#allocation50_spill] sm:$0xff]  ;;  %v7895_v22 = vld [vmem:[#allocation52_spill] sm:$0xff]  ;;  %v3046_v36 = vrot.slane %v3045_v31, 4 }
 0x603   :  { %4057 = vmatpush1.bf16.msra.mxu0 %v5170_v0  ;;  %v7890_v0 = vld [vmem:[#allocation41_spill] sm:$0xff]  ;;  %v3094_v38 = vadd.f32 %v7893_v11, %v7892_v57  ;;  %v3101_v17 = vadd.f32 %v7895_v22, %v7894_v4  ;;  %v3053_v44 = vrot.slane %v3052_v60, 4  ;;  %v3089_v11 = vadd.f32 %v3088_v6, %v3087_v47 }
 0x604   :  { %4058 = vmatprep.subr.bf16.mxu0 %v5175_v33  ;;  %v3039_v45 = vrot.slane %v3038_v12, 4  ;;  %v3034_v23 = vrot.slane %v3033_v42, 2  ;;  %v7891_v33 = vld [vmem:[#allocation40_spill] sm:$0xff]  ;;  %v3047_v14 = vadd.f32 %v3046_v36, %v3045_v31  ;;  %v7902_v36 = vld [vmem:[#allocation57_spill] sm:$0xff] }
 0x605   :  { %v3095_v4 = vrot.slane %v3094_v38, 4  ;;  %v3102_v57 = vrot.slane %v3101_v17, 4  ;;  %v3054_v5 = vadd.f32 %v3053_v44, %v3052_v60  ;;  %v7903_v44 = vld [vmem:[#allocation56_spill] sm:$0xff] }
 0x606   :  { %2860 = vperm.xlu0 %5068, %v2709_v43   ;;  %2855 = vperm.xlu1 %5069, %v2708_v32   ;;  %v7880_v43 = vld [vmem:[#allocation44_spill] sm:$0xff]  ;;  %v3035_v3 = vadd.f32 %v3034_v23, %v3033_v42 }
 0x607   :  { %4059 = vmatpush1.bf16.msra.mxu0 %v5173_v19  ;;  %v3073_v32 = vadd.f32 %v7880_v43, %v7879_v34  ;;  %v3059_v19 = vadd.f32 %v7891_v33, %v7890_v0  ;;  %v3066_v33 = vadd.f32 %v7899_v52, %v7898_v8  ;;  %v3103_v6 = vadd.f32 %v3102_v57, %v3101_v17 }
 0x608   :  { %4060 = vmatprep.subr.bf16.mxu0 %v5178_v50  ;;  %v3036_v22 = vrot.slane %v3035_v3, 1  ;;  %v3110_v8 = vadd.f32 %v3109_v15, %v3108_v54 }
 0x609   :  { %v3074_v50 = vrot.slane %v3073_v32, 4  ;;  %v3060_v10 = vrot.slane %v3059_v19, 4 }
 0x60a   :  { %2870 = vperm.xlu0 %5068, %v2712_v24   ;;  %2865 = vperm.xlu1 %5069, %v2711_v7   ;;  %v3080_v24 = vadd.f32 %v7882_v25, %v7881_v26  ;;  %v3027_v7 = vrot.slane %v3026_v27, 2 }
 0x60b   :  { %4061 = vmatpush1.bf16.msra.mxu0 %v5176_v9  ;;  %v3022_v9 = vrot.slane %v3021_v53, 1  ;;  %v3075_v0 = vadd.f32 %v3074_v50, %v3073_v32  ;;  %v3061_v59 = vadd.f32 %v3060_v10, %v3059_v19  ;;  %v3115_v10 = vadd.f32 %v7903_v44, %v7902_v36 }
 0x60c   :  { %4062 = vmatprep.subr.bf16.mxu0 %v5181_v1  ;;  %v7433_v61 = vpop.permute.xlu1 %2720  ;;  %v7435_v62 = vpop.permute.xlu0 %2715  ;;  %v3081_v20 = vrot.slane %v3080_v24, 4  ;;  %v3028_v1 = vadd.f32 %v3027_v7, %v3026_v27  ;;  %v3048_v19 = vrot.slane %v3047_v14, 2 }
 0x60d   :  { %v3023_v7 = vadd.f32 %v3022_v9, %v3021_v53  ;;  %v3076_v37 = vrot.slane %v3075_v0, 2  ;;  %v2874_v32 = vmul.f32 %v7433_v61, %v7872_v29  ;;  %v3096_v9 = vadd.f32 %v3095_v4, %v3094_v38 }
 0x60e   :  { %v3082_v27 = vadd.f32 %v3081_v20, %v3080_v24  ;;  %v2873_v24 = vmul.f32 %v7435_v62, %v7871_v63  ;;  %v3090_v20 = vrot.slane %v3089_v11, 2  ;;  %v3055_v61 = vrot.slane %v3054_v5, 2 }
 0x60f   :  { %4063 = vmatpush1.bf16.msra.mxu0 %v5179_v40  ;;  %v3040_v40 = vadd.f32 %v3039_v45, %v3038_v12  ;;  %v3029_v45 = vrot.slane %v3028_v1, 1  ;;  %v7489_v53 = vmul.f32 0.0625, %v3023_v7  ;;  %v3062_v29 = vrot.slane %v3061_v59, 2 }
 0x610   :  { %v7437_v39 = vpop.permute.xlu1 %2725  ;;  %v7439_v35 = vpop.permute.xlu0 %2730  ;;  %v3083_v52 = vrot.slane %v3082_v27, 2  ;;  %v3037_v62 = vadd.f32 %v3036_v22, %v3035_v3  ;;  %v3077_v63 = vadd.f32 %v3076_v37, %v3075_v0  ;;  %v3097_v57 = vrot.slane %v3096_v9, 2 }
 0x611   :  { %v3041_v23 = vrot.slane %v3040_v40, 2  ;;  %7901 = vst [vmem:[#allocation70_spill] sm:$0xff] %v7489_v53  ;;  %v3030_v50 = vadd.f32 %v3029_v45, %v3028_v1  ;;  %v2905_v1 = vadd.f32 %v2874_v32, %v2873_v24  ;;  %v3091_v45 = vadd.f32 %v3090_v20, %v3089_v11 }
 0x612   :  { %v3084_v7 = vadd.f32 %v3083_v52, %v3082_v27  ;;  %v2875_v54 = vmul.f32 %v7437_v39, %v7873_v55  ;;  %v2876_v15 = vmul.f32 %v7439_v35, %v7874_v30  ;;  %v3104_v38 = vrot.slane %v3103_v6, 2 }
 0x613   :  { %v3042_v47 = vadd.f32 %v3041_v23, %v3040_v40  ;;  %v3111_v4 = vrot.slane %v3110_v8, 2  ;;  %v3116_v17 = vrot.slane %v3115_v10, 4  ;;  %v3049_v23 = vadd.f32 %v3048_v19, %v3047_v14 }
 0x614   :  { %v7447_v56 = vpop.permute.xlu1 %2735  ;;  %v7449_v28 = vpop.permute.xlu0 %2740  ;;  %v3056_v53 = vadd.f32 %v3055_v61, %v3054_v5  ;;  %v3063_v44 = vadd.f32 %v3062_v29, %v3061_v59  ;;  %v3078_v52 = vrot.slane %v3077_v63, 1  ;;  %v3085_v37 = vrot.slane %v3084_v7, 1  ;;  %v7906_v61 = vld [vmem:[#allocation58_spill] sm:$0xff]  ;;  %v7907_v29 = vld [vmem:[#allocation59_spill] sm:$0xff] }
 0x615   :  { %v3043_v40 = vrot.slane %v3042_v47, 1  ;;  %v2906_v0 = vrot.slane %v2905_v1, 4  ;;  %v7507_v39 = vmul.f32 0.0625, %v3037_v62  ;;  %v3092_v55 = vrot.slane %v3091_v45, 1 }
 0x616   :  { %v2912_v30 = vadd.f32 %v2876_v15, %v2875_v54  ;;  %v3098_v22 = vadd.f32 %v3097_v57, %v3096_v9  ;;  %v3105_v27 = vadd.f32 %v3104_v38, %v3103_v6  ;;  %v3112_v14 = vadd.f32 %v3111_v4, %v3110_v8 }
 0x617   :  { %7905 = vst [vmem:[#allocation29_spill] sm:$0xff] %v7507_v39  ;;  %v3044_v35 = vadd.f32 %v3043_v40, %v3042_v47  ;;  %v3117_v5 = vadd.f32 %v3116_v17, %v3115_v10  ;;  %v3050_v59 = vrot.slane %v3049_v23, 1  ;;  %v3057_v32 = vrot.slane %v3056_v53, 1 }
 0x618   :  { %v7451_v48 = vpop.permute.xlu1 %2745  ;;  %v7453_v2 = vpop.permute.xlu0 %2750  ;;  %v3064_v24 = vrot.slane %v3063_v44, 1  ;;  %v3079_v20 = vadd.f32 %v3078_v52, %v3077_v63  ;;  %v3086_v19 = vadd.f32 %v3085_v37, %v3084_v7  ;;  %v2907_v36 = vadd.f32 %v2906_v0, %v2905_v1 }
 0x619   :  { %v3093_v47 = vadd.f32 %v3092_v55, %v3091_v45  ;;  %v2913_v40 = vrot.slane %v2912_v30, 4  ;;  %v2877_v9 = vmul.f32 %v7447_v56, %v7875_v18  ;;  %v2878_v8 = vmul.f32 %v7449_v28, %v7876_v41 }
 0x61a   :  { %v3099_v6 = vrot.slane %v3098_v22, 1  ;;  %v3106_v10 = vrot.slane %v3105_v27, 1  ;;  %v3118_v54 = vrot.slane %v3117_v5, 2  ;;  %v7517_v63 = vmul.f32 0.0625, %v3044_v35 }
 0x61b   :  { %v7519_v7 = vadd.f32 %v3050_v59, %v3049_v23  ;;  %v7521_v15 = vadd.f32 %v3057_v32, %v3056_v53  ;;  %v7523_v1 = vadd.f32 %v3064_v24, %v3063_v44  ;;  %v7526_v57 = vmul.f32 0.0625, %v3079_v20 }
 0x61c   :  { %v7463_v58 = vpop.permute.xlu1 %2755  ;;  %v7465_v46 = vpop.permute.xlu0 %2760  ;;  %v2908_v56 = vrot.slane %v2907_v36, 2  ;;  %v7528_v28 = vmul.f32 0.0625, %v3086_v19  ;;  %v7530_v4 = vmul.f32 0.0625, %v3093_v47  ;;  %v2914_v17 = vadd.f32 %v2913_v40, %v2912_v30  ;;  %v7913_v19 = vld [vmem:[#allocation41_spill] sm:$0xff]  ;;  %v7914_v47 = vld [vmem:[#allocation40_spill] sm:$0xff]  ;;  %v7915_v40 = vld [vmem:[#allocation43_spill] sm:$0xff] }
 0x61d   :  { %7885 = vst [vmem:[#allocation60_spill] sm:$0xff] %v7465_v46  ;;  %v3067_v46 = vrot.slane %v3066_v33, 4  ;;  %v7532_v23 = vadd.f32 %v3099_v6, %v3098_v22  ;;  %v7534_v53 = vadd.f32 %v3106_v10, %v3105_v27  ;;  %v7538_v52 = vadd.f32 %v3118_v54, %v3117_v5 }
 0x61e   :  { %v2879_v37 = vmul.f32 %v7451_v48, %v7877_v51  ;;  %v2880_v0 = vmul.f32 %v7453_v2, %v7878_v13  ;;  %v2909_v59 = vadd.f32 %v2908_v56, %v2907_v36  ;;  %v2915_v5 = vrot.slane %v2914_v17, 2  ;;  %v7908_v51 = vld [vmem:[#allocation36_spill] sm:$0xff]  ;;  %v7917_v56 = vld [vmem:[#allocation51_spill] sm:$0xff] }
 0x61f   :  { %v2881_v2 = vmul.f32 %v7463_v58, %v7886_v16  ;;  %v7916_v16 = vld [vmem:[#allocation42_spill] sm:$0xff] }
 0x620   :  { %v7481_v12 = vpop.permute.xlu1 %2765  ;;  %v7483_v42 = vpop.permute.xlu0 %2770 }
 0x621   :  { %7900 = vst [vmem:[#allocation69_spill] sm:$0xff] %v7483_v42  ;;  %v3068_v42 = vadd.f32 %v3067_v46, %v3066_v33  ;;  %v7501_v33 = vmul.f32 0.0625, %v3030_v50 }
 0x623   :  { %v3069_v46 = vrot.slane %v3068_v42, 2  ;;  %7904 = vst [vmem:[#allocation28_spill] sm:$0xff] %v7501_v33  ;;  %v3122_v33 = vadd.f32 %v7907_v29, %v7906_v61 }
 0x624   :  { %v7493_v31 = vpop.permute.xlu1 %2775  ;;  %v7495_v60 = vpop.permute.xlu0 %2780  ;;  %v7909_v13 = vld [vmem:[#allocation60_spill] sm:$0xff] }
 0x625   :  { %v7509_v50 = vadd.f32 %v3069_v46, %v3068_v42  ;;  %v3113_v42 = vrot.slane %v3112_v14, 1  ;;  %v3123_v18 = vrot.slane %v3122_v33, 4  ;;  %v2919_v46 = vadd.f32 %v2878_v8, %v2877_v9 }
 0x627   :  { %v3071_v45 = vrot.slane %v7509_v50, 1  ;;  %v7536_v44 = vadd.f32 %v3113_v42, %v3112_v14  ;;  %v3124_v30 = vadd.f32 %v3123_v18, %v3122_v33  ;;  %v2920_v24 = vrot.slane %v2919_v46, 4 }
 0x628   :  { %v7503_v3 = vpop.permute.xlu1 %2785  ;;  %v7505_v11 = vpop.permute.xlu0 %2790  ;;  %v7912_v33 = vld [vmem:[#allocation69_spill] sm:$0xff]  ;;  %v3120_v42 = vrot.slane %v7538_v52, 1 }
 0x629   :  { %v2887_v58 = vmul.f32 %v7503_v3, %v7915_v40  ;;  %v2888_v9 = vmul.f32 %v7505_v11, %v7916_v16  ;;  %v3125_v54 = vrot.slane %v3124_v30, 2  ;;  %v2921_v18 = vadd.f32 %v2920_v24, %v2919_v46  ;;  %v7919_v24 = vld [vmem:[#allocation53_spill] sm:$0xff] }
 0x62b   :  { %v2954_v11 = vadd.f32 %v2888_v9, %v2887_v58  ;;  %v2922_v46 = vrot.slane %v2921_v18, 2 }
 0x62d   :  { %v2923_v16 = vadd.f32 %v2922_v46, %v2921_v18 }
 0x66d   :  { %v2796_v62 = vpop.permute.xlu1 %2795  ;;  %v2801_v39 = vpop.permute.xlu0 %2800 }
 0x66e   :  { %v2889_v22 = vmul.f32 %v2796_v62, %v7879_v34  ;;  %v2890_v27 = vmul.f32 %v2801_v39, %v7880_v43  ;;  %v7911_v34 = vld [vmem:[#allocation38_spill] sm:$0xff]  ;;  %v2926_v39 = vadd.f32 %v2880_v0, %v2879_v37  ;;  %v2885_v62 = vmul.f32 %v7493_v31, %v7913_v19 }
 0x66f   :  { %v2884_v43 = vmul.f32 %v7912_v33, %v7911_v34  ;;  %v7918_v37 = vld [vmem:[#allocation50_spill] sm:$0xff] }
 0x670   :  { %v2961_v8 = vadd.f32 %v2890_v27, %v2889_v22  ;;  %v2927_v3 = vrot.slane %v2926_v39, 4 }
 0x671   :  { %v2806_v38 = vpop.permute.xlu1 %2805  ;;  %v2811_v41 = vpop.permute.xlu0 %2810 }
 0x672   :  { %v2891_v35 = vmul.f32 %v2806_v38, %v7881_v26  ;;  %v2892_v55 = vmul.f32 %v2811_v41, %v7882_v25  ;;  %v2882_v26 = vmul.f32 %v7909_v13, %v7908_v51  ;;  %v7910_v25 = vld [vmem:[#allocation39_spill] sm:$0xff]  ;;  %v2916_v38 = vadd.f32 %v2915_v5, %v2914_v17  ;;  %v7920_v17 = vld [vmem:[#allocation52_spill] sm:$0xff] }
 0x673   :  { %v2883_v36 = vmul.f32 %v7481_v12, %v7910_v25  ;;  %v2962_v22 = vrot.slane %v2961_v8, 4  ;;  %v7569_v51 = vadd.f32 %v3125_v54, %v3124_v30  ;;  %v2928_v34 = vadd.f32 %v2927_v3, %v2926_v39  ;;  %v7922_v39 = vld [vmem:[#allocation54_spill] sm:$0xff] }
 0x674   :  { %v2933_v41 = vadd.f32 %v2882_v26, %v2881_v2  ;;  %v2917_v2 = vrot.slane %v2916_v38, 1 }
 0x675   :  { %v2816_v14 = vpop.permute.xlu1 %2815  ;;  %v2821_v32 = vpop.permute.xlu0 %2820 }
 0x676   :  { %v2893_v20 = vmul.f32 %v2816_v14, %v7883_v49  ;;  %v2894_v48 = vmul.f32 %v2821_v32, %v7884_v21  ;;  %v2886_v49 = vmul.f32 %v7495_v60, %v7914_v47  ;;  %v2968_v21 = vadd.f32 %v2892_v55, %v2891_v35 }
 0x677   :  { %v2940_v60 = vadd.f32 %v2884_v43, %v2883_v36  ;;  %v2910_v35 = vrot.slane %v2909_v59, 1  ;;  %v2934_v26 = vrot.slane %v2933_v41, 4  ;;  %v2955_v47 = vrot.slane %v2954_v11, 4 }
 0x678   :  { %v2975_v6 = vadd.f32 %v2894_v48, %v2893_v20  ;;  %v2947_v55 = vadd.f32 %v2886_v49, %v2885_v62  ;;  %v2969_v14 = vrot.slane %v2968_v21, 4  ;;  %v2963_v49 = vadd.f32 %v2962_v22, %v2961_v8 }
 0x679   :  { %v2826_v12 = vpop.permute.xlu1 %2825  ;;  %v2831_v10 = vpop.permute.xlu0 %2830  ;;  %v2941_v25 = vrot.slane %v2940_v60, 4  ;;  %v7573_v62 = vadd.f32 %v2910_v35, %v2909_v59 }
 0x67a   :  { %v2895_v31 = vmul.f32 %v2826_v12, %v7917_v56  ;;  %v2896_v0 = vmul.f32 %v2831_v10, %v7918_v37  ;;  %v2976_v27 = vrot.slane %v2975_v6, 4  ;;  %v2948_v33 = vrot.slane %v2947_v55, 4  ;;  %v7921_v10 = vld [vmem:[#allocation55_spill] sm:$0xff] }
 0x67b   :  { %v2970_v43 = vadd.f32 %v2969_v14, %v2968_v21  ;;  %v7576_v56 = vadd.f32 %v2917_v2, %v2916_v38  ;;  %v2942_v37 = vadd.f32 %v2941_v25, %v2940_v60  ;;  %v2929_v21 = vrot.slane %v2928_v34, 2  ;;  %v7924_v38 = vld [vmem:[#allocation56_spill] sm:$0xff] }
 0x67c   :  { %v2982_v32 = vadd.f32 %v2896_v0, %v2895_v31  ;;  %v2977_v40 = vadd.f32 %v2976_v27, %v2975_v6  ;;  %v2935_v31 = vadd.f32 %v2934_v26, %v2933_v41  ;;  %v2949_v3 = vadd.f32 %v2948_v33, %v2947_v55 }
 0x67d   :  { %v2836_v20 = vpop.permute.xlu1 %2835  ;;  %v2841_v48 = vpop.permute.xlu0 %2840  ;;  %v2971_v59 = vrot.slane %v2970_v43, 2  ;;  %v2956_v14 = vadd.f32 %v2955_v47, %v2954_v11  ;;  %v2964_v8 = vrot.slane %v2963_v49, 2  ;;  %v2943_v60 = vrot.slane %v2942_v37, 2 }
 0x67e   :  { %v2897_v13 = vmul.f32 %v2836_v20, %v7919_v24  ;;  %v2898_v5 = vmul.f32 %v2841_v48, %v7920_v17  ;;  %v2983_v36 = vrot.slane %v2982_v32, 4  ;;  %v2978_v6 = vrot.slane %v2977_v40, 2  ;;  %v7923_v48 = vld [vmem:[#allocation57_spill] sm:$0xff] }
 0x67f   :  { %v2936_v41 = vrot.slane %v2935_v31, 2  ;;  %v2950_v55 = vrot.slane %v2949_v3, 2  ;;  %v2972_v2 = vadd.f32 %v2971_v59, %v2970_v43  ;;  %v2957_v11 = vrot.slane %v2956_v14, 2 }
 0x680   :  { %v2989_v19 = vadd.f32 %v2898_v5, %v2897_v13  ;;  %v2984_v9 = vadd.f32 %v2983_v36, %v2982_v32  ;;  %v2924_v32 = vrot.slane %v2923_v16, 1  ;;  %v2930_v5 = vadd.f32 %v2929_v21, %v2928_v34 }
 0x681   :  { %v2846_v30 = vpop.permute.xlu1 %2845  ;;  %v2851_v58 = vpop.permute.xlu0 %2850  ;;  %v2965_v25 = vadd.f32 %v2964_v8, %v2963_v49  ;;  %v2979_v36 = vadd.f32 %v2978_v6, %v2977_v40  ;;  %v2973_v21 = vrot.slane %v2972_v2, 1  ;;  %v2958_v49 = vadd.f32 %v2957_v11, %v2956_v14 }
 0x682   :  { %v2990_v12 = vrot.slane %v2989_v19, 4  ;;  %v2899_v54 = vmul.f32 %v2846_v30, %v7921_v10  ;;  %v2900_v0 = vmul.f32 %v2851_v58, %v7922_v39  ;;  %v2985_v20 = vrot.slane %v2984_v9, 2 }
 0x683   :  { %v2944_v39 = vadd.f32 %v2943_v60, %v2942_v37  ;;  %v2931_v34 = vrot.slane %v2930_v5, 1  ;;  %v2980_v40 = vrot.slane %v2979_v36, 1  ;;  %v2966_v6 = vrot.slane %v2965_v25, 1 }
 0x684   :  { %v2991_v35 = vadd.f32 %v2990_v12, %v2989_v19  ;;  %v2996_v22 = vadd.f32 %v2900_v0, %v2899_v54  ;;  %v2986_v30 = vadd.f32 %v2985_v20, %v2984_v9  ;;  %v2937_v54 = vadd.f32 %v2936_v41, %v2935_v31 }
 0x685   :  { %v2856_v27 = vpop.permute.xlu1 %2855  ;;  %v2861_v18 = vpop.permute.xlu0 %2860  ;;  %v2974_v31 = vadd.f32 %v2973_v21, %v2972_v2  ;;  %v2959_v60 = vrot.slane %v2958_v49, 1 }
 0x686   :  { %v2901_v46 = vmul.f32 %v2856_v27, %v7923_v48  ;;  %v2902_v24 = vmul.f32 %v2861_v18, %v7924_v38  ;;  %v2992_v13 = vrot.slane %v2991_v35, 2  ;;  %v2997_v17 = vrot.slane %v2996_v22, 4 }
 0x687   :  { %v2951_v18 = vadd.f32 %v2950_v55, %v2949_v3  ;;  %v2925_v48 = vadd.f32 %v2924_v32, %v2923_v16  ;;  %v2967_v3 = vadd.f32 %v2966_v6, %v2965_v25  ;;  %v3162_v16 = vsel %vm2081_vm1, %v7576_v56, %v7573_v62 }
 0x688   :  { %v3003_v26 = vadd.f32 %v2902_v24, %v2901_v46  ;;  %v2998_v33 = vadd.f32 %v2997_v17, %v2996_v22  ;;  %v2993_v0 = vadd.f32 %v2992_v13, %v2991_v35  ;;  %v2987_v22 = vrot.slane %v2986_v30, 1 }
 0x689   :  { %v2866_v19 = vpop.permute.xlu1 %2865  ;;  %v2871_v47 = vpop.permute.xlu0 %2870  ;;  %v2945_v46 = vrot.slane %v2944_v39, 1  ;;  %v2932_v24 = vadd.f32 %v2931_v34, %v2930_v5  ;;  %v2952_v41 = vrot.slane %v2951_v18, 1  ;;  %v2981_v13 = vadd.f32 %v2980_v40, %v2979_v36 }
 0x68a   :  { %v3004_v58 = vrot.slane %v3003_v26, 4  ;;  %v2903_v12 = vmul.f32 %v2866_v19, %v7906_v61  ;;  %v2904_v10 = vmul.f32 %v2871_v47, %v7907_v29  ;;  %v2999_v27 = vrot.slane %v2998_v33, 2 }
 0x68b   :  { %v2938_v61 = vrot.slane %v2937_v54, 1  ;;  %v2994_v29 = vrot.slane %v2993_v0, 1  ;;  %v2988_v14 = vadd.f32 %v2987_v22, %v2986_v30  ;;  %v2946_v2 = vadd.f32 %v2945_v46, %v2944_v39  ;;  %v5187_v22 = vld [vmem:[#allocation13 + $0x6c] ss:$48 sps:$4 sm:$0xff]  }
 0x68c   :  { %v3005_v43 = vadd.f32 %v3004_v58, %v3003_v26  ;;  %v3010_v59 = vadd.f32 %v2904_v10, %v2903_v12  ;;  %v3000_v8 = vadd.f32 %v2999_v27, %v2998_v33  ;;  %v3127_v26 = vrot.slane %v7569_v51, 1 }
 0x68d   :  { %v2939_v32 = vadd.f32 %v2938_v61, %v2937_v54  ;;  %v2995_v11 = vadd.f32 %v2994_v29, %v2993_v0  ;;  %v3169_v33 = vsel %vm2081_vm1, %v2974_v31, %v2967_v3  ;;  %v3163_v47 = vsel %vm2083_vm2, %v2925_v48, %v3162_v16  ;;  %v7927_v61 = vld [vmem:[#allocation29_spill] sm:$0xff] }
 0x68e   :  { %v3006_v9 = vrot.slane %v3005_v43, 2  ;;  %v3011_v20 = vrot.slane %v3010_v59, 4  ;;  %v3001_v37 = vrot.slane %v3000_v8, 1  ;;  %v2953_v36 = vadd.f32 %v2952_v41, %v2951_v18  ;;  %v5194_v16 = vld [vmem:[#allocation13 + $0x188] ss:$48 sps:$4 sm:$0xff]  }
 0x68f   :  { %v3170_v25 = vsel %vm2083_vm2, %v2981_v13, %v3169_v33  ;;  %v3164_v58 = vsel %vm2085_vm3, %v2932_v24, %v3163_v47  ;;  %v2960_v12 = vadd.f32 %v2959_v60, %v2958_v49  ;;  %v3141_v62 = vmul.f32 0.0625, %v7532_v23  ;;  %v5190_v24 = vld [vmem:[#allocation13 + $0xcc] ss:$48 sps:$4 sm:$0xff]   ;;  %v5188_v13 = vld [vmem:[#allocation13 + $0xc8] ss:$48 sps:$4 sm:$0xff]  }
 0x690   :  { %v3007_v35 = vadd.f32 %v3006_v9, %v3005_v43  ;;  %v3012_v38 = vadd.f32 %v3011_v20, %v3010_v59  ;;  %v3002_v19 = vadd.f32 %v3001_v37, %v3000_v8  ;;  %v3171_v10 = vsel %vm2085_vm3, %v2988_v14, %v3170_v25  ;;  %v5182_v8 = vld [vmem:[#allocation13 + $0x8] ss:$48 sps:$4 sm:$0xff]   ;;  %v5208_v47 = vld [vmem:[#allocation13 + $0x14] ss:$48 sps:$4 sm:$0xff]  }
 0x691   :  { %v3121_v56 = vadd.f32 %v3120_v42, %v7538_v52  ;;  %v3165_v54 = vsel %vm2087_vm4, %v2939_v32, %v3164_v58  ;;  %v3172_v39 = vsel %vm2087_vm4, %v2995_v11, %v3171_v10  ;;  %v3128_v0 = vadd.f32 %v3127_v26, %v7569_v51  ;;  %v7925_v9 = vld [vmem:[#allocation70_spill] sm:$0xff]  ;;  %v7926_v20 = vld [vmem:[#allocation28_spill] sm:$0xff]  ;;  %v5196_v26 = vld [vmem:[#allocation13 + $0x18c] ss:$48 sps:$4 sm:$0xff]  }
 0x692   :  { %v3008_v17 = vrot.slane %v3007_v35, 1  ;;  %v3013_v55 = vrot.slane %v3012_v38, 2  ;;  %v3166_v34 = vsel %vm2089_vm5, %v2946_v2, %v3165_v54  ;;  %v3173_v21 = vsel %vm2089_vm5, %v3002_v19, %v3172_v39  ;;  %v5185_v37 = vld [vmem:[#allocation13 + $0x68] ss:$48 sps:$4 sm:$0xff]   ;;  %v5199_v32 = vld [vmem:[#allocation13 + $0x1ec] ss:$48 sps:$4 sm:$0xff]  }
 0x693   :  { %v3072_v59 = vadd.f32 %v3071_v45, %v7509_v50  ;;  %v3142_v23 = vmul.f32 0.0625, %v7534_v53  ;;  %v3167_v18 = vsel %vm2091_vm6, %v2953_v36, %v3166_v34  ;;  %v3201_v42 = vsel %vm2081_vm1, %v7528_v28, %v7526_v57  ;;  %v5197_v11 = vld [vmem:[#allocation13 + $0x1e8] ss:$48 sps:$4 sm:$0xff]   ;;  %v5202_v2 = vld [vmem:[#allocation13 + $0x24c] ss:$48 sps:$4 sm:$0xff]  }
 0x694   :  { %v3014_v5 = vadd.f32 %v3013_v55, %v3012_v38  ;;  %v3009_v30 = vadd.f32 %v3008_v17, %v3007_v35  ;;  %v3143_v51 = vmul.f32 0.0625, %v7536_v44  ;;  %v3168_v49 = vsel %vm2093_vm8, %v2960_v12, %v3167_v18  ;;  %v5193_v17 = vld [vmem:[#allocation13 + $0x12c] ss:$48 sps:$4 sm:$0xff]   ;;  %v5191_v55 = vld [vmem:[#allocation13 + $0x128] ss:$48 sps:$4 sm:$0xff]  }
 0x695   :  { %v3134_v6 = vmul.f32 0.0625, %v7519_v7  ;;  %v3202_v50 = vsel %vm2083_vm2, %v7530_v4, %v3201_v42  ;;  %v3144_v45 = vmul.f32 0.0625, %v3121_v56  ;;  %v3194_v57 = vsel %vm2081_vm1, %v7926_v20, %v7925_v9  ;;  %v5200_v33 = vld [vmem:[#allocation13 + $0x248] ss:$48 sps:$4 sm:$0xff]   ;;  %v5205_v19 = vld [vmem:[#allocation13 + $0x2ac] ss:$48 sps:$4 sm:$0xff]  }
 0x696   :  { %v3015_v27 = vrot.slane %v3014_v5, 1  ;;  %v3174_v52 = vsel %vm2091_vm6, %v3009_v30, %v3173_v21  ;;  %v3135_v28 = vmul.f32 0.0625, %v7521_v15  ;;  %v3203_v44 = vsel %vm2085_vm3, %v3141_v62, %v3202_v50  ;;  %v5206_v36 = vld [vmem:[#allocation13 + $0x10] ss:$48 sps:$4 sm:$0xff]   ;;  %v5211_v25 = vld [vmem:[#allocation13 + $0x74] ss:$48 sps:$4 sm:$0xff]  }
 0x697   :  { %v3145_v48 = vmul.f32 0.0625, %v3128_v0  ;;  %v3195_v46 = vsel %vm2083_vm2, %v7927_v61, %v3194_v57  ;;  %v3136_v7 = vmul.f32 0.0625, %v7523_v1  ;;  %v3204_v4 = vsel %vm2087_vm4, %v3142_v23, %v3203_v44  ;;  %v5209_v30 = vld [vmem:[#allocation13 + $0x70] ss:$48 sps:$4 sm:$0xff]   ;;  %v5214_v58 = vld [vmem:[#allocation13 + $0xd4] ss:$48 sps:$4 sm:$0xff]  }
 0x698   :  { %v3016_v43 = vadd.f32 %v3015_v27, %v3014_v5  ;;  %v3196_v29 = vsel %vm2085_vm3, %v7517_v63, %v3195_v46  ;;  %v3137_v31 = vmul.f32 0.0625, %v3072_v59  ;;  %v3205_v15 = vsel %vm2089_vm5, %v3143_v51, %v3204_v4  ;;  %v5203_v5 = vld [vmem:[#allocation13 + $0x2a8] ss:$48 sps:$4 sm:$0xff]   ;;  %v5212_v12 = vld [vmem:[#allocation13 + $0xd0] ss:$48 sps:$4 sm:$0xff]  }
 0x699   :  { %v7928_v35 = vmov 0   ;;  %v3197_v38 = vsel %vm2087_vm4, %v3134_v6, %v3196_v29  ;;  %v3206_v1 = vsel %vm2091_vm6, %v3144_v45, %v3205_v15  ;;  %v5217_v10 = vld [vmem:[#allocation13 + $0x134] ss:$48 sps:$4 sm:$0xff]   ;;  %v5215_v27 = vld [vmem:[#allocation13 + $0x130] ss:$48 sps:$4 sm:$0xff]  }
 0x69a   :  { %v3175_v40 = vsel %vm2093_vm8, %v3016_v43, %v3174_v52  ;;  %v3198_v41 = vsel %vm2089_vm5, %v3135_v28, %v3197_v38  ;;  %v3207_v60 = vsel %vm2093_vm8, %v3145_v48, %v3206_v1  ;;  %v5220_v62 = vld [vmem:[#allocation13 + $0x194] ss:$48 sps:$4 sm:$0xff]   ;;  %v5218_v56 = vld [vmem:[#allocation13 + $0x190] ss:$48 sps:$4 sm:$0xff]   ;;  %v5232_v59 = vld [vmem:[#allocation13 + $0x1c] ss:$48 sps:$4 sm:$0xff]  }
 0x69b   :  { %v7616_v53 = vpack.c.bf16 %v3175_v40, %v3168_v49  ;;  %v3199_v63 = vsel %vm2091_vm6, %v3136_v7, %v3198_v41  ;;  %v5223_v54 = vld [vmem:[#allocation13 + $0x1f4] ss:$48 sps:$4 sm:$0xff]   ;;  %v5221_v39 = vld [vmem:[#allocation13 + $0x1f0] ss:$48 sps:$4 sm:$0xff]   ;;  %v5230_v23 = vld [vmem:[#allocation13 + $0x18] ss:$48 sps:$4 sm:$0xff]  }
 0x69c   :  { %v3200_v3 = vsel %vm2093_vm8, %v3137_v31, %v3199_v63  ;;  %v5226_v0 = vld [vmem:[#allocation13 + $0x254] ss:$48 sps:$4 sm:$0xff]   ;;  %v5224_v34 = vld [vmem:[#allocation13 + $0x250] ss:$48 sps:$4 sm:$0xff]   ;;  %v5235_v18 = vld [vmem:[#allocation13 + $0x7c] ss:$48 sps:$4 sm:$0xff]  }
 0x69d   :  { %3885 = vmatmul.mubr.bf16.vlgmr.msra.gmra.mrb[64].mxu1 %v7616_v53  ;;  %4081 = vmatmul.mubr.bf16.vlgmr.msra.gmra.mrb[128].mxu0 %v7616_v53  ;;  %v7640_v14 = vpack.c.bf16 %v3207_v60, %v3200_v3  ;;  %v5229_v21 = vld [vmem:[#allocation13 + $0x2b4] ss:$48 sps:$4 sm:$0xff]   ;;  %v5227_v43 = vld [vmem:[#allocation13 + $0x2b0] ss:$48 sps:$4 sm:$0xff]   ;;  %v5233_v52 = vld [vmem:[#allocation13 + $0x78] ss:$48 sps:$4 sm:$0xff]  }
 0x69e   :  { %3902 = vmatpush1.bf16.msra.mxu1 %v5182_v8  ;;  %3894 = vmatprep.mubr.bf16.mxu1 %v7928_v35  ;;  %v5238_v42 = vld [vmem:[#allocation13 + $0xdc] ss:$48 sps:$4 sm:$0xff]   ;;  %v5236_v51 = vld [vmem:[#allocation13 + $0xd8] ss:$48 sps:$4 sm:$0xff]   ;;  %v7653_v48 = vld [vmem:[#allocation19] ss:$0 sm:$0xff] }
 0x69f   :  { %3903 = vmatprep.subr.bf16.mxu1 %v5187_v22  ;;  %4086 = vmatprep.mubr.bf16.mxu0 %v7928_v35  ;;  %v5241_v49 = vld [vmem:[#allocation13 + $0x13c] ss:$48 sps:$4 sm:$0xff]   ;;  %v5239_v40 = vld [vmem:[#allocation13 + $0x138] ss:$48 sps:$4 sm:$0xff]   ;;  %v5279_v3 = vld [vmem:[#allocation17] sm:$0xff]  }
 0x6a0   :  { %v5244_v8 = vld [vmem:[#allocation13 + $0x19c] ss:$48 sps:$4 sm:$0xff]   ;;  %v5242_v6 = vld [vmem:[#allocation13 + $0x198] ss:$48 sps:$4 sm:$0xff]   ;;  %4581 = vrot.lane.b32.xlu1 %v7653_v48, %s6086_s10 }
 0x6a1   :  { %v5247_v50 = vld [vmem:[#allocation13 + $0x1fc] ss:$48 sps:$4 sm:$0xff]   ;;  %v5245_v45 = vld [vmem:[#allocation13 + $0x1f8] ss:$48 sps:$4 sm:$0xff]  }
 0x6a2   :  { %3904 = vmatpush1.bf16.msra.mxu1 %v5185_v37  ;;  %v5250_v22 = vld [vmem:[#allocation13 + $0x25c] ss:$48 sps:$4 sm:$0xff]   ;;  %v5248_v9 = vld [vmem:[#allocation13 + $0x258] ss:$48 sps:$4 sm:$0xff]  }
 0x6a3   :  { %3905 = vmatprep.subr.bf16.mxu1 %v5190_v24  ;;  %v5253_v20 = vld [vmem:[#allocation13 + $0x2bc] ss:$48 sps:$4 sm:$0xff]   ;;  %v5251_v57 = vld [vmem:[#allocation13 + $0x2b8] ss:$48 sps:$4 sm:$0xff]  }
 0x6a4   :  { %v5256_v28 = vld [vmem:[#allocation13 + $0x2c] ss:$48 sps:$4 sm:$0xff]   ;;  %v5254_v44 = vld [vmem:[#allocation13 + $0x28] ss:$48 sps:$4 sm:$0xff]  }
 0x6a5   :  { %3895 = vmatmul.mubr.bf16.gmra.mrb[68].mxu1 %v7640_v14  ;;  %4087 = vmatmul.mubr.bf16.gmra.mrb[132].mxu0 %v7640_v14  ;;  %v5259_v61 = vld [vmem:[#allocation13 + $0x8c] ss:$48 sps:$4 sm:$0xff]   ;;  %v5257_v46 = vld [vmem:[#allocation13 + $0x88] ss:$48 sps:$4 sm:$0xff]  }
 0x6a6   :  { %3906 = vmatpush1.bf16.msra.mxu1 %v5188_v13  ;;  %3933 = vmatprep.mubr.bf16.mxu1 %v7928_v35  ;;  %v5262_v7 = vld [vmem:[#allocation13 + $0xec] ss:$48 sps:$4 sm:$0xff]   ;;  %v5260_v4 = vld [vmem:[#allocation13 + $0xe8] ss:$48 sps:$4 sm:$0xff]   ;;  %v5278_v13 = vld [vmem:[#allocation17 + $0x40] sm:$0xff]  }
 0x6a7   :  { %3907 = vmatprep.subr.bf16.mxu1 %v5193_v17  ;;  %v5265_v29 = vld [vmem:[#allocation13 + $0x14c] ss:$48 sps:$4 sm:$0xff]   ;;  %v5263_v31 = vld [vmem:[#allocation13 + $0x148] ss:$48 sps:$4 sm:$0xff]   ;;  %4989 = vmatprep.subr.bf16.mxu0 %v5278_v13 }
 0x6a8   :  { %v5268_v15 = vld [vmem:[#allocation13 + $0x1ac] ss:$48 sps:$4 sm:$0xff]   ;;  %v5266_v37 = vld [vmem:[#allocation13 + $0x1a8] ss:$48 sps:$4 sm:$0xff]   ;;  %4990 = vmatpush3.bf16.msra.mxu0 %v5279_v3 }
 0x6a9   :  { %v5271_v38 = vld [vmem:[#allocation13 + $0x20c] ss:$48 sps:$4 sm:$0xff]   ;;  %v5269_v1 = vld [vmem:[#allocation13 + $0x208] ss:$48 sps:$4 sm:$0xff]  }
 0x6aa   :  { %3908 = vmatpush1.bf16.msra.mxu1 %v5191_v55  ;;  %v5274_v24 = vld [vmem:[#allocation13 + $0x26c] ss:$48 sps:$4 sm:$0xff]   ;;  %v5272_v41 = vld [vmem:[#allocation13 + $0x268] ss:$48 sps:$4 sm:$0xff]  }
 0x6ab   :  { %3909 = vmatprep.subr.bf16.mxu1 %v5196_v26  ;;  %v5277_v60 = vld [vmem:[#allocation13 + $0x2cc] ss:$48 sps:$4 sm:$0xff]   ;;  %v5275_v63 = vld [vmem:[#allocation13 + $0x2c8] ss:$48 sps:$4 sm:$0xff]   ;;  %v5282_v26 = vld [vmem:[#allocation17 + $0x50] sm:$0xff]  }
 0x6ac   :  { %v5280_v17 = vld [vmem:[#allocation17 + $0x48] sm:$0xff]  }
 0x6ad   :  { %v5281_v55 = vld [vmem:[#allocation17 + $0x8] sm:$0xff]   ;;  %4991 = vmatprep.subr.bf16.mxu0 %v5280_v17 }
 0x6ae   :  { %3910 = vmatpush1.bf16.msra.mxu1 %v5194_v16  ;;  %4992 = vmatpush3.bf16.msra.mxu0 %v5281_v55  ;;  %v5283_v16 = vld [vmem:[#allocation17 + $0x10] sm:$0xff]  }
 0x6af   :  { %3911 = vmatprep.subr.bf16.mxu1 %v5199_v32  ;;  %4993 = vmatprep.subr.bf16.mxu0 %v5282_v26  ;;  %v5284_v32 = vld [vmem:[#allocation17 + $0x58] sm:$0xff]  }
 0x6b2   :  { %3912 = vmatpush1.bf16.msra.mxu1 %v5197_v11  ;;  %4994 = vmatpush3.bf16.msra.mxu0 %v5283_v16  ;;  %v5285_v11 = vld [vmem:[#allocation17 + $0x18] sm:$0xff]  }
 0x6b3   :  { %3913 = vmatprep.subr.bf16.mxu1 %v5202_v2  ;;  %4995 = vmatprep.subr.bf16.mxu0 %v5284_v32  ;;  %v5286_v2 = vld [vmem:[#allocation17 + $0x60] sm:$0xff]  }
 0x6b6   :  { %3914 = vmatpush1.bf16.msra.mxu1 %v5200_v33  ;;  %4996 = vmatpush3.bf16.msra.mxu0 %v5285_v11  ;;  %v5288_v33 = vld [vmem:[#allocation17 + $0x68] sm:$0xff]  }
 0x6b7   :  { %3915 = vmatprep.subr.bf16.mxu1 %v5205_v19  ;;  %4997 = vmatprep.subr.bf16.mxu0 %v5286_v2  ;;  %v5290_v19 = vld [vmem:[#allocation17 + $0x70] sm:$0xff]  }
 0x6ba   :  { %3916 = vmatpush1.bf16.msra.mxu1 %v5203_v5  ;;  %v5291_v5 = vld [vmem:[#allocation17 + $0x30] sm:$0xff]  }
 0x6bb   :  { %3950 = vmatprep.subr.bf16.mxu1 %v5208_v47  ;;  %v5292_v47 = vld [vmem:[#allocation17 + $0x78] sm:$0xff]  }
 0x6bd   :  { %3934 = vmatmul.mubr.bf16.vlgmr.msra.gmra.mrb[72].mxu1 %v7616_v53 }
 0x6be   :  { %3951 = vmatpush1.bf16.msra.mxu1 %v5206_v36  ;;  %3943 = vmatprep.mubr.bf16.mxu1 %v7928_v35  ;;  %v5293_v36 = vld [vmem:[#allocation17 + $0x38] sm:$0xff]  }
 0x6bf   :  { %3952 = vmatprep.subr.bf16.mxu1 %v5211_v25  ;;  %v5294_v25 = vld [vmem:[#allocation17 + $0xc0] sm:$0xff]  }
 0x6c2   :  { %3953 = vmatpush1.bf16.msra.mxu1 %v5209_v30  ;;  %v5296_v30 = vld [vmem:[#allocation17 + $0xc8] sm:$0xff]  }
 0x6c3   :  { %3954 = vmatprep.subr.bf16.mxu1 %v5214_v58  ;;  %v5297_v58 = vld [vmem:[#allocation17 + $0x88] sm:$0xff]  }
 0x6c5   :  { %3944 = vmatmul.mubr.bf16.gmra.mrb[76].mxu1 %v7640_v14 }
 0x6c6   :  { %3955 = vmatpush1.bf16.msra.mxu1 %v5212_v12  ;;  %3982 = vmatprep.mubr.bf16.mxu1 %v7928_v35  ;;  %v5298_v12 = vld [vmem:[#allocation17 + $0xd0] sm:$0xff]  }
 0x6c7   :  { %3956 = vmatprep.subr.bf16.mxu1 %v5217_v10  ;;  %v5299_v10 = vld [vmem:[#allocation17 + $0x90] sm:$0xff]  }
 0x6ca   :  { %3957 = vmatpush1.bf16.msra.mxu1 %v5215_v27  ;;  %v5300_v27 = vld [vmem:[#allocation17 + $0xd8] sm:$0xff]  }
 0x6cb   :  { %3958 = vmatprep.subr.bf16.mxu1 %v5220_v62  ;;  %v5301_v62 = vld [vmem:[#allocation17 + $0x98] sm:$0xff]  }
 0x6ce   :  { %3959 = vmatpush1.bf16.msra.mxu1 %v5218_v56  ;;  %v5302_v56 = vld [vmem:[#allocation17 + $0xe0] sm:$0xff]  }
 0x6cf   :  { %3960 = vmatprep.subr.bf16.mxu1 %v5223_v54  ;;  %v5303_v54 = vld [vmem:[#allocation17 + $0xa0] sm:$0xff]  }
 0x6d2   :  { %3961 = vmatpush1.bf16.msra.mxu1 %v5221_v39  ;;  %v5304_v39 = vld [vmem:[#allocation17 + $0xe8] sm:$0xff]  }
 0x6d3   :  { %3962 = vmatprep.subr.bf16.mxu1 %v5226_v0  ;;  %v5305_v0 = vld [vmem:[#allocation17 + $0xa8] sm:$0xff]  }
 0x6d6   :  { %3963 = vmatpush1.bf16.msra.mxu1 %v5224_v34  ;;  %v5306_v34 = vld [vmem:[#allocation17 + $0xf0] sm:$0xff]  }
 0x6d7   :  { %3964 = vmatprep.subr.bf16.mxu1 %v5229_v21  ;;  %v5307_v21 = vld [vmem:[#allocation17 + $0xb0] sm:$0xff]  }
 0x6da   :  { %3965 = vmatpush1.bf16.msra.mxu1 %v5227_v43  ;;  %v5308_v43 = vld [vmem:[#allocation17 + $0xf8] sm:$0xff]  }
 0x6db   :  { %3999 = vmatprep.subr.bf16.mxu1 %v5232_v59  ;;  %v5309_v59 = vld [vmem:[#allocation17 + $0xb8] sm:$0xff]  }
 0x6dd   :  { %3983 = vmatmul.mubr.bf16.vlgmr.msra.gmra.mrb[80].mxu1 %v7616_v53 }
 0x6de   :  { %4000 = vmatpush1.bf16.msra.mxu1 %v5230_v23  ;;  %3992 = vmatprep.mubr.bf16.mxu1 %v7928_v35  ;;  %v7663_v23 = vld [vmem:[#allocation14] sm:$0xff] }
 0x6df   :  { %4001 = vmatprep.subr.bf16.mxu1 %v5235_v18  ;;  %v7929_v18 = vld [vmem:[#allocation63_spill] sm:$0xff] }
 0x6e2   :  { %4002 = vmatpush1.bf16.msra.mxu1 %v5233_v52  ;;  %v3315_v52 = vrot.slane %v7663_v23, %v7929_v18 }
 0x6e3   :  { %4003 = vmatprep.subr.bf16.mxu1 %v5238_v42  ;;  %v4171_v42 = vld [vmem:[#allocation16] sm:$0xf] }
 0x6e5   :  { %3993 = vmatmul.mubr.bf16.gmra.mrb[84].mxu1 %v7640_v14 }
 0x6e6   :  { %4004 = vmatpush1.bf16.msra.mxu1 %v5236_v51  ;;  %4031 = vmatprep.mubr.bf16.mxu1 %v7928_v35  ;;  %v7930_v51 = vld [vmem:[#allocation64_spill] sm:$0xff] }
 0x6e7   :  { %4005 = vmatprep.subr.bf16.mxu1 %v5241_v49  ;;  %v3319_v49 = vrot.slane %v7663_v23, %v7930_v51 }
 0x6ea   :  { %4006 = vmatpush1.bf16.msra.mxu1 %v5239_v40 }
 0x6eb   :  { %4007 = vmatprep.subr.bf16.mxu1 %v5244_v8 }
 0x6ee   :  { %4008 = vmatpush1.bf16.msra.mxu1 %v5242_v6 }
 0x6ef   :  { %4009 = vmatprep.subr.bf16.mxu1 %v5247_v50  ;;  %v4176_v50 = vrot.slane %v4171_v42, %v7929_v18 }
 0x6f2   :  { %4010 = vmatpush1.bf16.msra.mxu1 %v5245_v45 }
 0x6f3   :  { %4011 = vmatprep.subr.bf16.mxu1 %v5250_v22 }
 0x6f6   :  { %4012 = vmatpush1.bf16.msra.mxu1 %v5248_v9 }
 0x6f7   :  { %4013 = vmatprep.subr.bf16.mxu1 %v5253_v20  ;;  %v4180_v20 = vrot.slane %v4171_v42, %v7930_v51 }
 0x6fa   :  { %4014 = vmatpush1.bf16.msra.mxu1 %v5251_v57 }
 0x6fb   :  { %4097 = vmatprep.subr.bf16.mxu1 %v5256_v28 }
 0x6fd   :  { %4032 = vmatmul.mubr.bf16.vlgmr.msra.gmra.mrb[88].mxu1 %v7616_v53 }
 0x6fe   :  { %4098 = vmatpush1.bf16.msra.mxu1 %v5254_v44  ;;  %4041 = vmatprep.mubr.bf16.mxu1 %v7928_v35  ;;  %v7671_v44 = vld [vmem:[#allocation14 + $0x8] sm:$0xf] }
 0x6ff   :  { %4099 = vmatprep.subr.bf16.mxu1 %v5259_v61 }
 0x702   :  { %4100 = vmatpush1.bf16.msra.mxu1 %v5257_v46 }
 0x703   :  { %4101 = vmatprep.subr.bf16.mxu1 %v5262_v7 }
 0x705   :  { %4042 = vmatmul.mubr.bf16.gmra.mrb[92].mxu1 %v7640_v14 }
 0x706   :  { %4102 = vmatpush1.bf16.msra.mxu1 %v5260_v4  ;;  %4129 = vmatprep.mubr.bf16.mxu1 %v7928_v35 }
 0x707   :  { %4103 = vmatprep.subr.bf16.mxu1 %v5265_v29 }
 0x70a   :  { %4104 = vmatpush1.bf16.msra.mxu1 %v5263_v31 }
 0x70b   :  { %4105 = vmatprep.subr.bf16.mxu1 %v5268_v15 }
 0x70e   :  { %4106 = vmatpush1.bf16.msra.mxu1 %v5266_v37 }
 0x70f   :  { %4107 = vmatprep.subr.bf16.mxu1 %v5271_v38  ;;  %v3347_v38 = vrot.slane %v7671_v44, %v7929_v18 }
 0x712   :  { %4108 = vmatpush1.bf16.msra.mxu1 %v5269_v1 }
 0x713   :  { %4109 = vmatprep.subr.bf16.mxu1 %v5274_v24 }
 0x716   :  { %4110 = vmatpush1.bf16.msra.mxu1 %v5272_v41  ;;  %v3351_v41 = vrot.slane %v7671_v44, %v7930_v51 }
 0x717   :  { %4111 = vmatprep.subr.bf16.mxu1 %v5277_v60 }
 0x71a   :  { %4112 = vmatpush1.bf16.msra.mxu1 %v5275_v63 }
 0x71b   :  { %5017 = vmatprep.subr.bf16.mxu1 %v5294_v25 }
 0x71d   :  { %4130 = vmatmul.mubr.bf16.vlgmr.msra.gmra.mrb[96].mxu1 %v7616_v53  ;;  %v5287_v53 = vld [vmem:[#allocation17 + $0x20] sm:$0xff]  }
 0x71e   :  { %4135 = vmatprep.mubr.bf16.mxu1 %v7928_v35  ;;  %4998 = vmatpush3.bf16.msra.mxu0 %v5287_v53  ;;  %v5289_v35 = vld [vmem:[#allocation17 + $0x28] sm:$0xff]  }
 0x71f   :  { %4999 = vmatprep.subr.bf16.mxu0 %v5288_v33 }
 0x722   :  { %5000 = vmatpush3.bf16.msra.mxu0 %v5289_v35 }
 0x723   :  { %5001 = vmatprep.subr.bf16.mxu0 %v5290_v19 }
 0x725   :  { %4136 = vmatmul.mubr.bf16.gmra.mrb[100].mxu1 %v7640_v14  ;;  %v5295_v14 = vld [vmem:[#allocation17 + $0x80] sm:$0xff]  }
 0x726   :  { %5002 = vmatpush3.bf16.msra.mxu0 %v5291_v5  ;;  %5018 = vmatpush3.bf16.msra.mxu1 %v5295_v14 }
 0x727   :  { %5003 = vmatprep.subr.bf16.mxu0 %v5292_v47  ;;  %5019 = vmatprep.subr.bf16.mxu1 %v5296_v30 }
 0x72a   :  { %5004 = vmatpush3.bf16.msra.mxu0 %v5293_v36  ;;  %5020 = vmatpush3.bf16.msra.mxu1 %v5297_v58 }
 0x72b   :  { %5021 = vmatprep.subr.bf16.mxu1 %v5298_v12  ;;  %v7931_v12 = vld [vmem:[#allocation61_spill] sm:$0xff] }
 0x72e   :  { %5022 = vmatpush3.bf16.msra.mxu1 %v5299_v10  ;;  %v3323_v10 = vrot.slane %v7663_v23, %v7931_v12 }
 0x72f   :  { %5023 = vmatprep.subr.bf16.mxu1 %v5300_v27  ;;  %v7932_v27 = vld [vmem:[#allocation62_spill] sm:$0xff] }
 0x732   :  { %5024 = vmatpush3.bf16.msra.mxu1 %v5301_v62  ;;  %v3327_v62 = vrot.slane %v7663_v23, %v7932_v27 }
 0x733   :  { %5025 = vmatprep.subr.bf16.mxu1 %v5302_v56 }
 0x736   :  { %5026 = vmatpush3.bf16.msra.mxu1 %v5303_v54 }
 0x737   :  { %5027 = vmatprep.subr.bf16.mxu1 %v5304_v39  ;;  %v4184_v39 = vrot.slane %v4171_v42, %v7931_v12 }
 0x73a   :  { %5028 = vmatpush3.bf16.msra.mxu1 %v5305_v0 }
 0x73b   :  { %5029 = vmatprep.subr.bf16.mxu1 %v5306_v34 }
 0x73e   :  { %5030 = vmatpush3.bf16.msra.mxu1 %v5307_v21  ;;  %v4188_v21 = vrot.slane %v4171_v42, %v7932_v27 }
 0x73f   :  { %5031 = vmatprep.subr.bf16.mxu1 %v5308_v43 }
 0x742   :  { %5032 = vmatpush3.bf16.msra.mxu1 %v5309_v59 }
 0x770   :  { %v3886_v40 = vpop.f32.mrb[64].mxu1  ;;  %v4082_v8 = vpop.f32.mrb[128].mxu0 }
 0x771   :  { %v3887_v6 = vadd.f32 %v3886_v40, %v3315_v52  ;;  %v3888_v45 = vpop.f32.mrb[65].mxu1  ;;  %v4083_v22 = vpop.f32.mrb[129].mxu0 }
 0x772   :  { %v3889_v9 = vadd.f32 %v3888_v45, %v3319_v49  ;;  %v3890_v57 = vpop.f32.mrb[66].mxu1  ;;  %v4084_v28 = vpop.f32.mrb[130].mxu0 }
 0x773   :  { %v4146_v61 = vmax.f32 %v3887_v6, 0.0  ;;  %v3891_v46 = vadd.f32 %v3890_v57, %v3315_v52  ;;  %v3892_v7 = vpop.f32.mrb[67].mxu1  ;;  %v4085_v4 = vpop.f32.mrb[131].mxu0 }
 0x774   :  { %v4147_v29 = vmax.f32 %v3889_v9, 0.0  ;;  %v3893_v31 = vadd.f32 %v3892_v7, %v3319_v49  ;;  %v7933_v4 = vld [vmem:[#allocation65_spill] sm:$0xff] }
 0x775   :  { %v4193_v15 = vmul.f32 %v4176_v50, %v4146_v61  ;;  %v4154_v37 = vmax.f32 %v3891_v46, 0.0 }
 0x776   :  { %v4194_v1 = vmul.f32 %v4180_v20, %v4147_v29  ;;  %v4155_v24 = vmax.f32 %v3893_v31, 0.0  ;;  %v3331_v29 = vrot.slane %v7663_v23, %v7933_v4  ;;  %v7934_v31 = vld [vmem:[#allocation66_spill] sm:$0xff] }
 0x777   :  { %v4197_v60 = vmul.f32 %v4176_v50, %v4154_v37 }
 0x778   :  { %v4201_v63 = vadd.f32 %v4194_v1, %v4193_v15  ;;  %v4198_v13 = vmul.f32 %v4180_v20, %v4155_v24  ;;  %v3896_v3 = vpop.f32.mrb[68].mxu1  ;;  %v4088_v17 = vpop.f32.mrb[132].mxu0  ;;  %v3335_v15 = vrot.slane %v7663_v23, %v7934_v31 }
 0x779   :  { %v4089_v55 = vadd.f32 %v4088_v17, %v3347_v38  ;;  %v3897_v26 = vpop.f32.mrb[69].mxu1  ;;  %v4090_v16 = vpop.f32.mrb[133].mxu0 }
 0x77a   :  { %v4206_v32 = vadd.f32 %v4198_v13, %v4197_v60  ;;  %v4091_v11 = vadd.f32 %v4090_v16, %v3351_v41  ;;  %v3898_v2 = vpop.f32.mrb[70].mxu1  ;;  %v4092_v53 = vpop.f32.mrb[134].mxu0 }
 0x77b   :  { %v4093_v33 = vadd.f32 %v4092_v53, %v3347_v38  ;;  %v3899_v35 = vpop.f32.mrb[71].mxu1  ;;  %v4094_v19 = vpop.f32.mrb[135].mxu0  ;;  %v4162_v47 = vmax.f32 %v4089_v55, 0.0 }
 0x77c   :  { %v4095_v5 = vadd.f32 %v4094_v19, %v3351_v41  ;;  %v4163_v25 = vmax.f32 %v4091_v11, 0.0  ;;  %v7935_v35 = vld [vmem:[#allocation67_spill] sm:$0xff] }
 0x77d   :  { %v4166_v36 = vmax.f32 %v4093_v33, 0.0  ;;  %v3339_v19 = vrot.slane %v7663_v23, %v7935_v35 }
 0x77e   :  { %v4167_v14 = vmax.f32 %v4095_v5, 0.0  ;;  %v7936_v5 = vld [vmem:[#allocation68_spill] sm:$0xff] }
 0x77f   :  { %v4223_v30 = vpack.c.bf16 %v4166_v36, %v4162_v47  ;;  %v3343_v47 = vrot.slane %v7663_v23, %v7936_v5 }
 0x780   :  { %v4224_v58 = vpack.c.bf16 %v4167_v14, %v4163_v25 }
 0x790   :  { %v3935_v56 = vpop.f32.mrb[72].mxu1 }
 0x791   :  { %v3936_v54 = vadd.f32 %v3935_v56, %v3323_v10  ;;  %v3937_v0 = vpop.f32.mrb[73].mxu1 }
 0x792   :  { %v3938_v34 = vadd.f32 %v3937_v0, %v3327_v62  ;;  %v3939_v43 = vpop.f32.mrb[74].mxu1 }
 0x793   :  { %v4148_v59 = vmax.f32 %v3936_v54, 0.0  ;;  %v3940_v18 = vadd.f32 %v3939_v43, %v3323_v10  ;;  %v3941_v52 = vpop.f32.mrb[75].mxu1 }
 0x794   :  { %v4149_v51 = vmax.f32 %v3938_v34, 0.0  ;;  %v3942_v49 = vadd.f32 %v3941_v52, %v3327_v62 }
 0x795   :  { %v4195_v40 = vmul.f32 %v4184_v39, %v4148_v59  ;;  %v4156_v8 = vmax.f32 %v3940_v18, 0.0 }
 0x796   :  { %v4196_v6 = vmul.f32 %v4188_v21, %v4149_v51  ;;  %v4157_v50 = vmax.f32 %v3942_v49, 0.0 }
 0x797   :  { %v4199_v45 = vmul.f32 %v4184_v39, %v4156_v8  ;;  %v4202_v22 = vadd.f32 %v4201_v63, %v4195_v40 }
 0x798   :  { %v4200_v9 = vmul.f32 %v4188_v21, %v4157_v50  ;;  %v3945_v20 = vpop.f32.mrb[76].mxu1  ;;  %v3359_v50 = vrot.slane %v7671_v44, %v7932_v27 }
 0x799   :  { %v4207_v57 = vadd.f32 %v4206_v32, %v4199_v45  ;;  %v3946_v28 = vpop.f32.mrb[77].mxu1  ;;  %v4203_v61 = vadd.f32 %v4202_v22, %v4196_v6  ;;  %v3355_v6 = vrot.slane %v7671_v44, %v7931_v12  ;;  %v4582_v12 = vpop.permute.xlu1 %4581 }
 0x79a   :  { %v3947_v46 = vpop.f32.mrb[78].mxu1 }
 0x79b   :  { %v3948_v7 = vpop.f32.mrb[79].mxu1  ;;  %4204 = vadd.xlane.f32.xlu0 %v4203_v61  ;;  %v4208_v42 = vadd.f32 %v4207_v57, %v4200_v9 }
 0x79d   :  { %4209 = vadd.xlane.f32.xlu1 %v4208_v42 }
 0x7b0   :  { %v3984_v37 = vpop.f32.mrb[80].mxu1 }
 0x7b1   :  { %v3985_v38 = vadd.f32 %v3984_v37, %v3331_v29  ;;  %v3986_v1 = vpop.f32.mrb[81].mxu1 }
 0x7b2   :  { %v3987_v24 = vadd.f32 %v3986_v1, %v3335_v15  ;;  %v3988_v41 = vpop.f32.mrb[82].mxu1 }
 0x7b3   :  { %v3989_v60 = vadd.f32 %v3988_v41, %v3331_v29  ;;  %v3990_v63 = vpop.f32.mrb[83].mxu1  ;;  %v4150_v3 = vmax.f32 %v3985_v38, 0.0 }
 0x7b4   :  { %v3991_v13 = vadd.f32 %v3990_v63, %v3335_v15  ;;  %v4151_v55 = vmax.f32 %v3987_v24, 0.0 }
 0x7b5   :  { %v4158_v17 = vmax.f32 %v3989_v60, 0.0 }
 0x7b6   :  { %v4159_v26 = vmax.f32 %v3991_v13, 0.0 }
 0x7b7   :  { %v4219_v16 = vpack.c.bf16 %v4158_v17, %v4150_v3 }
 0x7b8   :  { %v4220_v32 = vpack.c.bf16 %v4159_v26, %v4151_v55  ;;  %v3994_v11 = vpop.f32.mrb[84].mxu1 }
 0x7b9   :  { %v3995_v2 = vpop.f32.mrb[85].mxu1 }
 0x7ba   :  { %v3996_v53 = vpop.f32.mrb[86].mxu1  ;;  %4515 = vmatprep.mubr.bf16.mxu0 %v4220_v32 }
 0x7bb   :  { %v3997_v33 = vpop.f32.mrb[87].mxu1  ;;  %4516 = vmatmul.mubr.bf16.vlgmr.msra.gmra.mrb[136].mxu0 %v4219_v16 }
 0x7bc   :  { %4523 = vmatprep.mubr.bf16.mxu0 %v4224_v58 }
 0x7c3   :  { %4524 = vmatmul.mubr.bf16.gmra.mrb[140].mxu0 %v4223_v30 }
 0x7d0   :  { %v4033_v36 = vpop.f32.mrb[88].mxu1 }
 0x7d1   :  { %v4034_v25 = vadd.f32 %v4033_v36, %v3339_v19  ;;  %v4035_v14 = vpop.f32.mrb[89].mxu1 }
 0x7d2   :  { %v4036_v10 = vadd.f32 %v4035_v14, %v3343_v47  ;;  %v4037_v62 = vpop.f32.mrb[90].mxu1 }
 0x7d3   :  { %v4038_v56 = vadd.f32 %v4037_v62, %v3339_v19  ;;  %v4039_v54 = vpop.f32.mrb[91].mxu1  ;;  %v4152_v0 = vmax.f32 %v4034_v25, 0.0 }
 0x7d4   :  { %v4040_v39 = vadd.f32 %v4039_v54, %v3343_v47  ;;  %v4153_v21 = vmax.f32 %v4036_v10, 0.0 }
 0x7d5   :  { %v4160_v34 = vmax.f32 %v4038_v56, 0.0 }
 0x7d6   :  { %v4161_v43 = vmax.f32 %v4040_v39, 0.0 }
 0x7d7   :  { %v4221_v58 = vpack.c.bf16 %v4160_v34, %v4152_v0 }
 0x7d8   :  { %v4222_v30 = vpack.c.bf16 %v4161_v43, %v4153_v21  ;;  %v4043_v59 = vpop.f32.mrb[92].mxu1 }
 0x7d9   :  { %v4044_v18 = vpop.f32.mrb[93].mxu1 }
 0x7da   :  { %v4045_v52 = vpop.f32.mrb[94].mxu1  ;;  %4564 = vmatprep.mubr.bf16.mxu1 %v4222_v30 }
 0x7db   :  { %v4046_v51 = vpop.f32.mrb[95].mxu1  ;;  %4565 = vmatmul.mubr.bf16.vlgmr.msra.gmra.mrb[104].mxu1 %v4221_v58 }
 0x7f0   :  { %v4131_v23 = vpop.f32.mrb[96].mxu1 }
 0x7f1   :  { %v4132_v49 = vpop.f32.mrb[97].mxu1 }
 0x7f2   :  { %v4133_v40 = vpop.f32.mrb[98].mxu1 }
 0x7f3   :  { %v4134_v8 = vpop.f32.mrb[99].mxu1 }
 0x7f8   :  { %v4137_v45 = vpop.f32.mrb[100].mxu1 }
 0x7f9   :  { %v4138_v22 = vadd.f32 %v4137_v45, %v3355_v6  ;;  %v4139_v9 = vpop.f32.mrb[101].mxu1 }
 0x7fa   :  { %v4140_v20 = vadd.f32 %v4139_v9, %v3359_v50  ;;  %v4141_v57 = vpop.f32.mrb[102].mxu1 }
 0x7fb   :  { %v4142_v28 = vadd.f32 %v4141_v57, %v3355_v6  ;;  %v4143_v61 = vpop.f32.mrb[103].mxu1  ;;  %v4164_v7 = vmax.f32 %v4138_v22, 0.0 }
 0x7fc   :  { %v4144_v46 = vadd.f32 %v4143_v61, %v3359_v50  ;;  %v4165_v4 = vmax.f32 %v4140_v20, 0.0 }
 0x7fd   :  { %v4168_v42 = vmax.f32 %v4142_v28, 0.0 }
 0x7fe   :  { %v4169_v29 = vmax.f32 %v4144_v46, 0.0 }
 0x7ff   :  { %v4225_v31 = vpack.c.bf16 %v4168_v42, %v4164_v7 }
 0x800   :  { %v4226_v15 = vpack.c.bf16 %v4169_v29, %v4165_v4 }
 0x802   :  { %4572 = vmatprep.mubr.bf16.mxu1 %v4226_v15 }
 0x803   :  { %4573 = vmatmul.mubr.bf16.gmra.mrb[108].mxu1 %v4225_v31 }
 0x828   :  { %v4205_v37 = vpop.xlane.xlu0 %4204 }
 0x829   :  { %v4217_v44 = vadd.f32 %v7653_v48, %v4205_v37 }
 0x82a   :  { %v4210_v27 = vpop.xlane.xlu1 %4209 }
 0x82b   :  { %4589 = vst.msk [vmem:[#allocation20] sm:$0xff] %vm4588_vm9, %v4217_v44  ;;  %v4218_v38 = vadd.f32 %v7653_v48, %v4210_v27 }
 0x82d   :  { %4590 = vst.msk [vmem:[#allocation20 + $0x8] sm:$0xff] %vm4588_vm9, %v4218_v38 }
 0x88e   :  { %v5005_v1 = vpop.f32.mrb[136].mxu0 }
 0x88f   :  { %v5006_v24 = vpop.f32.mrb[137].mxu0 }
 0x890   :  { %v5007_v41 = vadd.f32 %v5006_v24, %v5005_v1  ;;  %v5008_v60 = vpop.f32.mrb[138].mxu0 }
 0x891   :  { %v5009_v63 = vpop.f32.mrb[139].mxu0 }
 0x892   :  { %v5010_v13 = vadd.f32 %v5009_v63, %v5008_v60 }
 0x896   :  { %v5011_v3 = vpop.f32.mrb[140].mxu0 }
 0x897   :  { %v5012_v17 = vpop.f32.mrb[141].mxu0 }
 0x898   :  { %v5013_v55 = vadd.f32 %v5012_v17, %v5011_v3  ;;  %v5014_v26 = vpop.f32.mrb[142].mxu0 }
 0x899   :  { %v5015_v16 = vpop.f32.mrb[143].mxu0 }
 0x89a   :  { %v5016_v32 = vadd.f32 %v5015_v16, %v5014_v26 }
 0x8ae   :  { %v5033_v11 = vpop.f32.mrb[104].mxu1 }
 0x8af   :  { %v5034_v2 = vpop.f32.mrb[105].mxu1 }
 0x8b0   :  { %v5035_v53 = vadd.f32 %v5034_v2, %v5033_v11  ;;  %v5036_v33 = vpop.f32.mrb[106].mxu1 }
 0x8b1   :  { %v5037_v35 = vpop.f32.mrb[107].mxu1 }
 0x8b2   :  { %v4567_v19 = vadd.f32 %v5035_v53, %v5007_v41  ;;  %v5038_v48 = vadd.f32 %v5037_v35, %v5036_v33 }
 0x8b4   :  { %v4570_v5 = vadd.f32 %v5038_v48, %v5010_v13  ;;  %v4584_v47 = vadd.f32 %v4582_v12, %v4567_v19 }
 0x8b6   :  { %v4585_v36 = vadd.f32 %v4582_v12, %v4570_v5  ;;  %4593 = vrot.lane.b32.xlu0 %v4584_v47, %s6087_s4 }
 0x8b8   :  { %4595 = vrot.lane.b32.xlu1 %v4585_v36, %s6087_s4 }
 0x8d6   :  { %v5039_v25 = vpop.f32.mrb[108].mxu1 }
 0x8d7   :  { %v5040_v14 = vpop.f32.mrb[109].mxu1 }
 0x8d8   :  { %v5041_v10 = vadd.f32 %v5040_v14, %v5039_v25  ;;  %v5042_v62 = vpop.f32.mrb[110].mxu1 }
 0x8d9   :  { %v5043_v56 = vpop.f32.mrb[111].mxu1 }
 0x8da   :  { %v4575_v54 = vadd.f32 %v5041_v10, %v5013_v55  ;;  %v5044_v39 = vadd.f32 %v5043_v56, %v5042_v62 }
 0x8dc   :  { %v4586_v0 = vadd.f32 %v4582_v12, %v4575_v54  ;;  %v4578_v34 = vadd.f32 %v5044_v39, %v5016_v32 }
 0x8de   :  { %v4587_v21 = vadd.f32 %v4582_v12, %v4578_v34  ;;  %4604 = vrot.lane.b32.xlu0 %v4586_v0, %s6087_s4 }
 0x8e0   :  { %4606 = vrot.lane.b32.xlu1 %v4587_v21, %s6087_s4 }
 0x928   :  { %v4594_v43 = vpop.permute.xlu0 %4593 }
 0x929   :  { %4600 = vst.msk [vmem:[#allocation20] sm:$0xff] %vm4599_vm10, %v4594_v43 }
 0x92a   :  { %v4596_v58 = vpop.permute.xlu1 %4595 }
 0x92b   :  { %4601 = vst.msk [vmem:[#allocation20 + $0x8] sm:$0xff] %vm4599_vm10, %v4596_v58 }
 0x950   :  { %v4605_v30 = vpop.permute.xlu0 %4604 }
 0x951   :  { %4611 = vst.msk [vmem:[#allocation20] sm:$0xff] %vm4610_vm11, %v4605_v30 }
 0x952   :  { %v4607_v59 = vpop.permute.xlu1 %4606 }
 0x953   :  { %4612 = vst.msk [vmem:[#allocation20 + $0x8] sm:$0xff] %vm4610_vm11, %v4607_v59 }
 0x954   :  { %6043 = shalt.err (!%p6040_p8)
}
 0x955   :  { %s6044_s30 = scalar_lea.hbm %s7720_s11, 256 }
 0x956   :  { %p6045_p9 = scmp.ne.s32.totalorder %s7720_s11, %s6044_s30  ;;  %p6048_p10 = scmp.lt.u32.totalorder %s6044_s30, %s7720_s11 }
 0x958   :  { %p6050_p11 = pnand %p6048_p10, %p6045_p9 }
 0x95a   :  { %6053 = shalt.err (!%p6050_p11)
}
 0x95b   :  { %s6089_s19 = smov 128   ;;  %s6090_s20 = smov 8  }
 0x95c   :  { %4624 = dma.vmem_to_hbm [thread:$0]  %s4619_s29, 256, %s7720_s11, [#allocation4], %s6089_s19, %s6089_s19, %s6090_s20  }
 0x95d   :  { %6066 = dma.done.wait [#allocation4], 256  }
 0x95e   :  { %6067 = vsyncadd [#allocation4], 4294967040 }
 0x95f   :  { %4628 = vsyncpa [#allocation3], 1 }
 0x960   :  { %4629 = vsyncpa [#allocation6], 1 }
 0x961   :  { %4630 = vsyncpa [#allocation9], 1 }
 0x962   :  { %4631 = vsyncpa [#allocation12], 1 }
 0x963   :  { %4632 = vsyncpa [#allocation15], 1 }
 0x964   :  { %4633 = vsyncpa [#allocation18], 1 }
 0x965   :  { %4634 = vsyncpa [#allocation4], 1 }

</bundles_post_ra>
